<compile_context>
chip_gen: v6e
topology: v6e:2x2x1
jax: 0.10.0
libtpu: 0.0.40
codegen_flags: <defaults>
</compile_context>

<pallas_src>
import functools
import math

import jax
import jax.numpy as jnp
from jax import lax
from jax.experimental import pallas as pl
from jax.experimental.pallas import tpu as pltpu

_TP = 256  # pixel-tile (sublane) size; safe for v7x, bump to 512 on v5e/v6e.


def _round_up(x, m):
    return ((x + m - 1) // m) * m


# --------------------------------------------------------------------------
# Pallas kernels
# --------------------------------------------------------------------------
def _mm_bias_act_kernel(p_ref, w_ref, b_ref, o_ref, *, relu):
    # bf16 x bf16 -> f32 accumulate on the MXU, f32 bias / activation epilogue.
    y = jnp.dot(p_ref[...], w_ref[...], preferred_element_type=jnp.float32)
    y = y + b_ref[...]
    if relu:
        y = jnp.maximum(y, 0.0)
    o_ref[...] = y


def _mm_bias_gdn_kernel(p_ref, w_ref, b_ref, g_ref, gb_ref, o_ref, *, inverse):
    # conv/deconv matmul with GDN (or IGDN) fused into the epilogue:
    #   norm_i = beta_i + sum_j gamma[i, j] * y_j^2   (1x1 conv == channel matmul)
    y = jnp.dot(p_ref[...], w_ref[...], preferred_element_type=jnp.float32)
    y = y + b_ref[...]
    norm = jnp.dot(y * y, g_ref[...], preferred_element_type=jnp.float32) + gb_ref[...]
    if inverse:
        o_ref[...] = y * jnp.sqrt(norm)      # IGDN
    else:
        o_ref[...] = y * lax.rsqrt(norm)     # GDN


def _sigmoid(x):
    # divide routed through the EUP (reciprocal), exp also on the EUP.
    return pl.reciprocal(1.0 + jnp.exp(-x), approx=True)


def _erfc(x):
    # TODO(synk): erfc approximated (Abramowitz & Stegun 7.1.26, |err| < 1.5e-7);
    # Mosaic has no native erf/erfc lowering.
    ax = jnp.abs(x)
    t = pl.reciprocal(1.0 + 0.3275911 * ax, approx=True)
    poly = t * (0.254829592 + t * (-0.284496736 + t * (1.421413741
                + t * (-1.453152027 + t * 1.061405429))))
    erf_ax = 1.0 - poly * jnp.exp(-ax * ax)
    erf_x = jnp.where(x >= 0, erf_ax, -erf_ax)
    return 1.0 - erf_x


def _std_cumulative(x):
    # 0.5 * erfc(-x / sqrt(2))
    return 0.5 * _erfc(-x * 0.7071067811865476)


def _gaussian_cond_kernel(y_ref, s_ref, yhat_ref, lik_ref):
    y = y_ref[...]
    s = jnp.maximum(s_ref[...], 0.11)        # LowerBound(scale_bound=0.11)
    yhat = jnp.round(y)                      # eval-mode "dequantize" (means=None)
    yhat_ref[...] = yhat
    v = jnp.abs(yhat)
    inv_s = pl.reciprocal(s, approx=True)
    upper = _std_cumulative((0.5 - v) * inv_s)
    lower = _std_cumulative((-0.5 - v) * inv_s)
    lik_ref[...] = jnp.maximum(upper - lower, 1e-9)   # likelihood lower bound


_EB_FILTERS = (1, 3, 3, 3, 3, 1)             # EntropyBottleneck filters (1,3,3,3,3,1)


def _entropy_bottleneck_kernel(z_ref, med_ref,
                               m0, m1, m2, m3, m4,
                               b0, b1, b2, b3, b4,
                               f0, f1, f2, f3,
                               zhat_ref, lik_ref):
    z = z_ref[...]
    med = med_ref[...]
    zhat = jnp.round(z - med) + med
    zhat_ref[...] = zhat

    mats = (m0[...], m1[...], m2[...], m3[...], m4[...])     # (fout, fin, C)
    biases = (b0[...], b1[...], b2[...], b3[...], b4[...])   # (fout, C)
    factors = (f0[...], f1[...], f2[...], f3[...])           # (fout, C)

    def cumulative(v):                                       # _logits_cumulative, per channel
        h = v[None]                                          # (fin=1, P, C)
        for i in range(5):
            m = mats[i]                                      # (fout, fin, C)
            acc = biases[i][:, None, :]                      # (fout, 1, C)
            for j in range(m.shape[1]):                      # fin <= 3, unrolled
                acc = acc + m[:, j, None, :] * h[j]
            if i < 4:
                acc = acc + factors[i][:, None, :] * jnp.tanh(acc)
            h = acc
        return h[0]                                          # (P, C)

    lower = cumulative(zhat - 0.5)
    upper = cumulative(zhat + 0.5)
    su = lower + upper
    sgn = jnp.where(su > 0, -1.0, jnp.where(su < 0, 1.0, 0.0))   # -sign(lower + upper)
    lik = jnp.abs(_sigmoid(sgn * upper) - _sigmoid(sgn * lower))
    lik_ref[...] = jnp.maximum(lik, 1e-9)


# --------------------------------------------------------------------------
# Pallas wrappers
# --------------------------------------------------------------------------
def _resident_spec(shape):
    zeros = (0,) * len(shape)
    return pl.BlockSpec(shape, lambda i, _z=zeros: _z)


def _matmul_fused(patches, w, b, *, mode="none", gamma_t=None, gdn_beta=None):
    """(P, K) bf16 patches @ (K, Cout) bf16 weight + bias, with fused epilogue.

    mode: "none" | "relu" | "gdn" | "igdn".
    """
    P, K = patches.shape
    Cout = w.shape[1]
    P_pad = _round_up(P, 16)                 # bf16 sublane packing granularity
    if P_pad != P:                           # only tiny tensors hit this path
        patches = jnp.pad(patches, ((0, P_pad - P), (0, 0)))
    tp = min(_TP, P_pad)
    grid = (pl.cdiv(P_pad, tp),)

    if mode in ("gdn", "igdn"):
        kernel = functools.partial(_mm_bias_gdn_kernel, inverse=(mode == "igdn"))
        extra_args = (gamma_t, gdn_beta)
        extra_specs = [pl.BlockSpec((Cout, Cout), lambda i: (0, 0)),
                       pl.BlockSpec((1, Cout), lambda i: (0, 0))]
    else:
        kernel = functools.partial(_mm_bias_act_kernel, relu=(mode == "relu"))
        extra_args = ()
        extra_specs = []

    out = pl.pallas_call(
        kernel,
        out_shape=jax.ShapeDtypeStruct((P_pad, Cout), jnp.float32),
        grid_spec=pltpu.PrefetchScalarGridSpec(
            num_scalar_prefetch=0,
            grid=grid,
            in_specs=[pl.BlockSpec((tp, K), lambda i: (i, 0)),
                      pl.BlockSpec((K, Cout), lambda i: (0, 0)),
                      pl.BlockSpec((1, Cout), lambda i: (0, 0))] + extra_specs,
            out_specs=pl.BlockSpec((tp, Cout), lambda i: (i, 0))),
        compiler_params=pltpu.CompilerParams(dimension_semantics=("parallel",)),
    )(patches, w, b, *extra_args)
    return out[:P] if P_pad != P else out


def _im2col(x, k, stride, pad):
    # Pure-JAX glue: patch extraction (pad + strided slicing + stack), bf16.
    Nb, H, W, C = x.shape
    xp = jnp.pad(x, ((0, 0), (pad, pad), (pad, pad), (0, 0)))
    Hp, Wp = H + 2 * pad, W + 2 * pad
    Ho, Wo = (Hp - k) // stride + 1, (Wp - k) // stride + 1
    cols = []
    for kh in range(k):
        for kw in range(k):
            cols.append(xp[:, kh:kh + stride * (Ho - 1) + 1:stride,
                           kw:kw + stride * (Wo - 1) + 1:stride, :])
    patches = jnp.stack(cols, axis=3)                 # (N, Ho, Wo, k*k, C)
    return patches.reshape(Nb * Ho * Wo, k * k * C), (Nb, Ho, Wo)


def _conv_block(x, layer, *, k, stride, mode="none"):
    patches, (Nb, Ho, Wo) = _im2col(x.astype(jnp.bfloat16), k, stride, k // 2)
    out = _matmul_fused(patches, layer["w"], layer["b"], mode=mode,
                        gamma_t=layer.get("gamma"), gdn_beta=layer.get("beta"))
    return out.reshape(Nb, Ho, Wo, out.shape[-1])


def _deconv_block(x, layer, *, mode="none"):
    # ConvTranspose2d(k=5, s=2, p=2, output_padding=1) via sub-pixel decomposition:
    # a 3x3-tap stride-1 conv on the ORIGINAL (un-upsampled) input with a
    # phase-combined weight matrix (9*Cin, 4*Cout), then pixel-shuffle.
    patches, (Nb, Ho, Wo) = _im2col(x.astype(jnp.bfloat16), 3, 1, 1)
    out = _matmul_fused(patches, layer["w"], layer["b"], mode=mode,
                        gamma_t=layer.get("gamma"), gdn_beta=layer.get("beta"))
    Cout = out.shape[-1] // 4
    out = out.reshape(Nb, Ho, Wo, 2, 2, Cout)                       # (.., py, px, C)
    out = jnp.transpose(out, (0, 1, 3, 2, 4, 5)).reshape(Nb, 2 * Ho, 2 * Wo, Cout)
    return out


def _gaussian_conditional(y, scales):
    Nb, H, W, C = y.shape
    P = Nb * H * W
    yf = y.reshape(P, C)
    sf = scales.reshape(P, C)
    P_pad = _round_up(P, 8)
    if P_pad != P:
        yf = jnp.pad(yf, ((0, P_pad - P), (0, 0)))
        sf = jnp.pad(sf, ((0, P_pad - P), (0, 0)), constant_values=1.0)
    tp = min(_TP, P_pad)
    grid = (pl.cdiv(P_pad, tp),)
    y_hat, y_lik = pl.pallas_call(
        _gaussian_cond_kernel,
        out_shape=(jax.ShapeDtypeStruct((P_pad, C), jnp.float32),
                   jax.ShapeDtypeStruct((P_pad, C), jnp.float32)),
        grid_spec=pltpu.PrefetchScalarGridSpec(
            num_scalar_prefetch=0, grid=grid,
            in_specs=[pl.BlockSpec((tp, C), lambda i: (i, 0)),
                      pl.BlockSpec((tp, C), lambda i: (i, 0))],
            out_specs=[pl.BlockSpec((tp, C), lambda i: (i, 0)),
                       pl.BlockSpec((tp, C), lambda i: (i, 0))]),
        compiler_params=pltpu.CompilerParams(dimension_semantics=("parallel",)),
    )(yf, sf)
    if P_pad != P:
        y_hat, y_lik = y_hat[:P], y_lik[:P]
    return y_hat.reshape(Nb, H, W, C), y_lik.reshape(Nb, H, W, C)


def _entropy_bottleneck(z, ebp):
    Nb, H, W, C = z.shape
    P = Nb * H * W
    zf = z.reshape(P, C)
    P_pad = _round_up(P, 8)
    if P_pad != P:
        zf = jnp.pad(zf, ((0, P_pad - P), (0, 0)))
    tp = min(_TP, P_pad)
    grid = (pl.cdiv(P_pad, tp),)
    side = [ebp["medians"]] + list(ebp["mats"]) + list(ebp["biases"]) + list(ebp["factors"])
    z_hat, z_lik = pl.pallas_call(
        _entropy_bottleneck_kernel,
        out_shape=(jax.ShapeDtypeStruct((P_pad, C), jnp.float32),
                   jax.ShapeDtypeStruct((P_pad, C), jnp.float32)),
        grid_spec=pltpu.PrefetchScalarGridSpec(
            num_scalar_prefetch=0, grid=grid,
            in_specs=[pl.BlockSpec((tp, C), lambda i: (i, 0))]
                     + [_resident_spec(a.shape) for a in side],
            out_specs=[pl.BlockSpec((tp, C), lambda i: (i, 0)),
                       pl.BlockSpec((tp, C), lambda i: (i, 0))]),
        compiler_params=pltpu.CompilerParams(dimension_semantics=("parallel",)),
    )(zf, *side)
    if P_pad != P:
        z_hat, z_lik = z_hat[:P], z_lik[:P]
    return z_hat.reshape(Nb, H, W, C), z_lik.reshape(Nb, H, W, C)


# --------------------------------------------------------------------------
# Parameters: raw init (torch layouts) + one-time prep (hoisted out of the jit)
# --------------------------------------------------------------------------
def init_params(key, N, M):
    keys = list(jax.random.split(key, 64))
    ki = iter(keys)

    def conv_p(cin, cout, k):
        w = jax.random.normal(next(ki), (cout, cin, k, k), jnp.float32) * 0.1
        b = jax.random.normal(next(ki), (cout,), jnp.float32) * 0.01
        return w, b

    def deconv_p(cin, cout, k):
        w = jax.random.normal(next(ki), (cin, cout, k, k), jnp.float32) * 0.1
        b = jax.random.normal(next(ki), (cout,), jnp.float32) * 0.01
        return w, b

    def gdn_p(C):  # effective (reparameterized) GDN init: beta=1, gamma=0.1*I
        return 0.1 * jnp.eye(C, dtype=jnp.float32), jnp.ones((C,), jnp.float32)

    params = {
        "g_a": [conv_p(3, N, 5), conv_p(N, N, 5), conv_p(N, N, 5), conv_p(N, M, 5)],
        "g_a_gdn": [gdn_p(N) for _ in range(3)],
        "h_a": [conv_p(M, N, 3), conv_p(N, N, 5), conv_p(N, N, 5)],
        "h_s": [deconv_p(N, N, 5), deconv_p(N, N, 5), conv_p(N, M, 3)],
        "g_s": [deconv_p(M, N, 5), deconv_p(N, N, 5), deconv_p(N, N, 5), deconv_p(N, 3, 5)],
        "g_s_gdn": [gdn_p(N) for _ in range(3)],
    }

    # EntropyBottleneck(N): filters=(3,3,3,3), init_scale=10
    filters = _EB_FILTERS
    scale = 10.0 ** (1.0 / (len(filters) - 1))
    mats, biases, facs = [], [], []
    for i in range(len(filters) - 1):
        fin, fout = filters[i], filters[i + 1]
        init = math.log(math.expm1(1.0 / scale / fout))
        mats.append(jnp.full((N, fout, fin), init, jnp.float32))
        biases.append(jax.random.uniform(next(ki), (N, fout, 1), jnp.float32, -0.5, 0.5))
        if i < len(filters) - 2:
            facs.append(jnp.zeros((N, fout, 1), jnp.float32))
    quantiles = jnp.tile(jnp.array([-10.0, 0.0, 10.0], jnp.float32), (N, 1)).reshape(N, 1, 3)
    params["eb"] = {"matrices": mats, "biases": biases, "factors": facs,
                    "quantiles": quantiles}
    return params


def prepare_params(params):
    """One-time layout / reparameterization prep (kept out of the jitted forward)."""

    def conv_entry(wb, gdn=None):
        w, b = wb                                # w: (Cout, Cin, k, k) torch Conv2d
        Cout, Cin, k, _ = w.shape
        wm = jnp.transpose(w, (2, 3, 1, 0)).reshape(k * k * Cin, Cout)
        e = {"w": wm.astype(jnp.bfloat16),
             "b": b.reshape(1, Cout).astype(jnp.float32)}
        if gdn is not None:
            gamma, beta = gdn
            e["gamma"] = jnp.transpose(gamma).astype(jnp.float32)
            e["beta"] = beta.reshape(1, Cout).astype(jnp.float32)
        return e

    def deconv_entry(wb, gdn=None):
        # w: (Cin, Cout, 5, 5) torch ConvTranspose2d, stride=2, pad=2, out_pad=1.
        # Phase-combined conv matrix: tap (ty,tx) in {-1,0,1}^2, phase (py,px):
        #   ky = py + 4 - 2*kh_i,  kx = px + 4 - 2*kw_i   (zero if out of range).
        w, b = wb
        Cin, Cout, k, _ = w.shape
        rows = []
        for kh_i in range(3):
            for kw_i in range(3):
                cols = []
                for py in range(2):
                    for px in range(2):
                        ky = py + 4 - 2 * kh_i
                        kx = px + 4 - 2 * kw_i
                        if 0 <= ky < k and 0 <= kx < k:
                            cols.append(w[:, :, ky, kx])
                        else:
                            cols.append(jnp.zeros((Cin, Cout), w.dtype))
                rows.append(jnp.concatenate(cols, axis=1))       # (Cin, 4*Cout)
        wm = jnp.concatenate(rows, axis=0)                       # (9*Cin, 4*Cout)
        e = {"w": wm.astype(jnp.bfloat16),
             "b": jnp.tile(b, 4).reshape(1, 4 * Cout).astype(jnp.float32)}
        if gdn is not None:                     # phase-blocked (block-diagonal) IGDN params
            gamma, beta = gdn
            e["gamma"] = jnp.kron(jnp.eye(4, dtype=jnp.float32),
                                  jnp.transpose(gamma)).astype(jnp.float32)
            e["beta"] = jnp.tile(beta, 4).reshape(1, 4 * Cout).astype(jnp.float32)
        return e

    prep = {
        "g_a": [conv_entry(params["g_a"][i], params["g_a_gdn"][i]) for i in range(3)]
               + [conv_entry(params["g_a"][3])],
        "h_a": [conv_entry(wb) for wb in params["h_a"]],
        "h_s": [deconv_entry(params["h_s"][0]), deconv_entry(params["h_s"][1]),
                conv_entry(params["h_s"][2])],
        "g_s": [deconv_entry(params["g_s"][i], params["g_s_gdn"][i]) for i in range(3)]
               + [deconv_entry(params["g_s"][3])],
    }

    eb = params["eb"]
    C = eb["quantiles"].shape[0]
    prep["eb"] = {
        "medians": eb["quantiles"][:, 0, 1].reshape(1, C).astype(jnp.float32),
        "mats": [jnp.transpose(jax.nn.softplus(m), (1, 2, 0)).astype(jnp.float32)
                 for m in eb["matrices"]],                        # (fout, fin, C)
        "biases": [jnp.transpose(b[:, :, 0]).astype(jnp.float32)
                   for b in eb["biases"]],                        # (fout, C)
        "factors": [jnp.transpose(jnp.tanh(f)[:, :, 0]).astype(jnp.float32)
                    for f in eb["factors"]],                      # (fout, C)
    }
    return prep


# --------------------------------------------------------------------------
# Forward
# --------------------------------------------------------------------------
def scale_hyperprior_forward(prepared, x_nchw):
    p = prepared
    x = jnp.transpose(x_nchw, (0, 2, 3, 1)).astype(jnp.float32)   # NCHW -> NHWC

    # ---- g_a (conv+GDN fused) ----
    t = _conv_block(x, p["g_a"][0], k=5, stride=2, mode="gdn")
    t = _conv_block(t, p["g_a"][1], k=5, stride=2, mode="gdn")
    t = _conv_block(t, p["g_a"][2], k=5, stride=2, mode="gdn")
    y = _conv_block(t, p["g_a"][3], k=5, stride=2, mode="none")

    # ---- h_a(|y|) ----
    h = _conv_block(jnp.abs(y), p["h_a"][0], k=3, stride=1, mode="relu")
    h = _conv_block(h, p["h_a"][1], k=5, stride=2, mode="relu")
    z = _conv_block(h, p["h_a"][2], k=5, stride=2, mode="none")

    # ---- entropy bottleneck ----
    z_hat, z_lik = _entropy_bottleneck(z, p["eb"])

    # ---- h_s (sub-pixel deconv + ReLU fused) ----
    s = _deconv_block(z_hat, p["h_s"][0], mode="relu")
    s = _deconv_block(s, p["h_s"][1], mode="relu")
    scales_hat = _conv_block(s, p["h_s"][2], k=3, stride=1, mode="relu")

    # ---- gaussian conditional ----
    y_hat, y_lik = _gaussian_conditional(y, scales_hat)

    # ---- g_s (sub-pixel deconv + IGDN fused) ----
    d = _deconv_block(y_hat, p["g_s"][0], mode="igdn")
    d = _deconv_block(d, p["g_s"][1], mode="igdn")
    d = _deconv_block(d, p["g_s"][2], mode="igdn")
    x_hat = _deconv_block(d, p["g_s"][3], mode="none")

    return {
        "x_hat": jnp.transpose(x_hat, (0, 3, 1, 2)),
        "likelihoods": {
            "y": jnp.transpose(y_lik, (0, 3, 1, 2)),
            "z": jnp.transpose(z_lik, (0, 3, 1, 2)),
        },
    }


if __name__ == "__main__":
    key = jax.random.PRNGKey(0)
    N_ch, M_ch = 8, 16
    B, H, W = 1, 64, 64          # input must be a multiple of downsampling_factor = 64

    kp, kx = jax.random.split(key)
    params = init_params(kp, N_ch, M_ch)
    prepared = prepare_params(params)          # hoisted out of the jitted hot path
    x = jax.random.uniform(kx, (B, 3, H, W), jnp.float32)

    fwd = jax.jit(scale_hyperprior_forward)
    out = fwd(prepared, x)
    out = jax.block_until_ready(out)

    assert out["x_hat"].shape == (B, 3, H, W)
    assert out["likelihoods"]["y"].shape == (B, M_ch, H // 16, W // 16)
    assert out["likelihoods"]["z"].shape == (B, N_ch, H // 64, W // 64)
    assert bool(jnp.all(jnp.isfinite(out["x_hat"])))
    assert bool(jnp.all(out["likelihoods"]["y"] >= 1e-9))
    assert bool(jnp.all(out["likelihoods"]["z"] >= 1e-9))
    print("KERNEL_OK")
</pallas_src>

<mosaic_0001>
module attributes {stable_mosaic.version = 11 : i64} {
  func.func @_mm_bias_gdn_kernel(%arg0: i32, %arg1: memref<256x75xbf16, #tpu.memory_space<vmem>>, %arg2: memref<75x8xbf16, #tpu.memory_space<vmem>>, %arg3: memref<1x8xf32, #tpu.memory_space<vmem>>, %arg4: memref<8x8xf32, #tpu.memory_space<vmem>>, %arg5: memref<1x8xf32, #tpu.memory_space<vmem>>, %arg6: memref<256x8xf32, #tpu.memory_space<vmem>>) attributes {dimension_semantics = [#tpu.dimension_semantics<parallel>], iteration_bounds = array<i64: 4>, scalar_prefetch = 0 : i64, scratch_operands = 0 : i64, tpu.core_type = #tpu.core_type<tc>, window_params = [{transform_indices = @transform_0, window_bounds = array<i64: 256, 75>}, {pipeline_mode = #tpu.pipeline_mode<synchronous>, transform_indices = @transform_1, window_bounds = array<i64: 75, 8>}, {pipeline_mode = #tpu.pipeline_mode<synchronous>, transform_indices = @transform_2, window_bounds = array<i64: 1, 8>}, {pipeline_mode = #tpu.pipeline_mode<synchronous>, transform_indices = @transform_3, window_bounds = array<i64: 8, 8>}, {pipeline_mode = #tpu.pipeline_mode<synchronous>, transform_indices = @transform_4, window_bounds = array<i64: 1, 8>}, {transform_indices = @transform_5, window_bounds = array<i64: 256, 8>}]} {
    %c0 = arith.constant 0 : index
    %c0_0 = arith.constant 0 : index
    %0 = vector.load %arg1[%c0, %c0_0] : memref<256x75xbf16, #tpu.memory_space<vmem>>, vector<256x75xbf16>
    %c0_1 = arith.constant 0 : index
    %c0_2 = arith.constant 0 : index
    %1 = vector.load %arg2[%c0_1, %c0_2] : memref<75x8xbf16, #tpu.memory_space<vmem>>, vector<75x8xbf16>
    %cst = arith.constant dense<0.000000e+00> : vector<256x8xf32>
    %2 = tpu.matmul %0, %1, %cst {dimension_numbers = #tpu.dot_dimension_numbers<[1], [0], [0], [1], [0, 0, 1, 1], [], []>} : vector<256x75xbf16>, vector<75x8xbf16>, vector<256x8xf32> -> vector<256x8xf32>
    %c0_3 = arith.constant 0 : index
    %c0_4 = arith.constant 0 : index
    %3 = vector.load %arg3[%c0_3, %c0_4] : memref<1x8xf32, #tpu.memory_space<vmem>>, vector<1x8xf32>
    %4 = vector.broadcast %3 : vector<1x8xf32> to vector<256x8xf32>
    %5 = arith.addf %2, %4 : vector<256x8xf32>
    %6 = arith.mulf %5, %5 : vector<256x8xf32>
    %c0_5 = arith.constant 0 : index
    %c0_6 = arith.constant 0 : index
    %7 = vector.load %arg4[%c0_5, %c0_6] : memref<8x8xf32, #tpu.memory_space<vmem>>, vector<8x8xf32>
    %cst_7 = arith.constant dense<0.000000e+00> : vector<256x8xf32>
    %8 = tpu.matmul %6, %7, %cst_7 {dimension_numbers = #tpu.dot_dimension_numbers<[1], [0], [0], [1], [0, 0, 1, 1], [], []>} : vector<256x8xf32>, vector<8x8xf32>, vector<256x8xf32> -> vector<256x8xf32>
    %c0_8 = arith.constant 0 : index
    %c0_9 = arith.constant 0 : index
    %9 = vector.load %arg5[%c0_8, %c0_9] : memref<1x8xf32, #tpu.memory_space<vmem>>, vector<1x8xf32>
    %10 = vector.broadcast %9 : vector<1x8xf32> to vector<256x8xf32>
    %11 = arith.addf %8, %10 : vector<256x8xf32>
    %12 = math.rsqrt %11 : vector<256x8xf32>
    %13 = arith.mulf %5, %12 : vector<256x8xf32>
    %c0_10 = arith.constant 0 : index
    %c0_11 = arith.constant 0 : index
    %14 = vector.load %arg6[%c0_10, %c0_11] : memref<256x8xf32, #tpu.memory_space<vmem>>, vector<256x8xf32>
    tpu.vector_store %arg6[%c0_10, %c0_11], %13 {strides = array<i32>} : memref<256x8xf32, #tpu.memory_space<vmem>>, vector<256x8xf32>,
    return
  }
  func.func @transform_0(%arg0: i32) -> (i32, i32) {
    %c0_i32 = arith.constant 0 : i32
    %c0_i32_0 = arith.constant 0 : i32
    return %arg0, %c0_i32 : i32, i32
  }
  func.func @transform_1(%arg0: i32) -> (i32, i32) {
    %c0_i32 = arith.constant 0 : i32
    %c0_i32_0 = arith.constant 0 : i32
    %c0_i32_1 = arith.constant 0 : i32
    return %c0_i32, %c0_i32_0 : i32, i32
  }
  func.func @transform_2(%arg0: i32) -> (i32, i32) {
    %c0_i32 = arith.constant 0 : i32
    %c0_i32_0 = arith.constant 0 : i32
    %c0_i32_1 = arith.constant 0 : i32
    return %c0_i32, %c0_i32_0 : i32, i32
  }
  func.func @transform_3(%arg0: i32) -> (i32, i32) {
    %c0_i32 = arith.constant 0 : i32
    %c0_i32_0 = arith.constant 0 : i32
    %c0_i32_1 = arith.constant 0 : i32
    return %c0_i32, %c0_i32_0 : i32, i32
  }
  func.func @transform_4(%arg0: i32) -> (i32, i32) {
    %c0_i32 = arith.constant 0 : i32
    %c0_i32_0 = arith.constant 0 : i32
    %c0_i32_1 = arith.constant 0 : i32
    return %c0_i32, %c0_i32_0 : i32, i32
  }
  func.func @transform_5(%arg0: i32) -> (i32, i32) {
    %c0_i32 = arith.constant 0 : i32
    %c0_i32_0 = arith.constant 0 : i32
    return %arg0, %c0_i32 : i32, i32
  }
}

module attributes {stable_mosaic.version = 11 : i64} {
  func.func @_mm_bias_gdn_kernel(%arg0: i32, %arg1: memref<256x200xbf16, #tpu.memory_space<vmem>>, %arg2: memref<200x8xbf16, #tpu.memory_space<vmem>>, %arg3: memref<1x8xf32, #tpu.memory_space<vmem>>, %arg4: memref<8x8xf32, #tpu.memory_space<vmem>>, %arg5: memref<1x8xf32, #tpu.memory_space<vmem>>, %arg6: memref<256x8xf32, #tpu.memory_space<vmem>>) attributes {dimension_semantics = [#tpu.dimension_semantics<parallel>], iteration_bounds = array<i64: 1>, scalar_prefetch = 0 : i64, scratch_operands = 0 : i64, tpu.core_type = #tpu.core_type<tc>, window_params = [{transform_indices = @transform_0, window_bounds = array<i64: 256, 200>}, {pipeline_mode = #tpu.pipeline_mode<synchronous>, transform_indices = @transform_1, window_bounds = array<i64: 200, 8>}, {pipeline_mode = #tpu.pipeline_mode<synchronous>, transform_indices = @transform_2, window_bounds = array<i64: 1, 8>}, {pipeline_mode = #tpu.pipeline_mode<synchronous>, transform_indices = @transform_3, window_bounds = array<i64: 8, 8>}, {pipeline_mode = #tpu.pipeline_mode<synchronous>, transform_indices = @transform_4, window_bounds = array<i64: 1, 8>}, {transform_indices = @transform_5, window_bounds = array<i64: 256, 8>}]} {
    %c0 = arith.constant 0 : index
    %c0_0 = arith.constant 0 : index
    %0 = vector.load %arg1[%c0, %c0_0] : memref<256x200xbf16, #tpu.memory_space<vmem>>, vector<256x200xbf16>
    %c0_1 = arith.constant 0 : index
    %c0_2 = arith.constant 0 : index
    %1 = vector.load %arg2[%c0_1, %c0_2] : memref<200x8xbf16, #tpu.memory_space<vmem>>, vector<200x8xbf16>
    %cst = arith.constant dense<0.000000e+00> : vector<256x8xf32>
    %2 = tpu.matmul %0, %1, %cst {dimension_numbers = #tpu.dot_dimension_numbers<[1], [0], [0], [1], [0, 0, 1, 1], [], []>} : vector<256x200xbf16>, vector<200x8xbf16>, vector<256x8xf32> -> vector<256x8xf32>
    %c0_3 = arith.constant 0 : index
    %c0_4 = arith.constant 0 : index
    %3 = vector.load %arg3[%c0_3, %c0_4] : memref<1x8xf32, #tpu.memory_space<vmem>>, vector<1x8xf32>
    %4 = vector.broadcast %3 : vector<1x8xf32> to vector<256x8xf32>
    %5 = arith.addf %2, %4 : vector<256x8xf32>
    %6 = arith.mulf %5, %5 : vector<256x8xf32>
    %c0_5 = arith.constant 0 : index
    %c0_6 = arith.constant 0 : index
    %7 = vector.load %arg4[%c0_5, %c0_6] : memref<8x8xf32, #tpu.memory_space<vmem>>, vector<8x8xf32>
    %cst_7 = arith.constant dense<0.000000e+00> : vector<256x8xf32>
    %8 = tpu.matmul %6, %7, %cst_7 {dimension_numbers = #tpu.dot_dimension_numbers<[1], [0], [0], [1], [0, 0, 1, 1], [], []>} : vector<256x8xf32>, vector<8x8xf32>, vector<256x8xf32> -> vector<256x8xf32>
    %c0_8 = arith.constant 0 : index
    %c0_9 = arith.constant 0 : index
    %9 = vector.load %arg5[%c0_8, %c0_9] : memref<1x8xf32, #tpu.memory_space<vmem>>, vector<1x8xf32>
    %10 = vector.broadcast %9 : vector<1x8xf32> to vector<256x8xf32>
    %11 = arith.addf %8, %10 : vector<256x8xf32>
    %12 = math.rsqrt %11 : vector<256x8xf32>
    %13 = arith.mulf %5, %12 : vector<256x8xf32>
    %c0_10 = arith.constant 0 : index
    %c0_11 = arith.constant 0 : index
    %14 = vector.load %arg6[%c0_10, %c0_11] : memref<256x8xf32, #tpu.memory_space<vmem>>, vector<256x8xf32>
    tpu.vector_store %arg6[%c0_10, %c0_11], %13 {strides = array<i32>} : memref<256x8xf32, #tpu.memory_space<vmem>>, vector<256x8xf32>,
    return
  }
  func.func @transform_0(%arg0: i32) -> (i32, i32) {
    %c0_i32 = arith.constant 0 : i32
    %c0_i32_0 = arith.constant 0 : i32
    return %arg0, %c0_i32 : i32, i32
  }
  func.func @transform_1(%arg0: i32) -> (i32, i32) {
    %c0_i32 = arith.constant 0 : i32
    %c0_i32_0 = arith.constant 0 : i32
    %c0_i32_1 = arith.constant 0 : i32
    return %c0_i32, %c0_i32_0 : i32, i32
  }
  func.func @transform_2(%arg0: i32) -> (i32, i32) {
    %c0_i32 = arith.constant 0 : i32
    %c0_i32_0 = arith.constant 0 : i32
    %c0_i32_1 = arith.constant 0 : i32
    return %c0_i32, %c0_i32_0 : i32, i32
  }
  func.func @transform_3(%arg0: i32) -> (i32, i32) {
    %c0_i32 = arith.constant 0 : i32
    %c0_i32_0 = arith.constant 0 : i32
    %c0_i32_1 = arith.constant 0 : i32
    return %c0_i32, %c0_i32_0 : i32, i32
  }
  func.func @transform_4(%arg0: i32) -> (i32, i32) {
    %c0_i32 = arith.constant 0 : i32
    %c0_i32_0 = arith.constant 0 : i32
    %c0_i32_1 = arith.constant 0 : i32
    return %c0_i32, %c0_i32_0 : i32, i32
  }
  func.func @transform_5(%arg0: i32) -> (i32, i32) {
    %c0_i32 = arith.constant 0 : i32
    %c0_i32_0 = arith.constant 0 : i32
    return %arg0, %c0_i32 : i32, i32
  }
}

module attributes {stable_mosaic.version = 11 : i64} {
  func.func @_mm_bias_gdn_kernel(%arg0: i32, %arg1: memref<64x200xbf16, #tpu.memory_space<vmem>>, %arg2: memref<200x8xbf16, #tpu.memory_space<vmem>>, %arg3: memref<1x8xf32, #tpu.memory_space<vmem>>, %arg4: memref<8x8xf32, #tpu.memory_space<vmem>>, %arg5: memref<1x8xf32, #tpu.memory_space<vmem>>, %arg6: memref<64x8xf32, #tpu.memory_space<vmem>>) attributes {dimension_semantics = [#tpu.dimension_semantics<parallel>], iteration_bounds = array<i64: 1>, scalar_prefetch = 0 : i64, scratch_operands = 0 : i64, tpu.core_type = #tpu.core_type<tc>, window_params = [{transform_indices = @transform_0, window_bounds = array<i64: 64, 200>}, {pipeline_mode = #tpu.pipeline_mode<synchronous>, transform_indices = @transform_1, window_bounds = array<i64: 200, 8>}, {pipeline_mode = #tpu.pipeline_mode<synchronous>, transform_indices = @transform_2, window_bounds = array<i64: 1, 8>}, {pipeline_mode = #tpu.pipeline_mode<synchronous>, transform_indices = @transform_3, window_bounds = array<i64: 8, 8>}, {pipeline_mode = #tpu.pipeline_mode<synchronous>, transform_indices = @transform_4, window_bounds = array<i64: 1, 8>}, {transform_indices = @transform_5, window_bounds = array<i64: 64, 8>}]} {
    %c0 = arith.constant 0 : index
    %c0_0 = arith.constant 0 : index
    %0 = vector.load %arg1[%c0, %c0_0] : memref<64x200xbf16, #tpu.memory_space<vmem>>, vector<64x200xbf16>
    %c0_1 = arith.constant 0 : index
    %c0_2 = arith.constant 0 : index
    %1 = vector.load %arg2[%c0_1, %c0_2] : memref<200x8xbf16, #tpu.memory_space<vmem>>, vector<200x8xbf16>
    %cst = arith.constant dense<0.000000e+00> : vector<64x8xf32>
    %2 = tpu.matmul %0, %1, %cst {dimension_numbers = #tpu.dot_dimension_numbers<[1], [0], [0], [1], [0, 0, 1, 1], [], []>} : vector<64x200xbf16>, vector<200x8xbf16>, vector<64x8xf32> -> vector<64x8xf32>
    %c0_3 = arith.constant 0 : index
    %c0_4 = arith.constant 0 : index
    %3 = vector.load %arg3[%c0_3, %c0_4] : memref<1x8xf32, #tpu.memory_space<vmem>>, vector<1x8xf32>
    %4 = vector.broadcast %3 : vector<1x8xf32> to vector<64x8xf32>
    %5 = arith.addf %2, %4 : vector<64x8xf32>
    %6 = arith.mulf %5, %5 : vector<64x8xf32>
    %c0_5 = arith.constant 0 : index
    %c0_6 = arith.constant 0 : index
    %7 = vector.load %arg4[%c0_5, %c0_6] : memref<8x8xf32, #tpu.memory_space<vmem>>, vector<8x8xf32>
    %cst_7 = arith.constant dense<0.000000e+00> : vector<64x8xf32>
    %8 = tpu.matmul %6, %7, %cst_7 {dimension_numbers = #tpu.dot_dimension_numbers<[1], [0], [0], [1], [0, 0, 1, 1], [], []>} : vector<64x8xf32>, vector<8x8xf32>, vector<64x8xf32> -> vector<64x8xf32>
    %c0_8 = arith.constant 0 : index
    %c0_9 = arith.constant 0 : index
    %9 = vector.load %arg5[%c0_8, %c0_9] : memref<1x8xf32, #tpu.memory_space<vmem>>, vector<1x8xf32>
    %10 = vector.broadcast %9 : vector<1x8xf32> to vector<64x8xf32>
    %11 = arith.addf %8, %10 : vector<64x8xf32>
    %12 = math.rsqrt %11 : vector<64x8xf32>
    %13 = arith.mulf %5, %12 : vector<64x8xf32>
    %c0_10 = arith.constant 0 : index
    %c0_11 = arith.constant 0 : index
    %14 = vector.load %arg6[%c0_10, %c0_11] : memref<64x8xf32, #tpu.memory_space<vmem>>, vector<64x8xf32>
    tpu.vector_store %arg6[%c0_10, %c0_11], %13 {strides = array<i32>} : memref<64x8xf32, #tpu.memory_space<vmem>>, vector<64x8xf32>,
    return
  }
  func.func @transform_0(%arg0: i32) -> (i32, i32) {
    %c0_i32 = arith.constant 0 : i32
    %c0_i32_0 = arith.constant 0 : i32
    return %arg0, %c0_i32 : i32, i32
  }
  func.func @transform_1(%arg0: i32) -> (i32, i32) {
    %c0_i32 = arith.constant 0 : i32
    %c0_i32_0 = arith.constant 0 : i32
    %c0_i32_1 = arith.constant 0 : i32
    return %c0_i32, %c0_i32_0 : i32, i32
  }
  func.func @transform_2(%arg0: i32) -> (i32, i32) {
    %c0_i32 = arith.constant 0 : i32
    %c0_i32_0 = arith.constant 0 : i32
    %c0_i32_1 = arith.constant 0 : i32
    return %c0_i32, %c0_i32_0 : i32, i32
  }
  func.func @transform_3(%arg0: i32) -> (i32, i32) {
    %c0_i32 = arith.constant 0 : i32
    %c0_i32_0 = arith.constant 0 : i32
    %c0_i32_1 = arith.constant 0 : i32
    return %c0_i32, %c0_i32_0 : i32, i32
  }
  func.func @transform_4(%arg0: i32) -> (i32, i32) {
    %c0_i32 = arith.constant 0 : i32
    %c0_i32_0 = arith.constant 0 : i32
    %c0_i32_1 = arith.constant 0 : i32
    return %c0_i32, %c0_i32_0 : i32, i32
  }
  func.func @transform_5(%arg0: i32) -> (i32, i32) {
    %c0_i32 = arith.constant 0 : i32
    %c0_i32_0 = arith.constant 0 : i32
    return %arg0, %c0_i32 : i32, i32
  }
}

module attributes {stable_mosaic.version = 11 : i64} {
  func.func @_mm_bias_act_kernel(%arg0: i32, %arg1: memref<16x200xbf16, #tpu.memory_space<vmem>>, %arg2: memref<200x16xbf16, #tpu.memory_space<vmem>>, %arg3: memref<1x16xf32, #tpu.memory_space<vmem>>, %arg4: memref<16x16xf32, #tpu.memory_space<vmem>>) attributes {dimension_semantics = [#tpu.dimension_semantics<parallel>], iteration_bounds = array<i64: 1>, scalar_prefetch = 0 : i64, scratch_operands = 0 : i64, tpu.core_type = #tpu.core_type<tc>, window_params = [{transform_indices = @transform_0, window_bounds = array<i64: 16, 200>}, {pipeline_mode = #tpu.pipeline_mode<synchronous>, transform_indices = @transform_1, window_bounds = array<i64: 200, 16>}, {pipeline_mode = #tpu.pipeline_mode<synchronous>, transform_indices = @transform_2, window_bounds = array<i64: 1, 16>}, {transform_indices = @transform_3, window_bounds = array<i64: 16, 16>}]} {
    %c0 = arith.constant 0 : index
    %c0_0 = arith.constant 0 : index
    %0 = vector.load %arg1[%c0, %c0_0] : memref<16x200xbf16, #tpu.memory_space<vmem>>, vector<16x200xbf16>
    %c0_1 = arith.constant 0 : index
    %c0_2 = arith.constant 0 : index
    %1 = vector.load %arg2[%c0_1, %c0_2] : memref<200x16xbf16, #tpu.memory_space<vmem>>, vector<200x16xbf16>
    %cst = arith.constant dense<0.000000e+00> : vector<16x16xf32>
    %2 = tpu.matmul %0, %1, %cst {dimension_numbers = #tpu.dot_dimension_numbers<[1], [0], [0], [1], [0, 0, 1, 1], [], []>} : vector<16x200xbf16>, vector<200x16xbf16>, vector<16x16xf32> -> vector<16x16xf32>
    %c0_3 = arith.constant 0 : index
    %c0_4 = arith.constant 0 : index
    %3 = vector.load %arg3[%c0_3, %c0_4] : memref<1x16xf32, #tpu.memory_space<vmem>>, vector<1x16xf32>
    %4 = vector.broadcast %3 : vector<1x16xf32> to vector<16x16xf32>
    %5 = arith.addf %2, %4 : vector<16x16xf32>
    %c0_5 = arith.constant 0 : index
    %c0_6 = arith.constant 0 : index
    %6 = vector.load %arg4[%c0_5, %c0_6] : memref<16x16xf32, #tpu.memory_space<vmem>>, vector<16x16xf32>
    tpu.vector_store %arg4[%c0_5, %c0_6], %5 {strides = array<i32>} : memref<16x16xf32, #tpu.memory_space<vmem>>, vector<16x16xf32>,
    return
  }
  func.func @transform_0(%arg0: i32) -> (i32, i32) {
    %c0_i32 = arith.constant 0 : i32
    %c0_i32_0 = arith.constant 0 : i32
    return %arg0, %c0_i32 : i32, i32
  }
  func.func @transform_1(%arg0: i32) -> (i32, i32) {
    %c0_i32 = arith.constant 0 : i32
    %c0_i32_0 = arith.constant 0 : i32
    %c0_i32_1 = arith.constant 0 : i32
    return %c0_i32, %c0_i32_0 : i32, i32
  }
  func.func @transform_2(%arg0: i32) -> (i32, i32) {
    %c0_i32 = arith.constant 0 : i32
    %c0_i32_0 = arith.constant 0 : i32
    %c0_i32_1 = arith.constant 0 : i32
    return %c0_i32, %c0_i32_0 : i32, i32
  }
  func.func @transform_3(%arg0: i32) -> (i32, i32) {
    %c0_i32 = arith.constant 0 : i32
    %c0_i32_0 = arith.constant 0 : i32
    return %arg0, %c0_i32 : i32, i32
  }
}

module attributes {stable_mosaic.version = 11 : i64} {
  func.func @_mm_bias_act_kernel(%arg0: i32, %arg1: memref<16x144xbf16, #tpu.memory_space<vmem>>, %arg2: memref<144x8xbf16, #tpu.memory_space<vmem>>, %arg3: memref<1x8xf32, #tpu.memory_space<vmem>>, %arg4: memref<16x8xf32, #tpu.memory_space<vmem>>) attributes {dimension_semantics = [#tpu.dimension_semantics<parallel>], iteration_bounds = array<i64: 1>, scalar_prefetch = 0 : i64, scratch_operands = 0 : i64, tpu.core_type = #tpu.core_type<tc>, window_params = [{transform_indices = @transform_0, window_bounds = array<i64: 16, 144>}, {pipeline_mode = #tpu.pipeline_mode<synchronous>, transform_indices = @transform_1, window_bounds = array<i64: 144, 8>}, {pipeline_mode = #tpu.pipeline_mode<synchronous>, transform_indices = @transform_2, window_bounds = array<i64: 1, 8>}, {transform_indices = @transform_3, window_bounds = array<i64: 16, 8>}]} {
    %c0 = arith.constant 0 : index
    %c0_0 = arith.constant 0 : index
    %0 = vector.load %arg1[%c0, %c0_0] : memref<16x144xbf16, #tpu.memory_space<vmem>>, vector<16x144xbf16>
    %c0_1 = arith.constant 0 : index
    %c0_2 = arith.constant 0 : index
    %1 = vector.load %arg2[%c0_1, %c0_2] : memref<144x8xbf16, #tpu.memory_space<vmem>>, vector<144x8xbf16>
    %cst = arith.constant dense<0.000000e+00> : vector<16x8xf32>
    %2 = tpu.matmul %0, %1, %cst {dimension_numbers = #tpu.dot_dimension_numbers<[1], [0], [0], [1], [0, 0, 1, 1], [], []>} : vector<16x144xbf16>, vector<144x8xbf16>, vector<16x8xf32> -> vector<16x8xf32>
    %c0_3 = arith.constant 0 : index
    %c0_4 = arith.constant 0 : index
    %3 = vector.load %arg3[%c0_3, %c0_4] : memref<1x8xf32, #tpu.memory_space<vmem>>, vector<1x8xf32>
    %4 = vector.broadcast %3 : vector<1x8xf32> to vector<16x8xf32>
    %5 = arith.addf %2, %4 : vector<16x8xf32>
    %cst_5 = arith.constant 0.000000e+00 : f32
    %6 = vector.broadcast %cst_5 : f32 to vector<16x8xf32>
    %7 = arith.maximumf %5, %6 : vector<16x8xf32>
    %c0_6 = arith.constant 0 : index
    %c0_7 = arith.constant 0 : index
    %8 = vector.load %arg4[%c0_6, %c0_7] : memref<16x8xf32, #tpu.memory_space<vmem>>, vector<16x8xf32>
    tpu.vector_store %arg4[%c0_6, %c0_7], %7 {strides = array<i32>} : memref<16x8xf32, #tpu.memory_space<vmem>>, vector<16x8xf32>,
    return
  }
  func.func @transform_0(%arg0: i32) -> (i32, i32) {
    %c0_i32 = arith.constant 0 : i32
    %c0_i32_0 = arith.constant 0 : i32
    return %arg0, %c0_i32 : i32, i32
  }
  func.func @transform_1(%arg0: i32) -> (i32, i32) {
    %c0_i32 = arith.constant 0 : i32
    %c0_i32_0 = arith.constant 0 : i32
    %c0_i32_1 = arith.constant 0 : i32
    return %c0_i32, %c0_i32_0 : i32, i32
  }
  func.func @transform_2(%arg0: i32) -> (i32, i32) {
    %c0_i32 = arith.constant 0 : i32
    %c0_i32_0 = arith.constant 0 : i32
    %c0_i32_1 = arith.constant 0 : i32
    return %c0_i32, %c0_i32_0 : i32, i32
  }
  func.func @transform_3(%arg0: i32) -> (i32, i32) {
    %c0_i32 = arith.constant 0 : i32
    %c0_i32_0 = arith.constant 0 : i32
    return %arg0, %c0_i32 : i32, i32
  }
}

module attributes {stable_mosaic.version = 11 : i64} {
  func.func @_mm_bias_act_kernel(%arg0: i32, %arg1: memref<16x200xbf16, #tpu.memory_space<vmem>>, %arg2: memref<200x8xbf16, #tpu.memory_space<vmem>>, %arg3: memref<1x8xf32, #tpu.memory_space<vmem>>, %arg4: memref<16x8xf32, #tpu.memory_space<vmem>>) attributes {dimension_semantics = [#tpu.dimension_semantics<parallel>], iteration_bounds = array<i64: 1>, scalar_prefetch = 0 : i64, scratch_operands = 0 : i64, tpu.core_type = #tpu.core_type<tc>, window_params = [{transform_indices = @transform_0, window_bounds = array<i64: 16, 200>}, {pipeline_mode = #tpu.pipeline_mode<synchronous>, transform_indices = @transform_1, window_bounds = array<i64: 200, 8>}, {pipeline_mode = #tpu.pipeline_mode<synchronous>, transform_indices = @transform_2, window_bounds = array<i64: 1, 8>}, {transform_indices = @transform_3, window_bounds = array<i64: 16, 8>}]} {
    %c0 = arith.constant 0 : index
    %c0_0 = arith.constant 0 : index
    %0 = vector.load %arg1[%c0, %c0_0] : memref<16x200xbf16, #tpu.memory_space<vmem>>, vector<16x200xbf16>
    %c0_1 = arith.constant 0 : index
    %c0_2 = arith.constant 0 : index
    %1 = vector.load %arg2[%c0_1, %c0_2] : memref<200x8xbf16, #tpu.memory_space<vmem>>, vector<200x8xbf16>
    %cst = arith.constant dense<0.000000e+00> : vector<16x8xf32>
    %2 = tpu.matmul %0, %1, %cst {dimension_numbers = #tpu.dot_dimension_numbers<[1], [0], [0], [1], [0, 0, 1, 1], [], []>} : vector<16x200xbf16>, vector<200x8xbf16>, vector<16x8xf32> -> vector<16x8xf32>
    %c0_3 = arith.constant 0 : index
    %c0_4 = arith.constant 0 : index
    %3 = vector.load %arg3[%c0_3, %c0_4] : memref<1x8xf32, #tpu.memory_space<vmem>>, vector<1x8xf32>
    %4 = vector.broadcast %3 : vector<1x8xf32> to vector<16x8xf32>
    %5 = arith.addf %2, %4 : vector<16x8xf32>
    %cst_5 = arith.constant 0.000000e+00 : f32
    %6 = vector.broadcast %cst_5 : f32 to vector<16x8xf32>
    %7 = arith.maximumf %5, %6 : vector<16x8xf32>
    %c0_6 = arith.constant 0 : index
    %c0_7 = arith.constant 0 : index
    %8 = vector.load %arg4[%c0_6, %c0_7] : memref<16x8xf32, #tpu.memory_space<vmem>>, vector<16x8xf32>
    tpu.vector_store %arg4[%c0_6, %c0_7], %7 {strides = array<i32>} : memref<16x8xf32, #tpu.memory_space<vmem>>, vector<16x8xf32>,
    return
  }
  func.func @transform_0(%arg0: i32) -> (i32, i32) {
    %c0_i32 = arith.constant 0 : i32
    %c0_i32_0 = arith.constant 0 : i32
    return %arg0, %c0_i32 : i32, i32
  }
  func.func @transform_1(%arg0: i32) -> (i32, i32) {
    %c0_i32 = arith.constant 0 : i32
    %c0_i32_0 = arith.constant 0 : i32
    %c0_i32_1 = arith.constant 0 : i32
    return %c0_i32, %c0_i32_0 : i32, i32
  }
  func.func @transform_2(%arg0: i32) -> (i32, i32) {
    %c0_i32 = arith.constant 0 : i32
    %c0_i32_0 = arith.constant 0 : i32
    %c0_i32_1 = arith.constant 0 : i32
    return %c0_i32, %c0_i32_0 : i32, i32
  }
  func.func @transform_3(%arg0: i32) -> (i32, i32) {
    %c0_i32 = arith.constant 0 : i32
    %c0_i32_0 = arith.constant 0 : i32
    return %arg0, %c0_i32 : i32, i32
  }
}

module attributes {stable_mosaic.version = 11 : i64} {
  func.func @_entropy_bottleneck_kernel(%arg0: i32, %arg1: memref<8x8xf32, #tpu.memory_space<vmem>>, %arg2: memref<1x8xf32, #tpu.memory_space<vmem>>, %arg3: memref<3x1x8xf32, #tpu.memory_space<vmem>>, %arg4: memref<3x3x8xf32, #tpu.memory_space<vmem>>, %arg5: memref<3x3x8xf32, #tpu.memory_space<vmem>>, %arg6: memref<3x3x8xf32, #tpu.memory_space<vmem>>, %arg7: memref<1x3x8xf32, #tpu.memory_space<vmem>>, %arg8: memref<3x8xf32, #tpu.memory_space<vmem>>, %arg9: memref<3x8xf32, #tpu.memory_space<vmem>>, %arg10: memref<3x8xf32, #tpu.memory_space<vmem>>, %arg11: memref<3x8xf32, #tpu.memory_space<vmem>>, %arg12: memref<1x8xf32, #tpu.memory_space<vmem>>, %arg13: memref<3x8xf32, #tpu.memory_space<vmem>>, %arg14: memref<3x8xf32, #tpu.memory_space<vmem>>, %arg15: memref<3x8xf32, #tpu.memory_space<vmem>>, %arg16: memref<3x8xf32, #tpu.memory_space<vmem>>, %arg17: memref<8x8xf32, #tpu.memory_space<vmem>>, %arg18: memref<8x8xf32, #tpu.memory_space<vmem>>) attributes {dimension_semantics = [#tpu.dimension_semantics<parallel>], iteration_bounds = array<i64: 1>, scalar_prefetch = 0 : i64, scratch_operands = 0 : i64, tpu.core_type = #tpu.core_type<tc>, window_params = [{transform_indices = @transform_0, window_bounds = array<i64: 8, 8>}, {pipeline_mode = #tpu.pipeline_mode<synchronous>, transform_indices = @transform_1, window_bounds = array<i64: 1, 8>}, {pipeline_mode = #tpu.pipeline_mode<synchronous>, transform_indices = @transform_2, window_bounds = array<i64: 3, 1, 8>}, {pipeline_mode = #tpu.pipeline_mode<synchronous>, transform_indices = @transform_3, window_bounds = array<i64: 3, 3, 8>}, {pipeline_mode = #tpu.pipeline_mode<synchronous>, transform_indices = @transform_4, window_bounds = array<i64: 3, 3, 8>}, {pipeline_mode = #tpu.pipeline_mode<synchronous>, transform_indices = @transform_5, window_bounds = array<i64: 3, 3, 8>}, {pipeline_mode = #tpu.pipeline_mode<synchronous>, transform_indices = @transform_6, window_bounds = array<i64: 1, 3, 8>}, {pipeline_mode = #tpu.pipeline_mode<synchronous>, transform_indices = @transform_7, window_bounds = array<i64: 3, 8>}, {pipeline_mode = #tpu.pipeline_mode<synchronous>, transform_indices = @transform_8, window_bounds = array<i64: 3, 8>}, {pipeline_mode = #tpu.pipeline_mode<synchronous>, transform_indices = @transform_9, window_bounds = array<i64: 3, 8>}, {pipeline_mode = #tpu.pipeline_mode<synchronous>, transform_indices = @transform_10, window_bounds = array<i64: 3, 8>}, {pipeline_mode = #tpu.pipeline_mode<synchronous>, transform_indices = @transform_11, window_bounds = array<i64: 1, 8>}, {pipeline_mode = #tpu.pipeline_mode<synchronous>, transform_indices = @transform_12, window_bounds = array<i64: 3, 8>}, {pipeline_mode = #tpu.pipeline_mode<synchronous>, transform_indices = @transform_13, window_bounds = array<i64: 3, 8>}, {pipeline_mode = #tpu.pipeline_mode<synchronous>, transform_indices = @transform_14, window_bounds = array<i64: 3, 8>}, {pipeline_mode = #tpu.pipeline_mode<synchronous>, transform_indices = @transform_15, window_bounds = array<i64: 3, 8>}, {transform_indices = @transform_16, window_bounds = array<i64: 8, 8>}, {transform_indices = @transform_17, window_bounds = array<i64: 8, 8>}]} {
    %c0 = arith.constant 0 : index
    %c0_0 = arith.constant 0 : index
    %0 = vector.load %arg1[%c0, %c0_0] : memref<8x8xf32, #tpu.memory_space<vmem>>, vector<8x8xf32>
    %c0_1 = arith.constant 0 : index
    %c0_2 = arith.constant 0 : index
    %1 = vector.load %arg2[%c0_1, %c0_2] : memref<1x8xf32, #tpu.memory_space<vmem>>, vector<1x8xf32>
    %2 = vector.broadcast %1 : vector<1x8xf32> to vector<8x8xf32>
    %3 = arith.subf %0, %2 : vector<8x8xf32>
    %4 = math.roundeven %3 : vector<8x8xf32>
    %5 = vector.broadcast %1 : vector<1x8xf32> to vector<8x8xf32>
    %6 = arith.addf %4, %5 : vector<8x8xf32>
    %c0_3 = arith.constant 0 : index
    %c0_4 = arith.constant 0 : index
    %7 = vector.load %arg17[%c0_3, %c0_4] : memref<8x8xf32, #tpu.memory_space<vmem>>, vector<8x8xf32>
    tpu.vector_store %arg17[%c0_3, %c0_4], %6 {strides = array<i32>} : memref<8x8xf32, #tpu.memory_space<vmem>>, vector<8x8xf32>,
    %c0_5 = arith.constant 0 : index
    %c0_6 = arith.constant 0 : index
    %c0_7 = arith.constant 0 : index
    %8 = vector.load %arg3[%c0_5, %c0_6, %c0_7] : memref<3x1x8xf32, #tpu.memory_space<vmem>>, vector<3x1x8xf32>
    %c0_8 = arith.constant 0 : index
    %c0_9 = arith.constant 0 : index
    %c0_10 = arith.constant 0 : index
    %9 = vector.load %arg4[%c0_8, %c0_9, %c0_10] : memref<3x3x8xf32, #tpu.memory_space<vmem>>, vector<3x3x8xf32>
    %c0_11 = arith.constant 0 : index
    %c0_12 = arith.constant 0 : index
    %c0_13 = arith.constant 0 : index
    %10 = vector.load %arg5[%c0_11, %c0_12, %c0_13] : memref<3x3x8xf32, #tpu.memory_space<vmem>>, vector<3x3x8xf32>
    %c0_14 = arith.constant 0 : index
    %c0_15 = arith.constant 0 : index
    %c0_16 = arith.constant 0 : index
    %11 = vector.load %arg6[%c0_14, %c0_15, %c0_16] : memref<3x3x8xf32, #tpu.memory_space<vmem>>, vector<3x3x8xf32>
    %c0_17 = arith.constant 0 : index
    %c0_18 = arith.constant 0 : index
    %c0_19 = arith.constant 0 : index
    %12 = vector.load %arg7[%c0_17, %c0_18, %c0_19] : memref<1x3x8xf32, #tpu.memory_space<vmem>>, vector<1x3x8xf32>
    %c0_20 = arith.constant 0 : index
    %c0_21 = arith.constant 0 : index
    %13 = vector.load %arg8[%c0_20, %c0_21] : memref<3x8xf32, #tpu.memory_space<vmem>>, vector<3x8xf32>
    %c0_22 = arith.constant 0 : index
    %c0_23 = arith.constant 0 : index
    %14 = vector.load %arg9[%c0_22, %c0_23] : memref<3x8xf32, #tpu.memory_space<vmem>>, vector<3x8xf32>
    %c0_24 = arith.constant 0 : index
    %c0_25 = arith.constant 0 : index
    %15 = vector.load %arg10[%c0_24, %c0_25] : memref<3x8xf32, #tpu.memory_space<vmem>>, vector<3x8xf32>
    %c0_26 = arith.constant 0 : index
    %c0_27 = arith.constant 0 : index
    %16 = vector.load %arg11[%c0_26, %c0_27] : memref<3x8xf32, #tpu.memory_space<vmem>>, vector<3x8xf32>
    %c0_28 = arith.constant 0 : index
    %c0_29 = arith.constant 0 : index
    %17 = vector.load %arg12[%c0_28, %c0_29] : memref<1x8xf32, #tpu.memory_space<vmem>>, vector<1x8xf32>
    %c0_30 = arith.constant 0 : index
    %c0_31 = arith.constant 0 : index
    %18 = vector.load %arg13[%c0_30, %c0_31] : memref<3x8xf32, #tpu.memory_space<vmem>>, vector<3x8xf32>
    %c0_32 = arith.constant 0 : index
    %c0_33 = arith.constant 0 : index
    %19 = vector.load %arg14[%c0_32, %c0_33] : memref<3x8xf32, #tpu.memory_space<vmem>>, vector<3x8xf32>
    %c0_34 = arith.constant 0 : index
    %c0_35 = arith.constant 0 : index
    %20 = vector.load %arg15[%c0_34, %c0_35] : memref<3x8xf32, #tpu.memory_space<vmem>>, vector<3x8xf32>
    %c0_36 = arith.constant 0 : index
    %c0_37 = arith.constant 0 : index
    %21 = vector.load %arg16[%c0_36, %c0_37] : memref<3x8xf32, #tpu.memory_space<vmem>>, vector<3x8xf32>
    %cst = arith.constant 5.000000e-01 : f32
    %22 = vector.broadcast %cst : f32 to vector<8x8xf32>
    %23 = arith.subf %6, %22 : vector<8x8xf32>
    %24 = vector.shape_cast %23 : vector<8x8xf32> to vector<1x8x8xf32>
    %25 = vector.shape_cast %13 : vector<3x8xf32> to vector<3x1x8xf32>
    %26 = vector.shape_cast %8 : vector<3x1x8xf32> to vector<3x8xf32>
    %27 = vector.shape_cast %26 : vector<3x8xf32> to vector<3x1x8xf32>
    %28 = vector.shape_cast %24 : vector<1x8x8xf32> to vector<8x8xf32>
    %29 = vector.shape_cast %28 : vector<8x8xf32> to vector<1x8x8xf32>
    %30 = vector.broadcast %27 : vector<3x1x8xf32> to vector<3x8x8xf32>
    %31 = vector.broadcast %29 : vector<1x8x8xf32> to vector<3x8x8xf32>
    %32 = arith.mulf %30, %31 : vector<3x8x8xf32>
    %33 = vector.broadcast %25 : vector<3x1x8xf32> to vector<3x8x8xf32>
    %34 = arith.addf %33, %32 : vector<3x8x8xf32>
    %35 = vector.shape_cast %18 : vector<3x8xf32> to vector<3x1x8xf32>
    %36 = math.tanh %34 : vector<3x8x8xf32>
    %37 = vector.broadcast %35 : vector<3x1x8xf32> to vector<3x8x8xf32>
    %38 = arith.mulf %37, %36 : vector<3x8x8xf32>
    %39 = arith.addf %34, %38 : vector<3x8x8xf32>
    %40 = vector.shape_cast %14 : vector<3x8xf32> to vector<3x1x8xf32>
    %41 = vector.extract_strided_slice %9 {offsets = [0, 0, 0], sizes = [3, 1, 8], strides = [1, 1, 1]} : vector<3x3x8xf32> to vector<3x1x8xf32>
    %42 = vector.shape_cast %41 : vector<3x1x8xf32> to vector<3x8xf32>
    %43 = vector.shape_cast %42 : vector<3x8xf32> to vector<3x1x8xf32>
    %44 = vector.extract_strided_slice %39 {offsets = [0, 0, 0], sizes = [1, 8, 8], strides = [1, 1, 1]} : vector<3x8x8xf32> to vector<1x8x8xf32>
    %45 = vector.shape_cast %44 : vector<1x8x8xf32> to vector<8x8xf32>
    %46 = vector.shape_cast %45 : vector<8x8xf32> to vector<1x8x8xf32>
    %47 = vector.broadcast %43 : vector<3x1x8xf32> to vector<3x8x8xf32>
    %48 = vector.broadcast %46 : vector<1x8x8xf32> to vector<3x8x8xf32>
    %49 = arith.mulf %47, %48 : vector<3x8x8xf32>
    %50 = vector.broadcast %40 : vector<3x1x8xf32> to vector<3x8x8xf32>
    %51 = arith.addf %50, %49 : vector<3x8x8xf32>
    %52 = vector.extract_strided_slice %9 {offsets = [0, 1, 0], sizes = [3, 1, 8], strides = [1, 1, 1]} : vector<3x3x8xf32> to vector<3x1x8xf32>
    %53 = vector.shape_cast %52 : vector<3x1x8xf32> to vector<3x8xf32>
    %54 = vector.shape_cast %53 : vector<3x8xf32> to vector<3x1x8xf32>
    %55 = vector.extract_strided_slice %39 {offsets = [1, 0, 0], sizes = [1, 8, 8], strides = [1, 1, 1]} : vector<3x8x8xf32> to vector<1x8x8xf32>
    %56 = vector.shape_cast %55 : vector<1x8x8xf32> to vector<8x8xf32>
    %57 = vector.shape_cast %56 : vector<8x8xf32> to vector<1x8x8xf32>
    %58 = vector.broadcast %54 : vector<3x1x8xf32> to vector<3x8x8xf32>
    %59 = vector.broadcast %57 : vector<1x8x8xf32> to vector<3x8x8xf32>
    %60 = arith.mulf %58, %59 : vector<3x8x8xf32>
    %61 = arith.addf %51, %60 : vector<3x8x8xf32>
    %62 = vector.extract_strided_slice %9 {offsets = [0, 2, 0], sizes = [3, 1, 8], strides = [1, 1, 1]} : vector<3x3x8xf32> to vector<3x1x8xf32>
    %63 = vector.shape_cast %62 : vector<3x1x8xf32> to vector<3x8xf32>
    %64 = vector.shape_cast %63 : vector<3x8xf32> to vector<3x1x8xf32>
    %65 = vector.extract_strided_slice %39 {offsets = [2, 0, 0], sizes = [1, 8, 8], strides = [1, 1, 1]} : vector<3x8x8xf32> to vector<1x8x8xf32>
    %66 = vector.shape_cast %65 : vector<1x8x8xf32> to vector<8x8xf32>
    %67 = vector.shape_cast %66 : vector<8x8xf32> to vector<1x8x8xf32>
    %68 = vector.broadcast %64 : vector<3x1x8xf32> to vector<3x8x8xf32>
    %69 = vector.broadcast %67 : vector<1x8x8xf32> to vector<3x8x8xf32>
    %70 = arith.mulf %68, %69 : vector<3x8x8xf32>
    %71 = arith.addf %61, %70 : vector<3x8x8xf32>
    %72 = vector.shape_cast %19 : vector<3x8xf32> to vector<3x1x8xf32>
    %73 = math.tanh %71 : vector<3x8x8xf32>
    %74 = vector.broadcast %72 : vector<3x1x8xf32> to vector<3x8x8xf32>
    %75 = arith.mulf %74, %73 : vector<3x8x8xf32>
    %76 = arith.addf %71, %75 : vector<3x8x8xf32>
    %77 = vector.shape_cast %15 : vector<3x8xf32> to vector<3x1x8xf32>
    %78 = vector.extract_strided_slice %10 {offsets = [0, 0, 0], sizes = [3, 1, 8], strides = [1, 1, 1]} : vector<3x3x8xf32> to vector<3x1x8xf32>
    %79 = vector.shape_cast %78 : vector<3x1x8xf32> to vector<3x8xf32>
    %80 = vector.shape_cast %79 : vector<3x8xf32> to vector<3x1x8xf32>
    %81 = vector.extract_strided_slice %76 {offsets = [0, 0, 0], sizes = [1, 8, 8], strides = [1, 1, 1]} : vector<3x8x8xf32> to vector<1x8x8xf32>
    %82 = vector.shape_cast %81 : vector<1x8x8xf32> to vector<8x8xf32>
    %83 = vector.shape_cast %82 : vector<8x8xf32> to vector<1x8x8xf32>
    %84 = vector.broadcast %80 : vector<3x1x8xf32> to vector<3x8x8xf32>
    %85 = vector.broadcast %83 : vector<1x8x8xf32> to vector<3x8x8xf32>
    %86 = arith.mulf %84, %85 : vector<3x8x8xf32>
    %87 = vector.broadcast %77 : vector<3x1x8xf32> to vector<3x8x8xf32>
    %88 = arith.addf %87, %86 : vector<3x8x8xf32>
    %89 = vector.extract_strided_slice %10 {offsets = [0, 1, 0], sizes = [3, 1, 8], strides = [1, 1, 1]} : vector<3x3x8xf32> to vector<3x1x8xf32>
    %90 = vector.shape_cast %89 : vector<3x1x8xf32> to vector<3x8xf32>
    %91 = vector.shape_cast %90 : vector<3x8xf32> to vector<3x1x8xf32>
    %92 = vector.extract_strided_slice %76 {offsets = [1, 0, 0], sizes = [1, 8, 8], strides = [1, 1, 1]} : vector<3x8x8xf32> to vector<1x8x8xf32>
    %93 = vector.shape_cast %92 : vector<1x8x8xf32> to vector<8x8xf32>
    %94 = vector.shape_cast %93 : vector<8x8xf32> to vector<1x8x8xf32>
    %95 = vector.broadcast %91 : vector<3x1x8xf32> to vector<3x8x8xf32>
    %96 = vector.broadcast %94 : vector<1x8x8xf32> to vector<3x8x8xf32>
    %97 = arith.mulf %95, %96 : vector<3x8x8xf32>
    %98 = arith.addf %88, %97 : vector<3x8x8xf32>
    %99 = vector.extract_strided_slice %10 {offsets = [0, 2, 0], sizes = [3, 1, 8], strides = [1, 1, 1]} : vector<3x3x8xf32> to vector<3x1x8xf32>
    %100 = vector.shape_cast %99 : vector<3x1x8xf32> to vector<3x8xf32>
    %101 = vector.shape_cast %100 : vector<3x8xf32> to vector<3x1x8xf32>
    %102 = vector.extract_strided_slice %76 {offsets = [2, 0, 0], sizes = [1, 8, 8], strides = [1, 1, 1]} : vector<3x8x8xf32> to vector<1x8x8xf32>
    %103 = vector.shape_cast %102 : vector<1x8x8xf32> to vector<8x8xf32>
    %104 = vector.shape_cast %103 : vector<8x8xf32> to vector<1x8x8xf32>
    %105 = vector.broadcast %101 : vector<3x1x8xf32> to vector<3x8x8xf32>
    %106 = vector.broadcast %104 : vector<1x8x8xf32> to vector<3x8x8xf32>
    %107 = arith.mulf %105, %106 : vector<3x8x8xf32>
    %108 = arith.addf %98, %107 : vector<3x8x8xf32>
    %109 = vector.shape_cast %20 : vector<3x8xf32> to vector<3x1x8xf32>
    %110 = math.tanh %108 : vector<3x8x8xf32>
    %111 = vector.broadcast %109 : vector<3x1x8xf32> to vector<3x8x8xf32>
    %112 = arith.mulf %111, %110 : vector<3x8x8xf32>
    %113 = arith.addf %108, %112 : vector<3x8x8xf32>
    %114 = vector.shape_cast %16 : vector<3x8xf32> to vector<3x1x8xf32>
    %115 = vector.extract_strided_slice %11 {offsets = [0, 0, 0], sizes = [3, 1, 8], strides = [1, 1, 1]} : vector<3x3x8xf32> to vector<3x1x8xf32>
    %116 = vector.shape_cast %115 : vector<3x1x8xf32> to vector<3x8xf32>
    %117 = vector.shape_cast %116 : vector<3x8xf32> to vector<3x1x8xf32>
    %118 = vector.extract_strided_slice %113 {offsets = [0, 0, 0], sizes = [1, 8, 8], strides = [1, 1, 1]} : vector<3x8x8xf32> to vector<1x8x8xf32>
    %119 = vector.shape_cast %118 : vector<1x8x8xf32> to vector<8x8xf32>
    %120 = vector.shape_cast %119 : vector<8x8xf32> to vector<1x8x8xf32>
    %121 = vector.broadcast %117 : vector<3x1x8xf32> to vector<3x8x8xf32>
    %122 = vector.broadcast %120 : vector<1x8x8xf32> to vector<3x8x8xf32>
    %123 = arith.mulf %121, %122 : vector<3x8x8xf32>
    %124 = vector.broadcast %114 : vector<3x1x8xf32> to vector<3x8x8xf32>
    %125 = arith.addf %124, %123 : vector<3x8x8xf32>
    %126 = vector.extract_strided_slice %11 {offsets = [0, 1, 0], sizes = [3, 1, 8], strides = [1, 1, 1]} : vector<3x3x8xf32> to vector<3x1x8xf32>
    %127 = vector.shape_cast %126 : vector<3x1x8xf32> to vector<3x8xf32>
    %128 = vector.shape_cast %127 : vector<3x8xf32> to vector<3x1x8xf32>
    %129 = vector.extract_strided_slice %113 {offsets = [1, 0, 0], sizes = [1, 8, 8], strides = [1, 1, 1]} : vector<3x8x8xf32> to vector<1x8x8xf32>
    %130 = vector.shape_cast %129 : vector<1x8x8xf32> to vector<8x8xf32>
    %131 = vector.shape_cast %130 : vector<8x8xf32> to vector<1x8x8xf32>
    %132 = vector.broadcast %128 : vector<3x1x8xf32> to vector<3x8x8xf32>
    %133 = vector.broadcast %131 : vector<1x8x8xf32> to vector<3x8x8xf32>
    %134 = arith.mulf %132, %133 : vector<3x8x8xf32>
    %135 = arith.addf %125, %134 : vector<3x8x8xf32>
    %136 = vector.extract_strided_slice %11 {offsets = [0, 2, 0], sizes = [3, 1, 8], strides = [1, 1, 1]} : vector<3x3x8xf32> to vector<3x1x8xf32>
    %137 = vector.shape_cast %136 : vector<3x1x8xf32> to vector<3x8xf32>
    %138 = vector.shape_cast %137 : vector<3x8xf32> to vector<3x1x8xf32>
    %139 = vector.extract_strided_slice %113 {offsets = [2, 0, 0], sizes = [1, 8, 8], strides = [1, 1, 1]} : vector<3x8x8xf32> to vector<1x8x8xf32>
    %140 = vector.shape_cast %139 : vector<1x8x8xf32> to vector<8x8xf32>
    %141 = vector.shape_cast %140 : vector<8x8xf32> to vector<1x8x8xf32>
    %142 = vector.broadcast %138 : vector<3x1x8xf32> to vector<3x8x8xf32>
    %143 = vector.broadcast %141 : vector<1x8x8xf32> to vector<3x8x8xf32>
    %144 = arith.mulf %142, %143 : vector<3x8x8xf32>
    %145 = arith.addf %135, %144 : vector<3x8x8xf32>
    %146 = vector.shape_cast %21 : vector<3x8xf32> to vector<3x1x8xf32>
    %147 = math.tanh %145 : vector<3x8x8xf32>
    %148 = vector.broadcast %146 : vector<3x1x8xf32> to vector<3x8x8xf32>
    %149 = arith.mulf %148, %147 : vector<3x8x8xf32>
    %150 = arith.addf %145, %149 : vector<3x8x8xf32>
    %151 = vector.shape_cast %17 : vector<1x8xf32> to vector<1x1x8xf32>
    %152 = vector.extract_strided_slice %12 {offsets = [0, 0, 0], sizes = [1, 1, 8], strides = [1, 1, 1]} : vector<1x3x8xf32> to vector<1x1x8xf32>
    %153 = vector.shape_cast %152 : vector<1x1x8xf32> to vector<1x8xf32>
    %154 = vector.shape_cast %153 : vector<1x8xf32> to vector<1x1x8xf32>
    %155 = vector.extract_strided_slice %150 {offsets = [0, 0, 0], sizes = [1, 8, 8], strides = [1, 1, 1]} : vector<3x8x8xf32> to vector<1x8x8xf32>
    %156 = vector.shape_cast %155 : vector<1x8x8xf32> to vector<8x8xf32>
    %157 = vector.shape_cast %156 : vector<8x8xf32> to vector<1x8x8xf32>
    %158 = vector.broadcast %154 : vector<1x1x8xf32> to vector<1x8x8xf32>
    %159 = arith.mulf %158, %157 : vector<1x8x8xf32>
    %160 = vector.broadcast %151 : vector<1x1x8xf32> to vector<1x8x8xf32>
    %161 = arith.addf %160, %159 : vector<1x8x8xf32>
    %162 = vector.extract_strided_slice %12 {offsets = [0, 1, 0], sizes = [1, 1, 8], strides = [1, 1, 1]} : vector<1x3x8xf32> to vector<1x1x8xf32>
    %163 = vector.shape_cast %162 : vector<1x1x8xf32> to vector<1x8xf32>
    %164 = vector.shape_cast %163 : vector<1x8xf32> to vector<1x1x8xf32>
    %165 = vector.extract_strided_slice %150 {offsets = [1, 0, 0], sizes = [1, 8, 8], strides = [1, 1, 1]} : vector<3x8x8xf32> to vector<1x8x8xf32>
    %166 = vector.shape_cast %165 : vector<1x8x8xf32> to vector<8x8xf32>
    %167 = vector.shape_cast %166 : vector<8x8xf32> to vector<1x8x8xf32>
    %168 = vector.broadcast %164 : vector<1x1x8xf32> to vector<1x8x8xf32>
    %169 = arith.mulf %168, %167 : vector<1x8x8xf32>
    %170 = arith.addf %161, %169 : vector<1x8x8xf32>
    %171 = vector.extract_strided_slice %12 {offsets = [0, 2, 0], sizes = [1, 1, 8], strides = [1, 1, 1]} : vector<1x3x8xf32> to vector<1x1x8xf32>
    %172 = vector.shape_cast %171 : vector<1x1x8xf32> to vector<1x8xf32>
    %173 = vector.shape_cast %172 : vector<1x8xf32> to vector<1x1x8xf32>
    %174 = vector.extract_strided_slice %150 {offsets = [2, 0, 0], sizes = [1, 8, 8], strides = [1, 1, 1]} : vector<3x8x8xf32> to vector<1x8x8xf32>
    %175 = vector.shape_cast %174 : vector<1x8x8xf32> to vector<8x8xf32>
    %176 = vector.shape_cast %175 : vector<8x8xf32> to vector<1x8x8xf32>
    %177 = vector.broadcast %173 : vector<1x1x8xf32> to vector<1x8x8xf32>
    %178 = arith.mulf %177, %176 : vector<1x8x8xf32>
    %179 = arith.addf %170, %178 : vector<1x8x8xf32>
    %180 = vector.shape_cast %179 : vector<1x8x8xf32> to vector<8x8xf32>
    %cst_38 = arith.constant 5.000000e-01 : f32
    %181 = vector.broadcast %cst_38 : f32 to vector<8x8xf32>
    %182 = arith.addf %6, %181 : vector<8x8xf32>
    %183 = vector.shape_cast %182 : vector<8x8xf32> to vector<1x8x8xf32>
    %184 = vector.shape_cast %13 : vector<3x8xf32> to vector<3x1x8xf32>
    %185 = vector.shape_cast %8 : vector<3x1x8xf32> to vector<3x8xf32>
    %186 = vector.shape_cast %185 : vector<3x8xf32> to vector<3x1x8xf32>
    %187 = vector.shape_cast %183 : vector<1x8x8xf32> to vector<8x8xf32>
    %188 = vector.shape_cast %187 : vector<8x8xf32> to vector<1x8x8xf32>
    %189 = vector.broadcast %186 : vector<3x1x8xf32> to vector<3x8x8xf32>
    %190 = vector.broadcast %188 : vector<1x8x8xf32> to vector<3x8x8xf32>
    %191 = arith.mulf %189, %190 : vector<3x8x8xf32>
    %192 = vector.broadcast %184 : vector<3x1x8xf32> to vector<3x8x8xf32>
    %193 = arith.addf %192, %191 : vector<3x8x8xf32>
    %194 = vector.shape_cast %18 : vector<3x8xf32> to vector<3x1x8xf32>
    %195 = math.tanh %193 : vector<3x8x8xf32>
    %196 = vector.broadcast %194 : vector<3x1x8xf32> to vector<3x8x8xf32>
    %197 = arith.mulf %196, %195 : vector<3x8x8xf32>
    %198 = arith.addf %193, %197 : vector<3x8x8xf32>
    %199 = vector.shape_cast %14 : vector<3x8xf32> to vector<3x1x8xf32>
    %200 = vector.extract_strided_slice %9 {offsets = [0, 0, 0], sizes = [3, 1, 8], strides = [1, 1, 1]} : vector<3x3x8xf32> to vector<3x1x8xf32>
    %201 = vector.shape_cast %200 : vector<3x1x8xf32> to vector<3x8xf32>
    %202 = vector.shape_cast %201 : vector<3x8xf32> to vector<3x1x8xf32>
    %203 = vector.extract_strided_slice %198 {offsets = [0, 0, 0], sizes = [1, 8, 8], strides = [1, 1, 1]} : vector<3x8x8xf32> to vector<1x8x8xf32>
    %204 = vector.shape_cast %203 : vector<1x8x8xf32> to vector<8x8xf32>
    %205 = vector.shape_cast %204 : vector<8x8xf32> to vector<1x8x8xf32>
    %206 = vector.broadcast %202 : vector<3x1x8xf32> to vector<3x8x8xf32>
    %207 = vector.broadcast %205 : vector<1x8x8xf32> to vector<3x8x8xf32>
    %208 = arith.mulf %206, %207 : vector<3x8x8xf32>
    %209 = vector.broadcast %199 : vector<3x1x8xf32> to vector<3x8x8xf32>
    %210 = arith.addf %209, %208 : vector<3x8x8xf32>
    %211 = vector.extract_strided_slice %9 {offsets = [0, 1, 0], sizes = [3, 1, 8], strides = [1, 1, 1]} : vector<3x3x8xf32> to vector<3x1x8xf32>
    %212 = vector.shape_cast %211 : vector<3x1x8xf32> to vector<3x8xf32>
    %213 = vector.shape_cast %212 : vector<3x8xf32> to vector<3x1x8xf32>
    %214 = vector.extract_strided_slice %198 {offsets = [1, 0, 0], sizes = [1, 8, 8], strides = [1, 1, 1]} : vector<3x8x8xf32> to vector<1x8x8xf32>
    %215 = vector.shape_cast %214 : vector<1x8x8xf32> to vector<8x8xf32>
    %216 = vector.shape_cast %215 : vector<8x8xf32> to vector<1x8x8xf32>
    %217 = vector.broadcast %213 : vector<3x1x8xf32> to vector<3x8x8xf32>
    %218 = vector.broadcast %216 : vector<1x8x8xf32> to vector<3x8x8xf32>
    %219 = arith.mulf %217, %218 : vector<3x8x8xf32>
    %220 = arith.addf %210, %219 : vector<3x8x8xf32>
    %221 = vector.extract_strided_slice %9 {offsets = [0, 2, 0], sizes = [3, 1, 8], strides = [1, 1, 1]} : vector<3x3x8xf32> to vector<3x1x8xf32>
    %222 = vector.shape_cast %221 : vector<3x1x8xf32> to vector<3x8xf32>
    %223 = vector.shape_cast %222 : vector<3x8xf32> to vector<3x1x8xf32>
    %224 = vector.extract_strided_slice %198 {offsets = [2, 0, 0], sizes = [1, 8, 8], strides = [1, 1, 1]} : vector<3x8x8xf32> to vector<1x8x8xf32>
    %225 = vector.shape_cast %224 : vector<1x8x8xf32> to vector<8x8xf32>
    %226 = vector.shape_cast %225 : vector<8x8xf32> to vector<1x8x8xf32>
    %227 = vector.broadcast %223 : vector<3x1x8xf32> to vector<3x8x8xf32>
    %228 = vector.broadcast %226 : vector<1x8x8xf32> to vector<3x8x8xf32>
    %229 = arith.mulf %227, %228 : vector<3x8x8xf32>
    %230 = arith.addf %220, %229 : vector<3x8x8xf32>
    %231 = vector.shape_cast %19 : vector<3x8xf32> to vector<3x1x8xf32>
    %232 = math.tanh %230 : vector<3x8x8xf32>
    %233 = vector.broadcast %231 : vector<3x1x8xf32> to vector<3x8x8xf32>
    %234 = arith.mulf %233, %232 : vector<3x8x8xf32>
    %235 = arith.addf %230, %234 : vector<3x8x8xf32>
    %236 = vector.shape_cast %15 : vector<3x8xf32> to vector<3x1x8xf32>
    %237 = vector.extract_strided_slice %10 {offsets = [0, 0, 0], sizes = [3, 1, 8], strides = [1, 1, 1]} : vector<3x3x8xf32> to vector<3x1x8xf32>
    %238 = vector.shape_cast %237 : vector<3x1x8xf32> to vector<3x8xf32>
    %239 = vector.shape_cast %238 : vector<3x8xf32> to vector<3x1x8xf32>
    %240 = vector.extract_strided_slice %235 {offsets = [0, 0, 0], sizes = [1, 8, 8], strides = [1, 1, 1]} : vector<3x8x8xf32> to vector<1x8x8xf32>
    %241 = vector.shape_cast %240 : vector<1x8x8xf32> to vector<8x8xf32>
    %242 = vector.shape_cast %241 : vector<8x8xf32> to vector<1x8x8xf32>
    %243 = vector.broadcast %239 : vector<3x1x8xf32> to vector<3x8x8xf32>
    %244 = vector.broadcast %242 : vector<1x8x8xf32> to vector<3x8x8xf32>
    %245 = arith.mulf %243, %244 : vector<3x8x8xf32>
    %246 = vector.broadcast %236 : vector<3x1x8xf32> to vector<3x8x8xf32>
    %247 = arith.addf %246, %245 : vector<3x8x8xf32>
    %248 = vector.extract_strided_slice %10 {offsets = [0, 1, 0], sizes = [3, 1, 8], strides = [1, 1, 1]} : vector<3x3x8xf32> to vector<3x1x8xf32>
    %249 = vector.shape_cast %248 : vector<3x1x8xf32> to vector<3x8xf32>
    %250 = vector.shape_cast %249 : vector<3x8xf32> to vector<3x1x8xf32>
    %251 = vector.extract_strided_slice %235 {offsets = [1, 0, 0], sizes = [1, 8, 8], strides = [1, 1, 1]} : vector<3x8x8xf32> to vector<1x8x8xf32>
    %252 = vector.shape_cast %251 : vector<1x8x8xf32> to vector<8x8xf32>
    %253 = vector.shape_cast %252 : vector<8x8xf32> to vector<1x8x8xf32>
    %254 = vector.broadcast %250 : vector<3x1x8xf32> to vector<3x8x8xf32>
    %255 = vector.broadcast %253 : vector<1x8x8xf32> to vector<3x8x8xf32>
    %256 = arith.mulf %254, %255 : vector<3x8x8xf32>
    %257 = arith.addf %247, %256 : vector<3x8x8xf32>
    %258 = vector.extract_strided_slice %10 {offsets = [0, 2, 0], sizes = [3, 1, 8], strides = [1, 1, 1]} : vector<3x3x8xf32> to vector<3x1x8xf32>
    %259 = vector.shape_cast %258 : vector<3x1x8xf32> to vector<3x8xf32>
    %260 = vector.shape_cast %259 : vector<3x8xf32> to vector<3x1x8xf32>
    %261 = vector.extract_strided_slice %235 {offsets = [2, 0, 0], sizes = [1, 8, 8], strides = [1, 1, 1]} : vector<3x8x8xf32> to vector<1x8x8xf32>
    %262 = vector.shape_cast %261 : vector<1x8x8xf32> to vector<8x8xf32>
    %263 = vector.shape_cast %262 : vector<8x8xf32> to vector<1x8x8xf32>
    %264 = vector.broadcast %260 : vector<3x1x8xf32> to vector<3x8x8xf32>
    %265 = vector.broadcast %263 : vector<1x8x8xf32> to vector<3x8x8xf32>
    %266 = arith.mulf %264, %265 : vector<3x8x8xf32>
    %267 = arith.addf %257, %266 : vector<3x8x8xf32>
    %268 = vector.shape_cast %20 : vector<3x8xf32> to vector<3x1x8xf32>
    %269 = math.tanh %267 : vector<3x8x8xf32>
    %270 = vector.broadcast %268 : vector<3x1x8xf32> to vector<3x8x8xf32>
    %271 = arith.mulf %270, %269 : vector<3x8x8xf32>
    %272 = arith.addf %267, %271 : vector<3x8x8xf32>
    %273 = vector.shape_cast %16 : vector<3x8xf32> to vector<3x1x8xf32>
    %274 = vector.extract_strided_slice %11 {offsets = [0, 0, 0], sizes = [3, 1, 8], strides = [1, 1, 1]} : vector<3x3x8xf32> to vector<3x1x8xf32>
    %275 = vector.shape_cast %274 : vector<3x1x8xf32> to vector<3x8xf32>
    %276 = vector.shape_cast %275 : vector<3x8xf32> to vector<3x1x8xf32>
    %277 = vector.extract_strided_slice %272 {offsets = [0, 0, 0], sizes = [1, 8, 8], strides = [1, 1, 1]} : vector<3x8x8xf32> to vector<1x8x8xf32>
    %278 = vector.shape_cast %277 : vector<1x8x8xf32> to vector<8x8xf32>
    %279 = vector.shape_cast %278 : vector<8x8xf32> to vector<1x8x8xf32>
    %280 = vector.broadcast %276 : vector<3x1x8xf32> to vector<3x8x8xf32>
    %281 = vector.broadcast %279 : vector<1x8x8xf32> to vector<3x8x8xf32>
    %282 = arith.mulf %280, %281 : vector<3x8x8xf32>
    %283 = vector.broadcast %273 : vector<3x1x8xf32> to vector<3x8x8xf32>
    %284 = arith.addf %283, %282 : vector<3x8x8xf32>
    %285 = vector.extract_strided_slice %11 {offsets = [0, 1, 0], sizes = [3, 1, 8], strides = [1, 1, 1]} : vector<3x3x8xf32> to vector<3x1x8xf32>
    %286 = vector.shape_cast %285 : vector<3x1x8xf32> to vector<3x8xf32>
    %287 = vector.shape_cast %286 : vector<3x8xf32> to vector<3x1x8xf32>
    %288 = vector.extract_strided_slice %272 {offsets = [1, 0, 0], sizes = [1, 8, 8], strides = [1, 1, 1]} : vector<3x8x8xf32> to vector<1x8x8xf32>
    %289 = vector.shape_cast %288 : vector<1x8x8xf32> to vector<8x8xf32>
    %290 = vector.shape_cast %289 : vector<8x8xf32> to vector<1x8x8xf32>
    %291 = vector.broadcast %287 : vector<3x1x8xf32> to vector<3x8x8xf32>
    %292 = vector.broadcast %290 : vector<1x8x8xf32> to vector<3x8x8xf32>
    %293 = arith.mulf %291, %292 : vector<3x8x8xf32>
    %294 = arith.addf %284, %293 : vector<3x8x8xf32>
    %295 = vector.extract_strided_slice %11 {offsets = [0, 2, 0], sizes = [3, 1, 8], strides = [1, 1, 1]} : vector<3x3x8xf32> to vector<3x1x8xf32>
    %296 = vector.shape_cast %295 : vector<3x1x8xf32> to vector<3x8xf32>
    %297 = vector.shape_cast %296 : vector<3x8xf32> to vector<3x1x8xf32>
    %298 = vector.extract_strided_slice %272 {offsets = [2, 0, 0], sizes = [1, 8, 8], strides = [1, 1, 1]} : vector<3x8x8xf32> to vector<1x8x8xf32>
    %299 = vector.shape_cast %298 : vector<1x8x8xf32> to vector<8x8xf32>
    %300 = vector.shape_cast %299 : vector<8x8xf32> to vector<1x8x8xf32>
    %301 = vector.broadcast %297 : vector<3x1x8xf32> to vector<3x8x8xf32>
    %302 = vector.broadcast %300 : vector<1x8x8xf32> to vector<3x8x8xf32>
    %303 = arith.mulf %301, %302 : vector<3x8x8xf32>
    %304 = arith.addf %294, %303 : vector<3x8x8xf32>
    %305 = vector.shape_cast %21 : vector<3x8xf32> to vector<3x1x8xf32>
    %306 = math.tanh %304 : vector<3x8x8xf32>
    %307 = vector.broadcast %305 : vector<3x1x8xf32> to vector<3x8x8xf32>
    %308 = arith.mulf %307, %306 : vector<3x8x8xf32>
    %309 = arith.addf %304, %308 : vector<3x8x8xf32>
    %310 = vector.shape_cast %17 : vector<1x8xf32> to vector<1x1x8xf32>
    %311 = vector.extract_strided_slice %12 {offsets = [0, 0, 0], sizes = [1, 1, 8], strides = [1, 1, 1]} : vector<1x3x8xf32> to vector<1x1x8xf32>
    %312 = vector.shape_cast %311 : vector<1x1x8xf32> to vector<1x8xf32>
    %313 = vector.shape_cast %312 : vector<1x8xf32> to vector<1x1x8xf32>
    %314 = vector.extract_strided_slice %309 {offsets = [0, 0, 0], sizes = [1, 8, 8], strides = [1, 1, 1]} : vector<3x8x8xf32> to vector<1x8x8xf32>
    %315 = vector.shape_cast %314 : vector<1x8x8xf32> to vector<8x8xf32>
    %316 = vector.shape_cast %315 : vector<8x8xf32> to vector<1x8x8xf32>
    %317 = vector.broadcast %313 : vector<1x1x8xf32> to vector<1x8x8xf32>
    %318 = arith.mulf %317, %316 : vector<1x8x8xf32>
    %319 = vector.broadcast %310 : vector<1x1x8xf32> to vector<1x8x8xf32>
    %320 = arith.addf %319, %318 : vector<1x8x8xf32>
    %321 = vector.extract_strided_slice %12 {offsets = [0, 1, 0], sizes = [1, 1, 8], strides = [1, 1, 1]} : vector<1x3x8xf32> to vector<1x1x8xf32>
    %322 = vector.shape_cast %321 : vector<1x1x8xf32> to vector<1x8xf32>
    %323 = vector.shape_cast %322 : vector<1x8xf32> to vector<1x1x8xf32>
    %324 = vector.extract_strided_slice %309 {offsets = [1, 0, 0], sizes = [1, 8, 8], strides = [1, 1, 1]} : vector<3x8x8xf32> to vector<1x8x8xf32>
    %325 = vector.shape_cast %324 : vector<1x8x8xf32> to vector<8x8xf32>
    %326 = vector.shape_cast %325 : vector<8x8xf32> to vector<1x8x8xf32>
    %327 = vector.broadcast %323 : vector<1x1x8xf32> to vector<1x8x8xf32>
    %328 = arith.mulf %327, %326 : vector<1x8x8xf32>
    %329 = arith.addf %320, %328 : vector<1x8x8xf32>
    %330 = vector.extract_strided_slice %12 {offsets = [0, 2, 0], sizes = [1, 1, 8], strides = [1, 1, 1]} : vector<1x3x8xf32> to vector<1x1x8xf32>
    %331 = vector.shape_cast %330 : vector<1x1x8xf32> to vector<1x8xf32>
    %332 = vector.shape_cast %331 : vector<1x8xf32> to vector<1x1x8xf32>
    %333 = vector.extract_strided_slice %309 {offsets = [2, 0, 0], sizes = [1, 8, 8], strides = [1, 1, 1]} : vector<3x8x8xf32> to vector<1x8x8xf32>
    %334 = vector.shape_cast %333 : vector<1x8x8xf32> to vector<8x8xf32>
    %335 = vector.shape_cast %334 : vector<8x8xf32> to vector<1x8x8xf32>
    %336 = vector.broadcast %332 : vector<1x1x8xf32> to vector<1x8x8xf32>
    %337 = arith.mulf %336, %335 : vector<1x8x8xf32>
    %338 = arith.addf %329, %337 : vector<1x8x8xf32>
    %339 = vector.shape_cast %338 : vector<1x8x8xf32> to vector<8x8xf32>
    %340 = arith.addf %180, %339 : vector<8x8xf32>
    %cst_39 = arith.constant 0.000000e+00 : f32
    %341 = vector.broadcast %cst_39 : f32 to vector<8x8xf32>
    %342 = arith.cmpf ogt, %340, %341 : vector<8x8xf32>
    %cst_40 = arith.constant 0.000000e+00 : f32
    %343 = vector.broadcast %cst_40 : f32 to vector<8x8xf32>
    %344 = arith.cmpf olt, %340, %343 : vector<8x8xf32>
    %cst_41 = arith.constant 1.000000e+00 : f32
    %cst_42 = arith.constant 0.000000e+00 : f32
    %345 = vector.broadcast %cst_41 : f32 to vector<8x8xf32>
    %346 = vector.broadcast %cst_42 : f32 to vector<8x8xf32>
    %347 = arith.select %344, %345, %346 : vector<8x8xi1>, vector<8x8xf32>
    %cst_43 = arith.constant -1.000000e+00 : f32
    %348 = vector.broadcast %cst_43 : f32 to vector<8x8xf32>
    %349 = arith.select %342, %348, %347 : vector<8x8xi1>, vector<8x8xf32>
    %350 = arith.mulf %349, %339 : vector<8x8xf32>
    %cst_44 = arith.constant 0.000000e+00 : f32
    %351 = vector.broadcast %cst_44 : f32 to vector<8x8xf32>
    %352 = arith.subf %351, %350 : vector<8x8xf32>
    %353 = math.exp %352 : vector<8x8xf32>
    %cst_45 = arith.constant 1.000000e+00 : f32
    %354 = vector.broadcast %cst_45 : f32 to vector<8x8xf32>
    %355 = arith.addf %354, %353 : vector<8x8xf32>
    %356 = tpu.reciprocal %355 {approx = true} : vector<8x8xf32> -> vector<8x8xf32>
    %357 = arith.mulf %349, %180 : vector<8x8xf32>
    %cst_46 = arith.constant 0.000000e+00 : f32
    %358 = vector.broadcast %cst_46 : f32 to vector<8x8xf32>
    %359 = arith.subf %358, %357 : vector<8x8xf32>
    %360 = math.exp %359 : vector<8x8xf32>
    %cst_47 = arith.constant 1.000000e+00 : f32
    %361 = vector.broadcast %cst_47 : f32 to vector<8x8xf32>
    %362 = arith.addf %361, %360 : vector<8x8xf32>
    %363 = tpu.reciprocal %362 {approx = true} : vector<8x8xf32> -> vector<8x8xf32>
    %364 = arith.subf %356, %363 : vector<8x8xf32>
    %365 = math.absf %364 : vector<8x8xf32>
    %cst_48 = arith.constant 9.99999971E-10 : f32
    %366 = vector.broadcast %cst_48 : f32 to vector<8x8xf32>
    %367 = arith.maximumf %365, %366 : vector<8x8xf32>
    %c0_49 = arith.constant 0 : index
    %c0_50 = arith.constant 0 : index
    %368 = vector.load %arg18[%c0_49, %c0_50] : memref<8x8xf32, #tpu.memory_space<vmem>>, vector<8x8xf32>
    tpu.vector_store %arg18[%c0_49, %c0_50], %367 {strides = array<i32>} : memref<8x8xf32, #tpu.memory_space<vmem>>, vector<8x8xf32>,
    return
  }
  func.func @transform_0(%arg0: i32) -> (i32, i32) {
    %c0_i32 = arith.constant 0 : i32
    %c0_i32_0 = arith.constant 0 : i32
    return %arg0, %c0_i32 : i32, i32
  }
  func.func @transform_1(%arg0: i32) -> (i32, i32) {
    %c0_i32 = arith.constant 0 : i32
    %c0_i32_0 = arith.constant 0 : i32
    %c0_i32_1 = arith.constant 0 : i32
    return %c0_i32, %c0_i32_0 : i32, i32
  }
  func.func @transform_2(%arg0: i32) -> (i32, i32, i32) {
    %c0_i32 = arith.constant 0 : i32
    %c0_i32_0 = arith.constant 0 : i32
    %c0_i32_1 = arith.constant 0 : i32
    %c0_i32_2 = arith.constant 0 : i32
    return %c0_i32, %c0_i32_0, %c0_i32_1 : i32, i32, i32
  }
  func.func @transform_3(%arg0: i32) -> (i32, i32, i32) {
    %c0_i32 = arith.constant 0 : i32
    %c0_i32_0 = arith.constant 0 : i32
    %c0_i32_1 = arith.constant 0 : i32
    %c0_i32_2 = arith.constant 0 : i32
    return %c0_i32, %c0_i32_0, %c0_i32_1 : i32, i32, i32
  }
  func.func @transform_4(%arg0: i32) -> (i32, i32, i32) {
    %c0_i32 = arith.constant 0 : i32
    %c0_i32_0 = arith.constant 0 : i32
    %c0_i32_1 = arith.constant 0 : i32
    %c0_i32_2 = arith.constant 0 : i32
    return %c0_i32, %c0_i32_0, %c0_i32_1 : i32, i32, i32
  }
  func.func @transform_5(%arg0: i32) -> (i32, i32, i32) {
    %c0_i32 = arith.constant 0 : i32
    %c0_i32_0 = arith.constant 0 : i32
    %c0_i32_1 = arith.constant 0 : i32
    %c0_i32_2 = arith.constant 0 : i32
    return %c0_i32, %c0_i32_0, %c0_i32_1 : i32, i32, i32
  }
  func.func @transform_6(%arg0: i32) -> (i32, i32, i32) {
    %c0_i32 = arith.constant 0 : i32
    %c0_i32_0 = arith.constant 0 : i32
    %c0_i32_1 = arith.constant 0 : i32
    %c0_i32_2 = arith.constant 0 : i32
    return %c0_i32, %c0_i32_0, %c0_i32_1 : i32, i32, i32
  }
  func.func @transform_7(%arg0: i32) -> (i32, i32) {
    %c0_i32 = arith.constant 0 : i32
    %c0_i32_0 = arith.constant 0 : i32
    %c0_i32_1 = arith.constant 0 : i32
    return %c0_i32, %c0_i32_0 : i32, i32
  }
  func.func @transform_8(%arg0: i32) -> (i32, i32) {
    %c0_i32 = arith.constant 0 : i32
    %c0_i32_0 = arith.constant 0 : i32
    %c0_i32_1 = arith.constant 0 : i32
    return %c0_i32, %c0_i32_0 : i32, i32
  }
  func.func @transform_9(%arg0: i32) -> (i32, i32) {
    %c0_i32 = arith.constant 0 : i32
    %c0_i32_0 = arith.constant 0 : i32
    %c0_i32_1 = arith.constant 0 : i32
    return %c0_i32, %c0_i32_0 : i32, i32
  }
  func.func @transform_10(%arg0: i32) -> (i32, i32) {
    %c0_i32 = arith.constant 0 : i32
    %c0_i32_0 = arith.constant 0 : i32
    %c0_i32_1 = arith.constant 0 : i32
    return %c0_i32, %c0_i32_0 : i32, i32
  }
  func.func @transform_11(%arg0: i32) -> (i32, i32) {
    %c0_i32 = arith.constant 0 : i32
    %c0_i32_0 = arith.constant 0 : i32
    %c0_i32_1 = arith.constant 0 : i32
    return %c0_i32, %c0_i32_0 : i32, i32
  }
  func.func @transform_12(%arg0: i32) -> (i32, i32) {
    %c0_i32 = arith.constant 0 : i32
    %c0_i32_0 = arith.constant 0 : i32
    %c0_i32_1 = arith.constant 0 : i32
    return %c0_i32, %c0_i32_0 : i32, i32
  }
  func.func @transform_13(%arg0: i32) -> (i32, i32) {
    %c0_i32 = arith.constant 0 : i32
    %c0_i32_0 = arith.constant 0 : i32
    %c0_i32_1 = arith.constant 0 : i32
    return %c0_i32, %c0_i32_0 : i32, i32
  }
  func.func @transform_14(%arg0: i32) -> (i32, i32) {
    %c0_i32 = arith.constant 0 : i32
    %c0_i32_0 = arith.constant 0 : i32
    %c0_i32_1 = arith.constant 0 : i32
    return %c0_i32, %c0_i32_0 : i32, i32
  }
  func.func @transform_15(%arg0: i32) -> (i32, i32) {
    %c0_i32 = arith.constant 0 : i32
    %c0_i32_0 = arith.constant 0 : i32
    %c0_i32_1 = arith.constant 0 : i32
    return %c0_i32, %c0_i32_0 : i32, i32
  }
  func.func @transform_16(%arg0: i32) -> (i32, i32) {
    %c0_i32 = arith.constant 0 : i32
    %c0_i32_0 = arith.constant 0 : i32
    return %arg0, %c0_i32 : i32, i32
  }
  func.func @transform_17(%arg0: i32) -> (i32, i32) {
    %c0_i32 = arith.constant 0 : i32
    %c0_i32_0 = arith.constant 0 : i32
    return %arg0, %c0_i32 : i32, i32
  }
}

module attributes {stable_mosaic.version = 11 : i64} {
  func.func @_mm_bias_act_kernel(%arg0: i32, %arg1: memref<16x200xbf16, #tpu.memory_space<vmem>>, %arg2: memref<200x8xbf16, #tpu.memory_space<vmem>>, %arg3: memref<1x8xf32, #tpu.memory_space<vmem>>, %arg4: memref<16x8xf32, #tpu.memory_space<vmem>>) attributes {dimension_semantics = [#tpu.dimension_semantics<parallel>], iteration_bounds = array<i64: 1>, scalar_prefetch = 0 : i64, scratch_operands = 0 : i64, tpu.core_type = #tpu.core_type<tc>, window_params = [{transform_indices = @transform_0, window_bounds = array<i64: 16, 200>}, {pipeline_mode = #tpu.pipeline_mode<synchronous>, transform_indices = @transform_1, window_bounds = array<i64: 200, 8>}, {pipeline_mode = #tpu.pipeline_mode<synchronous>, transform_indices = @transform_2, window_bounds = array<i64: 1, 8>}, {transform_indices = @transform_3, window_bounds = array<i64: 16, 8>}]} {
    %c0 = arith.constant 0 : index
    %c0_0 = arith.constant 0 : index
    %0 = vector.load %arg1[%c0, %c0_0] : memref<16x200xbf16, #tpu.memory_space<vmem>>, vector<16x200xbf16>
    %c0_1 = arith.constant 0 : index
    %c0_2 = arith.constant 0 : index
    %1 = vector.load %arg2[%c0_1, %c0_2] : memref<200x8xbf16, #tpu.memory_space<vmem>>, vector<200x8xbf16>
    %cst = arith.constant dense<0.000000e+00> : vector<16x8xf32>
    %2 = tpu.matmul %0, %1, %cst {dimension_numbers = #tpu.dot_dimension_numbers<[1], [0], [0], [1], [0, 0, 1, 1], [], []>} : vector<16x200xbf16>, vector<200x8xbf16>, vector<16x8xf32> -> vector<16x8xf32>
    %c0_3 = arith.constant 0 : index
    %c0_4 = arith.constant 0 : index
    %3 = vector.load %arg3[%c0_3, %c0_4] : memref<1x8xf32, #tpu.memory_space<vmem>>, vector<1x8xf32>
    %4 = vector.broadcast %3 : vector<1x8xf32> to vector<16x8xf32>
    %5 = arith.addf %2, %4 : vector<16x8xf32>
    %c0_5 = arith.constant 0 : index
    %c0_6 = arith.constant 0 : index
    %6 = vector.load %arg4[%c0_5, %c0_6] : memref<16x8xf32, #tpu.memory_space<vmem>>, vector<16x8xf32>
    tpu.vector_store %arg4[%c0_5, %c0_6], %5 {strides = array<i32>} : memref<16x8xf32, #tpu.memory_space<vmem>>, vector<16x8xf32>,
    return
  }
  func.func @transform_0(%arg0: i32) -> (i32, i32) {
    %c0_i32 = arith.constant 0 : i32
    %c0_i32_0 = arith.constant 0 : i32
    return %arg0, %c0_i32 : i32, i32
  }
  func.func @transform_1(%arg0: i32) -> (i32, i32) {
    %c0_i32 = arith.constant 0 : i32
    %c0_i32_0 = arith.constant 0 : i32
    %c0_i32_1 = arith.constant 0 : i32
    return %c0_i32, %c0_i32_0 : i32, i32
  }
  func.func @transform_2(%arg0: i32) -> (i32, i32) {
    %c0_i32 = arith.constant 0 : i32
    %c0_i32_0 = arith.constant 0 : i32
    %c0_i32_1 = arith.constant 0 : i32
    return %c0_i32, %c0_i32_0 : i32, i32
  }
  func.func @transform_3(%arg0: i32) -> (i32, i32) {
    %c0_i32 = arith.constant 0 : i32
    %c0_i32_0 = arith.constant 0 : i32
    return %arg0, %c0_i32 : i32, i32
  }
}

module attributes {stable_mosaic.version = 11 : i64} {
  func.func @_mm_bias_act_kernel(%arg0: i32, %arg1: memref<16x72xbf16, #tpu.memory_space<vmem>>, %arg2: memref<72x32xbf16, #tpu.memory_space<vmem>>, %arg3: memref<1x32xf32, #tpu.memory_space<vmem>>, %arg4: memref<16x32xf32, #tpu.memory_space<vmem>>) attributes {dimension_semantics = [#tpu.dimension_semantics<parallel>], iteration_bounds = array<i64: 1>, scalar_prefetch = 0 : i64, scratch_operands = 0 : i64, tpu.core_type = #tpu.core_type<tc>, window_params = [{transform_indices = @transform_0, window_bounds = array<i64: 16, 72>}, {pipeline_mode = #tpu.pipeline_mode<synchronous>, transform_indices = @transform_1, window_bounds = array<i64: 72, 32>}, {pipeline_mode = #tpu.pipeline_mode<synchronous>, transform_indices = @transform_2, window_bounds = array<i64: 1, 32>}, {transform_indices = @transform_3, window_bounds = array<i64: 16, 32>}]} {
    %c0 = arith.constant 0 : index
    %c0_0 = arith.constant 0 : index
    %0 = vector.load %arg1[%c0, %c0_0] : memref<16x72xbf16, #tpu.memory_space<vmem>>, vector<16x72xbf16>
    %c0_1 = arith.constant 0 : index
    %c0_2 = arith.constant 0 : index
    %1 = vector.load %arg2[%c0_1, %c0_2] : memref<72x32xbf16, #tpu.memory_space<vmem>>, vector<72x32xbf16>
    %cst = arith.constant dense<0.000000e+00> : vector<16x32xf32>
    %2 = tpu.matmul %0, %1, %cst {dimension_numbers = #tpu.dot_dimension_numbers<[1], [0], [0], [1], [0, 0, 1, 1], [], []>} : vector<16x72xbf16>, vector<72x32xbf16>, vector<16x32xf32> -> vector<16x32xf32>
    %c0_3 = arith.constant 0 : index
    %c0_4 = arith.constant 0 : index
    %3 = vector.load %arg3[%c0_3, %c0_4] : memref<1x32xf32, #tpu.memory_space<vmem>>, vector<1x32xf32>
    %4 = vector.broadcast %3 : vector<1x32xf32> to vector<16x32xf32>
    %5 = arith.addf %2, %4 : vector<16x32xf32>
    %cst_5 = arith.constant 0.000000e+00 : f32
    %6 = vector.broadcast %cst_5 : f32 to vector<16x32xf32>
    %7 = arith.maximumf %5, %6 : vector<16x32xf32>
    %c0_6 = arith.constant 0 : index
    %c0_7 = arith.constant 0 : index
    %8 = vector.load %arg4[%c0_6, %c0_7] : memref<16x32xf32, #tpu.memory_space<vmem>>, vector<16x32xf32>
    tpu.vector_store %arg4[%c0_6, %c0_7], %7 {strides = array<i32>} : memref<16x32xf32, #tpu.memory_space<vmem>>, vector<16x32xf32>,
    return
  }
  func.func @transform_0(%arg0: i32) -> (i32, i32) {
    %c0_i32 = arith.constant 0 : i32
    %c0_i32_0 = arith.constant 0 : i32
    return %arg0, %c0_i32 : i32, i32
  }
  func.func @transform_1(%arg0: i32) -> (i32, i32) {
    %c0_i32 = arith.constant 0 : i32
    %c0_i32_0 = arith.constant 0 : i32
    %c0_i32_1 = arith.constant 0 : i32
    return %c0_i32, %c0_i32_0 : i32, i32
  }
  func.func @transform_2(%arg0: i32) -> (i32, i32) {
    %c0_i32 = arith.constant 0 : i32
    %c0_i32_0 = arith.constant 0 : i32
    %c0_i32_1 = arith.constant 0 : i32
    return %c0_i32, %c0_i32_0 : i32, i32
  }
  func.func @transform_3(%arg0: i32) -> (i32, i32) {
    %c0_i32 = arith.constant 0 : i32
    %c0_i32_0 = arith.constant 0 : i32
    return %arg0, %c0_i32 : i32, i32
  }
}

module attributes {stable_mosaic.version = 11 : i64} {
  func.func @_gaussian_cond_kernel(%arg0: i32, %arg1: memref<16x16xf32, #tpu.memory_space<vmem>>, %arg2: memref<16x16xf32, #tpu.memory_space<vmem>>, %arg3: memref<16x16xf32, #tpu.memory_space<vmem>>, %arg4: memref<16x16xf32, #tpu.memory_space<vmem>>) attributes {dimension_semantics = [#tpu.dimension_semantics<parallel>], iteration_bounds = array<i64: 1>, scalar_prefetch = 0 : i64, scratch_operands = 0 : i64, tpu.core_type = #tpu.core_type<tc>, window_params = [{transform_indices = @transform_0, window_bounds = array<i64: 16, 16>}, {transform_indices = @transform_1, window_bounds = array<i64: 16, 16>}, {transform_indices = @transform_2, window_bounds = array<i64: 16, 16>}, {transform_indices = @transform_3, window_bounds = array<i64: 16, 16>}]} {
    %c0 = arith.constant 0 : index
    %c0_0 = arith.constant 0 : index
    %0 = vector.load %arg1[%c0, %c0_0] : memref<16x16xf32, #tpu.memory_space<vmem>>, vector<16x16xf32>
    %c0_1 = arith.constant 0 : index
    %c0_2 = arith.constant 0 : index
    %1 = vector.load %arg2[%c0_1, %c0_2] : memref<16x16xf32, #tpu.memory_space<vmem>>, vector<16x16xf32>
    %cst = arith.constant 1.100000e-01 : f32
    %2 = vector.broadcast %cst : f32 to vector<16x16xf32>
    %3 = arith.maximumf %1, %2 : vector<16x16xf32>
    %4 = math.roundeven %0 : vector<16x16xf32>
    %c0_3 = arith.constant 0 : index
    %c0_4 = arith.constant 0 : index
    %5 = vector.load %arg3[%c0_3, %c0_4] : memref<16x16xf32, #tpu.memory_space<vmem>>, vector<16x16xf32>
    tpu.vector_store %arg3[%c0_3, %c0_4], %4 {strides = array<i32>} : memref<16x16xf32, #tpu.memory_space<vmem>>, vector<16x16xf32>,
    %6 = math.absf %4 : vector<16x16xf32>
    %7 = tpu.reciprocal %3 {approx = true} : vector<16x16xf32> -> vector<16x16xf32>
    %cst_5 = arith.constant 5.000000e-01 : f32
    %8 = vector.broadcast %cst_5 : f32 to vector<16x16xf32>
    %9 = arith.subf %8, %6 : vector<16x16xf32>
    %10 = arith.mulf %9, %7 : vector<16x16xf32>
    %cst_6 = arith.constant 0.000000e+00 : f32
    %11 = vector.broadcast %cst_6 : f32 to vector<16x16xf32>
    %12 = arith.subf %11, %10 : vector<16x16xf32>
    %cst_7 = arith.constant 0.707106769 : f32
    %13 = vector.broadcast %cst_7 : f32 to vector<16x16xf32>
    %14 = arith.mulf %12, %13 : vector<16x16xf32>
    %15 = math.absf %14 : vector<16x16xf32>
    %cst_8 = arith.constant 0.327591091 : f32
    %16 = vector.broadcast %cst_8 : f32 to vector<16x16xf32>
    %17 = arith.mulf %16, %15 : vector<16x16xf32>
    %cst_9 = arith.constant 1.000000e+00 : f32
    %18 = vector.broadcast %cst_9 : f32 to vector<16x16xf32>
    %19 = arith.addf %18, %17 : vector<16x16xf32>
    %20 = tpu.reciprocal %19 {approx = true} : vector<16x16xf32> -> vector<16x16xf32>
    %cst_10 = arith.constant 1.06140542 : f32
    %21 = vector.broadcast %cst_10 : f32 to vector<16x16xf32>
    %22 = arith.mulf %20, %21 : vector<16x16xf32>
    %cst_11 = arith.constant -1.45315206 : f32
    %23 = vector.broadcast %cst_11 : f32 to vector<16x16xf32>
    %24 = arith.addf %23, %22 : vector<16x16xf32>
    %25 = arith.mulf %20, %24 : vector<16x16xf32>
    %cst_12 = arith.constant 1.42141378 : f32
    %26 = vector.broadcast %cst_12 : f32 to vector<16x16xf32>
    %27 = arith.addf %26, %25 : vector<16x16xf32>
    %28 = arith.mulf %20, %27 : vector<16x16xf32>
    %cst_13 = arith.constant -0.284496725 : f32
    %29 = vector.broadcast %cst_13 : f32 to vector<16x16xf32>
    %30 = arith.addf %29, %28 : vector<16x16xf32>
    %31 = arith.mulf %20, %30 : vector<16x16xf32>
    %cst_14 = arith.constant 0.254829586 : f32
    %32 = vector.broadcast %cst_14 : f32 to vector<16x16xf32>
    %33 = arith.addf %32, %31 : vector<16x16xf32>
    %34 = arith.mulf %20, %33 : vector<16x16xf32>
    %cst_15 = arith.constant 0.000000e+00 : f32
    %35 = vector.broadcast %cst_15 : f32 to vector<16x16xf32>
    %36 = arith.subf %35, %15 : vector<16x16xf32>
    %37 = arith.mulf %36, %15 : vector<16x16xf32>
    %38 = math.exp %37 : vector<16x16xf32>
    %39 = arith.mulf %34, %38 : vector<16x16xf32>
    %cst_16 = arith.constant 1.000000e+00 : f32
    %40 = vector.broadcast %cst_16 : f32 to vector<16x16xf32>
    %41 = arith.subf %40, %39 : vector<16x16xf32>
    %cst_17 = arith.constant 0.000000e+00 : f32
    %42 = vector.broadcast %cst_17 : f32 to vector<16x16xf32>
    %43 = arith.cmpf oge, %14, %42 : vector<16x16xf32>
    %cst_18 = arith.constant 0.000000e+00 : f32
    %44 = vector.broadcast %cst_18 : f32 to vector<16x16xf32>
    %45 = arith.subf %44, %41 : vector<16x16xf32>
    %46 = arith.select %43, %41, %45 : vector<16x16xi1>, vector<16x16xf32>
    %cst_19 = arith.constant 1.000000e+00 : f32
    %47 = vector.broadcast %cst_19 : f32 to vector<16x16xf32>
    %48 = arith.subf %47, %46 : vector<16x16xf32>
    %cst_20 = arith.constant 5.000000e-01 : f32
    %49 = vector.broadcast %cst_20 : f32 to vector<16x16xf32>
    %50 = arith.mulf %49, %48 : vector<16x16xf32>
    %cst_21 = arith.constant -5.000000e-01 : f32
    %51 = vector.broadcast %cst_21 : f32 to vector<16x16xf32>
    %52 = arith.subf %51, %6 : vector<16x16xf32>
    %53 = arith.mulf %52, %7 : vector<16x16xf32>
    %cst_22 = arith.constant 0.000000e+00 : f32
    %54 = vector.broadcast %cst_22 : f32 to vector<16x16xf32>
    %55 = arith.subf %54, %53 : vector<16x16xf32>
    %cst_23 = arith.constant 0.707106769 : f32
    %56 = vector.broadcast %cst_23 : f32 to vector<16x16xf32>
    %57 = arith.mulf %55, %56 : vector<16x16xf32>
    %58 = math.absf %57 : vector<16x16xf32>
    %cst_24 = arith.constant 0.327591091 : f32
    %59 = vector.broadcast %cst_24 : f32 to vector<16x16xf32>
    %60 = arith.mulf %59, %58 : vector<16x16xf32>
    %cst_25 = arith.constant 1.000000e+00 : f32
    %61 = vector.broadcast %cst_25 : f32 to vector<16x16xf32>
    %62 = arith.addf %61, %60 : vector<16x16xf32>
    %63 = tpu.reciprocal %62 {approx = true} : vector<16x16xf32> -> vector<16x16xf32>
    %cst_26 = arith.constant 1.06140542 : f32
    %64 = vector.broadcast %cst_26 : f32 to vector<16x16xf32>
    %65 = arith.mulf %63, %64 : vector<16x16xf32>
    %cst_27 = arith.constant -1.45315206 : f32
    %66 = vector.broadcast %cst_27 : f32 to vector<16x16xf32>
    %67 = arith.addf %66, %65 : vector<16x16xf32>
    %68 = arith.mulf %63, %67 : vector<16x16xf32>
    %cst_28 = arith.constant 1.42141378 : f32
    %69 = vector.broadcast %cst_28 : f32 to vector<16x16xf32>
    %70 = arith.addf %69, %68 : vector<16x16xf32>
    %71 = arith.mulf %63, %70 : vector<16x16xf32>
    %cst_29 = arith.constant -0.284496725 : f32
    %72 = vector.broadcast %cst_29 : f32 to vector<16x16xf32>
    %73 = arith.addf %72, %71 : vector<16x16xf32>
    %74 = arith.mulf %63, %73 : vector<16x16xf32>
    %cst_30 = arith.constant 0.254829586 : f32
    %75 = vector.broadcast %cst_30 : f32 to vector<16x16xf32>
    %76 = arith.addf %75, %74 : vector<16x16xf32>
    %77 = arith.mulf %63, %76 : vector<16x16xf32>
    %cst_31 = arith.constant 0.000000e+00 : f32
    %78 = vector.broadcast %cst_31 : f32 to vector<16x16xf32>
    %79 = arith.subf %78, %58 : vector<16x16xf32>
    %80 = arith.mulf %79, %58 : vector<16x16xf32>
    %81 = math.exp %80 : vector<16x16xf32>
    %82 = arith.mulf %77, %81 : vector<16x16xf32>
    %cst_32 = arith.constant 1.000000e+00 : f32
    %83 = vector.broadcast %cst_32 : f32 to vector<16x16xf32>
    %84 = arith.subf %83, %82 : vector<16x16xf32>
    %cst_33 = arith.constant 0.000000e+00 : f32
    %85 = vector.broadcast %cst_33 : f32 to vector<16x16xf32>
    %86 = arith.cmpf oge, %57, %85 : vector<16x16xf32>
    %cst_34 = arith.constant 0.000000e+00 : f32
    %87 = vector.broadcast %cst_34 : f32 to vector<16x16xf32>
    %88 = arith.subf %87, %84 : vector<16x16xf32>
    %89 = arith.select %86, %84, %88 : vector<16x16xi1>, vector<16x16xf32>
    %cst_35 = arith.constant 1.000000e+00 : f32
    %90 = vector.broadcast %cst_35 : f32 to vector<16x16xf32>
    %91 = arith.subf %90, %89 : vector<16x16xf32>
    %cst_36 = arith.constant 5.000000e-01 : f32
    %92 = vector.broadcast %cst_36 : f32 to vector<16x16xf32>
    %93 = arith.mulf %92, %91 : vector<16x16xf32>
    %94 = arith.subf %50, %93 : vector<16x16xf32>
    %cst_37 = arith.constant 9.99999971E-10 : f32
    %95 = vector.broadcast %cst_37 : f32 to vector<16x16xf32>
    %96 = arith.maximumf %94, %95 : vector<16x16xf32>
    %c0_38 = arith.constant 0 : index
    %c0_39 = arith.constant 0 : index
    %97 = vector.load %arg4[%c0_38, %c0_39] : memref<16x16xf32, #tpu.memory_space<vmem>>, vector<16x16xf32>
    tpu.vector_store %arg4[%c0_38, %c0_39], %96 {strides = array<i32>} : memref<16x16xf32, #tpu.memory_space<vmem>>, vector<16x16xf32>,
    return
  }
  func.func @transform_0(%arg0: i32) -> (i32, i32) {
    %c0_i32 = arith.constant 0 : i32
    %c0_i32_0 = arith.constant 0 : i32
    return %arg0, %c0_i32 : i32, i32
  }
  func.func @transform_1(%arg0: i32) -> (i32, i32) {
    %c0_i32 = arith.constant 0 : i32
    %c0_i32_0 = arith.constant 0 : i32
    return %arg0, %c0_i32 : i32, i32
  }
  func.func @transform_2(%arg0: i32) -> (i32, i32) {
    %c0_i32 = arith.constant 0 : i32
    %c0_i32_0 = arith.constant 0 : i32
    return %arg0, %c0_i32 : i32, i32
  }
  func.func @transform_3(%arg0: i32) -> (i32, i32) {
    %c0_i32 = arith.constant 0 : i32
    %c0_i32_0 = arith.constant 0 : i32
    return %arg0, %c0_i32 : i32, i32
  }
}

module attributes {stable_mosaic.version = 11 : i64} {
  func.func @_mm_bias_act_kernel(%arg0: i32, %arg1: memref<16x72xbf16, #tpu.memory_space<vmem>>, %arg2: memref<72x16xbf16, #tpu.memory_space<vmem>>, %arg3: memref<1x16xf32, #tpu.memory_space<vmem>>, %arg4: memref<16x16xf32, #tpu.memory_space<vmem>>) attributes {dimension_semantics = [#tpu.dimension_semantics<parallel>], iteration_bounds = array<i64: 1>, scalar_prefetch = 0 : i64, scratch_operands = 0 : i64, tpu.core_type = #tpu.core_type<tc>, window_params = [{transform_indices = @transform_0, window_bounds = array<i64: 16, 72>}, {pipeline_mode = #tpu.pipeline_mode<synchronous>, transform_indices = @transform_1, window_bounds = array<i64: 72, 16>}, {pipeline_mode = #tpu.pipeline_mode<synchronous>, transform_indices = @transform_2, window_bounds = array<i64: 1, 16>}, {transform_indices = @transform_3, window_bounds = array<i64: 16, 16>}]} {
    %c0 = arith.constant 0 : index
    %c0_0 = arith.constant 0 : index
    %0 = vector.load %arg1[%c0, %c0_0] : memref<16x72xbf16, #tpu.memory_space<vmem>>, vector<16x72xbf16>
    %c0_1 = arith.constant 0 : index
    %c0_2 = arith.constant 0 : index
    %1 = vector.load %arg2[%c0_1, %c0_2] : memref<72x16xbf16, #tpu.memory_space<vmem>>, vector<72x16xbf16>
    %cst = arith.constant dense<0.000000e+00> : vector<16x16xf32>
    %2 = tpu.matmul %0, %1, %cst {dimension_numbers = #tpu.dot_dimension_numbers<[1], [0], [0], [1], [0, 0, 1, 1], [], []>} : vector<16x72xbf16>, vector<72x16xbf16>, vector<16x16xf32> -> vector<16x16xf32>
    %c0_3 = arith.constant 0 : index
    %c0_4 = arith.constant 0 : index
    %3 = vector.load %arg3[%c0_3, %c0_4] : memref<1x16xf32, #tpu.memory_space<vmem>>, vector<1x16xf32>
    %4 = vector.broadcast %3 : vector<1x16xf32> to vector<16x16xf32>
    %5 = arith.addf %2, %4 : vector<16x16xf32>
    %cst_5 = arith.constant 0.000000e+00 : f32
    %6 = vector.broadcast %cst_5 : f32 to vector<16x16xf32>
    %7 = arith.maximumf %5, %6 : vector<16x16xf32>
    %c0_6 = arith.constant 0 : index
    %c0_7 = arith.constant 0 : index
    %8 = vector.load %arg4[%c0_6, %c0_7] : memref<16x16xf32, #tpu.memory_space<vmem>>, vector<16x16xf32>
    tpu.vector_store %arg4[%c0_6, %c0_7], %7 {strides = array<i32>} : memref<16x16xf32, #tpu.memory_space<vmem>>, vector<16x16xf32>,
    return
  }
  func.func @transform_0(%arg0: i32) -> (i32, i32) {
    %c0_i32 = arith.constant 0 : i32
    %c0_i32_0 = arith.constant 0 : i32
    return %arg0, %c0_i32 : i32, i32
  }
  func.func @transform_1(%arg0: i32) -> (i32, i32) {
    %c0_i32 = arith.constant 0 : i32
    %c0_i32_0 = arith.constant 0 : i32
    %c0_i32_1 = arith.constant 0 : i32
    return %c0_i32, %c0_i32_0 : i32, i32
  }
  func.func @transform_2(%arg0: i32) -> (i32, i32) {
    %c0_i32 = arith.constant 0 : i32
    %c0_i32_0 = arith.constant 0 : i32
    %c0_i32_1 = arith.constant 0 : i32
    return %c0_i32, %c0_i32_0 : i32, i32
  }
  func.func @transform_3(%arg0: i32) -> (i32, i32) {
    %c0_i32 = arith.constant 0 : i32
    %c0_i32_0 = arith.constant 0 : i32
    return %arg0, %c0_i32 : i32, i32
  }
}

module attributes {stable_mosaic.version = 11 : i64} {
  func.func @_mm_bias_gdn_kernel(%arg0: i32, %arg1: memref<16x144xbf16, #tpu.memory_space<vmem>>, %arg2: memref<144x32xbf16, #tpu.memory_space<vmem>>, %arg3: memref<1x32xf32, #tpu.memory_space<vmem>>, %arg4: memref<32x32xf32, #tpu.memory_space<vmem>>, %arg5: memref<1x32xf32, #tpu.memory_space<vmem>>, %arg6: memref<16x32xf32, #tpu.memory_space<vmem>>) attributes {dimension_semantics = [#tpu.dimension_semantics<parallel>], iteration_bounds = array<i64: 1>, scalar_prefetch = 0 : i64, scratch_operands = 0 : i64, tpu.core_type = #tpu.core_type<tc>, window_params = [{transform_indices = @transform_0, window_bounds = array<i64: 16, 144>}, {pipeline_mode = #tpu.pipeline_mode<synchronous>, transform_indices = @transform_1, window_bounds = array<i64: 144, 32>}, {pipeline_mode = #tpu.pipeline_mode<synchronous>, transform_indices = @transform_2, window_bounds = array<i64: 1, 32>}, {pipeline_mode = #tpu.pipeline_mode<synchronous>, transform_indices = @transform_3, window_bounds = array<i64: 32, 32>}, {pipeline_mode = #tpu.pipeline_mode<synchronous>, transform_indices = @transform_4, window_bounds = array<i64: 1, 32>}, {transform_indices = @transform_5, window_bounds = array<i64: 16, 32>}]} {
    %c0 = arith.constant 0 : index
    %c0_0 = arith.constant 0 : index
    %0 = vector.load %arg1[%c0, %c0_0] : memref<16x144xbf16, #tpu.memory_space<vmem>>, vector<16x144xbf16>
    %c0_1 = arith.constant 0 : index
    %c0_2 = arith.constant 0 : index
    %1 = vector.load %arg2[%c0_1, %c0_2] : memref<144x32xbf16, #tpu.memory_space<vmem>>, vector<144x32xbf16>
    %cst = arith.constant dense<0.000000e+00> : vector<16x32xf32>
    %2 = tpu.matmul %0, %1, %cst {dimension_numbers = #tpu.dot_dimension_numbers<[1], [0], [0], [1], [0, 0, 1, 1], [], []>} : vector<16x144xbf16>, vector<144x32xbf16>, vector<16x32xf32> -> vector<16x32xf32>
    %c0_3 = arith.constant 0 : index
    %c0_4 = arith.constant 0 : index
    %3 = vector.load %arg3[%c0_3, %c0_4] : memref<1x32xf32, #tpu.memory_space<vmem>>, vector<1x32xf32>
    %4 = vector.broadcast %3 : vector<1x32xf32> to vector<16x32xf32>
    %5 = arith.addf %2, %4 : vector<16x32xf32>
    %6 = arith.mulf %5, %5 : vector<16x32xf32>
    %c0_5 = arith.constant 0 : index
    %c0_6 = arith.constant 0 : index
    %7 = vector.load %arg4[%c0_5, %c0_6] : memref<32x32xf32, #tpu.memory_space<vmem>>, vector<32x32xf32>
    %cst_7 = arith.constant dense<0.000000e+00> : vector<16x32xf32>
    %8 = tpu.matmul %6, %7, %cst_7 {dimension_numbers = #tpu.dot_dimension_numbers<[1], [0], [0], [1], [0, 0, 1, 1], [], []>} : vector<16x32xf32>, vector<32x32xf32>, vector<16x32xf32> -> vector<16x32xf32>
    %c0_8 = arith.constant 0 : index
    %c0_9 = arith.constant 0 : index
    %9 = vector.load %arg5[%c0_8, %c0_9] : memref<1x32xf32, #tpu.memory_space<vmem>>, vector<1x32xf32>
    %10 = vector.broadcast %9 : vector<1x32xf32> to vector<16x32xf32>
    %11 = arith.addf %8, %10 : vector<16x32xf32>
    %12 = math.sqrt %11 : vector<16x32xf32>
    %13 = arith.mulf %5, %12 : vector<16x32xf32>
    %c0_10 = arith.constant 0 : index
    %c0_11 = arith.constant 0 : index
    %14 = vector.load %arg6[%c0_10, %c0_11] : memref<16x32xf32, #tpu.memory_space<vmem>>, vector<16x32xf32>
    tpu.vector_store %arg6[%c0_10, %c0_11], %13 {strides = array<i32>} : memref<16x32xf32, #tpu.memory_space<vmem>>, vector<16x32xf32>,
    return
  }
  func.func @transform_0(%arg0: i32) -> (i32, i32) {
    %c0_i32 = arith.constant 0 : i32
    %c0_i32_0 = arith.constant 0 : i32
    return %arg0, %c0_i32 : i32, i32
  }
  func.func @transform_1(%arg0: i32) -> (i32, i32) {
    %c0_i32 = arith.constant 0 : i32
    %c0_i32_0 = arith.constant 0 : i32
    %c0_i32_1 = arith.constant 0 : i32
    return %c0_i32, %c0_i32_0 : i32, i32
  }
  func.func @transform_2(%arg0: i32) -> (i32, i32) {
    %c0_i32 = arith.constant 0 : i32
    %c0_i32_0 = arith.constant 0 : i32
    %c0_i32_1 = arith.constant 0 : i32
    return %c0_i32, %c0_i32_0 : i32, i32
  }
  func.func @transform_3(%arg0: i32) -> (i32, i32) {
    %c0_i32 = arith.constant 0 : i32
    %c0_i32_0 = arith.constant 0 : i32
    %c0_i32_1 = arith.constant 0 : i32
    return %c0_i32, %c0_i32_0 : i32, i32
  }
  func.func @transform_4(%arg0: i32) -> (i32, i32) {
    %c0_i32 = arith.constant 0 : i32
    %c0_i32_0 = arith.constant 0 : i32
    %c0_i32_1 = arith.constant 0 : i32
    return %c0_i32, %c0_i32_0 : i32, i32
  }
  func.func @transform_5(%arg0: i32) -> (i32, i32) {
    %c0_i32 = arith.constant 0 : i32
    %c0_i32_0 = arith.constant 0 : i32
    return %arg0, %c0_i32 : i32, i32
  }
}

module attributes {stable_mosaic.version = 11 : i64} {
  func.func @_mm_bias_gdn_kernel(%arg0: i32, %arg1: memref<64x72xbf16, #tpu.memory_space<vmem>>, %arg2: memref<72x32xbf16, #tpu.memory_space<vmem>>, %arg3: memref<1x32xf32, #tpu.memory_space<vmem>>, %arg4: memref<32x32xf32, #tpu.memory_space<vmem>>, %arg5: memref<1x32xf32, #tpu.memory_space<vmem>>, %arg6: memref<64x32xf32, #tpu.memory_space<vmem>>) attributes {dimension_semantics = [#tpu.dimension_semantics<parallel>], iteration_bounds = array<i64: 1>, scalar_prefetch = 0 : i64, scratch_operands = 0 : i64, tpu.core_type = #tpu.core_type<tc>, window_params = [{transform_indices = @transform_0, window_bounds = array<i64: 64, 72>}, {pipeline_mode = #tpu.pipeline_mode<synchronous>, transform_indices = @transform_1, window_bounds = array<i64: 72, 32>}, {pipeline_mode = #tpu.pipeline_mode<synchronous>, transform_indices = @transform_2, window_bounds = array<i64: 1, 32>}, {pipeline_mode = #tpu.pipeline_mode<synchronous>, transform_indices = @transform_3, window_bounds = array<i64: 32, 32>}, {pipeline_mode = #tpu.pipeline_mode<synchronous>, transform_indices = @transform_4, window_bounds = array<i64: 1, 32>}, {transform_indices = @transform_5, window_bounds = array<i64: 64, 32>}]} {
    %c0 = arith.constant 0 : index
    %c0_0 = arith.constant 0 : index
    %0 = vector.load %arg1[%c0, %c0_0] : memref<64x72xbf16, #tpu.memory_space<vmem>>, vector<64x72xbf16>
    %c0_1 = arith.constant 0 : index
    %c0_2 = arith.constant 0 : index
    %1 = vector.load %arg2[%c0_1, %c0_2] : memref<72x32xbf16, #tpu.memory_space<vmem>>, vector<72x32xbf16>
    %cst = arith.constant dense<0.000000e+00> : vector<64x32xf32>
    %2 = tpu.matmul %0, %1, %cst {dimension_numbers = #tpu.dot_dimension_numbers<[1], [0], [0], [1], [0, 0, 1, 1], [], []>} : vector<64x72xbf16>, vector<72x32xbf16>, vector<64x32xf32> -> vector<64x32xf32>
    %c0_3 = arith.constant 0 : index
    %c0_4 = arith.constant 0 : index
    %3 = vector.load %arg3[%c0_3, %c0_4] : memref<1x32xf32, #tpu.memory_space<vmem>>, vector<1x32xf32>
    %4 = vector.broadcast %3 : vector<1x32xf32> to vector<64x32xf32>
    %5 = arith.addf %2, %4 : vector<64x32xf32>
    %6 = arith.mulf %5, %5 : vector<64x32xf32>
    %c0_5 = arith.constant 0 : index
    %c0_6 = arith.constant 0 : index
    %7 = vector.load %arg4[%c0_5, %c0_6] : memref<32x32xf32, #tpu.memory_space<vmem>>, vector<32x32xf32>
    %cst_7 = arith.constant dense<0.000000e+00> : vector<64x32xf32>
    %8 = tpu.matmul %6, %7, %cst_7 {dimension_numbers = #tpu.dot_dimension_numbers<[1], [0], [0], [1], [0, 0, 1, 1], [], []>} : vector<64x32xf32>, vector<32x32xf32>, vector<64x32xf32> -> vector<64x32xf32>
    %c0_8 = arith.constant 0 : index
    %c0_9 = arith.constant 0 : index
    %9 = vector.load %arg5[%c0_8, %c0_9] : memref<1x32xf32, #tpu.memory_space<vmem>>, vector<1x32xf32>
    %10 = vector.broadcast %9 : vector<1x32xf32> to vector<64x32xf32>
    %11 = arith.addf %8, %10 : vector<64x32xf32>
    %12 = math.sqrt %11 : vector<64x32xf32>
    %13 = arith.mulf %5, %12 : vector<64x32xf32>
    %c0_10 = arith.constant 0 : index
    %c0_11 = arith.constant 0 : index
    %14 = vector.load %arg6[%c0_10, %c0_11] : memref<64x32xf32, #tpu.memory_space<vmem>>, vector<64x32xf32>
    tpu.vector_store %arg6[%c0_10, %c0_11], %13 {strides = array<i32>} : memref<64x32xf32, #tpu.memory_space<vmem>>, vector<64x32xf32>,
    return
  }
  func.func @transform_0(%arg0: i32) -> (i32, i32) {
    %c0_i32 = arith.constant 0 : i32
    %c0_i32_0 = arith.constant 0 : i32
    return %arg0, %c0_i32 : i32, i32
  }
  func.func @transform_1(%arg0: i32) -> (i32, i32) {
    %c0_i32 = arith.constant 0 : i32
    %c0_i32_0 = arith.constant 0 : i32
    %c0_i32_1 = arith.constant 0 : i32
    return %c0_i32, %c0_i32_0 : i32, i32
  }
  func.func @transform_2(%arg0: i32) -> (i32, i32) {
    %c0_i32 = arith.constant 0 : i32
    %c0_i32_0 = arith.constant 0 : i32
    %c0_i32_1 = arith.constant 0 : i32
    return %c0_i32, %c0_i32_0 : i32, i32
  }
  func.func @transform_3(%arg0: i32) -> (i32, i32) {
    %c0_i32 = arith.constant 0 : i32
    %c0_i32_0 = arith.constant 0 : i32
    %c0_i32_1 = arith.constant 0 : i32
    return %c0_i32, %c0_i32_0 : i32, i32
  }
  func.func @transform_4(%arg0: i32) -> (i32, i32) {
    %c0_i32 = arith.constant 0 : i32
    %c0_i32_0 = arith.constant 0 : i32
    %c0_i32_1 = arith.constant 0 : i32
    return %c0_i32, %c0_i32_0 : i32, i32
  }
  func.func @transform_5(%arg0: i32) -> (i32, i32) {
    %c0_i32 = arith.constant 0 : i32
    %c0_i32_0 = arith.constant 0 : i32
    return %arg0, %c0_i32 : i32, i32
  }
}

module attributes {stable_mosaic.version = 11 : i64} {
  func.func @_mm_bias_gdn_kernel(%arg0: i32, %arg1: memref<256x72xbf16, #tpu.memory_space<vmem>>, %arg2: memref<72x32xbf16, #tpu.memory_space<vmem>>, %arg3: memref<1x32xf32, #tpu.memory_space<vmem>>, %arg4: memref<32x32xf32, #tpu.memory_space<vmem>>, %arg5: memref<1x32xf32, #tpu.memory_space<vmem>>, %arg6: memref<256x32xf32, #tpu.memory_space<vmem>>) attributes {dimension_semantics = [#tpu.dimension_semantics<parallel>], iteration_bounds = array<i64: 1>, scalar_prefetch = 0 : i64, scratch_operands = 0 : i64, tpu.core_type = #tpu.core_type<tc>, window_params = [{transform_indices = @transform_0, window_bounds = array<i64: 256, 72>}, {pipeline_mode = #tpu.pipeline_mode<synchronous>, transform_indices = @transform_1, window_bounds = array<i64: 72, 32>}, {pipeline_mode = #tpu.pipeline_mode<synchronous>, transform_indices = @transform_2, window_bounds = array<i64: 1, 32>}, {pipeline_mode = #tpu.pipeline_mode<synchronous>, transform_indices = @transform_3, window_bounds = array<i64: 32, 32>}, {pipeline_mode = #tpu.pipeline_mode<synchronous>, transform_indices = @transform_4, window_bounds = array<i64: 1, 32>}, {transform_indices = @transform_5, window_bounds = array<i64: 256, 32>}]} {
    %c0 = arith.constant 0 : index
    %c0_0 = arith.constant 0 : index
    %0 = vector.load %arg1[%c0, %c0_0] : memref<256x72xbf16, #tpu.memory_space<vmem>>, vector<256x72xbf16>
    %c0_1 = arith.constant 0 : index
    %c0_2 = arith.constant 0 : index
    %1 = vector.load %arg2[%c0_1, %c0_2] : memref<72x32xbf16, #tpu.memory_space<vmem>>, vector<72x32xbf16>
    %cst = arith.constant dense<0.000000e+00> : vector<256x32xf32>
    %2 = tpu.matmul %0, %1, %cst {dimension_numbers = #tpu.dot_dimension_numbers<[1], [0], [0], [1], [0, 0, 1, 1], [], []>} : vector<256x72xbf16>, vector<72x32xbf16>, vector<256x32xf32> -> vector<256x32xf32>
    %c0_3 = arith.constant 0 : index
    %c0_4 = arith.constant 0 : index
    %3 = vector.load %arg3[%c0_3, %c0_4] : memref<1x32xf32, #tpu.memory_space<vmem>>, vector<1x32xf32>
    %4 = vector.broadcast %3 : vector<1x32xf32> to vector<256x32xf32>
    %5 = arith.addf %2, %4 : vector<256x32xf32>
    %6 = arith.mulf %5, %5 : vector<256x32xf32>
    %c0_5 = arith.constant 0 : index
    %c0_6 = arith.constant 0 : index
    %7 = vector.load %arg4[%c0_5, %c0_6] : memref<32x32xf32, #tpu.memory_space<vmem>>, vector<32x32xf32>
    %cst_7 = arith.constant dense<0.000000e+00> : vector<256x32xf32>
    %8 = tpu.matmul %6, %7, %cst_7 {dimension_numbers = #tpu.dot_dimension_numbers<[1], [0], [0], [1], [0, 0, 1, 1], [], []>} : vector<256x32xf32>, vector<32x32xf32>, vector<256x32xf32> -> vector<256x32xf32>
    %c0_8 = arith.constant 0 : index
    %c0_9 = arith.constant 0 : index
    %9 = vector.load %arg5[%c0_8, %c0_9] : memref<1x32xf32, #tpu.memory_space<vmem>>, vector<1x32xf32>
    %10 = vector.broadcast %9 : vector<1x32xf32> to vector<256x32xf32>
    %11 = arith.addf %8, %10 : vector<256x32xf32>
    %12 = math.sqrt %11 : vector<256x32xf32>
    %13 = arith.mulf %5, %12 : vector<256x32xf32>
    %c0_10 = arith.constant 0 : index
    %c0_11 = arith.constant 0 : index
    %14 = vector.load %arg6[%c0_10, %c0_11] : memref<256x32xf32, #tpu.memory_space<vmem>>, vector<256x32xf32>
    tpu.vector_store %arg6[%c0_10, %c0_11], %13 {strides = array<i32>} : memref<256x32xf32, #tpu.memory_space<vmem>>, vector<256x32xf32>,
    return
  }
  func.func @transform_0(%arg0: i32) -> (i32, i32) {
    %c0_i32 = arith.constant 0 : i32
    %c0_i32_0 = arith.constant 0 : i32
    return %arg0, %c0_i32 : i32, i32
  }
  func.func @transform_1(%arg0: i32) -> (i32, i32) {
    %c0_i32 = arith.constant 0 : i32
    %c0_i32_0 = arith.constant 0 : i32
    %c0_i32_1 = arith.constant 0 : i32
    return %c0_i32, %c0_i32_0 : i32, i32
  }
  func.func @transform_2(%arg0: i32) -> (i32, i32) {
    %c0_i32 = arith.constant 0 : i32
    %c0_i32_0 = arith.constant 0 : i32
    %c0_i32_1 = arith.constant 0 : i32
    return %c0_i32, %c0_i32_0 : i32, i32
  }
  func.func @transform_3(%arg0: i32) -> (i32, i32) {
    %c0_i32 = arith.constant 0 : i32
    %c0_i32_0 = arith.constant 0 : i32
    %c0_i32_1 = arith.constant 0 : i32
    return %c0_i32, %c0_i32_0 : i32, i32
  }
  func.func @transform_4(%arg0: i32) -> (i32, i32) {
    %c0_i32 = arith.constant 0 : i32
    %c0_i32_0 = arith.constant 0 : i32
    %c0_i32_1 = arith.constant 0 : i32
    return %c0_i32, %c0_i32_0 : i32, i32
  }
  func.func @transform_5(%arg0: i32) -> (i32, i32) {
    %c0_i32 = arith.constant 0 : i32
    %c0_i32_0 = arith.constant 0 : i32
    return %arg0, %c0_i32 : i32, i32
  }
}

module attributes {stable_mosaic.version = 11 : i64} {
  func.func @_mm_bias_act_kernel(%arg0: i32, %arg1: memref<256x72xbf16, #tpu.memory_space<vmem>>, %arg2: memref<72x12xbf16, #tpu.memory_space<vmem>>, %arg3: memref<1x12xf32, #tpu.memory_space<vmem>>, %arg4: memref<256x12xf32, #tpu.memory_space<vmem>>) attributes {dimension_semantics = [#tpu.dimension_semantics<parallel>], iteration_bounds = array<i64: 4>, scalar_prefetch = 0 : i64, scratch_operands = 0 : i64, tpu.core_type = #tpu.core_type<tc>, window_params = [{transform_indices = @transform_0, window_bounds = array<i64: 256, 72>}, {pipeline_mode = #tpu.pipeline_mode<synchronous>, transform_indices = @transform_1, window_bounds = array<i64: 72, 12>}, {pipeline_mode = #tpu.pipeline_mode<synchronous>, transform_indices = @transform_2, window_bounds = array<i64: 1, 12>}, {transform_indices = @transform_3, window_bounds = array<i64: 256, 12>}]} {
    %c0 = arith.constant 0 : index
    %c0_0 = arith.constant 0 : index
    %0 = vector.load %arg1[%c0, %c0_0] : memref<256x72xbf16, #tpu.memory_space<vmem>>, vector<256x72xbf16>
    %c0_1 = arith.constant 0 : index
    %c0_2 = arith.constant 0 : index
    %1 = vector.load %arg2[%c0_1, %c0_2] : memref<72x12xbf16, #tpu.memory_space<vmem>>, vector<72x12xbf16>
    %cst = arith.constant dense<0.000000e+00> : vector<256x12xf32>
    %2 = tpu.matmul %0, %1, %cst {dimension_numbers = #tpu.dot_dimension_numbers<[1], [0], [0], [1], [0, 0, 1, 1], [], []>} : vector<256x72xbf16>, vector<72x12xbf16>, vector<256x12xf32> -> vector<256x12xf32>
    %c0_3 = arith.constant 0 : index
    %c0_4 = arith.constant 0 : index
    %3 = vector.load %arg3[%c0_3, %c0_4] : memref<1x12xf32, #tpu.memory_space<vmem>>, vector<1x12xf32>
    %4 = vector.broadcast %3 : vector<1x12xf32> to vector<256x12xf32>
    %5 = arith.addf %2, %4 : vector<256x12xf32>
    %c0_5 = arith.constant 0 : index
    %c0_6 = arith.constant 0 : index
    %6 = vector.load %arg4[%c0_5, %c0_6] : memref<256x12xf32, #tpu.memory_space<vmem>>, vector<256x12xf32>
    tpu.vector_store %arg4[%c0_5, %c0_6], %5 {strides = array<i32>} : memref<256x12xf32, #tpu.memory_space<vmem>>, vector<256x12xf32>,
    return
  }
  func.func @transform_0(%arg0: i32) -> (i32, i32) {
    %c0_i32 = arith.constant 0 : i32
    %c0_i32_0 = arith.constant 0 : i32
    return %arg0, %c0_i32 : i32, i32
  }
  func.func @transform_1(%arg0: i32) -> (i32, i32) {
    %c0_i32 = arith.constant 0 : i32
    %c0_i32_0 = arith.constant 0 : i32
    %c0_i32_1 = arith.constant 0 : i32
    return %c0_i32, %c0_i32_0 : i32, i32
  }
  func.func @transform_2(%arg0: i32) -> (i32, i32) {
    %c0_i32 = arith.constant 0 : i32
    %c0_i32_0 = arith.constant 0 : i32
    %c0_i32_1 = arith.constant 0 : i32
    return %c0_i32, %c0_i32_0 : i32, i32
  }
  func.func @transform_3(%arg0: i32) -> (i32, i32) {
    %c0_i32 = arith.constant 0 : i32
    %c0_i32_0 = arith.constant 0 : i32
    return %arg0, %c0_i32 : i32, i32
  }
}

</mosaic_0001>

<bundles_post_ra>
// kernel: scale_hyperprior_forward.16
= control target key start
LH: loop header
LB: loop body
LE: loop exit
PB: predicated region body
PF: predicated region fallthrough
CT: control target
= control target key end

     0   :  { %s1479_s18 = smov 0   ;;  %s1884_s0 = inlined_call_operand.vmem [shape: bf16[1024,75], index: 0, kind: input, shape index: {}]   ;;  %s1885_s1 = inlined_call_operand.vmem [shape: bf16[75,8], index: 1, kind: input, shape index: {}]   ;;  %s1886_s2 = inlined_call_operand.vmem [shape: f32[1,8], index: 2, kind: input, shape index: {}]   ;;  %s1887_s3 = inlined_call_operand.vmem [shape: f32[8,8], index: 3, kind: input, shape index: {}]   ;;  %s1888_s4 = inlined_call_operand.vmem [shape: f32[1,8], index: 4, kind: input, shape index: {}]   ;;  %s1889_s5 = inlined_call_operand.vmem [shape: f32[1024,8], index: 5, kind: output, shape index: {}]  }
   0x1 LB: > { %s1118_s19 = sadd.s32 4294967295, %s1446_s18   ;;  %p1122_p0 = scmp.ge.s32.totalorder %s1446_s18, 1  ;;  %s1446_s18 = sphi %s1479_s18, %s15_s18  }
   0x2   : > { %p188_p1 = scmp.lt.s32.totalorder %s1446_s18, 5 }
   0x4   : > { %p189_p2 = pnand %p1122_p0, %p188_p1 }
   0x5   : > { %s1123_s24 = sshll.u32 (!%p189_p2), %s1118_s19, 5 }
   0x6   : > { %192 = sbr.rel (%p189_p2) target bundleno = 513 (0x201), region = 40  ;;  %p217_p3 = scmp.lt.s32.totalorder (!%p189_p2), %s1123_s24, 127 }
   0xb   : > { %v1355_v0 = vld [vmem:[%s1885_s1 + $0x20] sm:$0x3f]   ;;  %vm436_vm0 = vcmask 1044480   ;;  %vm437_vm1 = vcmask 1045504   ;;  %v1448_v1 = vmov 65535   ;;  %v1356_v4 = vld [vmem:[%s1885_s1 + $0x18] sm:$0xff]  }
   0xc   : > { %v438_v2 = vsel %vm436_vm0, 4294967295, %v1448_v1  ;;  %v1357_v6 = vld [vmem:[%s1885_s1 + $0x10] sm:$0xff]   ;;  %s1891_s24 = smov (!%p217_p3, %s1123_s24), 127  ;;  %v1358_v7 = vld [vmem:[%s1885_s1 + $0x8] sm:$0xff]   ;;  %vm387_vm2 = vcmask 613376   ;;  %v1359_v9 = vld [vmem:[%s1885_s1] sm:$0xff]  }
   0xd   : > { %v439_v3 = vsel %vm437_vm1, %v438_v2, 0  ;;  %s1124_s27 = sshll.u32 %s1891_s24, 2  ;;  %v636_v25 = vld [vmem:[%s1887_s3] sm:$0xff]  ;;  %vm644_vm3 = vcmask 64512   ;;  %s1126_s16 = sshll.u32 %s1891_s24, 3 }
   0xe   : > { %v441_v5 = vand.u32 %v1355_v0, %v439_v3  ;;  %s1505_s7 = scalar_lea.vmem %s1884_s0, %s1124_s27  ;;  %1296 = vmatprep.subr.mxu1 %v636_v25  ;;  %v1548_v27 = vld [vmem:[%s1886_s2] ss:$0 sm:$0xff]  ;;  %s1759_s20 = scalar_lea.vmem %s1889_s5, %s1126_s16 }
   0xf   : > { %v1360_v8 = vld [vmem:[%s1505_s7] sm:$0xff]   ;;  %v1361_v10 = vld [vmem:[%s1505_s7 + $0x8] sm:$0xff]   ;;  %v1362_v11 = vld [vmem:[%s1505_s7 + $0x10] sm:$0xff]   ;;  %1297 = vmatpush3.msra.mxu1 %v636_v25 }
  0x10   : > { %1254 = vmatprep.subr.bf16.mxu0 %v441_v5  ;;  %1264 = vmatprep.mubr.msk.bf16.mxu0 %vm387_vm2, %v1360_v8  ;;  %v1363_v12 = vld [vmem:[%s1505_s7 + $0x18] sm:$0xff]   ;;  %v1364_v13 = vld [vmem:[%s1505_s7 + $0x20] sm:$0xff]   ;;  %v1365_v14 = vld [vmem:[%s1505_s7 + $0x28] sm:$0xff]  }
  0x11   : > { %1255 = vmatpush3.bf16.msra.mxu0 %v441_v5  ;;  %v1366_v15 = vld [vmem:[%s1505_s7 + $0x30] sm:$0xff]   ;;  %v1367_v16 = vld [vmem:[%s1505_s7 + $0x38] sm:$0xff]   ;;  %v1368_v17 = vld [vmem:[%s1505_s7 + $0x40] sm:$0xff]  }
  0x12   : > { %1256 = vmatprep.subr.bf16.mxu0 %v1356_v4  ;;  %v1369_v18 = vld [vmem:[%s1505_s7 + $0x48] sm:$0xff]   ;;  %v1370_v19 = vld [vmem:[%s1505_s7 + $0x50] sm:$0xff]   ;;  %v1371_v20 = vld [vmem:[%s1505_s7 + $0x58] sm:$0xff]  }
  0x13   : > { %v1372_v21 = vld [vmem:[%s1505_s7 + $0x60] sm:$0xff]   ;;  %v1373_v22 = vld [vmem:[%s1505_s7 + $0x68] sm:$0xff]   ;;  %v1374_v23 = vld [vmem:[%s1505_s7 + $0x70] sm:$0xff]  }
  0x14   : > { %v1375_v24 = vld [vmem:[%s1505_s7 + $0x78] sm:$0xff]  }
  0x15   : > { %1257 = vmatpush3.bf16.msra.mxu0 %v1356_v4 }
  0x16   : > { %1258 = vmatprep.subr.bf16.mxu0 %v1357_v6 }
  0x19   : > { %1259 = vmatpush3.bf16.msra.mxu0 %v1357_v6 }
  0x1a   : > { %1260 = vmatprep.subr.bf16.mxu0 %v1358_v7 }
  0x1d   : > { %1261 = vmatpush3.bf16.msra.mxu0 %v1358_v7 }
  0x1e   : > { %1262 = vmatprep.subr.bf16.mxu0 %v1359_v9 }
  0x21   : > { %1263 = vmatpush3.bf16.msra.mxu0 %v1359_v9 }
  0x24   : > { %1265 = vmatmul.mubr.msk.bf16.vlgmr.msra.gmra.mxu0 %vm387_vm2, %v1361_v10 }
  0x25   : > { %1268 = vmatprep.mubr.msk.bf16.mxu0 %vm387_vm2, %v1362_v11 }
  0x2c   : > { %1269 = vmatmul.mubr.msk.bf16.gmra.mxu0 %vm387_vm2, %v1363_v12 }
  0x2d   : > { %1272 = vmatprep.mubr.msk.bf16.mxu0 %vm387_vm2, %v1364_v13 }
  0x34   : > { %1273 = vmatmul.mubr.msk.bf16.gmra.mxu0 %vm387_vm2, %v1365_v14 }
  0x35   : > { %1276 = vmatprep.mubr.msk.bf16.mxu0 %vm387_vm2, %v1366_v15 }
  0x3c   : > { %1277 = vmatmul.mubr.msk.bf16.gmra.mxu0 %vm387_vm2, %v1367_v16 }
  0x3d   : > { %1280 = vmatprep.mubr.msk.bf16.mxu0 %vm387_vm2, %v1368_v17 }
  0x44   : > { %1281 = vmatmul.mubr.msk.bf16.gmra.mxu0 %vm387_vm2, %v1369_v18 }
  0x45   : > { %1284 = vmatprep.mubr.msk.bf16.mxu0 %vm387_vm2, %v1370_v19 }
  0x4c   : > { %1285 = vmatmul.mubr.msk.bf16.gmra.mxu0 %vm387_vm2, %v1371_v20 }
  0x4d   : > { %1288 = vmatprep.mubr.msk.bf16.mxu0 %vm387_vm2, %v1372_v21 }
  0x54   : > { %1289 = vmatmul.mubr.msk.bf16.gmra.mxu0 %vm387_vm2, %v1373_v22 }
  0x55   : > { %1292 = vmatprep.mubr.msk.bf16.mxu0 %vm387_vm2, %v1374_v23 }
  0x5c   : > { %1293 = vmatmul.mubr.msk.bf16.gmra.mxu0 %vm387_vm2, %v1375_v24 }
  0xe4   : > { %v1266_v26 = vpop.f32.mrf.mxu0 }
  0xe5   : > { %v1556_v32 = vadd.f32 %v1266_v26, %v1548_v27 }
  0xe6   : > { %v477_v28 = vpop.f32.mrf.mxu0 }
  0xe7   : > { %v1551_v29 = vadd.f32 %v1548_v27, %v477_v28  ;;  %v606_v38 = vmul.f32 %v1556_v32, %v1556_v32 }
  0xe8   : > { %v1267_v30 = vpop.f32.mrf.mxu0 }
  0xe9   : > { %v604_v31 = vmul.f32 %v1551_v29, %v1551_v29  ;;  %v1563_v36 = vadd.f32 %v1267_v30, %v1548_v27 }
  0xea   : > { %v480_v33 = vpop.f32.mrf.mxu0 }
  0xeb   : > { %v1559_v34 = vadd.f32 %v1548_v27, %v480_v33  ;;  %1298 = vmatprep.mubr.msk.f32.mxu1 %vm644_vm3, %v604_v31  ;;  %v607_v42 = vmul.f32 %v1563_v36, %v1563_v36 }
  0xec   : > { %v1270_v35 = vpop.f32.mrf.mxu0 }
  0xed   : > { %v605_v37 = vmul.f32 %v1559_v34, %v1559_v34  ;;  %v1579_v44 = vadd.f32 %v1270_v35, %v1548_v27 }
  0xee   : > { %v493_v39 = vpop.f32.mrf.mxu0 }
  0xef   : > { %v1570_v40 = vadd.f32 %v1548_v27, %v493_v39  ;;  %1299 = vmatmul.mubr.msk.f32.vlgmr.msra.gmra.mxu1 %vm644_vm3, %v605_v37  ;;  %v610_v50 = vmul.f32 %v1579_v44, %v1579_v44 }
  0xf0   : > { %v1271_v41 = vpop.f32.mrf.mxu0  ;;  %1301 = vmatprep.mubr.msk.f32.mxu1 %vm644_vm3, %v606_v38 }
  0xf1   : > { %v608_v43 = vmul.f32 %v1570_v40, %v1570_v40  ;;  %v1587_v48 = vadd.f32 %v1271_v41, %v1548_v27 }
  0xf2   : > { %v496_v45 = vpop.f32.mrf.mxu0 }
  0xf3   : > { %v1582_v46 = vadd.f32 %v1548_v27, %v496_v45  ;;  %1302 = vmatmul.mubr.msk.f32.gmra.mxu1 %vm644_vm3, %v607_v42  ;;  %v611_v54 = vmul.f32 %v1587_v48, %v1587_v48 }
  0xf4   : > { %v1274_v47 = vpop.f32.mrf.mxu0  ;;  %1304 = vmatprep.mubr.msk.f32.mxu1 %vm644_vm3, %v608_v43 }
  0xf5   : > { %v609_v49 = vmul.f32 %v1582_v46, %v1582_v46  ;;  %v1603_v56 = vadd.f32 %v1274_v47, %v1548_v27 }
  0xf6   : > { %v509_v51 = vpop.f32.mrf.mxu0 }
  0xf7   : > { %v1594_v52 = vadd.f32 %v1548_v27, %v509_v51  ;;  %1305 = vmatmul.mubr.msk.f32.gmra.mxu1 %vm644_vm3, %v609_v49  ;;  %v614_v62 = vmul.f32 %v1603_v56, %v1603_v56 }
  0xf8   : > { %v1275_v53 = vpop.f32.mrf.mxu0  ;;  %1307 = vmatprep.mubr.msk.f32.mxu1 %vm644_vm3, %v610_v50 }
  0xf9   : > { %v612_v55 = vmul.f32 %v1594_v52, %v1594_v52  ;;  %v1611_v60 = vadd.f32 %v1275_v53, %v1548_v27 }
  0xfa   : > { %v512_v57 = vpop.f32.mrf.mxu0 }
  0xfb   : > { %v1606_v58 = vadd.f32 %v1548_v27, %v512_v57  ;;  %1308 = vmatmul.mubr.msk.f32.gmra.mxu1 %vm644_vm3, %v611_v54  ;;  %v615_v2 = vmul.f32 %v1611_v60, %v1611_v60 }
  0xfc   : > { %v1278_v59 = vpop.f32.mrf.mxu0  ;;  %1310 = vmatprep.mubr.msk.f32.mxu1 %vm644_vm3, %v612_v55 }
  0xfd   : > { %v613_v61 = vmul.f32 %v1606_v58, %v1606_v58  ;;  %v1627_v4 = vadd.f32 %v1278_v59, %v1548_v27 }
  0xfe   : > { %v525_v63 = vpop.f32.mrf.mxu0 }
  0xff   : > { %v1618_v0 = vadd.f32 %v1548_v27, %v525_v63  ;;  %1311 = vmatmul.mubr.msk.f32.gmra.mxu1 %vm644_vm3, %v613_v61  ;;  %v618_v10 = vmul.f32 %v1627_v4, %v1627_v4 }
 0x100   : > { %v1279_v1 = vpop.f32.mrf.mxu0  ;;  %1313 = vmatprep.mubr.msk.f32.mxu1 %vm644_vm3, %v614_v62 }
 0x101   : > { %v616_v3 = vmul.f32 %v1618_v0, %v1618_v0  ;;  %v1635_v8 = vadd.f32 %v1279_v1, %v1548_v27 }
 0x102   : > { %v528_v5 = vpop.f32.mrf.mxu0 }
 0x103   : > { %v1630_v6 = vadd.f32 %v1548_v27, %v528_v5  ;;  %1314 = vmatmul.mubr.msk.f32.gmra.mxu1 %vm644_vm3, %v615_v2  ;;  %v619_v14 = vmul.f32 %v1635_v8, %v1635_v8 }
 0x104   : > { %v1282_v7 = vpop.f32.mrf.mxu0  ;;  %1316 = vmatprep.mubr.msk.f32.mxu1 %vm644_vm3, %v616_v3 }
 0x105   : > { %v617_v9 = vmul.f32 %v1630_v6, %v1630_v6  ;;  %v1651_v16 = vadd.f32 %v1282_v7, %v1548_v27 }
 0x106   : > { %v541_v11 = vpop.f32.mrf.mxu0 }
 0x107   : > { %v1642_v12 = vadd.f32 %v1548_v27, %v541_v11  ;;  %1317 = vmatmul.mubr.msk.f32.gmra.mxu1 %vm644_vm3, %v617_v9  ;;  %v622_v22 = vmul.f32 %v1651_v16, %v1651_v16 }
 0x108   : > { %v1283_v13 = vpop.f32.mrf.mxu0  ;;  %1319 = vmatprep.mubr.msk.f32.mxu1 %vm644_vm3, %v618_v10 }
 0x109   : > { %v620_v15 = vmul.f32 %v1642_v12, %v1642_v12  ;;  %v1659_v20 = vadd.f32 %v1283_v13, %v1548_v27 }
 0x10a   : > { %v544_v17 = vpop.f32.mrf.mxu0 }
 0x10b   : > { %v1654_v18 = vadd.f32 %v1548_v27, %v544_v17  ;;  %1320 = vmatmul.mubr.msk.f32.gmra.mxu1 %vm644_vm3, %v619_v14  ;;  %v623_v26 = vmul.f32 %v1659_v20, %v1659_v20 }
 0x10c   : > { %v1286_v19 = vpop.f32.mrf.mxu0  ;;  %1322 = vmatprep.mubr.msk.f32.mxu1 %vm644_vm3, %v620_v15 }
 0x10d   : > { %v621_v21 = vmul.f32 %v1654_v18, %v1654_v18  ;;  %v1675_v30 = vadd.f32 %v1286_v19, %v1548_v27 }
 0x10e   : > { %v557_v23 = vpop.f32.mrf.mxu0 }
 0x10f   : > { %v1666_v24 = vadd.f32 %v1548_v27, %v557_v23  ;;  %1323 = vmatmul.mubr.msk.f32.gmra.mxu1 %vm644_vm3, %v621_v21  ;;  %v626_v39 = vmul.f32 %v1675_v30, %v1675_v30 }
 0x110   : > { %v1287_v25 = vpop.f32.mrf.mxu0  ;;  %1325 = vmatprep.mubr.msk.f32.mxu1 %vm644_vm3, %v622_v22 }
 0x111   : > { %v624_v28 = vmul.f32 %v1666_v24, %v1666_v24  ;;  %v1683_v37 = vadd.f32 %v1287_v25, %v1548_v27 }
 0x112   : > { %v560_v31 = vpop.f32.mrf.mxu0 }
 0x113   : > { %v1678_v33 = vadd.f32 %v1548_v27, %v560_v31  ;;  %1326 = vmatmul.mubr.msk.f32.gmra.mxu1 %vm644_vm3, %v623_v26  ;;  %v627_v45 = vmul.f32 %v1683_v37, %v1683_v37 }
 0x114   : > { %v1290_v35 = vpop.f32.mrf.mxu0  ;;  %1328 = vmatprep.mubr.msk.f32.mxu1 %vm644_vm3, %v624_v28 }
 0x115   : > { %v625_v38 = vmul.f32 %v1678_v33, %v1678_v33  ;;  %v1699_v49 = vadd.f32 %v1290_v35, %v1548_v27 }
 0x116   : > { %v573_v41 = vpop.f32.mrf.mxu0 }
 0x117   : > { %v1690_v42 = vadd.f32 %v1548_v27, %v573_v41  ;;  %1329 = vmatmul.mubr.msk.f32.gmra.mxu1 %vm644_vm3, %v625_v38  ;;  %v630_v57 = vmul.f32 %v1699_v49, %v1699_v49 }
 0x118   : > { %v1291_v43 = vpop.f32.mrf.mxu0  ;;  %1331 = vmatprep.mubr.msk.f32.mxu1 %vm644_vm3, %v626_v39 }
 0x119   : > { %v628_v47 = vmul.f32 %v1690_v42, %v1690_v42  ;;  %v1707_v54 = vadd.f32 %v1291_v43, %v1548_v27 }
 0x11a   : > { %v576_v50 = vpop.f32.mrf.mxu0 }
 0x11b   : > { %v1702_v51 = vadd.f32 %v1548_v27, %v576_v50  ;;  %1332 = vmatmul.mubr.msk.f32.gmra.mxu1 %vm644_vm3, %v627_v45  ;;  %v631_v63 = vmul.f32 %v1707_v54, %v1707_v54 }
 0x11c   : > { %v1294_v53 = vpop.f32.mrf.mxu0  ;;  %1334 = vmatprep.mubr.msk.f32.mxu1 %vm644_vm3, %v628_v47 }
 0x11d   : > { %v629_v55 = vmul.f32 %v1702_v51, %v1702_v51  ;;  %v1723_v2 = vadd.f32 %v1294_v53, %v1548_v27 }
 0x11e   : > { %v589_v59 = vpop.f32.mrf.mxu0 }
 0x11f   : > { %v1714_v61 = vadd.f32 %v1548_v27, %v589_v59  ;;  %1335 = vmatmul.mubr.msk.f32.gmra.mxu1 %vm644_vm3, %v629_v55  ;;  %v634_v10 = vmul.f32 %v1723_v2, %v1723_v2 }
 0x120   : > { %v1295_v62 = vpop.f32.mrf.mxu0  ;;  %1337 = vmatprep.mubr.msk.f32.mxu1 %vm644_vm3, %v630_v57 }
 0x121   : > { %v632_v1 = vmul.f32 %v1714_v61, %v1714_v61  ;;  %v1731_v7 = vadd.f32 %v1295_v62, %v1548_v27 }
 0x122   : > { %v592_v3 = vpop.f32.mrf.mxu0 }
 0x123   : > { %v1726_v5 = vadd.f32 %v1548_v27, %v592_v3  ;;  %1338 = vmatmul.mubr.msk.f32.gmra.mxu1 %vm644_vm3, %v631_v63  ;;  %v635_v11 = vmul.f32 %v1731_v7, %v1731_v7  ;;  %v1745_v27 = vld [vmem:[%s1888_s4] ss:$0 sm:$0xff] }
 0x124   : > { %1340 = vmatprep.mubr.msk.f32.mxu1 %vm644_vm3, %v632_v1 }
 0x125   : > { %v633_v9 = vmul.f32 %v1726_v5, %v1726_v5 }
 0x127   : > { %1341 = vmatmul.mubr.msk.f32.gmra.mxu1 %vm644_vm3, %v633_v9 }
 0x128   : > { %1343 = vmatprep.mubr.msk.f32.mxu1 %vm644_vm3, %v634_v10 }
 0x12b   : > { %1344 = vmatmul.mubr.msk.f32.gmra.mxu1 %vm644_vm3, %v635_v11 }
 0x1af   : > { %v1300_v13 = vpop.f32.mrf.mxu1 }
 0x1b0   : > { %v813_v14 = vadd.f32 %v1300_v13, %v1745_v27 }
 0x1b1   : > { %v807_v15 = vpop.f32.mrf.mxu1 }
 0x1b2   : > { %1376 = vrsqrt.f32 %v813_v14  ;;  %v808_v17 = vadd.f32 %v1745_v27, %v807_v15 }
 0x1b3   : > { %v1303_v19 = vpop.f32.mrf.mxu1 }
 0x1b4   : > { %1378 = vrsqrt.f32 %v808_v17  ;;  %v823_v21 = vadd.f32 %v1303_v19, %v1745_v27 }
 0x1b5   : > { %v817_v22 = vpop.f32.mrf.mxu1 }
 0x1b6   : > { %1380 = vrsqrt.f32 %v823_v21  ;;  %v818_v23 = vadd.f32 %v1745_v27, %v817_v22 }
 0x1b7   : > { %v1306_v25 = vpop.f32.mrf.mxu1 }
 0x1b8   : > { %1382 = vrsqrt.f32 %v818_v23  ;;  %v833_v26 = vadd.f32 %v1306_v25, %v1745_v27 }
 0x1b9   : > { %v827_v28 = vpop.f32.mrf.mxu1 }
 0x1ba   : > { %1384 = vrsqrt.f32 %v833_v26  ;;  %v828_v31 = vadd.f32 %v1745_v27, %v827_v28 }
 0x1bb   : > { %v1309_v35 = vpop.f32.mrf.mxu1 }
 0x1bc   : > { %1386 = vrsqrt.f32 %v828_v31  ;;  %v843_v38 = vadd.f32 %v1309_v35, %v1745_v27 }
 0x1bd   : > { %v837_v39 = vpop.f32.mrf.mxu1 }
 0x1be   : > { %1388 = vrsqrt.f32 %v843_v38  ;;  %v838_v41 = vadd.f32 %v1745_v27, %v837_v39 }
 0x1bf   : > { %v1377_v43 = vpop.eup %1376  ;;  %v1312_v45 = vpop.f32.mrf.mxu1 }
 0x1c0   : > { %v999_v47 = vmul.f32 %v1377_v43, %v1559_v34  ;;  %1390 = vrsqrt.f32 %v838_v41  ;;  %v853_v50 = vadd.f32 %v1312_v45, %v1745_v27 }
 0x1c1   : > { %v1379_v53 = vpop.eup %1378  ;;  %v847_v55 = vpop.f32.mrf.mxu1 }
 0x1c2   : > { %1031 = vst.msk [vmem:[%s1759_s20 + $0x8] sm:$0xff] %vm644_vm3, %v999_v47  ;;  %v998_v57 = vmul.f32 %v1379_v53, %v1551_v29  ;;  %1392 = vrsqrt.f32 %v853_v50  ;;  %v848_v59 = vadd.f32 %v1745_v27, %v847_v55 }
 0x1c3   : > { %v1381_v62 = vpop.eup %1380  ;;  %v1315_v63 = vpop.f32.mrf.mxu1 }
 0x1c4   : > { %1030 = vst.msk [vmem:[%s1759_s20] sm:$0xff] %vm644_vm3, %v998_v57  ;;  %v1001_v34 = vmul.f32 %v1381_v62, %v1563_v36  ;;  %1394 = vrsqrt.f32 %v848_v59  ;;  %v863_v1 = vadd.f32 %v1315_v63, %v1745_v27 }
 0x1c5   : > { %v1383_v3 = vpop.eup %1382  ;;  %v857_v9 = vpop.f32.mrf.mxu1 }
 0x1c6   : > { %1033 = vst.msk [vmem:[%s1759_s20 + $0x18] sm:$0xff] %vm644_vm3, %v1001_v34  ;;  %v1000_v29 = vmul.f32 %v1383_v3, %v1556_v32  ;;  %1396 = vrsqrt.f32 %v863_v1  ;;  %v858_v10 = vadd.f32 %v1745_v27, %v857_v9 }
 0x1c7   : > { %v1385_v11 = vpop.eup %1384  ;;  %v1318_v13 = vpop.f32.mrf.mxu1 }
 0x1c8   : > { %1032 = vst.msk [vmem:[%s1759_s20 + $0x10] sm:$0xff] %vm644_vm3, %v1000_v29  ;;  %v1003_v36 = vmul.f32 %v1385_v11, %v1582_v46  ;;  %1398 = vrsqrt.f32 %v858_v10  ;;  %v873_v14 = vadd.f32 %v1318_v13, %v1745_v27 }
 0x1c9   : > { %v1387_v15 = vpop.eup %1386  ;;  %v867_v17 = vpop.f32.mrf.mxu1 }
 0x1ca   : > { %1035 = vst.msk [vmem:[%s1759_s20 + $0x28] sm:$0xff] %vm644_vm3, %v1003_v36  ;;  %v1002_v32 = vmul.f32 %v1387_v15, %v1570_v40  ;;  %1400 = vrsqrt.f32 %v873_v14  ;;  %v868_v19 = vadd.f32 %v1745_v27, %v867_v17 }
 0x1cb   : > { %v1389_v21 = vpop.eup %1388  ;;  %v1321_v22 = vpop.f32.mrf.mxu1 }
 0x1cc   : > { %1034 = vst.msk [vmem:[%s1759_s20 + $0x20] sm:$0xff] %vm644_vm3, %v1002_v32  ;;  %v1005_v46 = vmul.f32 %v1389_v21, %v1587_v48  ;;  %1402 = vrsqrt.f32 %v868_v19  ;;  %v883_v23 = vadd.f32 %v1321_v22, %v1745_v27 }
 0x1cd   : > { %v1391_v25 = vpop.eup %1390  ;;  %v877_v26 = vpop.f32.mrf.mxu1 }
 0x1ce   : > { %1037 = vst.msk [vmem:[%s1759_s20 + $0x38] sm:$0xff] %vm644_vm3, %v1005_v46  ;;  %v1004_v40 = vmul.f32 %v1391_v25, %v1579_v44  ;;  %1404 = vrsqrt.f32 %v883_v23  ;;  %v878_v28 = vadd.f32 %v1745_v27, %v877_v26 }
 0x1cf   : > { %v1393_v31 = vpop.eup %1392  ;;  %v1324_v35 = vpop.f32.mrf.mxu1 }
 0x1d0   : > { %1036 = vst.msk [vmem:[%s1759_s20 + $0x30] sm:$0xff] %vm644_vm3, %v1004_v40  ;;  %v1007_v48 = vmul.f32 %v1393_v31, %v1606_v58  ;;  %1406 = vrsqrt.f32 %v878_v28  ;;  %v893_v38 = vadd.f32 %v1324_v35, %v1745_v27 }
 0x1d1   : > { %v1395_v39 = vpop.eup %1394  ;;  %v887_v41 = vpop.f32.mrf.mxu1 }
 0x1d2   : > { %1039 = vst.msk [vmem:[%s1759_s20 + $0x48] sm:$0xff] %vm644_vm3, %v1007_v48  ;;  %v1006_v44 = vmul.f32 %v1395_v39, %v1594_v52  ;;  %1408 = vrsqrt.f32 %v893_v38  ;;  %v888_v43 = vadd.f32 %v1745_v27, %v887_v41 }
 0x1d3   : > { %v1397_v45 = vpop.eup %1396  ;;  %v1327_v47 = vpop.f32.mrf.mxu1 }
 0x1d4   : > { %1038 = vst.msk [vmem:[%s1759_s20 + $0x40] sm:$0xff] %vm644_vm3, %v1006_v44  ;;  %v1009_v58 = vmul.f32 %v1397_v45, %v1611_v60  ;;  %1410 = vrsqrt.f32 %v888_v43  ;;  %v903_v50 = vadd.f32 %v1327_v47, %v1745_v27 }
 0x1d5   : > { %v1399_v53 = vpop.eup %1398  ;;  %v897_v55 = vpop.f32.mrf.mxu1 }
 0x1d6   : > { %1041 = vst.msk [vmem:[%s1759_s20 + $0x58] sm:$0xff] %vm644_vm3, %v1009_v58  ;;  %v1008_v52 = vmul.f32 %v1399_v53, %v1603_v56  ;;  %1412 = vrsqrt.f32 %v903_v50  ;;  %v898_v57 = vadd.f32 %v1745_v27, %v897_v55 }
 0x1d7   : > { %v1401_v59 = vpop.eup %1400  ;;  %v1330_v62 = vpop.f32.mrf.mxu1 }
 0x1d8   : > { %1040 = vst.msk [vmem:[%s1759_s20 + $0x50] sm:$0xff] %vm644_vm3, %v1008_v52  ;;  %v1011_v60 = vmul.f32 %v1401_v59, %v1630_v6  ;;  %1414 = vrsqrt.f32 %v898_v57  ;;  %v913_v63 = vadd.f32 %v1330_v62, %v1745_v27 }
 0x1d9   : > { %v1403_v34 = vpop.eup %1402  ;;  %v907_v1 = vpop.f32.mrf.mxu1 }
 0x1da   : > { %1043 = vst.msk [vmem:[%s1759_s20 + $0x68] sm:$0xff] %vm644_vm3, %v1011_v60  ;;  %v1010_v56 = vmul.f32 %v1403_v34, %v1618_v0  ;;  %1416 = vrsqrt.f32 %v913_v63  ;;  %v908_v3 = vadd.f32 %v1745_v27, %v907_v1 }
 0x1db   : > { %v1405_v9 = vpop.eup %1404  ;;  %v1333_v29 = vpop.f32.mrf.mxu1 }
 0x1dc   : > { %1042 = vst.msk [vmem:[%s1759_s20 + $0x60] sm:$0xff] %vm644_vm3, %v1010_v56  ;;  %v1013_v6 = vmul.f32 %v1405_v9, %v1635_v8  ;;  %1418 = vrsqrt.f32 %v908_v3  ;;  %v923_v10 = vadd.f32 %v1333_v29, %v1745_v27 }
 0x1dd   : > { %v1407_v11 = vpop.eup %1406  ;;  %v917_v13 = vpop.f32.mrf.mxu1 }
 0x1de   : > { %1045 = vst.msk [vmem:[%s1759_s20 + $0x78] sm:$0xff] %vm644_vm3, %v1013_v6  ;;  %v1012_v0 = vmul.f32 %v1407_v11, %v1627_v4  ;;  %1420 = vrsqrt.f32 %v923_v10  ;;  %v918_v36 = vadd.f32 %v1745_v27, %v917_v13 }
 0x1df   : > { %v1409_v14 = vpop.eup %1408  ;;  %v1336_v15 = vpop.f32.mrf.mxu1 }
 0x1e0   : > { %1044 = vst.msk [vmem:[%s1759_s20 + $0x70] sm:$0xff] %vm644_vm3, %v1012_v0  ;;  %v1015_v8 = vmul.f32 %v1409_v14, %v1654_v18  ;;  %1422 = vrsqrt.f32 %v918_v36  ;;  %v933_v17 = vadd.f32 %v1336_v15, %v1745_v27 }
 0x1e1   : > { %v1411_v32 = vpop.eup %1410  ;;  %v927_v19 = vpop.f32.mrf.mxu1 }
 0x1e2   : > { %1047 = vst.msk [vmem:[%s1759_s20 + $0x88] sm:$0xff] %vm644_vm3, %v1015_v8  ;;  %v1014_v4 = vmul.f32 %v1411_v32, %v1642_v12  ;;  %1424 = vrsqrt.f32 %v933_v17  ;;  %v928_v21 = vadd.f32 %v1745_v27, %v927_v19 }
 0x1e3   : > { %v1413_v22 = vpop.eup %1412  ;;  %v1339_v46 = vpop.f32.mrf.mxu1 }
 0x1e4   : > { %1046 = vst.msk [vmem:[%s1759_s20 + $0x80] sm:$0xff] %vm644_vm3, %v1014_v4  ;;  %v1017_v18 = vmul.f32 %v1413_v22, %v1659_v20  ;;  %1426 = vrsqrt.f32 %v928_v21  ;;  %v943_v23 = vadd.f32 %v1339_v46, %v1745_v27 }
 0x1e5   : > { %v1415_v25 = vpop.eup %1414  ;;  %v937_v26 = vpop.f32.mrf.mxu1 }
 0x1e6   : > { %1049 = vst.msk [vmem:[%s1759_s20 + $0x98] sm:$0xff] %vm644_vm3, %v1017_v18  ;;  %v1016_v12 = vmul.f32 %v1415_v25, %v1651_v16  ;;  %1428 = vrsqrt.f32 %v943_v23  ;;  %v938_v40 = vadd.f32 %v1745_v27, %v937_v26 }
 0x1e7   : > { %v1417_v28 = vpop.eup %1416  ;;  %v1342_v31 = vpop.f32.mrf.mxu1 }
 0x1e8   : > { %1048 = vst.msk [vmem:[%s1759_s20 + $0x90] sm:$0xff] %vm644_vm3, %v1016_v12  ;;  %v1019_v20 = vmul.f32 %v1417_v28, %v1678_v33  ;;  %1430 = vrsqrt.f32 %v938_v40  ;;  %v953_v35 = vadd.f32 %v1342_v31, %v1745_v27 }
 0x1e9   : > { %v1419_v48 = vpop.eup %1418  ;;  %v947_v38 = vpop.f32.mrf.mxu1 }
 0x1ea   : > { %1051 = vst.msk [vmem:[%s1759_s20 + $0xa8] sm:$0xff] %vm644_vm3, %v1019_v20  ;;  %v1018_v16 = vmul.f32 %v1419_v48, %v1666_v24  ;;  %1432 = vrsqrt.f32 %v953_v35  ;;  %v948_v39 = vadd.f32 %v1745_v27, %v947_v38 }
 0x1eb   : > { %v1421_v41 = vpop.eup %1420  ;;  %v1345_v44 = vpop.f32.mrf.mxu1 }
 0x1ec   : > { %1050 = vst.msk [vmem:[%s1759_s20 + $0xa0] sm:$0xff] %vm644_vm3, %v1018_v16  ;;  %v1021_v33 = vmul.f32 %v1421_v41, %v1683_v37  ;;  %1434 = vrsqrt.f32 %v948_v39  ;;  %v963_v43 = vadd.f32 %v1345_v44, %v1745_v27 }
 0x1ed   : > { %v1423_v45 = vpop.eup %1422  ;;  %v957_v47 = vpop.f32.mrf.mxu1 }
 0x1ee   : > { %1053 = vst.msk [vmem:[%s1759_s20 + $0xb8] sm:$0xff] %vm644_vm3, %v1021_v33  ;;  %v1020_v24 = vmul.f32 %v1423_v45, %v1675_v30  ;;  %1436 = vrsqrt.f32 %v963_v43  ;;  %v958_v58 = vadd.f32 %v1745_v27, %v957_v47 }
 0x1ef   : > { %v1425_v50 = vpop.eup %1424 }
 0x1f0   : > { %1052 = vst.msk [vmem:[%s1759_s20 + $0xb0] sm:$0xff] %vm644_vm3, %v1020_v24  ;;  %v1023_v37 = vmul.f32 %v1425_v50, %v1702_v51  ;;  %1438 = vrsqrt.f32 %v958_v58 }
 0x1f1   : > { %v1427_v53 = vpop.eup %1426 }
 0x1f2   : > { %1055 = vst.msk [vmem:[%s1759_s20 + $0xc8] sm:$0xff] %vm644_vm3, %v1023_v37  ;;  %v1022_v55 = vmul.f32 %v1427_v53, %v1690_v42 }
 0x1f3   : > { %v1429_v52 = vpop.eup %1428 }
 0x1f4   : > { %1054 = vst.msk [vmem:[%s1759_s20 + $0xc0] sm:$0xff] %vm644_vm3, %v1022_v55  ;;  %v1025_v30 = vmul.f32 %v1429_v52, %v1707_v54 }
 0x1f5   : > { %v1431_v27 = vpop.eup %1430 }
 0x1f6   : > { %1057 = vst.msk [vmem:[%s1759_s20 + $0xd8] sm:$0xff] %vm644_vm3, %v1025_v30  ;;  %v1024_v57 = vmul.f32 %v1431_v27, %v1699_v49 }
 0x1f7   : > { %v1433_v51 = vpop.eup %1432 }
 0x1f8   : > { %1056 = vst.msk [vmem:[%s1759_s20 + $0xd0] sm:$0xff] %vm644_vm3, %v1024_v57  ;;  %v1027_v59 = vmul.f32 %v1433_v51, %v1726_v5 }
 0x1f9   : > { %v1435_v62 = vpop.eup %1434 }
 0x1fa   : > { %1059 = vst.msk [vmem:[%s1759_s20 + $0xe8] sm:$0xff] %vm644_vm3, %v1027_v59  ;;  %v1026_v42 = vmul.f32 %v1435_v62, %v1714_v61 }
 0x1fb   : > { %v1437_v60 = vpop.eup %1436 }
 0x1fc   : > { %1058 = vst.msk [vmem:[%s1759_s20 + $0xe0] sm:$0xff] %vm644_vm3, %v1026_v42  ;;  %v1029_v54 = vmul.f32 %v1437_v60, %v1731_v7 }
 0x1fd   : > { %v1439_v63 = vpop.eup %1438 }
 0x1fe   : > { %1061 = vst.msk [vmem:[%s1759_s20 + $0xf8] sm:$0xff] %vm644_vm3, %v1029_v54  ;;  %v1028_v49 = vmul.f32 %v1439_v63, %v1723_v2 }
 0x200   : > { %1060 = vst.msk [vmem:[%s1759_s20 + $0xf0] sm:$0xff] %vm644_vm3, %v1028_v49 }
 0x201 PF: > { %s15_s18 = sadd.s32 1, %s1446_s18  }
 0x202   : > { %p12_p4 = scmp.ge.s32.totalorder %s15_s18, 6  }
 0x204   :  { %14 = sbr.rel (!%p12_p4) target bundleno = 1 (0x1), region = 70 }

// kernel: scale_hyperprior_forward.17
= control target key start
LH: loop header
LB: loop body
LE: loop exit
PB: predicated region body
PF: predicated region fallthrough
CT: control target
= control target key end

     0   :  { %v1310_v0 = vmov 0   ;;  %vm304_vm0 = vcmask 588800   ;;  %vm353_vm1 = vcmask 1043456   ;;  %vm558_vm2 = vcmask 64512   ;;  %s1939_s1 = inlined_call_operand.vmem [shape: bf16[200,8], index: 1, kind: input, shape index: {}]   ;;  %s1940_s0 = inlined_call_operand.vmem [shape: bf16[256,200], index: 0, kind: input, shape index: {}]   ;;  %s1941_s3 = inlined_call_operand.vmem [shape: f32[8,8], index: 3, kind: input, shape index: {}]   ;;  %s1942_s2 = inlined_call_operand.vmem [shape: f32[1,8], index: 2, kind: input, shape index: {}]   ;;  %s1943_s4 = inlined_call_operand.vmem [shape: f32[1,8], index: 4, kind: input, shape index: {}]   ;;  %s1944_s5 = inlined_call_operand.vmem [shape: f32[256,8], index: 5, kind: output, shape index: {}]  }
   0x1   :  { %357 = vmatprep.subr.bf16.mxu0 %v1310_v0  ;;  %v1185_v1 = vld [vmem:[%s1939_s1 + $0x38] sm:$0xff]   ;;  %1158 = vmatprep.subr.bf16.mxu1 %v1310_v0  ;;  %v1186_v2 = vld [vmem:[%s1939_s1 + $0x30] sm:$0xff]   ;;  %v1187_v3 = vld [vmem:[%s1939_s1 + $0x28] sm:$0xff]  }
   0x2   :  { %358 = vmatpush1.bf16.msra.mxu0 %v1185_v1  ;;  %1171 = vmatpush1.bf16.msra.mxu1 %v1185_v1  ;;  %v1188_v4 = vld [vmem:[%s1939_s1 + $0x20] sm:$0xff]   ;;  %v1189_v6 = vld [vmem:[%s1939_s1 + $0x18] sm:$0xff]   ;;  %v1190_v7 = vld [vmem:[%s1939_s1 + $0x10] sm:$0xff]  }
   0x3   :  { %359 = vmatprep.subr.bf16.mxu0 %v1310_v0  ;;  %1159 = vmatprep.subr.bf16.mxu1 %v1310_v0  ;;  %v1200_v5 = vld [vmem:[%s1940_s0 + $0x4] ss:$8 sps:$4 sm:$0xff]   ;;  %v1193_v10 = vld [vmem:[%s1939_s1 + $0x60] ss:$0 sps:$4 sm:$0xff]   ;;  %v1194_v13 = vld [vmem:[%s1939_s1 + $0x58] sm:$0xff]  }
   0x4   :  { %1026 = vmatprep.mubr.msk.bf16.mxu0 %vm304_vm0, %v1200_v5  ;;  %v1191_v8 = vld [vmem:[%s1939_s1 + $0x8] sm:$0xff]   ;;  %v1192_v9 = vld [vmem:[%s1939_s1] sm:$0xff]   ;;  %v355_v12 = vsel %vm353_vm1, %v1193_v10, 0  ;;  %v1195_v14 = vld [vmem:[%s1939_s1 + $0x50] sm:$0xff]  }
   0x5   :  { %v1230_v11 = vld [vmem:[%s1940_s0 + $0xc4] ss:$8 sps:$4 sm:$0xff]   ;;  %v1198_v17 = vld [vmem:[%s1940_s0] ss:$8 sps:$4 sm:$0xff]   ;;  %v1201_v19 = vld [vmem:[%s1940_s0 + $0x14] ss:$8 sps:$4 sm:$0xff]  }
   0x6   :  { %360 = vmatpush1.bf16.msra.mxu0 %v1186_v2  ;;  %1172 = vmatpush1.bf16.msra.mxu1 %v1186_v2  ;;  %v1196_v15 = vld [vmem:[%s1939_s1 + $0x48] sm:$0xff]   ;;  %v1197_v16 = vld [vmem:[%s1939_s1 + $0x40] sm:$0xff]   ;;  %v1234_v20 = vld [vmem:[%s1940_s0 + $0xd4] ss:$8 sps:$4 sm:$0xff]  }
   0x7   :  { %361 = vmatprep.subr.bf16.mxu0 %v1310_v0  ;;  %1160 = vmatprep.subr.bf16.mxu1 %v1310_v0  ;;  %v1228_v18 = vld [vmem:[%s1940_s0 + $0xc0] ss:$8 sps:$4 sm:$0xff]   ;;  %v1203_v21 = vld [vmem:[%s1940_s0 + $0x10] ss:$8 sps:$4 sm:$0xff]   ;;  %v1204_v23 = vld [vmem:[%s1940_s0 + $0x24] ss:$8 sps:$4 sm:$0xff]  }
   0x8   :  { %1038 = vmatprep.mubr.msk.bf16.mxu1 %vm304_vm0, %v1230_v11  ;;  %v1236_v22 = vld [vmem:[%s1940_s0 + $0xd0] ss:$8 sps:$4 sm:$0xff]   ;;  %v1240_v24 = vld [vmem:[%s1940_s0 + $0xe4] ss:$8 sps:$4 sm:$0xff]   ;;  %v1206_v25 = vld [vmem:[%s1940_s0 + $0x20] ss:$8 sps:$4 sm:$0xff]  }
   0x9   :  { %v1242_v26 = vld [vmem:[%s1940_s0 + $0xe0] ss:$8 sps:$4 sm:$0xff]   ;;  %v1207_v27 = vld [vmem:[%s1940_s0 + $0x34] ss:$8 sps:$4 sm:$0xff]   ;;  %v1209_v29 = vld [vmem:[%s1940_s0 + $0x30] ss:$8 sps:$4 sm:$0xff]  }
   0xa   :  { %362 = vmatpush1.bf16.msra.mxu0 %v1187_v3  ;;  %1173 = vmatpush1.bf16.msra.mxu1 %v1187_v3  ;;  %v1243_v28 = vld [vmem:[%s1940_s0 + $0xf4] ss:$8 sps:$4 sm:$0xff]   ;;  %v1245_v30 = vld [vmem:[%s1940_s0 + $0xf0] ss:$8 sps:$4 sm:$0xff]   ;;  %v1210_v31 = vld [vmem:[%s1940_s0 + $0x44] ss:$8 sps:$4 sm:$0xff]  }
   0xb   :  { %363 = vmatprep.subr.bf16.mxu0 %v1310_v0  ;;  %1161 = vmatprep.subr.bf16.mxu1 %v1310_v0  ;;  %v1212_v32 = vld [vmem:[%s1940_s0 + $0x40] ss:$8 sps:$4 sm:$0xff]   ;;  %v1213_v33 = vld [vmem:[%s1940_s0 + $0x54] ss:$8 sps:$4 sm:$0xff]   ;;  %v1215_v34 = vld [vmem:[%s1940_s0 + $0x50] ss:$8 sps:$4 sm:$0xff]  }
   0xc   :  { %v1216_v35 = vld [vmem:[%s1940_s0 + $0x64] ss:$8 sps:$4 sm:$0xff]   ;;  %v1218_v36 = vld [vmem:[%s1940_s0 + $0x60] ss:$8 sps:$4 sm:$0xff]   ;;  %v1219_v37 = vld [vmem:[%s1940_s0 + $0x74] ss:$8 sps:$4 sm:$0xff]  }
   0xd   :  { %v1221_v38 = vld [vmem:[%s1940_s0 + $0x70] ss:$8 sps:$4 sm:$0xff]   ;;  %v1222_v39 = vld [vmem:[%s1940_s0 + $0x84] ss:$8 sps:$4 sm:$0xff]   ;;  %v1224_v40 = vld [vmem:[%s1940_s0 + $0x80] ss:$8 sps:$4 sm:$0xff]  }
   0xe   :  { %364 = vmatpush1.bf16.msra.mxu0 %v1188_v4  ;;  %1174 = vmatpush1.bf16.msra.mxu1 %v1188_v4  ;;  %v1225_v41 = vld [vmem:[%s1940_s0 + $0x94] ss:$8 sps:$4 sm:$0xff]   ;;  %v1227_v42 = vld [vmem:[%s1940_s0 + $0x90] ss:$8 sps:$4 sm:$0xff]   ;;  %v1231_v43 = vld [vmem:[%s1940_s0 + $0xa4] ss:$8 sps:$4 sm:$0xff]  }
   0xf   :  { %365 = vmatprep.subr.bf16.mxu0 %v1310_v0  ;;  %1162 = vmatprep.subr.bf16.mxu1 %v1310_v0  ;;  %v550_v44 = vld [vmem:[%s1941_s3] sm:$0xff]  ;;  %v1237_v46 = vld [vmem:[%s1940_s0 + $0xb4] ss:$8 sps:$4 sm:$0xff]   ;;  %v1239_v47 = vld [vmem:[%s1940_s0 + $0xb0] ss:$8 sps:$4 sm:$0xff]  }
  0x10   :  { %v1233_v45 = vld [vmem:[%s1940_s0 + $0xa0] ss:$8 sps:$4 sm:$0xff]  }
  0x11   :  { %v1524_v48 = vld [vmem:[%s1942_s2] ss:$0 sm:$0xff] }
  0x12   :  { %366 = vmatpush1.bf16.msra.mxu0 %v1189_v6  ;;  %1175 = vmatpush1.bf16.msra.mxu1 %v1189_v6 }
  0x13   :  { %367 = vmatprep.subr.bf16.mxu0 %v1310_v0  ;;  %1163 = vmatprep.subr.bf16.mxu1 %v1310_v0 }
  0x16   :  { %368 = vmatpush1.bf16.msra.mxu0 %v1190_v7  ;;  %1176 = vmatpush1.bf16.msra.mxu1 %v1190_v7 }
  0x17   :  { %369 = vmatprep.subr.bf16.mxu0 %v1310_v0  ;;  %1164 = vmatprep.subr.bf16.mxu1 %v1310_v0 }
  0x1a   :  { %370 = vmatpush1.bf16.msra.mxu0 %v1191_v8  ;;  %1177 = vmatpush1.bf16.msra.mxu1 %v1191_v8 }
  0x1b   :  { %371 = vmatprep.subr.bf16.mxu0 %v1310_v0  ;;  %1165 = vmatprep.subr.bf16.mxu1 %v1310_v0 }
  0x1e   :  { %372 = vmatpush1.bf16.msra.mxu0 %v1192_v9  ;;  %1178 = vmatpush1.bf16.msra.mxu1 %v1192_v9 }
  0x1f   :  { %379 = vmatprep.subr.bf16.mxu0 %v1310_v0  ;;  %1166 = vmatprep.subr.bf16.mxu1 %v1310_v0 }
  0x22   :  { %380 = vmatpush2.bf16.msra.mxu0 %v355_v12  ;;  %1179 = vmatpush2.bf16.msra.mxu1 %v355_v12 }
  0x23   :  { %381 = vmatprep.subr.bf16.mxu0 %v1310_v0  ;;  %1167 = vmatprep.subr.bf16.mxu1 %v1310_v0 }
  0x26   :  { %382 = vmatpush2.bf16.msra.mxu0 %v1194_v13  ;;  %1180 = vmatpush2.bf16.msra.mxu1 %v1194_v13 }
  0x27   :  { %383 = vmatprep.subr.bf16.mxu0 %v1310_v0  ;;  %1168 = vmatprep.subr.bf16.mxu1 %v1310_v0 }
  0x2a   :  { %384 = vmatpush2.bf16.msra.mxu0 %v1195_v14  ;;  %1181 = vmatpush2.bf16.msra.mxu1 %v1195_v14 }
  0x2b   :  { %385 = vmatprep.subr.bf16.mxu0 %v1310_v0  ;;  %1169 = vmatprep.subr.bf16.mxu1 %v1310_v0 }
  0x2e   :  { %386 = vmatpush2.bf16.msra.mxu0 %v1196_v15  ;;  %1182 = vmatpush2.bf16.msra.mxu1 %v1196_v15 }
  0x2f   :  { %387 = vmatprep.subr.bf16.mxu0 %v1310_v0  ;;  %1170 = vmatprep.subr.bf16.mxu1 %v1310_v0 }
  0x32   :  { %388 = vmatpush2.bf16.msra.mxu0 %v1197_v16  ;;  %1183 = vmatpush2.bf16.msra.mxu1 %v1197_v16 }
  0x33   :  { %1108 = vmatprep.subr.mxu1 %v550_v44 }
  0x35   :  { %390 = vmatmul.mubr.bf16.vlgmr.msra.gmra.mxu0 %v1198_v17  ;;  %486 = vmatmul.mubr.bf16.vlgmr.msra.gmra.mxu1 %v1228_v18 }
  0x36   :  { %1027 = vmatprep.mubr.msk.bf16.mxu0 %vm304_vm0, %v1201_v19  ;;  %1039 = vmatprep.mubr.msk.bf16.mxu1 %vm304_vm0, %v1234_v20 }
  0x37   :  { %1109 = vmatpush3.msra.mxu1 %v550_v44 }
  0x3d   :  { %398 = vmatmul.mubr.bf16.gmra.mxu0 %v1203_v21  ;;  %494 = vmatmul.mubr.bf16.gmra.mxu1 %v1236_v22 }
  0x3e   :  { %1028 = vmatprep.mubr.msk.bf16.mxu0 %vm304_vm0, %v1204_v23  ;;  %1040 = vmatprep.mubr.msk.bf16.mxu1 %vm304_vm0, %v1240_v24 }
  0x45   :  { %406 = vmatmul.mubr.bf16.gmra.mxu0 %v1206_v25  ;;  %502 = vmatmul.mubr.bf16.gmra.mxu1 %v1242_v26 }
  0x46   :  { %1029 = vmatprep.mubr.msk.bf16.mxu0 %vm304_vm0, %v1207_v27  ;;  %1041 = vmatprep.mubr.msk.bf16.mxu1 %vm304_vm0, %v1243_v28 }
  0x4d   :  { %414 = vmatmul.mubr.bf16.gmra.mxu0 %v1209_v29  ;;  %510 = vmatmul.mubr.bf16.gmra.mxu1 %v1245_v30 }
  0x4e   :  { %1030 = vmatprep.mubr.msk.bf16.mxu0 %vm304_vm0, %v1210_v31 }
  0x55   :  { %422 = vmatmul.mubr.bf16.gmra.mxu0 %v1212_v32 }
  0x56   :  { %1031 = vmatprep.mubr.msk.bf16.mxu0 %vm304_vm0, %v1213_v33 }
  0x5d   :  { %430 = vmatmul.mubr.bf16.gmra.mxu0 %v1215_v34 }
  0x5e   :  { %1032 = vmatprep.mubr.msk.bf16.mxu0 %vm304_vm0, %v1216_v35 }
  0x65   :  { %438 = vmatmul.mubr.bf16.gmra.mxu0 %v1218_v36 }
  0x66   :  { %1033 = vmatprep.mubr.msk.bf16.mxu0 %vm304_vm0, %v1219_v37 }
  0x6d   :  { %446 = vmatmul.mubr.bf16.gmra.mxu0 %v1221_v38 }
  0x6e   :  { %1034 = vmatprep.mubr.msk.bf16.mxu0 %vm304_vm0, %v1222_v39 }
  0x75   :  { %454 = vmatmul.mubr.bf16.gmra.mxu0 %v1224_v40 }
  0x76   :  { %1035 = vmatprep.mubr.msk.bf16.mxu0 %vm304_vm0, %v1225_v41 }
  0x7d   :  { %462 = vmatmul.mubr.bf16.gmra.mxu0 %v1227_v42 }
  0x7e   :  { %1036 = vmatprep.mubr.msk.bf16.mxu0 %vm304_vm0, %v1231_v43 }
  0x85   :  { %470 = vmatmul.mubr.bf16.gmra.mxu0 %v1233_v45 }
  0x86   :  { %1037 = vmatprep.mubr.msk.bf16.mxu0 %vm304_vm0, %v1237_v46 }
  0x8d   :  { %478 = vmatmul.mubr.bf16.gmra.mxu0 %v1239_v47 }
  0xf5   :  { %v391_v49 = vpop.f32.mrf.mxu0  ;;  %v1526_v50 = vpop.f32.mrf.mxu1 }
  0xf6   :  { %v1529_v51 = vadd.f32 %v1524_v48, %v391_v49 }
  0xf7   :  { %v393_v52 = vpop.f32.mrf.mxu0  ;;  %v489_v53 = vpop.f32.mrf.mxu1 }
  0xf8   :  { %v518_v54 = vmul.f32 %v1529_v51, %v1529_v51 }
  0xf9   :  { %v394_v55 = vpop.f32.mrf.mxu0  ;;  %v1533_v56 = vpop.f32.mrf.mxu1 }
  0xfa   :  { %v1536_v57 = vadd.f32 %v1524_v48, %v394_v55  ;;  %1110 = vmatprep.mubr.msk.f32.mxu1 %vm558_vm2, %v518_v54 }
  0xfb   :  { %v396_v58 = vpop.f32.mrf.mxu0  ;;  %v492_v59 = vpop.f32.mrf.mxu1 }
  0xfc   :  { %v519_v60 = vmul.f32 %v1536_v57, %v1536_v57 }
  0xfd   :  { %v399_v61 = vpop.f32.mrf.mxu0  ;;  %v1541_v62 = vpop.f32.mrf.mxu1 }
  0xfe   :  { %v1544_v63 = vadd.f32 %v1524_v48, %v399_v61  ;;  %1111 = vmatmul.mubr.msk.f32.vlgmr.msra.gmra.mxu1 %vm558_vm2, %v519_v60 }
  0xff   :  { %v401_v0 = vpop.f32.mrf.mxu0  ;;  %v497_v1 = vpop.f32.mrf.mxu1 }
 0x100   :  { %v520_v2 = vmul.f32 %v1544_v63, %v1544_v63 }
 0x101   :  { %v402_v3 = vpop.f32.mrf.mxu0  ;;  %v1549_v4 = vpop.f32.mrf.mxu1 }
 0x102   :  { %v1552_v5 = vadd.f32 %v1524_v48, %v402_v3  ;;  %1113 = vmatprep.mubr.msk.f32.mxu1 %vm558_vm2, %v520_v2 }
 0x103   :  { %v404_v6 = vpop.f32.mrf.mxu0  ;;  %v500_v7 = vpop.f32.mrf.mxu1 }
 0x104   :  { %v521_v8 = vmul.f32 %v1552_v5, %v1552_v5 }
 0x105   :  { %v407_v9 = vpop.f32.mrf.mxu0  ;;  %v1557_v10 = vpop.f32.mrf.mxu1 }
 0x106   :  { %v1560_v11 = vadd.f32 %v1524_v48, %v407_v9  ;;  %1114 = vmatmul.mubr.msk.f32.gmra.mxu1 %vm558_vm2, %v521_v8 }
 0x107   :  { %v409_v12 = vpop.f32.mrf.mxu0  ;;  %v505_v13 = vpop.f32.mrf.mxu1 }
 0x108   :  { %v522_v14 = vmul.f32 %v1560_v11, %v1560_v11 }
 0x109   :  { %v410_v15 = vpop.f32.mrf.mxu0  ;;  %v1565_v16 = vpop.f32.mrf.mxu1 }
 0x10a   :  { %v1568_v17 = vadd.f32 %v1524_v48, %v410_v15  ;;  %1116 = vmatprep.mubr.msk.f32.mxu1 %vm558_vm2, %v522_v14 }
 0x10b   :  { %v412_v18 = vpop.f32.mrf.mxu0  ;;  %v508_v19 = vpop.f32.mrf.mxu1 }
 0x10c   :  { %v523_v20 = vmul.f32 %v1568_v17, %v1568_v17 }
 0x10d   :  { %v415_v21 = vpop.f32.mrf.mxu0  ;;  %v1573_v22 = vpop.f32.mrf.mxu1 }
 0x10e   :  { %v1576_v23 = vadd.f32 %v1524_v48, %v415_v21  ;;  %1117 = vmatmul.mubr.msk.f32.gmra.mxu1 %vm558_vm2, %v523_v20 }
 0x10f   :  { %v417_v24 = vpop.f32.mrf.mxu0  ;;  %v513_v25 = vpop.f32.mrf.mxu1 }
 0x110   :  { %v524_v26 = vmul.f32 %v1576_v23, %v1576_v23 }
 0x111   :  { %v418_v27 = vpop.f32.mrf.mxu0  ;;  %v1581_v28 = vpop.f32.mrf.mxu1 }
 0x112   :  { %v1584_v29 = vadd.f32 %v1524_v48, %v418_v27  ;;  %1119 = vmatprep.mubr.msk.f32.mxu1 %vm558_vm2, %v524_v26 }
 0x113   :  { %v420_v30 = vpop.f32.mrf.mxu0  ;;  %v516_v31 = vpop.f32.mrf.mxu1 }
 0x114   :  { %v525_v32 = vmul.f32 %v1584_v29, %v1584_v29 }
 0x115   :  { %v423_v33 = vpop.f32.mrf.mxu0 }
 0x116   :  { %v1590_v34 = vadd.f32 %v1524_v48, %v423_v33  ;;  %1120 = vmatmul.mubr.msk.f32.gmra.mxu1 %vm558_vm2, %v525_v32 }
 0x117   :  { %v425_v35 = vpop.f32.mrf.mxu0 }
 0x118   :  { %v526_v36 = vmul.f32 %v1590_v34, %v1590_v34 }
 0x119   :  { %v426_v37 = vpop.f32.mrf.mxu0 }
 0x11a   :  { %v1596_v38 = vadd.f32 %v1524_v48, %v426_v37  ;;  %1122 = vmatprep.mubr.msk.f32.mxu1 %vm558_vm2, %v526_v36 }
 0x11b   :  { %v428_v39 = vpop.f32.mrf.mxu0 }
 0x11c   :  { %v527_v40 = vmul.f32 %v1596_v38, %v1596_v38 }
 0x11d   :  { %v431_v41 = vpop.f32.mrf.mxu0 }
 0x11e   :  { %v1602_v42 = vadd.f32 %v1524_v48, %v431_v41  ;;  %1123 = vmatmul.mubr.msk.f32.gmra.mxu1 %vm558_vm2, %v527_v40 }
 0x11f   :  { %v433_v43 = vpop.f32.mrf.mxu0 }
 0x120   :  { %v528_v44 = vmul.f32 %v1602_v42, %v1602_v42 }
 0x121   :  { %v434_v45 = vpop.f32.mrf.mxu0 }
 0x122   :  { %v1608_v46 = vadd.f32 %v1524_v48, %v434_v45  ;;  %1125 = vmatprep.mubr.msk.f32.mxu1 %vm558_vm2, %v528_v44 }
 0x123   :  { %v436_v47 = vpop.f32.mrf.mxu0 }
 0x124   :  { %v529_v49 = vmul.f32 %v1608_v46, %v1608_v46 }
 0x125   :  { %v439_v52 = vpop.f32.mrf.mxu0 }
 0x126   :  { %v1614_v53 = vadd.f32 %v1524_v48, %v439_v52  ;;  %1126 = vmatmul.mubr.msk.f32.gmra.mxu1 %vm558_vm2, %v529_v49 }
 0x127   :  { %v441_v54 = vpop.f32.mrf.mxu0 }
 0x128   :  { %v530_v55 = vmul.f32 %v1614_v53, %v1614_v53  ;;  %v1681_v54 = vadd.f32 %v1524_v48, %v1526_v50  ;;  %v1697_v50 = vadd.f32 %v1524_v48, %v1541_v62  ;;  %v1716_v62 = vadd.f32 %v1524_v48, %v1573_v22 }
 0x129   :  { %v442_v58 = vpop.f32.mrf.mxu0 }
 0x12a   :  { %v1620_v59 = vadd.f32 %v1524_v48, %v442_v58  ;;  %1128 = vmatprep.mubr.msk.f32.mxu1 %vm558_vm2, %v530_v55 }
 0x12b   :  { %v444_v60 = vpop.f32.mrf.mxu0 }
 0x12c   :  { %v531_v61 = vmul.f32 %v1620_v59, %v1620_v59 }
 0x12d   :  { %v447_v0 = vpop.f32.mrf.mxu0 }
 0x12e   :  { %v1626_v1 = vadd.f32 %v1524_v48, %v447_v0  ;;  %1129 = vmatmul.mubr.msk.f32.gmra.mxu1 %vm558_vm2, %v531_v61  ;;  %v1689_v61 = vadd.f32 %v1524_v48, %v1533_v56  ;;  %v1705_v56 = vadd.f32 %v1524_v48, %v1549_v4  ;;  %v1723_v4 = vadd.f32 %v1524_v48, %v1565_v16 }
 0x12f   :  { %v449_v2 = vpop.f32.mrf.mxu0 }
 0x130   :  { %v532_v3 = vmul.f32 %v1626_v1, %v1626_v1  ;;  %v542_v2 = vmul.f32 %v1681_v54, %v1681_v54  ;;  %v547_v22 = vmul.f32 %v1723_v4, %v1723_v4 }
 0x131   :  { %v450_v6 = vpop.f32.mrf.mxu0 }
 0x132   :  { %v1632_v7 = vadd.f32 %v1524_v48, %v450_v6  ;;  %1131 = vmatprep.mubr.msk.f32.mxu1 %vm558_vm2, %v532_v3  ;;  %v543_v3 = vmul.f32 %v1689_v61, %v1689_v61  ;;  %v544_v6 = vmul.f32 %v1697_v50, %v1697_v50 }
 0x133   :  { %v452_v8 = vpop.f32.mrf.mxu0 }
 0x134   :  { %v533_v9 = vmul.f32 %v1632_v7, %v1632_v7  ;;  %v1711_v8 = vadd.f32 %v1524_v48, %v1557_v10  ;;  %v548_v10 = vmul.f32 %v1716_v62, %v1716_v62 }
 0x135   :  { %v455_v12 = vpop.f32.mrf.mxu0 }
 0x136   :  { %v1638_v13 = vadd.f32 %v1524_v48, %v455_v12  ;;  %1132 = vmatmul.mubr.msk.f32.gmra.mxu1 %vm558_vm2, %v533_v9  ;;  %v545_v9 = vmul.f32 %v1705_v56, %v1705_v56  ;;  %v546_v12 = vmul.f32 %v1711_v8, %v1711_v8 }
 0x137   :  { %v457_v14 = vpop.f32.mrf.mxu0 }
 0x138   :  { %v534_v15 = vmul.f32 %v1638_v13, %v1638_v13  ;;  %v1735_v14 = vadd.f32 %v1524_v48, %v1581_v28 }
 0x139   :  { %v458_v18 = vpop.f32.mrf.mxu0 }
 0x13a   :  { %v1644_v19 = vadd.f32 %v1524_v48, %v458_v18  ;;  %1134 = vmatprep.mubr.msk.f32.mxu1 %vm558_vm2, %v534_v15  ;;  %v549_v16 = vmul.f32 %v1735_v14, %v1735_v14  ;;  %v1745_v15 = vld [vmem:[%s1943_s4] ss:$0 sm:$0xff] }
 0x13b   :  { %v460_v20 = vpop.f32.mrf.mxu0 }
 0x13c   :  { %v535_v21 = vmul.f32 %v1644_v19, %v1644_v19 }
 0x13d   :  { %v463_v24 = vpop.f32.mrf.mxu0 }
 0x13e   :  { %v1650_v25 = vadd.f32 %v1524_v48, %v463_v24  ;;  %1135 = vmatmul.mubr.msk.f32.gmra.mxu1 %vm558_vm2, %v535_v21 }
 0x13f   :  { %v465_v26 = vpop.f32.mrf.mxu0 }
 0x140   :  { %v536_v27 = vmul.f32 %v1650_v25, %v1650_v25 }
 0x141   :  { %v466_v30 = vpop.f32.mrf.mxu0 }
 0x142   :  { %v1656_v31 = vadd.f32 %v1524_v48, %v466_v30  ;;  %1137 = vmatprep.mubr.msk.f32.mxu1 %vm558_vm2, %v536_v27 }
 0x143   :  { %v468_v32 = vpop.f32.mrf.mxu0 }
 0x144   :  { %v537_v33 = vmul.f32 %v1656_v31, %v1656_v31 }
 0x145   :  { %v471_v35 = vpop.f32.mrf.mxu0 }
 0x146   :  { %v1662_v36 = vadd.f32 %v1524_v48, %v471_v35  ;;  %1138 = vmatmul.mubr.msk.f32.gmra.mxu1 %vm558_vm2, %v537_v33 }
 0x147   :  { %v473_v37 = vpop.f32.mrf.mxu0 }
 0x148   :  { %v538_v39 = vmul.f32 %v1662_v36, %v1662_v36 }
 0x149   :  { %v474_v40 = vpop.f32.mrf.mxu0 }
 0x14a   :  { %v1668_v41 = vadd.f32 %v1524_v48, %v474_v40  ;;  %1140 = vmatprep.mubr.msk.f32.mxu1 %vm558_vm2, %v538_v39 }
 0x14b   :  { %v476_v43 = vpop.f32.mrf.mxu0 }
 0x14c   :  { %v539_v44 = vmul.f32 %v1668_v41, %v1668_v41 }
 0x14d   :  { %v479_v45 = vpop.f32.mrf.mxu0 }
 0x14e   :  { %v1674_v47 = vadd.f32 %v1524_v48, %v479_v45  ;;  %1141 = vmatmul.mubr.msk.f32.gmra.mxu1 %vm558_vm2, %v539_v44 }
 0x14f   :  { %v481_v49 = vpop.f32.mrf.mxu0 }
 0x150   :  { %v540_v52 = vmul.f32 %v1674_v47, %v1674_v47 }
 0x151   :  { %v482_v55 = vpop.f32.mrf.mxu0 }
 0x152   :  { %v1684_v58 = vadd.f32 %v1524_v48, %v482_v55  ;;  %1143 = vmatprep.mubr.msk.f32.mxu1 %vm558_vm2, %v540_v52 }
 0x153   :  { %v484_v60 = vpop.f32.mrf.mxu0 }
 0x154   :  { %v541_v0 = vmul.f32 %v1684_v58, %v1684_v58 }
 0x156   :  { %1144 = vmatmul.mubr.msk.f32.gmra.mxu1 %vm558_vm2, %v541_v0 }
 0x157   :  { %1146 = vmatprep.mubr.msk.f32.mxu1 %vm558_vm2, %v542_v2 }
 0x15a   :  { %1147 = vmatmul.mubr.msk.f32.gmra.mxu1 %vm558_vm2, %v543_v3 }
 0x15b   :  { %1149 = vmatprep.mubr.msk.f32.mxu1 %vm558_vm2, %v544_v6 }
 0x15e   :  { %1150 = vmatmul.mubr.msk.f32.gmra.mxu1 %vm558_vm2, %v545_v9 }
 0x15f   :  { %1152 = vmatprep.mubr.msk.f32.mxu1 %vm558_vm2, %v546_v12 }
 0x162   :  { %1153 = vmatmul.mubr.msk.f32.gmra.mxu1 %vm558_vm2, %v547_v22 }
 0x163   :  { %1155 = vmatprep.mubr.msk.f32.mxu1 %vm558_vm2, %v548_v10 }
 0x166   :  { %1156 = vmatmul.mubr.msk.f32.gmra.mxu1 %vm558_vm2, %v549_v16 }
 0x1be   :  { %v1112_v18 = vpop.f32.mrf.mxu1 }
 0x1bf   :  { %v727_v20 = vadd.f32 %v1112_v18, %v1745_v15 }
 0x1c0   :  { %v721_v21 = vpop.f32.mrf.mxu1 }
 0x1c1   :  { %1246 = vrsqrt.f32 %v727_v20  ;;  %v722_v48 = vadd.f32 %v1745_v15, %v721_v21 }
 0x1c3   :  { %1248 = vrsqrt.f32 %v722_v48 }
 0x1c6   :  { %v1115_v28 = vpop.f32.mrf.mxu1 }
 0x1c7   :  { %v737_v24 = vadd.f32 %v1115_v28, %v1745_v15 }
 0x1c8   :  { %v731_v26 = vpop.f32.mrf.mxu1 }
 0x1c9   :  { %1250 = vrsqrt.f32 %v737_v24  ;;  %v732_v27 = vadd.f32 %v1745_v15, %v731_v26 }
 0x1cb   :  { %1252 = vrsqrt.f32 %v732_v27 }
 0x1ce   :  { %v1247_v30 = vpop.eup %1246  ;;  %v1118_v32 = vpop.f32.mrf.mxu1 }
 0x1cf   :  { %v913_v33 = vmul.f32 %v1247_v30, %v1536_v57  ;;  %v747_v35 = vadd.f32 %v1118_v32, %v1745_v15 }
 0x1d0   :  { %v1249_v37 = vpop.eup %1248  ;;  %v741_v39 = vpop.f32.mrf.mxu1 }
 0x1d1   :  { %945 = vst.msk [vmem:[%s1944_s5 + $0x8] sm:$0xff] %vm558_vm2, %v913_v33  ;;  %v912_v40 = vmul.f32 %v1249_v37, %v1529_v51  ;;  %1254 = vrsqrt.f32 %v747_v35  ;;  %v742_v43 = vadd.f32 %v1745_v15, %v741_v39 }
 0x1d3   :  { %944 = vst.msk [vmem:[%s1944_s5] sm:$0xff] %vm558_vm2, %v912_v40  ;;  %1256 = vrsqrt.f32 %v742_v43 }
 0x1d6   :  { %v1251_v57 = vpop.eup %1250  ;;  %v1121_v44 = vpop.f32.mrf.mxu1 }
 0x1d7   :  { %v915_v45 = vmul.f32 %v1251_v57, %v1552_v5  ;;  %v757_v49 = vadd.f32 %v1121_v44, %v1745_v15 }
 0x1d8   :  { %v1253_v52 = vpop.eup %1252  ;;  %v751_v55 = vpop.f32.mrf.mxu1 }
 0x1d9   :  { %947 = vst.msk [vmem:[%s1944_s5 + $0x18] sm:$0xff] %vm558_vm2, %v915_v45  ;;  %v914_v51 = vmul.f32 %v1253_v52, %v1544_v63  ;;  %1258 = vrsqrt.f32 %v757_v49  ;;  %v752_v60 = vadd.f32 %v1745_v15, %v751_v55 }
 0x1db   :  { %946 = vst.msk [vmem:[%s1944_s5 + $0x10] sm:$0xff] %vm558_vm2, %v914_v51  ;;  %1260 = vrsqrt.f32 %v752_v60 }
 0x1de   :  { %v1255_v5 = vpop.eup %1254  ;;  %v1124_v0 = vpop.f32.mrf.mxu1 }
 0x1df   :  { %v917_v2 = vmul.f32 %v1255_v5, %v1568_v17  ;;  %v767_v3 = vadd.f32 %v1124_v0, %v1745_v15 }
 0x1e0   :  { %v1257_v6 = vpop.eup %1256  ;;  %v761_v9 = vpop.f32.mrf.mxu1 }
 0x1e1   :  { %949 = vst.msk [vmem:[%s1944_s5 + $0x28] sm:$0xff] %vm558_vm2, %v917_v2  ;;  %v916_v63 = vmul.f32 %v1257_v6, %v1560_v11  ;;  %1262 = vrsqrt.f32 %v767_v3  ;;  %v762_v12 = vadd.f32 %v1745_v15, %v761_v9 }
 0x1e3   :  { %948 = vst.msk [vmem:[%s1944_s5 + $0x20] sm:$0xff] %vm558_vm2, %v916_v63  ;;  %1264 = vrsqrt.f32 %v762_v12 }
 0x1e6   :  { %v1259_v17 = vpop.eup %1258  ;;  %v1127_v10 = vpop.f32.mrf.mxu1 }
 0x1e7   :  { %v919_v22 = vmul.f32 %v1259_v17, %v1584_v29  ;;  %v777_v16 = vadd.f32 %v1127_v10, %v1745_v15 }
 0x1e8   :  { %v1261_v18 = vpop.eup %1260  ;;  %v771_v20 = vpop.f32.mrf.mxu1 }
 0x1e9   :  { %951 = vst.msk [vmem:[%s1944_s5 + $0x38] sm:$0xff] %vm558_vm2, %v919_v22  ;;  %v918_v11 = vmul.f32 %v1261_v18, %v1576_v23  ;;  %1266 = vrsqrt.f32 %v777_v16  ;;  %v772_v21 = vadd.f32 %v1745_v15, %v771_v20 }
 0x1eb   :  { %950 = vst.msk [vmem:[%s1944_s5 + $0x30] sm:$0xff] %vm558_vm2, %v918_v11  ;;  %1268 = vrsqrt.f32 %v772_v21 }
 0x1ee   :  { %v1263_v29 = vpop.eup %1262  ;;  %v1130_v48 = vpop.f32.mrf.mxu1 }
 0x1ef   :  { %v921_v28 = vmul.f32 %v1263_v29, %v1596_v38  ;;  %v787_v24 = vadd.f32 %v1130_v48, %v1745_v15 }
 0x1f0   :  { %v1265_v26 = vpop.eup %1264  ;;  %v781_v27 = vpop.f32.mrf.mxu1 }
 0x1f1   :  { %953 = vst.msk [vmem:[%s1944_s5 + $0x48] sm:$0xff] %vm558_vm2, %v921_v28  ;;  %v920_v23 = vmul.f32 %v1265_v26, %v1590_v34  ;;  %1270 = vrsqrt.f32 %v787_v24  ;;  %v782_v30 = vadd.f32 %v1745_v15, %v781_v27 }
 0x1f3   :  { %952 = vst.msk [vmem:[%s1944_s5 + $0x40] sm:$0xff] %vm558_vm2, %v920_v23  ;;  %1272 = vrsqrt.f32 %v782_v30 }
 0x1f6   :  { %v1267_v38 = vpop.eup %1266  ;;  %v1133_v32 = vpop.f32.mrf.mxu1 }
 0x1f7   :  { %v923_v33 = vmul.f32 %v1267_v38, %v1608_v46  ;;  %v797_v35 = vadd.f32 %v1133_v32, %v1745_v15 }
 0x1f8   :  { %v1269_v37 = vpop.eup %1268  ;;  %v791_v39 = vpop.f32.mrf.mxu1 }
 0x1f9   :  { %955 = vst.msk [vmem:[%s1944_s5 + $0x58] sm:$0xff] %vm558_vm2, %v923_v33  ;;  %v922_v34 = vmul.f32 %v1269_v37, %v1602_v42  ;;  %1274 = vrsqrt.f32 %v797_v35  ;;  %v792_v40 = vadd.f32 %v1745_v15, %v791_v39 }
 0x1fb   :  { %954 = vst.msk [vmem:[%s1944_s5 + $0x50] sm:$0xff] %vm558_vm2, %v922_v34  ;;  %1276 = vrsqrt.f32 %v792_v40 }
 0x1fe   :  { %v1271_v46 = vpop.eup %1270  ;;  %v1136_v43 = vpop.f32.mrf.mxu1 }
 0x1ff   :  { %v925_v57 = vmul.f32 %v1271_v46, %v1620_v59  ;;  %v807_v44 = vadd.f32 %v1136_v43, %v1745_v15 }
 0x200   :  { %v1273_v45 = vpop.eup %1272  ;;  %v801_v49 = vpop.f32.mrf.mxu1 }
 0x201   :  { %957 = vst.msk [vmem:[%s1944_s5 + $0x68] sm:$0xff] %vm558_vm2, %v925_v57  ;;  %v924_v42 = vmul.f32 %v1273_v45, %v1614_v53  ;;  %1278 = vrsqrt.f32 %v807_v44  ;;  %v802_v52 = vadd.f32 %v1745_v15, %v801_v49 }
 0x203   :  { %956 = vst.msk [vmem:[%s1944_s5 + $0x60] sm:$0xff] %vm558_vm2, %v924_v42  ;;  %1280 = vrsqrt.f32 %v802_v52 }
 0x206   :  { %v1275_v59 = vpop.eup %1274  ;;  %v1139_v55 = vpop.f32.mrf.mxu1 }
 0x207   :  { %v927_v51 = vmul.f32 %v1275_v59, %v1632_v7  ;;  %v817_v60 = vadd.f32 %v1139_v55, %v1745_v15 }
 0x208   :  { %v1277_v5 = vpop.eup %1276  ;;  %v811_v0 = vpop.f32.mrf.mxu1 }
 0x209   :  { %959 = vst.msk [vmem:[%s1944_s5 + $0x78] sm:$0xff] %vm558_vm2, %v927_v51  ;;  %v926_v53 = vmul.f32 %v1277_v5, %v1626_v1  ;;  %1282 = vrsqrt.f32 %v817_v60  ;;  %v812_v2 = vadd.f32 %v1745_v15, %v811_v0 }
 0x20b   :  { %958 = vst.msk [vmem:[%s1944_s5 + $0x70] sm:$0xff] %vm558_vm2, %v926_v53  ;;  %1284 = vrsqrt.f32 %v812_v2 }
 0x20e   :  { %v1279_v7 = vpop.eup %1278  ;;  %v1142_v3 = vpop.f32.mrf.mxu1 }
 0x20f   :  { %v929_v6 = vmul.f32 %v1279_v7, %v1644_v19  ;;  %v827_v9 = vadd.f32 %v1142_v3, %v1745_v15 }
 0x210   :  { %v1281_v63 = vpop.eup %1280  ;;  %v821_v12 = vpop.f32.mrf.mxu1 }
 0x211   :  { %961 = vst.msk [vmem:[%s1944_s5 + $0x88] sm:$0xff] %vm558_vm2, %v929_v6  ;;  %v928_v1 = vmul.f32 %v1281_v63, %v1638_v13  ;;  %1286 = vrsqrt.f32 %v827_v9  ;;  %v822_v17 = vadd.f32 %v1745_v15, %v821_v12 }
 0x213   :  { %960 = vst.msk [vmem:[%s1944_s5 + $0x80] sm:$0xff] %vm558_vm2, %v928_v1  ;;  %1288 = vrsqrt.f32 %v822_v17 }
 0x216   :  { %v1283_v19 = vpop.eup %1282  ;;  %v1145_v10 = vpop.f32.mrf.mxu1 }
 0x217   :  { %v931_v22 = vmul.f32 %v1283_v19, %v1656_v31  ;;  %v837_v16 = vadd.f32 %v1145_v10, %v1745_v15 }
 0x218   :  { %v1285_v18 = vpop.eup %1284  ;;  %v831_v20 = vpop.f32.mrf.mxu1 }
 0x219   :  { %963 = vst.msk [vmem:[%s1944_s5 + $0x98] sm:$0xff] %vm558_vm2, %v931_v22  ;;  %v930_v13 = vmul.f32 %v1285_v18, %v1650_v25  ;;  %1290 = vrsqrt.f32 %v837_v16  ;;  %v832_v11 = vadd.f32 %v1745_v15, %v831_v20 }
 0x21a   :  { %v1148_v21 = vpop.f32.mrf.mxu1 }
 0x21b   :  { %962 = vst.msk [vmem:[%s1944_s5 + $0x90] sm:$0xff] %vm558_vm2, %v930_v13  ;;  %1292 = vrsqrt.f32 %v832_v11  ;;  %v847_v31 = vadd.f32 %v1148_v21, %v1745_v15 }
 0x21c   :  { %v841_v29 = vpop.f32.mrf.mxu1 }
 0x21d   :  { %1294 = vrsqrt.f32 %v847_v31  ;;  %v842_v48 = vadd.f32 %v1745_v15, %v841_v29 }
 0x21e   :  { %v1287_v28 = vpop.eup %1286  ;;  %v1151_v24 = vpop.f32.mrf.mxu1 }
 0x21f   :  { %v933_v25 = vmul.f32 %v1287_v28, %v1668_v41  ;;  %1296 = vrsqrt.f32 %v842_v48  ;;  %v857_v26 = vadd.f32 %v1151_v24, %v1745_v15 }
 0x220   :  { %v1289_v27 = vpop.eup %1288  ;;  %v851_v23 = vpop.f32.mrf.mxu1 }
 0x221   :  { %965 = vst.msk [vmem:[%s1944_s5 + $0xa8] sm:$0xff] %vm558_vm2, %v933_v25  ;;  %v932_v30 = vmul.f32 %v1289_v27, %v1662_v36  ;;  %1298 = vrsqrt.f32 %v857_v26  ;;  %v852_v38 = vadd.f32 %v1745_v15, %v851_v23 }
 0x222   :  { %v1154_v32 = vpop.f32.mrf.mxu1 }
 0x223   :  { %964 = vst.msk [vmem:[%s1944_s5 + $0xa0] sm:$0xff] %vm558_vm2, %v932_v30  ;;  %1300 = vrsqrt.f32 %v852_v38  ;;  %v867_v41 = vadd.f32 %v1154_v32, %v1745_v15 }
 0x224   :  { %v861_v33 = vpop.f32.mrf.mxu1 }
 0x225   :  { %1302 = vrsqrt.f32 %v867_v41  ;;  %v862_v35 = vadd.f32 %v1745_v15, %v861_v33 }
 0x226   :  { %v1291_v37 = vpop.eup %1290  ;;  %v1157_v39 = vpop.f32.mrf.mxu1 }
 0x227   :  { %v935_v36 = vmul.f32 %v1291_v37, %v1684_v58  ;;  %1304 = vrsqrt.f32 %v862_v35  ;;  %v877_v34 = vadd.f32 %v1157_v39, %v1745_v15 }
 0x228   :  { %v1293_v40 = vpop.eup %1292  ;;  %v871_v46 = vpop.f32.mrf.mxu1 }
 0x229   :  { %967 = vst.msk [vmem:[%s1944_s5 + $0xb8] sm:$0xff] %vm558_vm2, %v935_v36  ;;  %v934_v43 = vmul.f32 %v1293_v40, %v1674_v47  ;;  %1306 = vrsqrt.f32 %v877_v34  ;;  %v872_v57 = vadd.f32 %v1745_v15, %v871_v46 }
 0x22a   :  { %v1295_v44 = vpop.eup %1294 }
 0x22b   :  { %966 = vst.msk [vmem:[%s1944_s5 + $0xb0] sm:$0xff] %vm558_vm2, %v934_v43  ;;  %v937_v58 = vmul.f32 %v1295_v44, %v1689_v61  ;;  %1308 = vrsqrt.f32 %v872_v57 }
 0x22c   :  { %v1297_v45 = vpop.eup %1296 }
 0x22d   :  { %969 = vst.msk [vmem:[%s1944_s5 + $0xc8] sm:$0xff] %vm558_vm2, %v937_v58  ;;  %v936_v47 = vmul.f32 %v1297_v45, %v1681_v54 }
 0x22e   :  { %v1299_v49 = vpop.eup %1298 }
 0x22f   :  { %968 = vst.msk [vmem:[%s1944_s5 + $0xc0] sm:$0xff] %vm558_vm2, %v936_v47  ;;  %v939_v15 = vmul.f32 %v1299_v49, %v1705_v56 }
 0x230   :  { %v1301_v42 = vpop.eup %1300 }
 0x231   :  { %971 = vst.msk [vmem:[%s1944_s5 + $0xd8] sm:$0xff] %vm558_vm2, %v939_v15  ;;  %v938_v61 = vmul.f32 %v1301_v42, %v1697_v50 }
 0x232   :  { %v1303_v52 = vpop.eup %1302 }
 0x233   :  { %970 = vst.msk [vmem:[%s1944_s5 + $0xd0] sm:$0xff] %vm558_vm2, %v938_v61  ;;  %v941_v54 = vmul.f32 %v1303_v52, %v1723_v4 }
 0x234   :  { %v1305_v59 = vpop.eup %1304 }
 0x235   :  { %973 = vst.msk [vmem:[%s1944_s5 + $0xe8] sm:$0xff] %vm558_vm2, %v941_v54  ;;  %v940_v56 = vmul.f32 %v1305_v59, %v1711_v8 }
 0x236   :  { %v1307_v55 = vpop.eup %1306 }
 0x237   :  { %972 = vst.msk [vmem:[%s1944_s5 + $0xe0] sm:$0xff] %vm558_vm2, %v940_v56  ;;  %v943_v50 = vmul.f32 %v1307_v55, %v1735_v14 }
 0x238   :  { %v1309_v51 = vpop.eup %1308 }
 0x239   :  { %975 = vst.msk [vmem:[%s1944_s5 + $0xf8] sm:$0xff] %vm558_vm2, %v943_v50  ;;  %v942_v4 = vmul.f32 %v1309_v51, %v1716_v62 }
 0x23b   :  { %974 = vst.msk [vmem:[%s1944_s5 + $0xf0] sm:$0xff] %vm558_vm2, %v942_v4 }

// kernel: scale_hyperprior_forward.18
= control target key start
LH: loop header
LB: loop body
LE: loop exit
PB: predicated region body
PF: predicated region fallthrough
CT: control target
= control target key end

     0   :  { %v554_v0 = vmov 0   ;;  %vm172_vm0 = vcmask 588800   ;;  %vm185_vm1 = vcmask 1043456   ;;  %vm270_vm2 = vcmask 64512   ;;  %s737_s1 = inlined_call_operand.vmem [shape: bf16[200,8], index: 1, kind: input, shape index: {}]   ;;  %s738_s0 = inlined_call_operand.vmem [shape: bf16[64,200], index: 0, kind: input, shape index: {}]   ;;  %s739_s3 = inlined_call_operand.vmem [shape: f32[8,8], index: 3, kind: input, shape index: {}]   ;;  %s740_s2 = inlined_call_operand.vmem [shape: f32[1,8], index: 2, kind: input, shape index: {}]   ;;  %s741_s4 = inlined_call_operand.vmem [shape: f32[1,8], index: 4, kind: input, shape index: {}]   ;;  %s742_s5 = inlined_call_operand.vmem [shape: f32[64,8], index: 5, kind: output, shape index: {}]  }
   0x1   :  { %189 = vmatprep.subr.bf16.mxu0 %v554_v0  ;;  %v513_v1 = vld [vmem:[%s737_s1 + $0x38] sm:$0xff]   ;;  %486 = vmatprep.subr.bf16.mxu1 %v554_v0  ;;  %v514_v2 = vld [vmem:[%s737_s1 + $0x30] sm:$0xff]   ;;  %v515_v3 = vld [vmem:[%s737_s1 + $0x28] sm:$0xff]  }
   0x2   :  { %190 = vmatpush1.bf16.msra.mxu0 %v513_v1  ;;  %499 = vmatpush1.bf16.msra.mxu1 %v513_v1  ;;  %v516_v4 = vld [vmem:[%s737_s1 + $0x20] sm:$0xff]   ;;  %v517_v6 = vld [vmem:[%s737_s1 + $0x18] sm:$0xff]   ;;  %v518_v8 = vld [vmem:[%s737_s1 + $0x10] sm:$0xff]  }
   0x3   :  { %191 = vmatprep.subr.bf16.mxu0 %v554_v0  ;;  %487 = vmatprep.subr.bf16.mxu1 %v554_v0  ;;  %v528_v5 = vld [vmem:[%s738_s0 + $0x4] ss:$8 sps:$4 sm:$0xff]   ;;  %v534_v7 = vld [vmem:[%s738_s0 + $0x34] ss:$8 sps:$4 sm:$0xff]   ;;  %v521_v11 = vld [vmem:[%s737_s1 + $0x60] ss:$0 sps:$4 sm:$0xff]  }
   0x4   :  { %450 = vmatprep.mubr.msk.bf16.mxu0 %vm172_vm0, %v528_v5  ;;  %453 = vmatprep.mubr.msk.bf16.mxu1 %vm172_vm0, %v534_v7  ;;  %v519_v9 = vld [vmem:[%s737_s1 + $0x8] sm:$0xff]   ;;  %v520_v10 = vld [vmem:[%s737_s1] sm:$0xff]   ;;  %v187_v12 = vsel %vm185_vm1, %v521_v11, 0  ;;  %v522_v13 = vld [vmem:[%s737_s1 + $0x58] sm:$0xff]  }
   0x5   :  { %v523_v14 = vld [vmem:[%s737_s1 + $0x50] sm:$0xff]   ;;  %v524_v15 = vld [vmem:[%s737_s1 + $0x48] sm:$0xff]   ;;  %v525_v16 = vld [vmem:[%s737_s1 + $0x40] sm:$0xff]  }
   0x6   :  { %192 = vmatpush1.bf16.msra.mxu0 %v514_v2  ;;  %500 = vmatpush1.bf16.msra.mxu1 %v514_v2  ;;  %v526_v17 = vld [vmem:[%s738_s0] ss:$8 sps:$4 sm:$0xff]   ;;  %v532_v18 = vld [vmem:[%s738_s0 + $0x30] ss:$8 sps:$4 sm:$0xff]   ;;  %v529_v19 = vld [vmem:[%s738_s0 + $0x14] ss:$8 sps:$4 sm:$0xff]  }
   0x7   :  { %193 = vmatprep.subr.bf16.mxu0 %v554_v0  ;;  %488 = vmatprep.subr.bf16.mxu1 %v554_v0  ;;  %v531_v20 = vld [vmem:[%s738_s0 + $0x10] ss:$8 sps:$4 sm:$0xff]   ;;  %v535_v21 = vld [vmem:[%s738_s0 + $0x24] ss:$8 sps:$4 sm:$0xff]   ;;  %v537_v22 = vld [vmem:[%s738_s0 + $0x20] ss:$8 sps:$4 sm:$0xff]  }
   0x8   :  { %v262_v23 = vld [vmem:[%s739_s3] sm:$0xff] }
   0x9   :  { %v428_v24 = vld [vmem:[%s740_s2] ss:$0 sm:$0xff] }
   0xa   :  { %194 = vmatpush1.bf16.msra.mxu0 %v515_v3  ;;  %501 = vmatpush1.bf16.msra.mxu1 %v515_v3  ;;  %v454_v57 = vld [vmem:[%s741_s4] ss:$0 sm:$0xff] }
   0xb   :  { %195 = vmatprep.subr.bf16.mxu0 %v554_v0  ;;  %489 = vmatprep.subr.bf16.mxu1 %v554_v0 }
   0xe   :  { %196 = vmatpush1.bf16.msra.mxu0 %v516_v4  ;;  %502 = vmatpush1.bf16.msra.mxu1 %v516_v4 }
   0xf   :  { %197 = vmatprep.subr.bf16.mxu0 %v554_v0  ;;  %490 = vmatprep.subr.bf16.mxu1 %v554_v0 }
  0x12   :  { %198 = vmatpush1.bf16.msra.mxu0 %v517_v6  ;;  %503 = vmatpush1.bf16.msra.mxu1 %v517_v6 }
  0x13   :  { %199 = vmatprep.subr.bf16.mxu0 %v554_v0  ;;  %491 = vmatprep.subr.bf16.mxu1 %v554_v0 }
  0x16   :  { %200 = vmatpush1.bf16.msra.mxu0 %v518_v8  ;;  %504 = vmatpush1.bf16.msra.mxu1 %v518_v8 }
  0x17   :  { %201 = vmatprep.subr.bf16.mxu0 %v554_v0  ;;  %492 = vmatprep.subr.bf16.mxu1 %v554_v0 }
  0x1a   :  { %202 = vmatpush1.bf16.msra.mxu0 %v519_v9  ;;  %505 = vmatpush1.bf16.msra.mxu1 %v519_v9 }
  0x1b   :  { %203 = vmatprep.subr.bf16.mxu0 %v554_v0  ;;  %493 = vmatprep.subr.bf16.mxu1 %v554_v0 }
  0x1e   :  { %204 = vmatpush1.bf16.msra.mxu0 %v520_v10  ;;  %506 = vmatpush1.bf16.msra.mxu1 %v520_v10 }
  0x1f   :  { %211 = vmatprep.subr.bf16.mxu0 %v554_v0  ;;  %494 = vmatprep.subr.bf16.mxu1 %v554_v0 }
  0x22   :  { %212 = vmatpush2.bf16.msra.mxu0 %v187_v12  ;;  %507 = vmatpush2.bf16.msra.mxu1 %v187_v12 }
  0x23   :  { %213 = vmatprep.subr.bf16.mxu0 %v554_v0  ;;  %495 = vmatprep.subr.bf16.mxu1 %v554_v0 }
  0x26   :  { %214 = vmatpush2.bf16.msra.mxu0 %v522_v13  ;;  %508 = vmatpush2.bf16.msra.mxu1 %v522_v13 }
  0x27   :  { %215 = vmatprep.subr.bf16.mxu0 %v554_v0  ;;  %496 = vmatprep.subr.bf16.mxu1 %v554_v0 }
  0x2a   :  { %216 = vmatpush2.bf16.msra.mxu0 %v523_v14  ;;  %509 = vmatpush2.bf16.msra.mxu1 %v523_v14 }
  0x2b   :  { %217 = vmatprep.subr.bf16.mxu0 %v554_v0  ;;  %497 = vmatprep.subr.bf16.mxu1 %v554_v0 }
  0x2e   :  { %218 = vmatpush2.bf16.msra.mxu0 %v524_v15  ;;  %510 = vmatpush2.bf16.msra.mxu1 %v524_v15 }
  0x2f   :  { %219 = vmatprep.subr.bf16.mxu0 %v554_v0  ;;  %498 = vmatprep.subr.bf16.mxu1 %v554_v0 }
  0x32   :  { %220 = vmatpush2.bf16.msra.mxu0 %v525_v16  ;;  %511 = vmatpush2.bf16.msra.mxu1 %v525_v16 }
  0x33   :  { %472 = vmatprep.subr.mxu1 %v262_v23 }
  0x35   :  { %222 = vmatmul.mubr.bf16.vlgmr.msra.gmra.mxu0 %v526_v17  ;;  %246 = vmatmul.mubr.bf16.vlgmr.msra.gmra.mxu1 %v532_v18 }
  0x36   :  { %451 = vmatprep.mubr.msk.bf16.mxu0 %vm172_vm0, %v529_v19  ;;  %473 = vmatpush3.msra.mxu1 %v262_v23 }
  0x3d   :  { %230 = vmatmul.mubr.bf16.gmra.mxu0 %v531_v20 }
  0x3e   :  { %452 = vmatprep.mubr.msk.bf16.mxu0 %vm172_vm0, %v535_v21 }
  0x45   :  { %238 = vmatmul.mubr.bf16.gmra.mxu0 %v537_v22 }
  0xf5   :  { %v223_v25 = vpop.f32.mrf.mxu0  ;;  %v247_v26 = vpop.f32.mrf.mxu1 }
  0xf6   :  { %v224_v27 = vadd.f32 %v428_v24, %v223_v25  ;;  %v692_v47 = vadd.f32 %v428_v24, %v247_v26 }
  0xf7   :  { %v225_v28 = vpop.f32.mrf.mxu0  ;;  %v249_v29 = vpop.f32.mrf.mxu1 }
  0xf8   :  { %v254_v30 = vmul.f32 %v224_v27, %v224_v27  ;;  %v260_v52 = vmul.f32 %v692_v47, %v692_v47 }
  0xf9   :  { %v226_v31 = vpop.f32.mrf.mxu0  ;;  %v250_v32 = vpop.f32.mrf.mxu1 }
  0xfa   :  { %v227_v33 = vadd.f32 %v428_v24, %v226_v31  ;;  %474 = vmatprep.mubr.msk.f32.mxu1 %vm270_vm2, %v254_v30  ;;  %v251_v54 = vadd.f32 %v428_v24, %v250_v32 }
  0xfb   :  { %v228_v34 = vpop.f32.mrf.mxu0  ;;  %v252_v35 = vpop.f32.mrf.mxu1 }
  0xfc   :  { %v255_v36 = vmul.f32 %v227_v33, %v227_v33  ;;  %v261_v56 = vmul.f32 %v251_v54, %v251_v54 }
  0xfd   :  { %v231_v37 = vpop.f32.mrf.mxu0 }
  0xfe   :  { %v685_v38 = vadd.f32 %v428_v24, %v231_v37  ;;  %475 = vmatmul.mubr.msk.f32.vlgmr.msra.gmra.mxu1 %vm270_vm2, %v255_v36 }
  0xff   :  { %v233_v39 = vpop.f32.mrf.mxu0 }
 0x100   :  { %v256_v40 = vmul.f32 %v685_v38, %v685_v38 }
 0x101   :  { %v234_v41 = vpop.f32.mrf.mxu0 }
 0x102   :  { %v235_v42 = vadd.f32 %v428_v24, %v234_v41  ;;  %477 = vmatprep.mubr.msk.f32.mxu1 %vm270_vm2, %v256_v40 }
 0x103   :  { %v236_v43 = vpop.f32.mrf.mxu0 }
 0x104   :  { %v257_v44 = vmul.f32 %v235_v42, %v235_v42 }
 0x105   :  { %v239_v45 = vpop.f32.mrf.mxu0 }
 0x106   :  { %v240_v46 = vadd.f32 %v428_v24, %v239_v45  ;;  %478 = vmatmul.mubr.msk.f32.gmra.mxu1 %vm270_vm2, %v257_v44 }
 0x107   :  { %v241_v48 = vpop.f32.mrf.mxu0 }
 0x108   :  { %v258_v49 = vmul.f32 %v240_v46, %v240_v46 }
 0x109   :  { %v242_v50 = vpop.f32.mrf.mxu0 }
 0x10a   :  { %v243_v51 = vadd.f32 %v428_v24, %v242_v50  ;;  %480 = vmatprep.mubr.msk.f32.mxu1 %vm270_vm2, %v258_v49 }
 0x10b   :  { %v244_v53 = vpop.f32.mrf.mxu0 }
 0x10c   :  { %v259_v55 = vmul.f32 %v243_v51, %v243_v51 }
 0x10e   :  { %481 = vmatmul.mubr.msk.f32.gmra.mxu1 %vm270_vm2, %v259_v55 }
 0x10f   :  { %483 = vmatprep.mubr.msk.f32.mxu1 %vm270_vm2, %v260_v52 }
 0x112   :  { %484 = vmatmul.mubr.msk.f32.gmra.mxu1 %vm270_vm2, %v261_v56 }
 0x1be   :  { %v476_v58 = vpop.f32.mrf.mxu1 }
 0x1bf   :  { %v367_v59 = vadd.f32 %v476_v58, %v454_v57 }
 0x1c0   :  { %v361_v60 = vpop.f32.mrf.mxu1 }
 0x1c1   :  { %538 = vrsqrt.f32 %v367_v59  ;;  %v362_v61 = vadd.f32 %v454_v57, %v361_v60 }
 0x1c3   :  { %540 = vrsqrt.f32 %v362_v61 }
 0x1c6   :  { %v479_v62 = vpop.f32.mrf.mxu1 }
 0x1c7   :  { %v377_v63 = vadd.f32 %v479_v62, %v454_v57 }
 0x1c8   :  { %v371_v0 = vpop.f32.mrf.mxu1 }
 0x1c9   :  { %542 = vrsqrt.f32 %v377_v63  ;;  %v372_v1 = vadd.f32 %v454_v57, %v371_v0 }
 0x1cb   :  { %544 = vrsqrt.f32 %v372_v1 }
 0x1ce   :  { %v539_v2 = vpop.eup %538  ;;  %v482_v3 = vpop.f32.mrf.mxu1 }
 0x1cf   :  { %v409_v4 = vmul.f32 %v539_v2, %v227_v33  ;;  %v387_v5 = vadd.f32 %v482_v3, %v454_v57 }
 0x1d0   :  { %v541_v6 = vpop.eup %540  ;;  %v381_v7 = vpop.f32.mrf.mxu1 }
 0x1d1   :  { %417 = vst.msk [vmem:[%s742_s5 + $0x8] sm:$0xff] %vm270_vm2, %v409_v4  ;;  %v408_v8 = vmul.f32 %v541_v6, %v224_v27  ;;  %546 = vrsqrt.f32 %v387_v5  ;;  %v382_v9 = vadd.f32 %v454_v57, %v381_v7 }
 0x1d2   :  { %v485_v10 = vpop.f32.mrf.mxu1 }
 0x1d3   :  { %416 = vst.msk [vmem:[%s742_s5] sm:$0xff] %vm270_vm2, %v408_v8  ;;  %548 = vrsqrt.f32 %v382_v9  ;;  %v397_v11 = vadd.f32 %v485_v10, %v454_v57 }
 0x1d4   :  { %v391_v12 = vpop.f32.mrf.mxu1 }
 0x1d5   :  { %550 = vrsqrt.f32 %v397_v11  ;;  %v392_v13 = vadd.f32 %v454_v57, %v391_v12 }
 0x1d6   :  { %v543_v14 = vpop.eup %542 }
 0x1d7   :  { %v411_v15 = vmul.f32 %v543_v14, %v235_v42  ;;  %552 = vrsqrt.f32 %v392_v13 }
 0x1d8   :  { %v545_v16 = vpop.eup %544 }
 0x1d9   :  { %419 = vst.msk [vmem:[%s742_s5 + $0x18] sm:$0xff] %vm270_vm2, %v411_v15  ;;  %v410_v17 = vmul.f32 %v545_v16, %v685_v38 }
 0x1db   :  { %418 = vst.msk [vmem:[%s742_s5 + $0x10] sm:$0xff] %vm270_vm2, %v410_v17 }
 0x1de   :  { %v547_v18 = vpop.eup %546 }
 0x1df   :  { %v413_v19 = vmul.f32 %v547_v18, %v243_v51 }
 0x1e0   :  { %v549_v20 = vpop.eup %548 }
 0x1e1   :  { %421 = vst.msk [vmem:[%s742_s5 + $0x28] sm:$0xff] %vm270_vm2, %v413_v19  ;;  %v412_v21 = vmul.f32 %v549_v20, %v240_v46 }
 0x1e2   :  { %v551_v22 = vpop.eup %550 }
 0x1e3   :  { %420 = vst.msk [vmem:[%s742_s5 + $0x20] sm:$0xff] %vm270_vm2, %v412_v21  ;;  %v415_v23 = vmul.f32 %v551_v22, %v251_v54 }
 0x1e4   :  { %v553_v24 = vpop.eup %552 }
 0x1e5   :  { %423 = vst.msk [vmem:[%s742_s5 + $0x38] sm:$0xff] %vm270_vm2, %v415_v23  ;;  %v414_v25 = vmul.f32 %v553_v24, %v692_v47 }
 0x1e7   :  { %422 = vst.msk [vmem:[%s742_s5 + $0x30] sm:$0xff] %vm270_vm2, %v414_v25 }

// kernel: scale_hyperprior_forward.19
= control target key start
LH: loop header
LB: loop body
LE: loop exit
PB: predicated region body
PF: predicated region fallthrough
CT: control target
= control target key end

     0   :  { %v223_v0 = vmov 0   ;;  %vm133_vm0 = vcmask 588800   ;;  %vm137_vm1 = vcmask 1043456   ;;  %vm182_vm2 = vcmask 130048   ;;  %s298_s1 = inlined_call_operand.vmem [shape: bf16[200,16], index: 1, kind: input, shape index: {}]   ;;  %s299_s0 = inlined_call_operand.vmem [shape: bf16[16,200], index: 0, kind: input, shape index: {}]   ;;  %s300_s2 = inlined_call_operand.vmem [shape: f32[1,16], index: 2, kind: input, shape index: {}]   ;;  %s301_s3 = inlined_call_operand.vmem [shape: f32[16,16], index: 3, kind: output, shape index: {}]  }
   0x1   :  { %141 = vmatprep.subr.bf16.mxu0 %v223_v0  ;;  %v207_v1 = vld [vmem:[%s298_s1 + $0x38] sm:$0xff]   ;;  %v208_v2 = vld [vmem:[%s298_s1 + $0x30] sm:$0xff]   ;;  %v209_v3 = vld [vmem:[%s298_s1 + $0x28] sm:$0xff]  }
   0x2   :  { %142 = vmatpush1.bf16.msra.mxu0 %v207_v1  ;;  %v210_v4 = vld [vmem:[%s298_s1 + $0x20] sm:$0xff]   ;;  %v211_v6 = vld [vmem:[%s298_s1 + $0x18] sm:$0xff]   ;;  %v212_v7 = vld [vmem:[%s298_s1 + $0x10] sm:$0xff]  }
   0x3   :  { %143 = vmatprep.subr.bf16.mxu0 %v223_v0  ;;  %v222_v5 = vld [vmem:[%s299_s0 + $0x4] ss:$8 sps:$4 sm:$0xff]   ;;  %v215_v10 = vld [vmem:[%s298_s1 + $0x60] ss:$0 sps:$4 sm:$0xff]   ;;  %v216_v12 = vld [vmem:[%s298_s1 + $0x58] sm:$0xff]  }
   0x4   :  { %205 = vmatprep.mubr.msk.bf16.mxu0 %vm133_vm0, %v222_v5  ;;  %v213_v8 = vld [vmem:[%s298_s1 + $0x8] sm:$0xff]   ;;  %v214_v9 = vld [vmem:[%s298_s1] sm:$0xff]   ;;  %v139_v11 = vsel %vm137_vm1, %v215_v10, 0  ;;  %v217_v13 = vld [vmem:[%s298_s1 + $0x50] sm:$0xff]  }
   0x5   :  { %v218_v14 = vld [vmem:[%s298_s1 + $0x48] sm:$0xff]   ;;  %v219_v15 = vld [vmem:[%s298_s1 + $0x40] sm:$0xff]  }
   0x6   :  { %144 = vmatpush1.bf16.msra.mxu0 %v208_v2  ;;  %v220_v16 = vld [vmem:[%s299_s0] ss:$8 sps:$4 sm:$0xff]  }
   0x7   :  { %145 = vmatprep.subr.bf16.mxu0 %v223_v0  ;;  %v189_v17 = vld [vmem:[%s300_s2] ss:$0 sm:$0xff] }
   0xa   :  { %146 = vmatpush1.bf16.msra.mxu0 %v209_v3 }
   0xb   :  { %147 = vmatprep.subr.bf16.mxu0 %v223_v0 }
   0xe   :  { %148 = vmatpush1.bf16.msra.mxu0 %v210_v4 }
   0xf   :  { %149 = vmatprep.subr.bf16.mxu0 %v223_v0 }
  0x12   :  { %150 = vmatpush1.bf16.msra.mxu0 %v211_v6 }
  0x13   :  { %151 = vmatprep.subr.bf16.mxu0 %v223_v0 }
  0x16   :  { %152 = vmatpush1.bf16.msra.mxu0 %v212_v7 }
  0x17   :  { %153 = vmatprep.subr.bf16.mxu0 %v223_v0 }
  0x1a   :  { %154 = vmatpush1.bf16.msra.mxu0 %v213_v8 }
  0x1b   :  { %155 = vmatprep.subr.bf16.mxu0 %v223_v0 }
  0x1e   :  { %156 = vmatpush1.bf16.msra.mxu0 %v214_v9 }
  0x1f   :  { %163 = vmatprep.subr.bf16.mxu0 %v223_v0 }
  0x22   :  { %164 = vmatpush2.bf16.msra.mxu0 %v139_v11 }
  0x23   :  { %165 = vmatprep.subr.bf16.mxu0 %v223_v0 }
  0x26   :  { %166 = vmatpush2.bf16.msra.mxu0 %v216_v12 }
  0x27   :  { %167 = vmatprep.subr.bf16.mxu0 %v223_v0 }
  0x2a   :  { %168 = vmatpush2.bf16.msra.mxu0 %v217_v13 }
  0x2b   :  { %169 = vmatprep.subr.bf16.mxu0 %v223_v0 }
  0x2e   :  { %170 = vmatpush2.bf16.msra.mxu0 %v218_v14 }
  0x2f   :  { %171 = vmatprep.subr.bf16.mxu0 %v223_v0 }
  0x32   :  { %172 = vmatpush2.bf16.msra.mxu0 %v219_v15 }
  0x35   :  { %174 = vmatmul.mubr.bf16.vlgmr.msra.gmra.mxu0 %v220_v16 }
  0xf5   :  { %v175_v18 = vpop.f32.mrf.mxu0 }
  0xf6   :  { %v176_v19 = vadd.f32 %v189_v17, %v175_v18 }
  0xf7   :  { %v177_v20 = vpop.f32.mrf.mxu0 }
  0xf8   :  { %183 = vst.msk [vmem:[%s301_s3] sm:$0xff] %vm182_vm2, %v176_v19 }
  0xf9   :  { %v178_v21 = vpop.f32.mrf.mxu0 }
  0xfa   :  { %v179_v22 = vadd.f32 %v189_v17, %v178_v21 }
  0xfb   :  { %v180_v23 = vpop.f32.mrf.mxu0 }
  0xfc   :  { %184 = vst.msk [vmem:[%s301_s3 + $0x8] sm:$0xff] %vm182_vm2, %v179_v22 }

// kernel: scale_hyperprior_forward.20
= control target key start
LH: loop header
LB: loop body
LE: loop exit
PB: predicated region body
PF: predicated region fallthrough
CT: control target
= control target key end

     0   :  { %v185_v0 = vmov 0   ;;  %vm105_vm0 = vcmask 130048   ;;  %vm152_vm1 = vcmask 64512   ;;  %s248_s1 = inlined_call_operand.vmem [shape: bf16[144,8], index: 1, kind: input, shape index: {}]   ;;  %s249_s0 = inlined_call_operand.vmem [shape: bf16[16,144], index: 0, kind: input, shape index: {}]   ;;  %s250_s2 = inlined_call_operand.vmem [shape: f32[1,8], index: 2, kind: input, shape index: {}]   ;;  %s251_s3 = inlined_call_operand.vmem [shape: f32[16,8], index: 3, kind: output, shape index: {}]  }
   0x1   :  { %109 = vmatprep.subr.bf16.mxu0 %v185_v0  ;;  %v173_v1 = vld [vmem:[%s248_s1 + $0x38] sm:$0xff]   ;;  %v174_v2 = vld [vmem:[%s248_s1 + $0x30] sm:$0xff]   ;;  %v175_v3 = vld [vmem:[%s248_s1 + $0x28] sm:$0xff]  }
   0x2   :  { %110 = vmatpush1.bf16.msra.mxu0 %v173_v1  ;;  %v176_v4 = vld [vmem:[%s248_s1 + $0x20] sm:$0xff]   ;;  %v177_v6 = vld [vmem:[%s248_s1 + $0x18] sm:$0xff]   ;;  %v178_v7 = vld [vmem:[%s248_s1 + $0x10] sm:$0xff]  }
   0x3   :  { %111 = vmatprep.subr.bf16.mxu0 %v185_v0  ;;  %v184_v5 = vld [vmem:[%s249_s0 + $0x4] ss:$8 sps:$4 sm:$0xff]   ;;  %v182_v11 = vld [vmem:[%s249_s0] ss:$8 sps:$4 sm:$0xff]  }
   0x4   :  { %171 = vmatprep.mubr.msk.bf16.mxu0 %vm105_vm0, %v184_v5  ;;  %v179_v8 = vld [vmem:[%s248_s1 + $0x8] sm:$0xff]   ;;  %v180_v9 = vld [vmem:[%s248_s1] sm:$0xff]  }
   0x5   :  { %v181_v10 = vld [vmem:[%s248_s1 + $0x40] sm:$0xff]  }
   0x6   :  { %112 = vmatpush1.bf16.msra.mxu0 %v174_v2  ;;  %v159_v12 = vld [vmem:[%s250_s2] ss:$0 sm:$0xff] }
   0x7   :  { %113 = vmatprep.subr.bf16.mxu0 %v185_v0 }
   0xa   :  { %114 = vmatpush1.bf16.msra.mxu0 %v175_v3 }
   0xb   :  { %115 = vmatprep.subr.bf16.mxu0 %v185_v0 }
   0xe   :  { %116 = vmatpush1.bf16.msra.mxu0 %v176_v4 }
   0xf   :  { %117 = vmatprep.subr.bf16.mxu0 %v185_v0 }
  0x12   :  { %118 = vmatpush1.bf16.msra.mxu0 %v177_v6 }
  0x13   :  { %119 = vmatprep.subr.bf16.mxu0 %v185_v0 }
  0x16   :  { %120 = vmatpush1.bf16.msra.mxu0 %v178_v7 }
  0x17   :  { %121 = vmatprep.subr.bf16.mxu0 %v185_v0 }
  0x1a   :  { %122 = vmatpush1.bf16.msra.mxu0 %v179_v8 }
  0x1b   :  { %123 = vmatprep.subr.bf16.mxu0 %v185_v0 }
  0x1e   :  { %124 = vmatpush1.bf16.msra.mxu0 %v180_v9 }
  0x1f   :  { %139 = vmatprep.subr.bf16.mxu0 %v185_v0 }
  0x22   :  { %140 = vmatpush2.bf16.msra.mxu0 %v181_v10 }
  0x25   :  { %142 = vmatmul.mubr.bf16.vlgmr.msra.gmra.mxu0 %v182_v11 }
  0xe5   :  { %v143_v13 = vpop.f32.mrf.mxu0 }
  0xe6   :  { %v144_v14 = vadd.f32 %v159_v12, %v143_v13 }
  0xe7   :  { %v145_v15 = vpop.f32.mrf.mxu0 }
  0xe8   :  { %v150_v16 = vmax.f32 %v144_v14, 0.0 }
  0xe9   :  { %v146_v17 = vpop.f32.mrf.mxu0 }
  0xea   :  { %153 = vst.msk [vmem:[%s251_s3] sm:$0xff] %vm152_vm1, %v150_v16  ;;  %v147_v18 = vadd.f32 %v159_v12, %v146_v17 }
  0xeb   :  { %v148_v19 = vpop.f32.mrf.mxu0 }
  0xec   :  { %v151_v20 = vmax.f32 %v147_v18, 0.0 }
  0xee   :  { %154 = vst.msk [vmem:[%s251_s3 + $0x8] sm:$0xff] %vm152_vm1, %v151_v20 }

// kernel: scale_hyperprior_forward.21
= control target key start
LH: loop header
LB: loop body
LE: loop exit
PB: predicated region body
PF: predicated region fallthrough
CT: control target
= control target key end

     0   :  { %v225_v0 = vmov 0   ;;  %vm133_vm0 = vcmask 588800   ;;  %vm137_vm1 = vcmask 1043456   ;;  %vm184_vm2 = vcmask 64512   ;;  %s300_s1 = inlined_call_operand.vmem [shape: bf16[200,8], index: 1, kind: input, shape index: {}]   ;;  %s301_s0 = inlined_call_operand.vmem [shape: bf16[16,200], index: 0, kind: input, shape index: {}]   ;;  %s302_s2 = inlined_call_operand.vmem [shape: f32[1,8], index: 2, kind: input, shape index: {}]   ;;  %s303_s3 = inlined_call_operand.vmem [shape: f32[16,8], index: 3, kind: output, shape index: {}]  }
   0x1   :  { %141 = vmatprep.subr.bf16.mxu0 %v225_v0  ;;  %v209_v1 = vld [vmem:[%s300_s1 + $0x38] sm:$0xff]   ;;  %v210_v2 = vld [vmem:[%s300_s1 + $0x30] sm:$0xff]   ;;  %v211_v3 = vld [vmem:[%s300_s1 + $0x28] sm:$0xff]  }
   0x2   :  { %142 = vmatpush1.bf16.msra.mxu0 %v209_v1  ;;  %v212_v4 = vld [vmem:[%s300_s1 + $0x20] sm:$0xff]   ;;  %v213_v6 = vld [vmem:[%s300_s1 + $0x18] sm:$0xff]   ;;  %v214_v7 = vld [vmem:[%s300_s1 + $0x10] sm:$0xff]  }
   0x3   :  { %143 = vmatprep.subr.bf16.mxu0 %v225_v0  ;;  %v224_v5 = vld [vmem:[%s301_s0 + $0x4] ss:$8 sps:$4 sm:$0xff]   ;;  %v217_v10 = vld [vmem:[%s300_s1 + $0x60] ss:$0 sps:$4 sm:$0xff]   ;;  %v218_v12 = vld [vmem:[%s300_s1 + $0x58] sm:$0xff]  }
   0x4   :  { %207 = vmatprep.mubr.msk.bf16.mxu0 %vm133_vm0, %v224_v5  ;;  %v215_v8 = vld [vmem:[%s300_s1 + $0x8] sm:$0xff]   ;;  %v216_v9 = vld [vmem:[%s300_s1] sm:$0xff]   ;;  %v139_v11 = vsel %vm137_vm1, %v217_v10, 0  ;;  %v219_v13 = vld [vmem:[%s300_s1 + $0x50] sm:$0xff]  }
   0x5   :  { %v220_v14 = vld [vmem:[%s300_s1 + $0x48] sm:$0xff]   ;;  %v221_v15 = vld [vmem:[%s300_s1 + $0x40] sm:$0xff]  }
   0x6   :  { %144 = vmatpush1.bf16.msra.mxu0 %v210_v2  ;;  %v222_v16 = vld [vmem:[%s301_s0] ss:$8 sps:$4 sm:$0xff]  }
   0x7   :  { %145 = vmatprep.subr.bf16.mxu0 %v225_v0  ;;  %v191_v17 = vld [vmem:[%s302_s2] ss:$0 sm:$0xff] }
   0xa   :  { %146 = vmatpush1.bf16.msra.mxu0 %v211_v3 }
   0xb   :  { %147 = vmatprep.subr.bf16.mxu0 %v225_v0 }
   0xe   :  { %148 = vmatpush1.bf16.msra.mxu0 %v212_v4 }
   0xf   :  { %149 = vmatprep.subr.bf16.mxu0 %v225_v0 }
  0x12   :  { %150 = vmatpush1.bf16.msra.mxu0 %v213_v6 }
  0x13   :  { %151 = vmatprep.subr.bf16.mxu0 %v225_v0 }
  0x16   :  { %152 = vmatpush1.bf16.msra.mxu0 %v214_v7 }
  0x17   :  { %153 = vmatprep.subr.bf16.mxu0 %v225_v0 }
  0x1a   :  { %154 = vmatpush1.bf16.msra.mxu0 %v215_v8 }
  0x1b   :  { %155 = vmatprep.subr.bf16.mxu0 %v225_v0 }
  0x1e   :  { %156 = vmatpush1.bf16.msra.mxu0 %v216_v9 }
  0x1f   :  { %163 = vmatprep.subr.bf16.mxu0 %v225_v0 }
  0x22   :  { %164 = vmatpush2.bf16.msra.mxu0 %v139_v11 }
  0x23   :  { %165 = vmatprep.subr.bf16.mxu0 %v225_v0 }
  0x26   :  { %166 = vmatpush2.bf16.msra.mxu0 %v218_v12 }
  0x27   :  { %167 = vmatprep.subr.bf16.mxu0 %v225_v0 }
  0x2a   :  { %168 = vmatpush2.bf16.msra.mxu0 %v219_v13 }
  0x2b   :  { %169 = vmatprep.subr.bf16.mxu0 %v225_v0 }
  0x2e   :  { %170 = vmatpush2.bf16.msra.mxu0 %v220_v14 }
  0x2f   :  { %171 = vmatprep.subr.bf16.mxu0 %v225_v0 }
  0x32   :  { %172 = vmatpush2.bf16.msra.mxu0 %v221_v15 }
  0x35   :  { %174 = vmatmul.mubr.bf16.vlgmr.msra.gmra.mxu0 %v222_v16 }
  0xf5   :  { %v175_v18 = vpop.f32.mrf.mxu0 }
  0xf6   :  { %v176_v19 = vadd.f32 %v191_v17, %v175_v18 }
  0xf7   :  { %v177_v20 = vpop.f32.mrf.mxu0 }
  0xf8   :  { %v182_v21 = vmax.f32 %v176_v19, 0.0 }
  0xf9   :  { %v178_v22 = vpop.f32.mrf.mxu0 }
  0xfa   :  { %185 = vst.msk [vmem:[%s303_s3] sm:$0xff] %vm184_vm2, %v182_v21  ;;  %v179_v23 = vadd.f32 %v191_v17, %v178_v22 }
  0xfb   :  { %v180_v24 = vpop.f32.mrf.mxu0 }
  0xfc   :  { %v183_v25 = vmax.f32 %v179_v23, 0.0 }
  0xfe   :  { %186 = vst.msk [vmem:[%s303_s3 + $0x8] sm:$0xff] %vm184_vm2, %v183_v25 }

// kernel: scale_hyperprior_forward.22
= control target key start
LH: loop header
LB: loop body
LE: loop exit
PB: predicated region body
PF: predicated region fallthrough
CT: control target
= control target key end

     0   :  { %v223_v0 = vmov 0   ;;  %vm133_vm0 = vcmask 588800   ;;  %vm137_vm1 = vcmask 1043456   ;;  %vm182_vm2 = vcmask 64512   ;;  %s298_s1 = inlined_call_operand.vmem [shape: bf16[200,8], index: 1, kind: input, shape index: {}]   ;;  %s299_s0 = inlined_call_operand.vmem [shape: bf16[16,200], index: 0, kind: input, shape index: {}]   ;;  %s300_s2 = inlined_call_operand.vmem [shape: f32[1,8], index: 2, kind: input, shape index: {}]   ;;  %s301_s3 = inlined_call_operand.vmem [shape: f32[16,8], index: 3, kind: output, shape index: {}]  }
   0x1   :  { %141 = vmatprep.subr.bf16.mxu0 %v223_v0  ;;  %v207_v1 = vld [vmem:[%s298_s1 + $0x38] sm:$0xff]   ;;  %v208_v2 = vld [vmem:[%s298_s1 + $0x30] sm:$0xff]   ;;  %v209_v3 = vld [vmem:[%s298_s1 + $0x28] sm:$0xff]  }
   0x2   :  { %142 = vmatpush1.bf16.msra.mxu0 %v207_v1  ;;  %v210_v4 = vld [vmem:[%s298_s1 + $0x20] sm:$0xff]   ;;  %v211_v6 = vld [vmem:[%s298_s1 + $0x18] sm:$0xff]   ;;  %v212_v7 = vld [vmem:[%s298_s1 + $0x10] sm:$0xff]  }
   0x3   :  { %143 = vmatprep.subr.bf16.mxu0 %v223_v0  ;;  %v222_v5 = vld [vmem:[%s299_s0 + $0x4] ss:$8 sps:$4 sm:$0xff]   ;;  %v215_v10 = vld [vmem:[%s298_s1 + $0x60] ss:$0 sps:$4 sm:$0xff]   ;;  %v216_v12 = vld [vmem:[%s298_s1 + $0x58] sm:$0xff]  }
   0x4   :  { %205 = vmatprep.mubr.msk.bf16.mxu0 %vm133_vm0, %v222_v5  ;;  %v213_v8 = vld [vmem:[%s298_s1 + $0x8] sm:$0xff]   ;;  %v214_v9 = vld [vmem:[%s298_s1] sm:$0xff]   ;;  %v139_v11 = vsel %vm137_vm1, %v215_v10, 0  ;;  %v217_v13 = vld [vmem:[%s298_s1 + $0x50] sm:$0xff]  }
   0x5   :  { %v218_v14 = vld [vmem:[%s298_s1 + $0x48] sm:$0xff]   ;;  %v219_v15 = vld [vmem:[%s298_s1 + $0x40] sm:$0xff]  }
   0x6   :  { %144 = vmatpush1.bf16.msra.mxu0 %v208_v2  ;;  %v220_v16 = vld [vmem:[%s299_s0] ss:$8 sps:$4 sm:$0xff]  }
   0x7   :  { %145 = vmatprep.subr.bf16.mxu0 %v223_v0  ;;  %v189_v17 = vld [vmem:[%s300_s2] ss:$0 sm:$0xff] }
   0xa   :  { %146 = vmatpush1.bf16.msra.mxu0 %v209_v3 }
   0xb   :  { %147 = vmatprep.subr.bf16.mxu0 %v223_v0 }
   0xe   :  { %148 = vmatpush1.bf16.msra.mxu0 %v210_v4 }
   0xf   :  { %149 = vmatprep.subr.bf16.mxu0 %v223_v0 }
  0x12   :  { %150 = vmatpush1.bf16.msra.mxu0 %v211_v6 }
  0x13   :  { %151 = vmatprep.subr.bf16.mxu0 %v223_v0 }
  0x16   :  { %152 = vmatpush1.bf16.msra.mxu0 %v212_v7 }
  0x17   :  { %153 = vmatprep.subr.bf16.mxu0 %v223_v0 }
  0x1a   :  { %154 = vmatpush1.bf16.msra.mxu0 %v213_v8 }
  0x1b   :  { %155 = vmatprep.subr.bf16.mxu0 %v223_v0 }
  0x1e   :  { %156 = vmatpush1.bf16.msra.mxu0 %v214_v9 }
  0x1f   :  { %163 = vmatprep.subr.bf16.mxu0 %v223_v0 }
  0x22   :  { %164 = vmatpush2.bf16.msra.mxu0 %v139_v11 }
  0x23   :  { %165 = vmatprep.subr.bf16.mxu0 %v223_v0 }
  0x26   :  { %166 = vmatpush2.bf16.msra.mxu0 %v216_v12 }
  0x27   :  { %167 = vmatprep.subr.bf16.mxu0 %v223_v0 }
  0x2a   :  { %168 = vmatpush2.bf16.msra.mxu0 %v217_v13 }
  0x2b   :  { %169 = vmatprep.subr.bf16.mxu0 %v223_v0 }
  0x2e   :  { %170 = vmatpush2.bf16.msra.mxu0 %v218_v14 }
  0x2f   :  { %171 = vmatprep.subr.bf16.mxu0 %v223_v0 }
  0x32   :  { %172 = vmatpush2.bf16.msra.mxu0 %v219_v15 }
  0x35   :  { %174 = vmatmul.mubr.bf16.vlgmr.msra.gmra.mxu0 %v220_v16 }
  0xf5   :  { %v175_v18 = vpop.f32.mrf.mxu0 }
  0xf6   :  { %v176_v19 = vadd.f32 %v189_v17, %v175_v18 }
  0xf7   :  { %v177_v20 = vpop.f32.mrf.mxu0 }
  0xf8   :  { %183 = vst.msk [vmem:[%s301_s3] sm:$0xff] %vm182_vm2, %v176_v19 }
  0xf9   :  { %v178_v21 = vpop.f32.mrf.mxu0 }
  0xfa   :  { %v179_v22 = vadd.f32 %v189_v17, %v178_v21 }
  0xfb   :  { %v180_v23 = vpop.f32.mrf.mxu0 }
  0xfc   :  { %184 = vst.msk [vmem:[%s301_s3 + $0x8] sm:$0xff] %vm182_vm2, %v179_v22 }

// kernel: scale_hyperprior_forward.23
= control target key start
LH: loop header
LB: loop body
LE: loop exit
PB: predicated region body
PF: predicated region fallthrough
CT: control target
= control target key end

     0   :  { %v103_v0 = vlaneseq  ;;  %v861_v3 = vmov 1966171168   ;;  %vm66_vm1 = vcmask 64512   ;;  %s1331_s0 = inlined_call_operand.vmem [shape: f32[8,8], index: 0, kind: input, shape index: {}]   ;;  %s1332_s1 = inlined_call_operand.vmem [shape: f32[1,8], index: 1, kind: input, shape index: {}]   ;;  %s1333_s7 = inlined_call_operand.vmem [shape: f32[3,8], index: 7, kind: input, shape index: {}]   ;;  %s1334_s2 = inlined_call_operand.vmem [shape: f32[3,1,8], index: 2, kind: input, shape index: {}]   ;;  %s1335_s16 = inlined_call_operand.vmem [shape: f32[8,8], index: 16, kind: output, shape index: {0}]   ;;  %s1336_s8 = inlined_call_operand.vmem [shape: f32[3,8], index: 8, kind: input, shape index: {}]   ;;  %s1337_s10 = inlined_call_operand.vmem [shape: f32[3,8], index: 10, kind: input, shape index: {}]   ;;  %s1338_s3 = inlined_call_operand.vmem [shape: f32[3,3,8], index: 3, kind: input, shape index: {}]   ;;  %s1339_s12 = inlined_call_operand.vmem [shape: f32[3,8], index: 12, kind: input, shape index: {}]   ;;  %s1340_s14 = inlined_call_operand.vmem [shape: f32[3,8], index: 14, kind: input, shape index: {}]   ;;  %s1341_s15 = inlined_call_operand.vmem [shape: f32[3,8], index: 15, kind: input, shape index: {}]   ;;  %s1342_s13 = inlined_call_operand.vmem [shape: f32[3,8], index: 13, kind: input, shape index: {}]   ;;  %s1343_s9 = inlined_call_operand.vmem [shape: f32[3,8], index: 9, kind: input, shape index: {}]   ;;  %s1344_s4 = inlined_call_operand.vmem [shape: f32[3,3,8], index: 4, kind: input, shape index: {}]   ;;  %s1345_s5 = inlined_call_operand.vmem [shape: f32[3,3,8], index: 5, kind: input, shape index: {}]   ;;  %s1346_s6 = inlined_call_operand.vmem [shape: f32[1,3,8], index: 6, kind: input, shape index: {}]   ;;  %s1347_s11 = inlined_call_operand.vmem [shape: f32[1,8], index: 11, kind: input, shape index: {}]   ;;  %s1348_s17 = inlined_call_operand.vmem [shape: f32[8,8], index: 17, kind: output, shape index: {1}]  }
   0x1   :  { %1349 = sst [smem:[#allocation2_spill]] %s1331_s0  ;;  %v101_v4 = vunpack.c.l.s4 %v861_v3  ;;  %v783_v13 = vld.sshfl [vmem:[%s1333_s7] sm:$0x13 pattern:$0x75316420] }
   0x2   :  { %1350 = sst [smem:[#allocation3_spill]] %s1332_s1  ;;  %v959_v8 = vshrl.u32 %v103_v0, 7  ;;  %v99_v15 = vcombine.high %v783_v13, %v783_v13  ;;  %v977_v23 = vld [vmem:[%s1334_s2] ss:$0 sm:$0xff]  ;;  %v982_v24 = vld [vmem:[%s1334_s2 + $0x1] ss:$0 sm:$0xff] }
   0x3   :  { %s1351_s26 = sld [smem:[#allocation2_spill]]  ;;  %v102_v6 = vunpack.c.0.s8 %v101_v4  ;;  %v987_v25 = vld [vmem:[%s1334_s2 + $0x2] ss:$0 sm:$0xff]  ;;  %v72_v42 = vld [vmem:[%s1338_s3 + $0x4] sm:$0x7] }
   0x4   :  { %s1352_s29 = sld [smem:[#allocation3_spill]]  ;;  %v970_v20 = vsub.s32 0, %v959_v8  ;;  %v788_v33 = vld.sshfl [vmem:[%s1336_s8] sm:$0x13 pattern:$0x75316420] }
   0x5   :  { %v962_v12 = vsub.s32 %v102_v6, %v959_v8  ;;  %v792_v37 = vld.sshfl [vmem:[%s1337_s10] sm:$0x13 pattern:$0x75316420]  ;;  %v210_v41 = vcombine.high %v788_v33, %v788_v33  ;;  %v73_v53 = vld [vmem:[%s1338_s3 + $0x8] sm:$0x7] }
   0x6   :  { %v1025_v38 = vld [vmem:[%s1338_s3] sm:$0x7]  ;;  %v492_v48 = vcombine.high %v792_v37, %v792_v37  ;;  %v1048_v51 = vrot.slane %v72_v42, %v970_v20  ;;  %v1076_v3 = vrot.slane %v73_v53, %v970_v20 }
   0x7   :  { %v106_v16 = vrot.slane %v783_v13, %v962_v12  ;;  %v113_v18 = vrot.slane %v99_v15, %v962_v12  ;;  %v787_v39 = vld.sshfl [vmem:[%s1339_s12] sm:$0x13 pattern:$0x75316420]  ;;  %v1041_v44 = vrot.slane %v1025_v38, %v970_v20  ;;  %v217_v45 = vrot.slane %v788_v33, %v962_v12 }
   0x8   :  { %v791_v40 = vld.sshfl [vmem:[%s1340_s14] sm:$0x13 pattern:$0x75316420]  ;;  %v162_v43 = vcombine.high %v787_v39, %v787_v39  ;;  %v169_v49 = vrot.slane %v787_v39, %v962_v12  ;;  %v224_v50 = vrot.slane %v210_v41, %v962_v12  ;;  %v499_v52 = vrot.slane %v792_v37, %v962_v12 }
   0x9   :  { %v55_v1 = vld [vmem:[%s1351_s26] sm:$0xff]  ;;  %v114_v19 = vcombine.high %v106_v16, %v106_v16  ;;  %v996_v27 = vrot.slane %v106_v16, %v970_v20  ;;  %v999_v28 = vrot.slane %v113_v18, %v970_v20  ;;  %v444_v46 = vcombine.high %v791_v40, %v791_v40 }
   0xa   :  { %v781_v2 = vld [vmem:[%s1352_s29] ss:$0 sm:$0xff]  ;;  %v451_v47 = vrot.slane %v791_v40, %v962_v12  ;;  %v506_v57 = vrot.slane %v492_v48, %v962_v12  ;;  %v176_v59 = vrot.slane %v162_v43, %v962_v12  ;;  %v225_v60 = vcombine.high %v217_v45, %v217_v45 }
   0xb   :  { %v63_v5 = vsub.f32 %v55_v1, %v781_v2  ;;  %v1002_v29 = vrot.slane %v114_v19, %v970_v20  ;;  %v458_v54 = vrot.slane %v444_v46, %v962_v12  ;;  %v793_v58 = vld.sshfl [vmem:[%s1341_s15] sm:$0x13 pattern:$0x75316420]  ;;  %v507_v61 = vcombine.high %v499_v52, %v499_v52 }
   0xc   :  { %v459_v55 = vcombine.high %v451_v47, %v451_v47  ;;  %v1056_v56 = vrot.slane %v451_v47, %v970_v20  ;;  %v1064_v62 = vrot.slane %v499_v52, %v970_v20  ;;  %v177_v63 = vcombine.high %v169_v49, %v169_v49 }
   0xd   :  { %v797_v7 = vcvt.f32.s32 %v63_v5  ;;  %v795_v9 = vand.u32 2147483647, %v63_v5  ;;  %v800_v11 = vand.u32 2147483648, %v63_v5  ;;  %v1067_v0 = vrot.slane %v458_v54, %v970_v20 }
   0xe   :  { %v1070_v1 = vrot.slane %v459_v55, %v970_v20  ;;  %v1079_v4 = vrot.slane %v217_v45, %v970_v20  ;;  %v1085_v6 = vrot.slane %v507_v61, %v970_v20  ;;  %v1095_v13 = vrot.slane %v176_v59, %v970_v20  ;;  %v789_v59 = vld.sshfl [vmem:[%s1342_s13] sm:$0x13 pattern:$0x75316420] }
   0xf   :  { %v798_v10 = vcvt.s32.f32 %v797_v7  ;;  %vm796_vm0 = vcmp.lt.f32.partialorder %v795_v9, 8388608.0  ;;  %v1088_v7 = vrot.slane %v169_v49, %v970_v20  ;;  %v1091_v9 = vrot.slane %v224_v50, %v970_v20 }
  0x10   :  { %v1101_v15 = vsub.s32 2, %v959_v8 }
  0x11   :  { %v799_v14 = vand.u32 2147483647, %v798_v10  ;;  %v585_v10 = vcombine.high %v793_v58, %v793_v58 }
  0x12   :  { %v1138_v47 = vrot.slane %v1025_v38, %v1101_v15  ;;  %v1141_v48 = vrot.slane %v72_v42, %v1101_v15  ;;  %v1145_v50 = vrot.slane %v73_v53, %v1101_v15 }
  0x13   :  { %v801_v17 = vor.u32 %v800_v11, %v799_v14  ;;  %v592_v11 = vrot.slane %v793_v58, %v962_v12  ;;  %v1098_v14 = vrot.slane %v225_v60, %v970_v20  ;;  %v599_v18 = vrot.slane %v585_v10, %v962_v12 }
  0x15   :  { %v802_v21 = vsel %vm796_vm0, %v801_v17, %v63_v5  ;;  %v1082_v5 = vsub.s32 1, %v959_v8  ;;  %v1105_v17 = vrot.slane %v177_v63, %v970_v20  ;;  %v600_v19 = vcombine.high %v592_v11, %v592_v11 }
  0x16   :  { %v972_v22 = vadd.f32 %v802_v21, %v781_v2  ;;  %v1073_v2 = vrot.slane %v506_v57, %v970_v20  ;;  %v1109_v21 = vrot.slane %v592_v11, %v970_v20  ;;  %v1123_v39 = vrot.slane %v599_v18, %v970_v20  ;;  %v790_v18 = vld.sshfl [vmem:[%s1343_s9] sm:$0x13 pattern:$0x75316420] }
  0x17   :  { %v1120_v37 = vrot.slane %v72_v42, %v1082_v5  ;;  %v1126_v40 = vrot.slane %v600_v19, %v970_v20  ;;  %v303_v19 = vcombine.high %v789_v59, %v789_v59 }
  0x18   :  { %67 = vst.msk [vmem:[%s1335_s16] sm:$0xff] %vm66_vm1, %v972_v22  ;;  %v782_v26 = vadd.f32 -0.5, %v972_v22  ;;  %v649_v16 = vadd.f32 0.5, %v972_v22 }
  0x1a   :  { %v133_v30 = vmul.f32 %v977_v23, %v782_v26  ;;  %v134_v31 = vmul.f32 %v982_v24, %v782_v26  ;;  %v135_v32 = vmul.f32 %v987_v25, %v782_v26  ;;  %v651_v8 = vmul.f32 %v982_v24, %v649_v16 }
  0x1b   :  { %v652_v22 = vmul.f32 %v987_v25, %v649_v16 }
  0x1c   :  { %v1011_v34 = vadd.f32 %v996_v27, %v133_v30  ;;  %v1014_v35 = vadd.f32 %v999_v28, %v134_v31  ;;  %v1017_v36 = vadd.f32 %v1002_v29, %v135_v32  ;;  %v1113_v30 = vrot.slane %v1025_v38, %v1082_v5 }
  0x1d   :  { %v650_v31 = vmul.f32 %v977_v23, %v649_v16  ;;  %v1130_v23 = vrot.slane %v73_v53, %v1082_v5  ;;  %v654_v25 = vadd.f32 %v651_v8, %v999_v28  ;;  %v317_v8 = vrot.slane %v303_v19, %v962_v12 }
  0x1e   :  { %805 = vtanh.f32 %v1011_v34 }
  0x1f   :  { %807 = vtanh.f32 %v1014_v35  ;;  %v653_v24 = vadd.f32 %v650_v31, %v996_v27  ;;  %v655_v27 = vadd.f32 %v652_v22, %v1002_v29  ;;  %v351_v31 = vcombine.high %v790_v18, %v790_v18 }
  0x20   :  { %809 = vtanh.f32 %v1017_v36 }
  0x21   :  { %811 = vtanh.f32 %v653_v24 }
  0x22   :  { %813 = vtanh.f32 %v654_v25 }
  0x23   :  { %815 = vtanh.f32 %v655_v27 }
  0x2b   :  { %v806_v26 = vpop.eup %805 }
  0x2c   :  { %v808_v32 = vpop.eup %807  ;;  %v196_v33 = vmul.f32 %v806_v26, %v1088_v7  ;;  %v310_v26 = vrot.slane %v789_v59, %v962_v12 }
  0x2d   :  { %v810_v41 = vpop.eup %809  ;;  %v197_v43 = vmul.f32 %v808_v32, %v1095_v13 }
  0x2e   :  { %v198_v45 = vmul.f32 %v810_v41, %v1105_v17  ;;  %v199_v46 = vadd.f32 %v196_v33, %v1011_v34  ;;  %v318_v22 = vcombine.high %v310_v26, %v310_v26  ;;  %v812_v32 = vpop.eup %811  ;;  %v74_v33 = vld [vmem:[%s1344_s4] sm:$0x7]  ;;  %v75_v41 = vld [vmem:[%s1344_s4 + $0x4] sm:$0x7] }
  0x2f   :  { %v200_v49 = vadd.f32 %v197_v43, %v1014_v35  ;;  %v76_v43 = vld [vmem:[%s1344_s4 + $0x8] sm:$0x7]  ;;  %v1219_v59 = vrot.slane %v74_v33, %v1082_v5 }
  0x30   :  { %v201_v28 = vadd.f32 %v198_v45, %v1017_v36  ;;  %v238_v52 = vmul.f32 %v1041_v44, %v199_v46  ;;  %v239_v34 = vmul.f32 %v1048_v51, %v199_v46  ;;  %v240_v38 = vmul.f32 %v1076_v3, %v199_v46  ;;  %v814_v46 = vpop.eup %813 }
  0x31   :  { %v271_v54 = vmul.f32 %v1113_v30, %v200_v49  ;;  %v272_v42 = vmul.f32 %v1120_v37, %v200_v49  ;;  %v273_v35 = vmul.f32 %v1130_v23, %v200_v49  ;;  %v659_v45 = vmul.f32 %v812_v32, %v1088_v7 }
  0x32   :  { %v256_v53 = vadd.f32 %v1079_v4, %v238_v52  ;;  %v257_v29 = vadd.f32 %v1091_v9, %v239_v34  ;;  %v258_v55 = vadd.f32 %v1098_v14, %v240_v38  ;;  %v289_v36 = vmul.f32 %v1138_v47, %v201_v28 }
  0x33   :  { %v290_v57 = vmul.f32 %v1141_v48, %v201_v28  ;;  %v291_v58 = vmul.f32 %v1145_v50, %v201_v28  ;;  %v1189_v49 = vrot.slane %v310_v26, %v970_v20  ;;  %v358_v28 = vrot.slane %v790_v18, %v962_v12 }
  0x34   :  { %v274_v60 = vadd.f32 %v271_v54, %v256_v53  ;;  %v275_v61 = vadd.f32 %v272_v42, %v257_v29  ;;  %v276_v63 = vadd.f32 %v273_v35, %v258_v55  ;;  %v365_v52 = vrot.slane %v351_v31, %v962_v12  ;;  %v816_v35 = vpop.eup %815 }
  0x35   :  { %v1194_v34 = vrot.slane %v317_v8, %v970_v20  ;;  %v1197_v38 = vrot.slane %v318_v22, %v970_v20  ;;  %v660_v54 = vmul.f32 %v814_v46, %v1095_v13  ;;  %v662_v42 = vadd.f32 %v659_v45, %v653_v24 }
  0x36   :  { %v1164_v10 = vadd.f32 %v289_v36, %v274_v60  ;;  %v1166_v11 = vadd.f32 %v290_v57, %v275_v61  ;;  %v1168_v16 = vadd.f32 %v291_v58, %v276_v63  ;;  %v366_v53 = vcombine.high %v358_v28, %v358_v28 }
  0x37   :  { %v1201_v7 = vrot.slane %v74_v33, %v970_v20  ;;  %v1204_v29 = vrot.slane %v75_v41, %v970_v20  ;;  %v1207_v55 = vrot.slane %v76_v43, %v970_v20  ;;  %v661_v12 = vmul.f32 %v816_v35, %v1105_v17 }
  0x38   :  { %817 = vtanh.f32 %v1164_v10  ;;  %v663_v36 = vadd.f32 %v660_v54, %v654_v25  ;;  %v665_v57 = vmul.f32 %v662_v42, %v1041_v44  ;;  %v666_v58 = vmul.f32 %v662_v42, %v1048_v51 }
  0x39   :  { %819 = vtanh.f32 %v1166_v11  ;;  %v1213_v13 = vrot.slane %v358_v28, %v970_v20  ;;  %v1216_v24 = vrot.slane %v365_v52, %v970_v20  ;;  %v667_v60 = vmul.f32 %v662_v42, %v1076_v3 }
  0x3a   :  { %821 = vtanh.f32 %v1168_v16  ;;  %v664_v61 = vadd.f32 %v661_v12, %v655_v27  ;;  %v668_v63 = vadd.f32 %v665_v57, %v1079_v4  ;;  %v669_v17 = vadd.f32 %v666_v58, %v1091_v9 }
  0x3b   :  { %v671_v44 = vmul.f32 %v663_v36, %v1113_v30  ;;  %v1226_v51 = vrot.slane %v75_v41, %v1082_v5  ;;  %v670_v25 = vadd.f32 %v667_v60, %v1098_v14  ;;  %v672_v18 = vmul.f32 %v663_v36, %v1120_v37 }
  0x3c   :  { %v673_v19 = vmul.f32 %v663_v36, %v1130_v23  ;;  %v677_v3 = vmul.f32 %v664_v61, %v1138_v47  ;;  %v678_v27 = vmul.f32 %v664_v61, %v1141_v48  ;;  %v679_v4 = vmul.f32 %v664_v61, %v1145_v50 }
  0x3d   :  { %v674_v31 = vadd.f32 %v671_v44, %v668_v63  ;;  %v1236_v8 = vrot.slane %v366_v53, %v970_v20  ;;  %v675_v22 = vadd.f32 %v672_v18, %v669_v17  ;;  %v411_v23 = vrot.slane %v76_v43, %v1082_v5 }
  0x3e   :  { %v676_v14 = vadd.f32 %v673_v19, %v670_v25  ;;  %v421_v45 = vrot.slane %v74_v33, %v1101_v15  ;;  %v425_v46 = vrot.slane %v75_v41, %v1101_v15  ;;  %v429_v54 = vrot.slane %v76_v43, %v1101_v15 }
  0x3f   :  { %v680_v47 = vadd.f32 %v677_v3, %v674_v31  ;;  %v681_v28 = vadd.f32 %v678_v27, %v675_v22  ;;  %v77_v3 = vld [vmem:[%s1345_s5] sm:$0x7]  ;;  %v78_v27 = vld [vmem:[%s1345_s5 + $0x4] sm:$0x7] }
  0x40   :  { %v682_v42 = vadd.f32 %v679_v4, %v676_v14  ;;  %v79_v4 = vld [vmem:[%s1345_s5 + $0x8] sm:$0x7] }
  0x41   :  { %823 = vtanh.f32 %v680_v47 }
  0x42   :  { %825 = vtanh.f32 %v681_v28 }
  0x43   :  { %827 = vtanh.f32 %v682_v42 }
  0x45   :  { %v818_v26 = vpop.eup %817 }
  0x46   :  { %v820_v9 = vpop.eup %819  ;;  %v337_v30 = vmul.f32 %v818_v26, %v1189_v49 }
  0x47   :  { %v822_v32 = vpop.eup %821  ;;  %v338_v37 = vmul.f32 %v820_v9, %v1194_v34 }
  0x48   :  { %v339_v48 = vmul.f32 %v822_v32, %v1197_v38  ;;  %v340_v50 = vadd.f32 %v337_v30, %v1164_v10 }
  0x49   :  { %v341_v52 = vadd.f32 %v338_v37, %v1166_v11 }
  0x4a   :  { %v342_v35 = vadd.f32 %v339_v48, %v1168_v16  ;;  %v379_v53 = vmul.f32 %v1201_v7, %v340_v50  ;;  %v380_v33 = vmul.f32 %v1204_v29, %v340_v50  ;;  %v381_v12 = vmul.f32 %v1207_v55, %v340_v50 }
  0x4b   :  { %v412_v36 = vmul.f32 %v1219_v59, %v341_v52  ;;  %v413_v10 = vmul.f32 %v1226_v51, %v341_v52  ;;  %v414_v41 = vmul.f32 %v411_v23, %v341_v52  ;;  %v1270_v48 = vrot.slane %v77_v3, %v970_v20 }
  0x4c   :  { %v397_v11 = vadd.f32 %v1213_v13, %v379_v53  ;;  %v398_v43 = vadd.f32 %v1216_v24, %v380_v33  ;;  %v399_v57 = vadd.f32 %v1236_v8, %v381_v12  ;;  %v430_v58 = vmul.f32 %v421_v45, %v342_v35 }
  0x4d   :  { %v431_v16 = vmul.f32 %v425_v46, %v342_v35  ;;  %v432_v60 = vmul.f32 %v429_v54, %v342_v35  ;;  %v1273_v50 = vrot.slane %v78_v27, %v970_v20  ;;  %v1276_v52 = vrot.slane %v79_v4, %v970_v20 }
  0x4e   :  { %v415_v61 = vadd.f32 %v412_v36, %v397_v11  ;;  %v416_v63 = vadd.f32 %v413_v10, %v398_v43  ;;  %v417_v17 = vadd.f32 %v414_v41, %v399_v57  ;;  %v824_v19 = vpop.eup %823 }
  0x4f   :  { %v686_v26 = vmul.f32 %v824_v19, %v1189_v49  ;;  %v826_v31 = vpop.eup %825 }
  0x50   :  { %v433_v44 = vadd.f32 %v430_v58, %v415_v61  ;;  %v434_v25 = vadd.f32 %v431_v16, %v416_v63  ;;  %v435_v18 = vadd.f32 %v432_v60, %v417_v17  ;;  %v687_v9 = vmul.f32 %v826_v31, %v1194_v34  ;;  %v828_v22 = vpop.eup %827 }
  0x51   :  { %v689_v30 = vadd.f32 %v686_v26, %v680_v47  ;;  %v688_v14 = vmul.f32 %v828_v22, %v1197_v38  ;;  %v570_v60 = vrot.slane %v79_v4, %v1101_v15 }
  0x52   :  { %829 = vtanh.f32 %v433_v44  ;;  %v690_v49 = vadd.f32 %v687_v9, %v681_v28 }
  0x53   :  { %831 = vtanh.f32 %v434_v25  ;;  %v692_v32 = vmul.f32 %v689_v30, %v1201_v7  ;;  %v693_v37 = vmul.f32 %v689_v30, %v1204_v29  ;;  %v694_v34 = vmul.f32 %v689_v30, %v1207_v55 }
  0x54   :  { %833 = vtanh.f32 %v435_v18  ;;  %v691_v47 = vadd.f32 %v688_v14, %v682_v42  ;;  %v698_v7 = vmul.f32 %v690_v49, %v1219_v59  ;;  %v1283_v29 = vrot.slane %v77_v3, %v1082_v5 }
  0x55   :  { %v695_v35 = vadd.f32 %v692_v32, %v1213_v13  ;;  %v696_v38 = vadd.f32 %v693_v37, %v1216_v24  ;;  %v697_v28 = vadd.f32 %v694_v34, %v1236_v8  ;;  %v699_v53 = vmul.f32 %v690_v49, %v1226_v51 }
  0x56   :  { %v700_v33 = vmul.f32 %v690_v49, %v411_v23  ;;  %v704_v10 = vmul.f32 %v691_v47, %v421_v45  ;;  %v705_v41 = vmul.f32 %v691_v47, %v425_v46  ;;  %v706_v55 = vmul.f32 %v691_v47, %v429_v54 }
  0x57   :  { %v701_v36 = vadd.f32 %v698_v7, %v695_v35  ;;  %v548_v24 = vrot.slane %v78_v27, %v1082_v5  ;;  %v702_v11 = vadd.f32 %v699_v53, %v696_v38  ;;  %v552_v8 = vrot.slane %v79_v4, %v1082_v5 }
  0x58   :  { %v703_v59 = vadd.f32 %v700_v33, %v697_v28  ;;  %v562_v51 = vrot.slane %v77_v3, %v1101_v15  ;;  %v566_v46 = vrot.slane %v78_v27, %v1101_v15 }
  0x59   :  { %v707_v23 = vadd.f32 %v704_v10, %v701_v36  ;;  %v708_v54 = vadd.f32 %v705_v41, %v702_v11 }
  0x5a   :  { %v709_v61 = vadd.f32 %v706_v55, %v703_v59  ;;  %v80_v55 = vld [vmem:[%s1346_s6] sm:$0x7] }
  0x5b   :  { %835 = vtanh.f32 %v707_v23 }
  0x5c   :  { %837 = vtanh.f32 %v708_v54 }
  0x5d   :  { %839 = vtanh.f32 %v709_v61 }
  0x5f   :  { %v830_v12 = vpop.eup %829 }
  0x60   :  { %v832_v42 = vpop.eup %831  ;;  %v478_v13 = vmul.f32 %v830_v12, %v1056_v56 }
  0x61   :  { %v834_v43 = vpop.eup %833  ;;  %v479_v57 = vmul.f32 %v832_v42, %v1067_v0 }
  0x62   :  { %v480_v58 = vmul.f32 %v834_v43, %v1070_v1  ;;  %v481_v45 = vadd.f32 %v478_v13, %v433_v44 }
  0x63   :  { %v482_v16 = vadd.f32 %v479_v57, %v434_v25 }
  0x64   :  { %v483_v63 = vadd.f32 %v480_v58, %v435_v18  ;;  %v520_v17 = vmul.f32 %v1270_v48, %v481_v45  ;;  %v521_v19 = vmul.f32 %v1273_v50, %v481_v45  ;;  %v522_v26 = vmul.f32 %v1276_v52, %v481_v45 }
  0x65   :  { %v553_v31 = vmul.f32 %v1283_v29, %v482_v16  ;;  %v554_v3 = vmul.f32 %v548_v24, %v482_v16  ;;  %v555_v9 = vmul.f32 %v552_v8, %v482_v16  ;;  %v628_v45 = vrot.slane %v80_v55, %v970_v20 }
  0x66   :  { %v538_v44 = vadd.f32 %v1064_v62, %v520_v17  ;;  %v539_v25 = vadd.f32 %v1073_v2, %v521_v19  ;;  %v540_v27 = vadd.f32 %v1085_v6, %v522_v26  ;;  %v571_v4 = vmul.f32 %v562_v51, %v483_v63 }
  0x67   :  { %v572_v30 = vmul.f32 %v566_v46, %v483_v63  ;;  %v573_v18 = vmul.f32 %v570_v60, %v483_v63 }
  0x68   :  { %v556_v22 = vadd.f32 %v553_v31, %v538_v44  ;;  %v557_v14 = vadd.f32 %v554_v3, %v539_v25  ;;  %v558_v49 = vadd.f32 %v555_v9, %v540_v27  ;;  %v836_v47 = vpop.eup %835 }
  0x69   :  { %v713_v35 = vmul.f32 %v836_v47, %v1056_v56  ;;  %v838_v38 = vpop.eup %837 }
  0x6a   :  { %v574_v32 = vadd.f32 %v571_v4, %v556_v22  ;;  %v575_v37 = vadd.f32 %v572_v30, %v557_v14  ;;  %v576_v34 = vadd.f32 %v573_v18, %v558_v49  ;;  %v714_v7 = vmul.f32 %v838_v38, %v1067_v0  ;;  %v840_v53 = vpop.eup %839 }
  0x6b   :  { %v716_v28 = vadd.f32 %v713_v35, %v707_v23  ;;  %v715_v33 = vmul.f32 %v840_v53, %v1070_v1  ;;  %v862_v38 = vmov 0.0  }
  0x6c   :  { %841 = vtanh.f32 %v574_v32  ;;  %v717_v12 = vadd.f32 %v714_v7, %v708_v54 }
  0x6d   :  { %843 = vtanh.f32 %v575_v37  ;;  %v719_v36 = vmul.f32 %v716_v28, %v1270_v48  ;;  %v720_v10 = vmul.f32 %v716_v28, %v1273_v50  ;;  %v721_v41 = vmul.f32 %v716_v28, %v1276_v52 }
  0x6e   :  { %845 = vtanh.f32 %v576_v34  ;;  %v718_v42 = vadd.f32 %v715_v33, %v709_v61  ;;  %v725_v13 = vmul.f32 %v717_v12, %v1283_v29  ;;  %v726_v11 = vmul.f32 %v717_v12, %v548_v24  ;;  %v794_v61 = vld [vmem:[%s1347_s11] ss:$0 sm:$0xff] }
  0x6f   :  { %v722_v56 = vadd.f32 %v719_v36, %v1064_v62  ;;  %v723_v0 = vadd.f32 %v720_v10, %v1073_v2  ;;  %v724_v1 = vadd.f32 %v721_v41, %v1085_v6  ;;  %v727_v59 = vmul.f32 %v717_v12, %v552_v8 }
  0x70   :  { %v731_v50 = vmul.f32 %v718_v42, %v562_v51  ;;  %v732_v57 = vmul.f32 %v718_v42, %v566_v46  ;;  %v733_v52 = vmul.f32 %v718_v42, %v570_v60  ;;  %v640_v29 = vrot.slane %v80_v55, %v1082_v5 }
  0x71   :  { %v728_v43 = vadd.f32 %v725_v13, %v722_v56  ;;  %v729_v54 = vadd.f32 %v726_v11, %v723_v0  ;;  %v730_v62 = vadd.f32 %v727_v59, %v724_v1  ;;  %v646_v6 = vrot.slane %v80_v55, %v1101_v15 }
  0x73   :  { %v734_v24 = vadd.f32 %v731_v50, %v728_v43  ;;  %v735_v46 = vadd.f32 %v732_v57, %v729_v54  ;;  %v736_v60 = vadd.f32 %v733_v52, %v730_v62 }
  0x75   :  { %847 = vtanh.f32 %v734_v24 }
  0x76   :  { %849 = vtanh.f32 %v735_v46 }
  0x77   :  { %851 = vtanh.f32 %v736_v60 }
  0x79   :  { %v842_v48 = vpop.eup %841 }
  0x7a   :  { %v844_v23 = vpop.eup %843  ;;  %v619_v58 = vmul.f32 %v842_v48, %v1109_v21 }
  0x7b   :  { %v846_v16 = vpop.eup %845  ;;  %v620_v2 = vmul.f32 %v844_v23, %v1123_v39 }
  0x7c   :  { %v621_v8 = vmul.f32 %v846_v16, %v1126_v40  ;;  %v622_v51 = vadd.f32 %v619_v58, %v574_v32 }
  0x7d   :  { %v623_v20 = vadd.f32 %v620_v2, %v575_v37 }
  0x7e   :  { %v624_v63 = vadd.f32 %v621_v8, %v576_v34  ;;  %v629_v17 = vmul.f32 %v628_v45, %v622_v51 }
  0x7f   :  { %v641_v19 = vmul.f32 %v640_v29, %v623_v20 }
  0x80   :  { %v636_v5 = vadd.f32 %v794_v61, %v629_v17  ;;  %v647_v26 = vmul.f32 %v646_v6, %v624_v63 }
  0x82   :  { %v642_v15 = vadd.f32 %v641_v19, %v636_v5  ;;  %v848_v3 = vpop.eup %847 }
  0x83   :  { %v850_v9 = vpop.eup %849  ;;  %v740_v44 = vmul.f32 %v848_v3, %v1109_v21 }
  0x84   :  { %v648_v31 = vadd.f32 %v647_v26, %v642_v15  ;;  %v852_v25 = vpop.eup %851  ;;  %v741_v27 = vmul.f32 %v850_v9, %v1123_v39 }
  0x85   :  { %v742_v4 = vmul.f32 %v852_v25, %v1126_v40  ;;  %v743_v30 = vadd.f32 %v740_v44, %v734_v24 }
  0x86   :  { %v744_v18 = vadd.f32 %v741_v27, %v735_v46 }
  0x87   :  { %v745_v22 = vadd.f32 %v742_v4, %v736_v60  ;;  %v746_v14 = vmul.f32 %v743_v30, %v628_v45 }
  0x88   :  { %v748_v49 = vmul.f32 %v744_v18, %v640_v29 }
  0x89   :  { %v747_v32 = vadd.f32 %v794_v61, %v746_v14  ;;  %v750_v37 = vmul.f32 %v745_v22, %v646_v6 }
  0x8b   :  { %v749_v34 = vadd.f32 %v748_v49, %v747_v32 }
  0x8d   :  { %v751_v47 = vadd.f32 %v750_v37, %v749_v34 }
  0x8f   :  { %v752_v35 = vadd.f32 %v751_v47, %v648_v31 }
  0x91   :  { %vm753_vm2 = vcmp.gt.f32.partialorder %v752_v35, 0.0  ;;  %vm754_vm3 = vcmp.lt.f32.partialorder %v752_v35, 0.0 }
  0x92   :  { %v755_v7 = vsel %vm754_vm3, 1.0, %v862_v38 }
  0x93   :  { %v756_v21 = vsel %vm753_vm2, -1.0, %v755_v7 }
  0x94   :  { %v757_v28 = vmul.f32 %v756_v21, %v751_v47  ;;  %v763_v53 = vmul.f32 %v756_v21, %v648_v31 }
  0x96   :  { %v758_v39 = vsub.f32 0.0, %v757_v28  ;;  %v764_v33 = vsub.f32 0.0, %v763_v53 }
  0x98   :  { %v759_v40 = vmul.f32 1.442695, %v758_v39  ;;  %v765_v12 = vmul.f32 1.442695, %v764_v33 }
  0x9a   :  { %853 = vpow2.f32 %v759_v40 }
  0x9b   :  { %855 = vpow2.f32 %v765_v12 }
  0xa7   :  { %v854_v36 = vpop.eup %853 }
  0xa8   :  { %v856_v10 = vpop.eup %855  ;;  %v761_v41 = vadd.f32 1.0, %v854_v36 }
  0xa9   :  { %v767_v55 = vadd.f32 1.0, %v856_v10 }
  0xaa   :  { %857 = vrcp.f32 %v761_v41 }
  0xab   :  { %859 = vrcp.f32 %v767_v55 }
  0xb7   :  { %v858_v42 = vpop.eup %857 }
  0xb8   :  { %v860_v56 = vpop.eup %859 }
  0xb9   :  { %v769_v0 = vsub.f32 %v858_v42, %v860_v56 }
  0xbb   :  { %v770_v13 = vand.u32 2147483647, %v769_v0 }
  0xbd   :  { %v771_v1 = vmax.f32 %v770_v13, 1e-09 }
  0xbf   :  { %772 = vst.msk [vmem:[%s1348_s17] sm:$0xff] %vm66_vm1, %v771_v1 }

// kernel: scale_hyperprior_forward.24
= control target key start
LH: loop header
LB: loop body
LE: loop exit
PB: predicated region body
PF: predicated region fallthrough
CT: control target
= control target key end

     0   :  { %vm69_vm0 = vcmask 1043456   ;;  %v159_v0 = vmov 0.0   ;;  %vm160_vm1 = vmmov 0   ;;  %vm65_vm2 = vcmask 588800   ;;  %s208_s1 = inlined_call_operand.vmem [shape: bf16[72,32], index: 1, kind: input, shape index: {}]   ;;  %s209_s0 = inlined_call_operand.vmem [shape: bf16[16,72], index: 0, kind: input, shape index: {}]   ;;  %s210_s2 = inlined_call_operand.vmem [shape: f32[1,32], index: 2, kind: input, shape index: {}]   ;;  %s211_s3 = inlined_call_operand.vmem [shape: f32[16,32], index: 3, kind: output, shape index: {}]  }
   0x1   :  { %137 = vmatprep.subr.bf16.mxu0 %v159_v0  ;;  %v153_v1 = vld [vmem:[%s208_s1 + $0x20] ss:$0 sps:$4 sm:$0xff]   ;;  %147 = vmatprep.mubr.msk.bf16.mxu0 %vm160_vm1, %v159_v0  ;;  %v154_v3 = vld [vmem:[%s208_s1 + $0x18] sm:$0xff]   ;;  %v155_v4 = vld [vmem:[%s208_s1 + $0x10] sm:$0xff]   ;;  %vm116_vm3 = vcmask 261120  }
   0x2   :  { %v71_v2 = vsel %vm69_vm0, %v153_v1, 0  ;;  %v156_v5 = vld [vmem:[%s208_s1 + $0x8] sm:$0xff]   ;;  %v157_v6 = vld [vmem:[%s208_s1] sm:$0xff]  }
   0x3   :  { %138 = vmatpush3.bf16.msra.mxu0 %v71_v2  ;;  %v158_v7 = vld [vmem:[%s209_s0] sm:$0xff]  }
   0x4   :  { %139 = vmatprep.subr.bf16.mxu0 %v159_v0  ;;  %v123_v8 = vld [vmem:[%s210_s2] ss:$0 sm:$0xff] }
   0x7   :  { %140 = vmatpush3.bf16.msra.mxu0 %v154_v3 }
   0x8   :  { %141 = vmatprep.subr.bf16.mxu0 %v159_v0 }
   0xb   :  { %142 = vmatpush3.bf16.msra.mxu0 %v155_v4 }
   0xc   :  { %143 = vmatprep.subr.bf16.mxu0 %v159_v0 }
   0xf   :  { %144 = vmatpush3.bf16.msra.mxu0 %v156_v5 }
  0x10   :  { %145 = vmatprep.subr.bf16.mxu0 %v159_v0 }
  0x13   :  { %146 = vmatpush3.bf16.msra.mxu0 %v157_v6 }
  0x16   :  { %148 = vmatmul.mubr.msk.bf16.vlgmr.msra.gmra.mxu0 %vm65_vm2, %v158_v7 }
  0xd6   :  { %v107_v9 = vpop.f32.mrf.mxu0 }
  0xd7   :  { %v108_v10 = vadd.f32 %v123_v8, %v107_v9 }
  0xd8   :  { %v149_v11 = vpop.f32.mrf.mxu0 }
  0xd9   :  { %v114_v12 = vmax.f32 %v108_v10, 0.0 }
  0xda   :  { %v110_v13 = vpop.f32.mrf.mxu0 }
  0xdb   :  { %117 = vst.msk [vmem:[%s211_s3] sm:$0xff] %vm116_vm3, %v114_v12  ;;  %v111_v14 = vadd.f32 %v123_v8, %v110_v13 }
  0xdc   :  { %v150_v15 = vpop.f32.mrf.mxu0 }
  0xdd   :  { %v115_v16 = vmax.f32 %v111_v14, 0.0 }
  0xdf   :  { %118 = vst.msk [vmem:[%s211_s3 + $0x8] sm:$0xff] %vm116_vm3, %v115_v16 }

// kernel: scale_hyperprior_forward.26
= control target key start
LH: loop header
LB: loop body
LE: loop exit
PB: predicated region body
PF: predicated region fallthrough
CT: control target
= control target key end

     0   :  { %vm69_vm0 = vcmask 1043456   ;;  %v159_v0 = vmov 0.0   ;;  %vm160_vm1 = vmmov 0   ;;  %vm65_vm2 = vcmask 588800   ;;  %s208_s1 = inlined_call_operand.vmem [shape: bf16[72,16], index: 1, kind: input, shape index: {}]   ;;  %s209_s0 = inlined_call_operand.vmem [shape: bf16[16,72], index: 0, kind: input, shape index: {}]   ;;  %s210_s2 = inlined_call_operand.vmem [shape: f32[1,16], index: 2, kind: input, shape index: {}]   ;;  %s211_s3 = inlined_call_operand.vmem [shape: f32[16,16], index: 3, kind: output, shape index: {}]  }
   0x1   :  { %137 = vmatprep.subr.bf16.mxu0 %v159_v0  ;;  %v153_v1 = vld [vmem:[%s208_s1 + $0x20] ss:$0 sps:$4 sm:$0xff]   ;;  %147 = vmatprep.mubr.msk.bf16.mxu0 %vm160_vm1, %v159_v0  ;;  %v154_v3 = vld [vmem:[%s208_s1 + $0x18] sm:$0xff]   ;;  %v155_v4 = vld [vmem:[%s208_s1 + $0x10] sm:$0xff]   ;;  %vm116_vm3 = vcmask 130048  }
   0x2   :  { %v71_v2 = vsel %vm69_vm0, %v153_v1, 0  ;;  %v156_v5 = vld [vmem:[%s208_s1 + $0x8] sm:$0xff]   ;;  %v157_v6 = vld [vmem:[%s208_s1] sm:$0xff]  }
   0x3   :  { %138 = vmatpush3.bf16.msra.mxu0 %v71_v2  ;;  %v158_v7 = vld [vmem:[%s209_s0] sm:$0xff]  }
   0x4   :  { %139 = vmatprep.subr.bf16.mxu0 %v159_v0  ;;  %v123_v8 = vld [vmem:[%s210_s2] ss:$0 sm:$0xff] }
   0x7   :  { %140 = vmatpush3.bf16.msra.mxu0 %v154_v3 }
   0x8   :  { %141 = vmatprep.subr.bf16.mxu0 %v159_v0 }
   0xb   :  { %142 = vmatpush3.bf16.msra.mxu0 %v155_v4 }
   0xc   :  { %143 = vmatprep.subr.bf16.mxu0 %v159_v0 }
   0xf   :  { %144 = vmatpush3.bf16.msra.mxu0 %v156_v5 }
  0x10   :  { %145 = vmatprep.subr.bf16.mxu0 %v159_v0 }
  0x13   :  { %146 = vmatpush3.bf16.msra.mxu0 %v157_v6 }
  0x16   :  { %148 = vmatmul.mubr.msk.bf16.vlgmr.msra.gmra.mxu0 %vm65_vm2, %v158_v7 }
  0xd6   :  { %v107_v9 = vpop.f32.mrf.mxu0 }
  0xd7   :  { %v108_v10 = vadd.f32 %v123_v8, %v107_v9 }
  0xd8   :  { %v149_v11 = vpop.f32.mrf.mxu0 }
  0xd9   :  { %v114_v12 = vmax.f32 %v108_v10, 0.0 }
  0xda   :  { %v110_v13 = vpop.f32.mrf.mxu0 }
  0xdb   :  { %117 = vst.msk [vmem:[%s211_s3] sm:$0xff] %vm116_vm3, %v114_v12  ;;  %v111_v14 = vadd.f32 %v123_v8, %v110_v13 }
  0xdc   :  { %v150_v15 = vpop.f32.mrf.mxu0 }
  0xdd   :  { %v115_v16 = vmax.f32 %v111_v14, 0.0 }
  0xdf   :  { %118 = vst.msk [vmem:[%s211_s3 + $0x8] sm:$0xff] %vm116_vm3, %v115_v16 }

// kernel: scale_hyperprior_forward.27
= control target key start
LH: loop header
LB: loop body
LE: loop exit
PB: predicated region body
PF: predicated region fallthrough
CT: control target
= control target key end

     0   :  { %s292_s0 = inlined_call_operand.vmem [shape: f32[16,16], index: 0, kind: input, shape index: {}]   ;;  %s293_s1 = inlined_call_operand.vmem [shape: f32[16,16], index: 1, kind: input, shape index: {}]   ;;  %s294_s2 = inlined_call_operand.vmem [shape: f32[16,16], index: 2, kind: output, shape index: {0}]   ;;  %s295_s3 = inlined_call_operand.hbm [shape: f32[16,16], index: 3, kind: output, shape index: {1}]  }
   0x1   :  { %v14_v0 = vld [vmem:[%s292_s0] sm:$0xff]  ;;  %v15_v2 = vld [vmem:[%s292_s0 + $0x8] sm:$0xff] }
   0x2   :  { %v16_v1 = vld [vmem:[%s293_s1] sm:$0xff]  ;;  %v169_v4 = vcvt.f32.s32 %v14_v0  ;;  %v17_v5 = vld [vmem:[%s293_s1 + $0x8] sm:$0xff]  ;;  %v167_v6 = vand.u32 2147483647, %v14_v0  ;;  %v177_v8 = vcvt.f32.s32 %v15_v2  ;;  %v172_v10 = vand.u32 2147483648, %v14_v0 }
   0x3   :  { %v18_v3 = vmax.f32 %v16_v1, 0.11  ;;  %v19_v7 = vmax.f32 %v17_v5, 0.11  ;;  %v175_v11 = vand.u32 2147483647, %v15_v2 }
   0x4   :  { %v170_v9 = vcvt.s32.f32 %v169_v4 }
   0x5   :  { %186 = vrcp.f32 %v18_v3 }
   0x6   :  { %9 = vsyncpa [#allocation3], 0  ;;  %v178_v12 = vcvt.s32.f32 %v177_v8  ;;  %v180_v13 = vand.u32 2147483648, %v15_v2  ;;  %188 = vrcp.f32 %v19_v7  ;;  %v171_v14 = vand.u32 2147483647, %v170_v9 }
   0x7   :  { %vm168_vm0 = vcmp.lt.f32.partialorder %v167_v6, 8388608.0  ;;  %vm22_vm1 = vcmask 130048   ;;  %vm176_vm2 = vcmp.lt.f32.partialorder %v175_v11, 8388608.0 }
   0x8   :  { %v179_v15 = vand.u32 2147483647, %v178_v12  ;;  %v173_v16 = vor.u32 %v172_v10, %v171_v14 }
   0xa   :  { %v181_v17 = vor.u32 %v180_v13, %v179_v15  ;;  %v174_v18 = vsel %vm168_vm0, %v173_v16, %v14_v0 }
   0xb   :  { %v25_v19 = vand.u32 2147483647, %v174_v18  ;;  %23 = vst.msk [vmem:[%s294_s2] sm:$0xff] %vm22_vm1, %v174_v18 }
   0xc   :  { %v182_v20 = vsel %vm176_vm2, %v181_v17, %v15_v2 }
   0xd   :  { %v26_v21 = vand.u32 2147483647, %v182_v20  ;;  %24 = vst.msk [vmem:[%s294_s2 + $0x8] sm:$0xff] %vm22_vm1, %v182_v20  ;;  %v29_v22 = vsub.f32 0.5, %v25_v19  ;;  %v85_v23 = vsub.f32 -0.5, %v25_v19  ;;  %s228_s2 = smov [#allocation2]  }
   0xe   :  { %s154_s22 = sshll.u32 %s228_s2, 4  ;;  %s155_s22 = int_to_ptr.vmem [resolvable:$true] %s154_s22 }
   0xf   :  { %v30_v24 = vsub.f32 0.5, %v26_v21  ;;  %v86_v25 = vsub.f32 -0.5, %v26_v21  ;;  %s206_s23 = scalar_lea.vmem %s155_s22, 256  ;;  %p211_p1 = scmp.lt.s32.totalorder %s155_s22, %s155_s22 }
  0x10   :  { %p207_p0 = scmp.ne.s32.totalorder %s155_s22, %s206_s23  ;;  %p212_p2 = scmp.lt.s32.totalorder %s206_s23, %s206_s23 }
  0x12   :  { %v187_v26 = vpop.eup %186  ;;  %p213_p3 = por %p212_p2, %p211_p1 }
  0x13   :  { %v189_v27 = vpop.eup %188  ;;  %v31_v28 = vmul.f32 %v187_v26, %v29_v22  ;;  %v87_v29 = vmul.f32 %v187_v26, %v85_v23 }
  0x14   :  { %v32_v30 = vmul.f32 %v189_v27, %v30_v24  ;;  %v88_v31 = vmul.f32 %v189_v27, %v86_v25  ;;  %p214_p4 = pnand %p213_p3, %p207_p0 }
  0x15   :  { %v33_v32 = vsub.f32 0.0, %v31_v28  ;;  %v89_v33 = vsub.f32 0.0, %v87_v29 }
  0x16   :  { %v34_v34 = vsub.f32 0.0, %v32_v30  ;;  %v90_v35 = vsub.f32 0.0, %v88_v31 }
  0x17   :  { %v271_v36 = vmul.f32 0.70710677, %v33_v32  ;;  %v273_v37 = vmul.f32 0.70710677, %v89_v33 }
  0x18   :  { %v275_v38 = vmul.f32 0.70710677, %v34_v34  ;;  %v277_v39 = vmul.f32 0.70710677, %v90_v35 }
  0x19   :  { %v37_v40 = vand.u32 2147483647, %v271_v36  ;;  %v93_v41 = vand.u32 2147483647, %v273_v37  ;;  %vm75_vm3 = vcmp.ge.f32.partialorder %v271_v36, 0.0  ;;  %vm131_vm4 = vcmp.ge.f32.partialorder %v273_v37, 0.0 }
  0x1a   :  { %v38_v42 = vand.u32 2147483647, %v275_v38  ;;  %v94_v43 = vand.u32 2147483647, %v277_v39  ;;  %vm76_vm5 = vcmp.ge.f32.partialorder %v275_v38, 0.0  ;;  %vm132_vm6 = vcmp.ge.f32.partialorder %v277_v39, 0.0 }
  0x1b   :  { %v39_v44 = vmul.f32 0.3275911, %v37_v40  ;;  %v95_v45 = vmul.f32 0.3275911, %v93_v41  ;;  %v63_v52 = vsub.f32 0.0, %v37_v40  ;;  %v119_v53 = vsub.f32 0.0, %v93_v41 }
  0x1c   :  { %v40_v46 = vmul.f32 0.3275911, %v38_v42  ;;  %v96_v49 = vmul.f32 0.3275911, %v94_v43  ;;  %v64_v55 = vsub.f32 0.0, %v38_v42  ;;  %v120_v57 = vsub.f32 0.0, %v94_v43 }
  0x1d   :  { %v41_v47 = vadd.f32 1.0, %v39_v44  ;;  %v97_v48 = vadd.f32 1.0, %v95_v45  ;;  %v65_v54 = vmul.f32 %v63_v52, %v37_v40  ;;  %v121_v56 = vmul.f32 %v119_v53, %v93_v41 }
  0x1e   :  { %v42_v50 = vadd.f32 1.0, %v40_v46  ;;  %v98_v51 = vadd.f32 1.0, %v96_v49  ;;  %v66_v59 = vmul.f32 %v64_v55, %v38_v42  ;;  %v122_v0 = vmul.f32 %v120_v57, %v94_v43 }
  0x1f   :  { %190 = vrcp.f32 %v41_v47  ;;  %v67_v58 = vmul.f32 1.442695, %v65_v54  ;;  %v123_v61 = vmul.f32 1.442695, %v121_v56 }
  0x20   :  { %192 = vrcp.f32 %v97_v48  ;;  %v69_v3 = vmul.f32 1.442695, %v66_v59  ;;  %v125_v8 = vmul.f32 1.442695, %v122_v0 }
  0x21   :  { %194 = vrcp.f32 %v42_v50 }
  0x22   :  { %196 = vrcp.f32 %v98_v51 }
  0x23   :  { %198 = vpow2.f32 %v67_v58 }
  0x24   :  { %200 = vpow2.f32 %v123_v61 }
  0x25   :  { %202 = vpow2.f32 %v69_v3 }
  0x26   :  { %204 = vpow2.f32 %v125_v8 }
  0x2c   :  { %v191_v60 = vpop.eup %190 }
  0x2d   :  { %v193_v62 = vpop.eup %192  ;;  %v45_v63 = vmul.f32 1.0614054, %v191_v60 }
  0x2e   :  { %v101_v1 = vmul.f32 1.0614054, %v193_v62  ;;  %v195_v4 = vpop.eup %194 }
  0x2f   :  { %v47_v2 = vadd.f32 -1.4531521, %v45_v63  ;;  %v46_v7 = vmul.f32 1.0614054, %v195_v4  ;;  %v197_v9 = vpop.eup %196 }
  0x30   :  { %v103_v5 = vadd.f32 -1.4531521, %v101_v1  ;;  %v102_v13 = vmul.f32 1.0614054, %v197_v9  ;;  %v199_v30 = vpop.eup %198 }
  0x31   :  { %v49_v6 = vmul.f32 %v191_v60, %v47_v2  ;;  %v48_v12 = vadd.f32 -1.4531521, %v46_v7  ;;  %v201_v32 = vpop.eup %200 }
  0x32   :  { %v105_v10 = vmul.f32 %v193_v62, %v103_v5  ;;  %v104_v17 = vadd.f32 -1.4531521, %v102_v13  ;;  %v203_v44 = vpop.eup %202 }
  0x33   :  { %v51_v11 = vadd.f32 1.4214138, %v49_v6  ;;  %v50_v16 = vmul.f32 %v195_v4, %v48_v12  ;;  %v205_v49 = vpop.eup %204 }
  0x34   :  { %v107_v14 = vadd.f32 1.4214138, %v105_v10  ;;  %v106_v21 = vmul.f32 %v197_v9, %v104_v17 }
  0x35   :  { %v53_v15 = vmul.f32 %v191_v60, %v51_v11  ;;  %v52_v20 = vadd.f32 1.4214138, %v50_v16 }
  0x36   :  { %v109_v18 = vmul.f32 %v193_v62, %v107_v14  ;;  %v108_v25 = vadd.f32 1.4214138, %v106_v21 }
  0x37   :  { %v55_v19 = vadd.f32 -0.28449672, %v53_v15  ;;  %v54_v24 = vmul.f32 %v195_v4, %v52_v20 }
  0x38   :  { %v111_v22 = vadd.f32 -0.28449672, %v109_v18  ;;  %v110_v29 = vmul.f32 %v197_v9, %v108_v25 }
  0x39   :  { %v57_v23 = vmul.f32 %v191_v60, %v55_v19  ;;  %v56_v28 = vadd.f32 -0.28449672, %v54_v24 }
  0x3a   :  { %v113_v26 = vmul.f32 %v193_v62, %v111_v22  ;;  %v112_v35 = vadd.f32 -0.28449672, %v110_v29 }
  0x3b   :  { %v59_v27 = vadd.f32 0.2548296, %v57_v23  ;;  %v58_v34 = vmul.f32 %v195_v4, %v56_v28 }
  0x3c   :  { %v115_v31 = vadd.f32 0.2548296, %v113_v26  ;;  %v114_v43 = vmul.f32 %v197_v9, %v112_v35 }
  0x3d   :  { %v61_v33 = vmul.f32 %v191_v60, %v59_v27  ;;  %v60_v42 = vadd.f32 0.2548296, %v58_v34 }
  0x3e   :  { %v117_v40 = vmul.f32 %v193_v62, %v115_v31  ;;  %v116_v48 = vadd.f32 0.2548296, %v114_v43 }
  0x3f   :  { %v71_v41 = vmul.f32 %v199_v30, %v61_v33  ;;  %v62_v47 = vmul.f32 %v195_v4, %v60_v42 }
  0x40   :  { %v127_v45 = vmul.f32 %v201_v32, %v117_v40  ;;  %v118_v53 = vmul.f32 %v197_v9, %v116_v48 }
  0x41   :  { %v73_v46 = vsub.f32 1.0, %v71_v41  ;;  %v72_v52 = vmul.f32 %v203_v44, %v62_v47 }
  0x42   :  { %v129_v50 = vsub.f32 1.0, %v127_v45  ;;  %v128_v57 = vmul.f32 %v205_v49, %v118_v53 }
  0x43   :  { %v77_v51 = vsub.f32 0.0, %v73_v46  ;;  %v74_v56 = vsub.f32 1.0, %v72_v52 }
  0x44   :  { %v133_v54 = vsub.f32 0.0, %v129_v50  ;;  %v130_v62 = vsub.f32 1.0, %v128_v57 }
  0x45   :  { %v79_v55 = vsel %vm75_vm3, %v73_v46, %v77_v51  ;;  %v78_v61 = vsub.f32 0.0, %v74_v56 }
  0x46   :  { %v81_v58 = vsub.f32 1.0, %v79_v55  ;;  %v135_v59 = vsel %vm131_vm4, %v129_v50, %v133_v54  ;;  %v134_v1 = vsub.f32 0.0, %v130_v62 }
  0x47   :  { %v137_v60 = vsub.f32 1.0, %v135_v59  ;;  %v80_v0 = vsel %vm76_vm5, %v74_v56, %v78_v61 }
  0x48   :  { %v83_v63 = vmul.f32 0.5, %v81_v58  ;;  %v82_v37 = vsub.f32 1.0, %v80_v0  ;;  %v136_v3 = vsel %vm132_vm6, %v130_v62, %v134_v1 }
  0x49   :  { %v139_v36 = vmul.f32 0.5, %v137_v60  ;;  %v138_v5 = vsub.f32 1.0, %v136_v3 }
  0x4a   :  { %v84_v4 = vmul.f32 0.5, %v82_v37 }
  0x4b   :  { %v141_v2 = vsub.f32 %v83_v63, %v139_v36  ;;  %v140_v7 = vmul.f32 0.5, %v138_v5 }
  0x4d   :  { %v143_v6 = vmax.f32 %v141_v2, 1e-09  ;;  %v142_v38 = vsub.f32 %v84_v4, %v140_v7 }
  0x4f   :  { %145 = vst.msk [vmem:[#allocation2] sm:$0xff] %vm22_vm1, %v143_v6  ;;  %v144_v8 = vmax.f32 %v142_v38, 1e-09 }
  0x51   :  { %146 = vst.msk [vmem:[#allocation2 + $0x8] sm:$0xff] %vm22_vm1, %v144_v8 }
  0x52   :  { %217 = shalt.err (!%p214_p4)
}
  0x53   :  { %s229_s24 = smov 128   ;;  %s230_s25 = smov 8  }
  0x54   :  { %160 = dma.vmem_to_hbm [thread:$0]  %s155_s22, 256, %s295_s3, [#allocation3], %s229_s24, %s229_s24, %s230_s25  }
  0x55   :  { %226 = dma.done.wait [#allocation3], 256  }
  0x56   :  { %227 = vsyncadd [#allocation3], 4294967040 }
  0x57   :  { %166 = vsyncpa [#allocation3], 1 }

// kernel: scale_hyperprior_forward.28
= control target key start
LH: loop header
LB: loop body
LE: loop exit
PB: predicated region body
PF: predicated region fallthrough
CT: control target
= control target key end

     0   :  { %v323_v0 = vmov 0   ;;  %vm111_vm0 = vcmask 130048   ;;  %vm169_vm1 = vcmask 261120   ;;  %s415_s1 = inlined_call_operand.vmem [shape: bf16[144,32], index: 1, kind: input, shape index: {}]   ;;  %s416_s0 = inlined_call_operand.vmem [shape: bf16[16,144], index: 0, kind: input, shape index: {}]   ;;  %s417_s3 = inlined_call_operand.vmem [shape: f32[32,32], index: 3, kind: input, shape index: {}]   ;;  %s418_s2 = inlined_call_operand.vmem [shape: f32[1,32], index: 2, kind: input, shape index: {}]   ;;  %s419_s4 = inlined_call_operand.vmem [shape: f32[1,32], index: 4, kind: input, shape index: {}]   ;;  %s420_s5 = inlined_call_operand.vmem [shape: f32[16,32], index: 5, kind: output, shape index: {}]  }
   0x1   :  { %115 = vmatprep.subr.bf16.mxu0 %v323_v0  ;;  %v307_v1 = vld [vmem:[%s415_s1 + $0x38] sm:$0xff]   ;;  %v308_v2 = vld [vmem:[%s415_s1 + $0x30] sm:$0xff]   ;;  %v309_v3 = vld [vmem:[%s415_s1 + $0x28] sm:$0xff]  }
   0x2   :  { %116 = vmatpush1.bf16.msra.mxu0 %v307_v1  ;;  %v310_v4 = vld [vmem:[%s415_s1 + $0x20] sm:$0xff]   ;;  %v311_v6 = vld [vmem:[%s415_s1 + $0x18] sm:$0xff]   ;;  %v312_v7 = vld [vmem:[%s415_s1 + $0x10] sm:$0xff]  }
   0x3   :  { %117 = vmatprep.subr.bf16.mxu0 %v323_v0  ;;  %v318_v5 = vld [vmem:[%s416_s0 + $0x4] ss:$8 sps:$4 sm:$0xff]   ;;  %v316_v11 = vld [vmem:[%s416_s0] ss:$8 sps:$4 sm:$0xff]   ;;  %v161_v12 = vld [vmem:[%s417_s3 + $0x18] sm:$0xff] }
   0x4   :  { %285 = vmatprep.mubr.msk.bf16.mxu0 %vm111_vm0, %v318_v5  ;;  %v313_v8 = vld [vmem:[%s415_s1 + $0x8] sm:$0xff]   ;;  %v314_v9 = vld [vmem:[%s415_s1] sm:$0xff]   ;;  %295 = vmatprep.subr.mxu1 %v161_v12  ;;  %v160_v13 = vld [vmem:[%s417_s3 + $0x10] sm:$0xff] }
   0x5   :  { %v315_v10 = vld [vmem:[%s415_s1 + $0x40] sm:$0xff]   ;;  %296 = vmatpush3.msra.mxu1 %v161_v12  ;;  %v159_v14 = vld [vmem:[%s417_s3 + $0x8] sm:$0xff] }
   0x6   :  { %118 = vmatpush1.bf16.msra.mxu0 %v308_v2  ;;  %297 = vmatprep.subr.mxu1 %v160_v13  ;;  %v158_v15 = vld [vmem:[%s417_s3] sm:$0xff] }
   0x7   :  { %119 = vmatprep.subr.bf16.mxu0 %v323_v0  ;;  %298 = vmatpush3.msra.mxu1 %v160_v13  ;;  %v273_v16 = vld [vmem:[%s418_s2] ss:$0 sm:$0xff] }
   0x8   :  { %299 = vmatprep.subr.mxu1 %v159_v14  ;;  %v286_v25 = vld [vmem:[%s419_s4] ss:$0 sm:$0xff] }
   0x9   :  { %300 = vmatpush3.msra.mxu1 %v159_v14 }
   0xa   :  { %120 = vmatpush1.bf16.msra.mxu0 %v309_v3  ;;  %301 = vmatprep.subr.mxu1 %v158_v15 }
   0xb   :  { %121 = vmatprep.subr.bf16.mxu0 %v323_v0  ;;  %302 = vmatpush3.msra.mxu1 %v158_v15 }
   0xe   :  { %122 = vmatpush1.bf16.msra.mxu0 %v310_v4 }
   0xf   :  { %123 = vmatprep.subr.bf16.mxu0 %v323_v0 }
  0x12   :  { %124 = vmatpush1.bf16.msra.mxu0 %v311_v6 }
  0x13   :  { %125 = vmatprep.subr.bf16.mxu0 %v323_v0 }
  0x16   :  { %126 = vmatpush1.bf16.msra.mxu0 %v312_v7 }
  0x17   :  { %127 = vmatprep.subr.bf16.mxu0 %v323_v0 }
  0x1a   :  { %128 = vmatpush1.bf16.msra.mxu0 %v313_v8 }
  0x1b   :  { %129 = vmatprep.subr.bf16.mxu0 %v323_v0 }
  0x1e   :  { %130 = vmatpush1.bf16.msra.mxu0 %v314_v9 }
  0x1f   :  { %145 = vmatprep.subr.bf16.mxu0 %v323_v0 }
  0x22   :  { %146 = vmatpush2.bf16.msra.mxu0 %v315_v10 }
  0x25   :  { %148 = vmatmul.mubr.bf16.vlgmr.msra.gmra.mxu0 %v316_v11 }
  0xe5   :  { %v149_v17 = vpop.f32.mrf.mxu0 }
  0xe6   :  { %v150_v18 = vadd.f32 %v273_v16, %v149_v17 }
  0xe7   :  { %v151_v19 = vpop.f32.mrf.mxu0 }
  0xe8   :  { %v156_v20 = vmul.f32 %v150_v18, %v150_v18 }
  0xe9   :  { %v152_v21 = vpop.f32.mrf.mxu0 }
  0xea   :  { %v153_v22 = vadd.f32 %v273_v16, %v152_v21  ;;  %303 = vmatprep.mubr.msk.f32.mxu1 %vm169_vm1, %v156_v20 }
  0xeb   :  { %v154_v23 = vpop.f32.mrf.mxu0 }
  0xec   :  { %v157_v24 = vmul.f32 %v153_v22, %v153_v22 }
  0xee   :  { %304 = vmatmul.mubr.msk.f32.vlgmr.msra.gmra.mxu1 %vm169_vm1, %v157_v24 }
 0x1ae   :  { %v305_v26 = vpop.f32.mrf.mxu1 }
 0x1af   :  { %v248_v27 = vadd.f32 %v305_v26, %v286_v25 }
 0x1b0   :  { %v242_v28 = vpop.f32.mrf.mxu1 }
 0x1b1   :  { %319 = vrsqrt.f32 %v248_v27  ;;  %v243_v29 = vadd.f32 %v286_v25, %v242_v28  ;;  %vm260_vm2 = vcmp.eq.f32.partialorder %v248_v27, inf  ;;  %v263_v32 = vand.u32 2147483648, %v248_v27 }
 0x1b2   :  { %vm262_vm3 = vcmp.eq.f32.partialorder %v248_v27, 0.0 }
 0x1b3   :  { %321 = vrsqrt.f32 %v243_v29  ;;  %vm253_vm4 = vcmp.eq.f32.partialorder %v243_v29, inf  ;;  %v256_v38 = vand.u32 2147483648, %v243_v29  ;;  %vm255_vm5 = vcmp.eq.f32.partialorder %v243_v29, 0.0 }
 0x1be   :  { %v320_v30 = vpop.eup %319 }
 0x1bf   :  { %v259_v31 = vmul.f32 %v320_v30, %v248_v27 }
 0x1c0   :  { %v322_v33 = vpop.eup %321 }
 0x1c1   :  { %v261_v34 = vsel %vm260_vm2, %v248_v27, %v259_v31  ;;  %v252_v36 = vmul.f32 %v322_v33, %v243_v29 }
 0x1c2   :  { %v264_v35 = vsel %vm262_vm3, %v263_v32, %v261_v34 }
 0x1c3   :  { %v266_v37 = vmul.f32 %v264_v35, %v153_v22  ;;  %v254_v39 = vsel %vm253_vm4, %v243_v29, %v252_v36 }
 0x1c4   :  { %v257_v40 = vsel %vm255_vm5, %v256_v38, %v254_v39 }
 0x1c5   :  { %268 = vst.msk [vmem:[%s420_s5 + $0x8] sm:$0xff] %vm169_vm1, %v266_v37  ;;  %v265_v41 = vmul.f32 %v257_v40, %v150_v18 }
 0x1c7   :  { %267 = vst.msk [vmem:[%s420_s5] sm:$0xff] %vm169_vm1, %v265_v41 }

// kernel: scale_hyperprior_forward.29
= control target key start
LH: loop header
LB: loop body
LE: loop exit
PB: predicated region body
PF: predicated region fallthrough
CT: control target
= control target key end

     0   :  { %vm105_vm0 = vcmask 1043456   ;;  %vm92_vm1 = vcmask 588800   ;;  %vm193_vm2 = vcmask 261120   ;;  %s685_s1 = inlined_call_operand.vmem [shape: bf16[72,32], index: 1, kind: input, shape index: {}]   ;;  %s686_s0 = inlined_call_operand.vmem [shape: bf16[64,72], index: 0, kind: input, shape index: {}]   ;;  %s687_s3 = inlined_call_operand.vmem [shape: f32[32,32], index: 3, kind: input, shape index: {}]   ;;  %s688_s2 = inlined_call_operand.vmem [shape: f32[1,32], index: 2, kind: input, shape index: {}]   ;;  %s689_s4 = inlined_call_operand.vmem [shape: f32[1,32], index: 4, kind: input, shape index: {}]   ;;  %s690_s5 = inlined_call_operand.vmem [shape: f32[64,32], index: 5, kind: output, shape index: {}]  }
   0x1   :  { %v482_v0 = vld [vmem:[%s685_s1 + $0x20] ss:$0 sps:$4 sm:$0xff]   ;;  %v483_v1 = vld [vmem:[%s685_s1 + $0x18] sm:$0xff]   ;;  %v484_v3 = vld [vmem:[%s685_s1 + $0x10] sm:$0xff]  }
   0x2   :  { %481 = vmatprep.subr.msk.bf16.mxu0 %vm105_vm0, %v482_v0  ;;  %v107_v2 = vsel %vm105_vm0, %v482_v0, 0  ;;  %v487_v4 = vld [vmem:[%s686_s0] sm:$0xff]   ;;  %v485_v5 = vld [vmem:[%s685_s1 + $0x8] sm:$0xff]   ;;  %v489_v8 = vld [vmem:[%s686_s0 + $0x10] sm:$0xff]  }
   0x3   :  { %444 = vmatpush3.bf16.msra.mxu0 %v107_v2  ;;  %453 = vmatprep.mubr.msk.bf16.mxu0 %vm92_vm1, %v487_v4  ;;  %v486_v6 = vld [vmem:[%s685_s1] sm:$0xff]   ;;  %v488_v7 = vld [vmem:[%s686_s0 + $0x8] sm:$0xff]   ;;  %v490_v9 = vld [vmem:[%s686_s0 + $0x18] sm:$0xff]  }
   0x4   :  { %445 = vmatprep.subr.bf16.mxu0 %v483_v1  ;;  %v185_v10 = vld [vmem:[%s687_s3 + $0x18] sm:$0xff]  ;;  %v184_v11 = vld [vmem:[%s687_s3 + $0x10] sm:$0xff]  ;;  %v183_v12 = vld [vmem:[%s687_s3 + $0x8] sm:$0xff] }
   0x5   :  { %461 = vmatprep.subr.mxu1 %v185_v10  ;;  %v182_v13 = vld [vmem:[%s687_s3] sm:$0xff] }
   0x6   :  { %462 = vmatpush3.msra.mxu1 %v185_v10  ;;  %v399_v15 = vld [vmem:[%s688_s2] ss:$0 sm:$0xff] }
   0x7   :  { %446 = vmatpush3.bf16.msra.mxu0 %v483_v1  ;;  %463 = vmatprep.subr.mxu1 %v184_v11  ;;  %v413_v39 = vld [vmem:[%s689_s4] ss:$0 sm:$0xff] }
   0x8   :  { %447 = vmatprep.subr.bf16.mxu0 %v484_v3  ;;  %464 = vmatpush3.msra.mxu1 %v184_v11 }
   0x9   :  { %465 = vmatprep.subr.mxu1 %v183_v12 }
   0xa   :  { %466 = vmatpush3.msra.mxu1 %v183_v12 }
   0xb   :  { %448 = vmatpush3.bf16.msra.mxu0 %v484_v3  ;;  %467 = vmatprep.subr.mxu1 %v182_v13 }
   0xc   :  { %449 = vmatprep.subr.bf16.mxu0 %v485_v5  ;;  %468 = vmatpush3.msra.mxu1 %v182_v13 }
   0xf   :  { %450 = vmatpush3.bf16.msra.mxu0 %v485_v5 }
  0x10   :  { %451 = vmatprep.subr.bf16.mxu0 %v486_v6 }
  0x13   :  { %452 = vmatpush3.bf16.msra.mxu0 %v486_v6 }
  0x16   :  { %454 = vmatmul.mubr.msk.bf16.vlgmr.msra.gmra.mxu0 %vm92_vm1, %v488_v7 }
  0x17   :  { %457 = vmatprep.mubr.msk.bf16.mxu0 %vm92_vm1, %v489_v8 }
  0x1e   :  { %458 = vmatmul.mubr.msk.bf16.gmra.mxu0 %vm92_vm1, %v490_v9 }
  0xd6   :  { %v455_v14 = vpop.f32.mrf.mxu0 }
  0xd7   :  { %v587_v20 = vadd.f32 %v455_v14, %v399_v15 }
  0xd8   :  { %v143_v16 = vpop.f32.mrf.mxu0 }
  0xd9   :  { %v583_v17 = vadd.f32 %v399_v15, %v143_v16  ;;  %v176_v26 = vmul.f32 %v587_v20, %v587_v20 }
  0xda   :  { %v456_v18 = vpop.f32.mrf.mxu0 }
  0xdb   :  { %v174_v19 = vmul.f32 %v583_v17, %v583_v17  ;;  %v590_v24 = vadd.f32 %v456_v18, %v399_v15 }
  0xdc   :  { %v146_v21 = vpop.f32.mrf.mxu0 }
  0xdd   :  { %v147_v22 = vadd.f32 %v399_v15, %v146_v21  ;;  %469 = vmatprep.mubr.msk.f32.mxu1 %vm193_vm2, %v174_v19  ;;  %v177_v30 = vmul.f32 %v590_v24, %v590_v24 }
  0xde   :  { %v459_v23 = vpop.f32.mrf.mxu0 }
  0xdf   :  { %v175_v25 = vmul.f32 %v147_v22, %v147_v22  ;;  %v602_v32 = vadd.f32 %v459_v23, %v399_v15 }
  0xe0   :  { %v159_v27 = vpop.f32.mrf.mxu0 }
  0xe1   :  { %v594_v28 = vadd.f32 %v399_v15, %v159_v27  ;;  %470 = vmatmul.mubr.msk.f32.vlgmr.msra.gmra.mxu1 %vm193_vm2, %v175_v25  ;;  %v180_v37 = vmul.f32 %v602_v32, %v602_v32 }
  0xe2   :  { %v460_v29 = vpop.f32.mrf.mxu0  ;;  %472 = vmatprep.mubr.msk.f32.mxu1 %vm193_vm2, %v176_v26 }
  0xe3   :  { %v178_v31 = vmul.f32 %v594_v28, %v594_v28  ;;  %v608_v35 = vadd.f32 %v460_v29, %v399_v15 }
  0xe4   :  { %v162_v33 = vpop.f32.mrf.mxu0 }
  0xe5   :  { %v604_v34 = vadd.f32 %v399_v15, %v162_v33  ;;  %473 = vmatmul.mubr.msk.f32.gmra.mxu1 %vm193_vm2, %v177_v30  ;;  %v181_v38 = vmul.f32 %v608_v35, %v608_v35 }
  0xe6   :  { %475 = vmatprep.mubr.msk.f32.mxu1 %vm193_vm2, %v178_v31 }
  0xe7   :  { %v179_v36 = vmul.f32 %v604_v34, %v604_v34 }
  0xe9   :  { %476 = vmatmul.mubr.msk.f32.gmra.mxu1 %vm193_vm2, %v179_v36 }
  0xea   :  { %478 = vmatprep.mubr.msk.f32.mxu1 %vm193_vm2, %v180_v37 }
  0xed   :  { %479 = vmatmul.mubr.msk.f32.gmra.mxu1 %vm193_vm2, %v181_v38 }
 0x1a1   :  { %v471_v40 = vpop.f32.mrf.mxu1 }
 0x1a2   :  { %v290_v41 = vadd.f32 %v471_v40, %v413_v39 }
 0x1a3   :  { %v284_v42 = vpop.f32.mrf.mxu1 }
 0x1a4   :  { %491 = vrsqrt.f32 %v290_v41  ;;  %v285_v43 = vadd.f32 %v413_v39, %v284_v42  ;;  %vm332_vm3 = vcmp.eq.f32.partialorder %v290_v41, inf  ;;  %v335_v58 = vand.u32 2147483648, %v290_v41 }
 0x1a5   :  { %v474_v44 = vpop.f32.mrf.mxu1  ;;  %vm334_vm4 = vcmp.eq.f32.partialorder %v290_v41, 0.0 }
 0x1a6   :  { %v300_v45 = vadd.f32 %v474_v44, %v413_v39  ;;  %493 = vrsqrt.f32 %v285_v43  ;;  %vm325_vm5 = vcmp.eq.f32.partialorder %v285_v43, inf  ;;  %v328_v1 = vand.u32 2147483648, %v285_v43 }
 0x1a7   :  { %v294_v46 = vpop.f32.mrf.mxu1  ;;  %vm327_vm6 = vcmp.eq.f32.partialorder %v285_v43, 0.0 }
 0x1a8   :  { %495 = vrsqrt.f32 %v300_v45  ;;  %v295_v47 = vadd.f32 %v413_v39, %v294_v46  ;;  %vm346_vm7 = vcmp.eq.f32.partialorder %v300_v45, inf  ;;  %v349_v4 = vand.u32 2147483648, %v300_v45 }
 0x1a9   :  { %v477_v48 = vpop.f32.mrf.mxu1  ;;  %vm348_vm8 = vcmp.eq.f32.partialorder %v300_v45, 0.0 }
 0x1aa   :  { %v310_v49 = vadd.f32 %v477_v48, %v413_v39  ;;  %497 = vrsqrt.f32 %v295_v47  ;;  %vm339_vm9 = vcmp.eq.f32.partialorder %v295_v47, inf  ;;  %v342_v13 = vand.u32 2147483648, %v295_v47 }
 0x1ab   :  { %v304_v50 = vpop.f32.mrf.mxu1  ;;  %vm341_vm10 = vcmp.eq.f32.partialorder %v295_v47, 0.0 }
 0x1ac   :  { %499 = vrsqrt.f32 %v310_v49  ;;  %v622_v51 = vadd.f32 %v413_v39, %v304_v50  ;;  %vm360_vm11 = vcmp.eq.f32.partialorder %v310_v49, inf  ;;  %v363_v16 = vand.u32 2147483648, %v310_v49 }
 0x1ad   :  { %v480_v52 = vpop.f32.mrf.mxu1  ;;  %vm362_vm12 = vcmp.eq.f32.partialorder %v310_v49, 0.0 }
 0x1ae   :  { %v624_v53 = vadd.f32 %v480_v52, %v413_v39  ;;  %501 = vrsqrt.f32 %v622_v51  ;;  %vm353_vm13 = vcmp.eq.f32.partialorder %v622_v51, inf  ;;  %v356_v26 = vand.u32 2147483648, %v622_v51 }
 0x1af   :  { %v314_v54 = vpop.f32.mrf.mxu1  ;;  %vm355_vm14 = vcmp.eq.f32.partialorder %v622_v51, 0.0 }
 0x1b0   :  { %503 = vrsqrt.f32 %v624_v53  ;;  %v628_v56 = vadd.f32 %v413_v39, %v314_v54  ;;  %vm374_vm15 = vcmp.eq.f32.partialorder %v624_v53, inf  ;;  %vm376_vm0 = vcmp.eq.f32.partialorder %v624_v53, 0.0 }
 0x1b1   :  { %v492_v55 = vpop.eup %491 }
 0x1b2   :  { %v331_v57 = vmul.f32 %v492_v55, %v290_v41  ;;  %505 = vrsqrt.f32 %v628_v56  ;;  %vm367_vm1 = vcmp.eq.f32.partialorder %v628_v56, inf  ;;  %v370_v39 = vand.u32 2147483648, %v628_v56 }
 0x1b3   :  { %v494_v59 = vpop.eup %493 }
 0x1b4   :  { %v333_v60 = vsel %vm332_vm3, %v290_v41, %v331_v57  ;;  %v324_v63 = vmul.f32 %v494_v59, %v285_v43  ;;  %vm369_vm3 = vcmp.eq.f32.partialorder %v628_v56, 0.0 }
 0x1b5   :  { %v496_v61 = vpop.eup %495  ;;  %v336_v62 = vsel %vm334_vm4, %v335_v58, %v333_v60 }
 0x1b6   :  { %v380_v0 = vmul.f32 %v336_v62, %v147_v22  ;;  %v345_v2 = vmul.f32 %v496_v61, %v300_v45  ;;  %v326_v3 = vsel %vm325_vm5, %v285_v43, %v324_v63 }
 0x1b7   :  { %v498_v5 = vpop.eup %497  ;;  %v329_v6 = vsel %vm327_vm6, %v328_v1, %v326_v3 }
 0x1b8   :  { %388 = vst.msk [vmem:[%s690_s5 + $0x8] sm:$0xff] %vm193_vm2, %v380_v0  ;;  %v347_v7 = vsel %vm346_vm7, %v300_v45, %v345_v2  ;;  %v379_v9 = vmul.f32 %v329_v6, %v583_v17  ;;  %v338_v11 = vmul.f32 %v498_v5, %v295_v47 }
 0x1b9   :  { %v500_v8 = vpop.eup %499  ;;  %v350_v10 = vsel %vm348_vm8, %v349_v4, %v347_v7 }
 0x1ba   :  { %v382_v12 = vmul.f32 %v350_v10, %v590_v24  ;;  %v359_v14 = vmul.f32 %v500_v8, %v310_v49  ;;  %387 = vst.msk [vmem:[%s690_s5] sm:$0xff] %vm193_vm2, %v379_v9  ;;  %v340_v15 = vsel %vm339_vm9, %v295_v47, %v338_v11 }
 0x1bb   :  { %v502_v18 = vpop.eup %501  ;;  %v343_v17 = vsel %vm341_vm10, %v342_v13, %v340_v15 }
 0x1bc   :  { %390 = vst.msk [vmem:[%s690_s5 + $0x18] sm:$0xff] %vm193_vm2, %v382_v12  ;;  %v361_v19 = vsel %vm360_vm11, %v310_v49, %v359_v14  ;;  %v381_v22 = vmul.f32 %v343_v17, %v587_v20  ;;  %v352_v24 = vmul.f32 %v502_v18, %v622_v51  ;;  %v377_v20 = vand.u32 2147483648, %v624_v53 }
 0x1bd   :  { %v504_v21 = vpop.eup %503  ;;  %v364_v23 = vsel %vm362_vm12, %v363_v16, %v361_v19 }
 0x1be   :  { %v384_v25 = vmul.f32 %v364_v23, %v604_v34  ;;  %v373_v27 = vmul.f32 %v504_v21, %v624_v53  ;;  %389 = vst.msk [vmem:[%s690_s5 + $0x10] sm:$0xff] %vm193_vm2, %v381_v22  ;;  %v354_v29 = vsel %vm353_vm13, %v622_v51, %v352_v24 }
 0x1bf   :  { %v506_v30 = vpop.eup %505  ;;  %v357_v31 = vsel %vm355_vm14, %v356_v26, %v354_v29 }
 0x1c0   :  { %392 = vst.msk [vmem:[%s690_s5 + $0x28] sm:$0xff] %vm193_vm2, %v384_v25  ;;  %v375_v33 = vsel %vm374_vm15, %v624_v53, %v373_v27  ;;  %v383_v34 = vmul.f32 %v357_v31, %v594_v28  ;;  %v366_v37 = vmul.f32 %v506_v30, %v628_v56 }
 0x1c1   :  { %v378_v36 = vsel %vm376_vm0, %v377_v20, %v375_v33 }
 0x1c2   :  { %v386_v38 = vmul.f32 %v378_v36, %v608_v35  ;;  %391 = vst.msk [vmem:[%s690_s5 + $0x20] sm:$0xff] %vm193_vm2, %v383_v34  ;;  %v368_v40 = vsel %vm367_vm1, %v628_v56, %v366_v37 }
 0x1c3   :  { %v371_v28 = vsel %vm369_vm3, %v370_v39, %v368_v40 }
 0x1c4   :  { %394 = vst.msk [vmem:[%s690_s5 + $0x38] sm:$0xff] %vm193_vm2, %v386_v38  ;;  %v385_v35 = vmul.f32 %v371_v28, %v602_v32 }
 0x1c6   :  { %393 = vst.msk [vmem:[%s690_s5 + $0x30] sm:$0xff] %vm193_vm2, %v385_v35 }

// kernel: scale_hyperprior_forward.30
= control target key start
LH: loop header
LB: loop body
LE: loop exit
PB: predicated region body
PF: predicated region fallthrough
CT: control target
= control target key end

     0   :  { %vm225_vm0 = vcmask 1043456   ;;  %vm176_vm1 = vcmask 588800   ;;  %vm433_vm2 = vcmask 261120   ;;  %s2159_s1 = inlined_call_operand.vmem [shape: bf16[72,32], index: 1, kind: input, shape index: {}]   ;;  %s2160_s0 = inlined_call_operand.vmem [shape: bf16[256,72], index: 0, kind: input, shape index: {}]   ;;  %s2161_s3 = inlined_call_operand.vmem [shape: f32[32,32], index: 3, kind: input, shape index: {}]   ;;  %s2162_s2 = inlined_call_operand.vmem [shape: f32[1,32], index: 2, kind: input, shape index: {}]   ;;  %s2163_s4 = inlined_call_operand.vmem [shape: f32[1,32], index: 4, kind: input, shape index: {}]   ;;  %s2164_s5 = inlined_call_operand.vmem [shape: f32[256,32], index: 5, kind: output, shape index: {}]  }
   0x1   :  { %v1274_v0 = vld [vmem:[%s2159_s1 + $0x20] ss:$0 sps:$4 sm:$0xff]   ;;  %v1275_v1 = vld [vmem:[%s2159_s1 + $0x18] sm:$0xff]   ;;  %v1276_v3 = vld [vmem:[%s2159_s1 + $0x10] sm:$0xff]  }
   0x2   :  { %1273 = vmatprep.subr.msk.bf16.mxu0 %vm225_vm0, %v1274_v0  ;;  %v227_v2 = vsel %vm225_vm0, %v1274_v0, 0  ;;  %v1279_v4 = vld [vmem:[%s2160_s0] sm:$0xff]   ;;  %v1277_v5 = vld [vmem:[%s2159_s1 + $0x8] sm:$0xff]   ;;  %v1281_v8 = vld [vmem:[%s2160_s0 + $0x10] sm:$0xff]  }
   0x3   :  { %1176 = vmatpush3.bf16.msra.mxu0 %v227_v2  ;;  %1185 = vmatprep.mubr.msk.bf16.mxu0 %vm176_vm1, %v1279_v4  ;;  %v1278_v6 = vld [vmem:[%s2159_s1] sm:$0xff]   ;;  %v1280_v7 = vld [vmem:[%s2160_s0 + $0x8] sm:$0xff]   ;;  %v1282_v9 = vld [vmem:[%s2160_s0 + $0x18] sm:$0xff]  }
   0x4   :  { %1177 = vmatprep.subr.bf16.mxu0 %v1275_v1  ;;  %v1283_v10 = vld [vmem:[%s2160_s0 + $0x20] sm:$0xff]   ;;  %v1284_v11 = vld [vmem:[%s2160_s0 + $0x28] sm:$0xff]   ;;  %v1285_v12 = vld [vmem:[%s2160_s0 + $0x30] sm:$0xff]  }
   0x5   :  { %v1286_v13 = vld [vmem:[%s2160_s0 + $0x38] sm:$0xff]   ;;  %v1287_v14 = vld [vmem:[%s2160_s0 + $0x40] sm:$0xff]   ;;  %v1288_v15 = vld [vmem:[%s2160_s0 + $0x48] sm:$0xff]  }
   0x6   :  { %v1289_v16 = vld [vmem:[%s2160_s0 + $0x50] sm:$0xff]   ;;  %v1290_v17 = vld [vmem:[%s2160_s0 + $0x58] sm:$0xff]   ;;  %v1291_v18 = vld [vmem:[%s2160_s0 + $0x60] sm:$0xff]  }
   0x7   :  { %1178 = vmatpush3.bf16.msra.mxu0 %v1275_v1  ;;  %v1292_v19 = vld [vmem:[%s2160_s0 + $0x68] sm:$0xff]   ;;  %v1293_v20 = vld [vmem:[%s2160_s0 + $0x70] sm:$0xff]   ;;  %v1294_v21 = vld [vmem:[%s2160_s0 + $0x78] sm:$0xff]  }
   0x8   :  { %1179 = vmatprep.subr.bf16.mxu0 %v1276_v3  ;;  %v425_v22 = vld [vmem:[%s2161_s3 + $0x18] sm:$0xff]  ;;  %v424_v23 = vld [vmem:[%s2161_s3 + $0x10] sm:$0xff]  ;;  %v423_v24 = vld [vmem:[%s2161_s3 + $0x8] sm:$0xff] }
   0x9   :  { %1217 = vmatprep.subr.mxu1 %v425_v22  ;;  %v422_v25 = vld [vmem:[%s2161_s3] sm:$0xff] }
   0xa   :  { %1218 = vmatpush3.msra.mxu1 %v425_v22  ;;  %v1483_v27 = vld [vmem:[%s2162_s2] ss:$0 sm:$0xff] }
   0xb   :  { %1180 = vmatpush3.bf16.msra.mxu0 %v1276_v3  ;;  %1219 = vmatprep.subr.mxu1 %v424_v23 }
   0xc   :  { %1181 = vmatprep.subr.bf16.mxu0 %v1277_v5  ;;  %1220 = vmatpush3.msra.mxu1 %v424_v23 }
   0xd   :  { %1221 = vmatprep.subr.mxu1 %v423_v24 }
   0xe   :  { %1222 = vmatpush3.msra.mxu1 %v423_v24 }
   0xf   :  { %1182 = vmatpush3.bf16.msra.mxu0 %v1277_v5  ;;  %1223 = vmatprep.subr.mxu1 %v422_v25 }
  0x10   :  { %1183 = vmatprep.subr.bf16.mxu0 %v1278_v6  ;;  %1224 = vmatpush3.msra.mxu1 %v422_v25 }
  0x13   :  { %1184 = vmatpush3.bf16.msra.mxu0 %v1278_v6 }
  0x16   :  { %1186 = vmatmul.mubr.msk.bf16.vlgmr.msra.gmra.mxu0 %vm176_vm1, %v1280_v7 }
  0x17   :  { %1189 = vmatprep.mubr.msk.bf16.mxu0 %vm176_vm1, %v1281_v8 }
  0x1e   :  { %1190 = vmatmul.mubr.msk.bf16.gmra.mxu0 %vm176_vm1, %v1282_v9 }
  0x1f   :  { %1193 = vmatprep.mubr.msk.bf16.mxu0 %vm176_vm1, %v1283_v10 }
  0x26   :  { %1194 = vmatmul.mubr.msk.bf16.gmra.mxu0 %vm176_vm1, %v1284_v11 }
  0x27   :  { %1197 = vmatprep.mubr.msk.bf16.mxu0 %vm176_vm1, %v1285_v12 }
  0x2e   :  { %1198 = vmatmul.mubr.msk.bf16.gmra.mxu0 %vm176_vm1, %v1286_v13 }
  0x2f   :  { %1201 = vmatprep.mubr.msk.bf16.mxu0 %vm176_vm1, %v1287_v14 }
  0x36   :  { %1202 = vmatmul.mubr.msk.bf16.gmra.mxu0 %vm176_vm1, %v1288_v15 }
  0x37   :  { %1205 = vmatprep.mubr.msk.bf16.mxu0 %vm176_vm1, %v1289_v16 }
  0x3e   :  { %1206 = vmatmul.mubr.msk.bf16.gmra.mxu0 %vm176_vm1, %v1290_v17 }
  0x3f   :  { %1209 = vmatprep.mubr.msk.bf16.mxu0 %vm176_vm1, %v1291_v18 }
  0x46   :  { %1210 = vmatmul.mubr.msk.bf16.gmra.mxu0 %vm176_vm1, %v1292_v19 }
  0x47   :  { %1213 = vmatprep.mubr.msk.bf16.mxu0 %vm176_vm1, %v1293_v20 }
  0x4e   :  { %1214 = vmatmul.mubr.msk.bf16.gmra.mxu0 %vm176_vm1, %v1294_v21 }
  0xd6   :  { %v1187_v26 = vpop.f32.mrf.mxu0 }
  0xd7   :  { %v1491_v32 = vadd.f32 %v1187_v26, %v1483_v27 }
  0xd8   :  { %v263_v28 = vpop.f32.mrf.mxu0 }
  0xd9   :  { %v1486_v29 = vadd.f32 %v1483_v27, %v263_v28  ;;  %v392_v38 = vmul.f32 %v1491_v32, %v1491_v32 }
  0xda   :  { %v1188_v30 = vpop.f32.mrf.mxu0 }
  0xdb   :  { %v390_v31 = vmul.f32 %v1486_v29, %v1486_v29  ;;  %v1498_v36 = vadd.f32 %v1188_v30, %v1483_v27 }
  0xdc   :  { %v266_v33 = vpop.f32.mrf.mxu0 }
  0xdd   :  { %v1494_v34 = vadd.f32 %v1483_v27, %v266_v33  ;;  %1225 = vmatprep.mubr.msk.f32.mxu1 %vm433_vm2, %v390_v31  ;;  %v393_v42 = vmul.f32 %v1498_v36, %v1498_v36 }
  0xde   :  { %v1191_v35 = vpop.f32.mrf.mxu0 }
  0xdf   :  { %v391_v37 = vmul.f32 %v1494_v34, %v1494_v34  ;;  %v1514_v44 = vadd.f32 %v1191_v35, %v1483_v27 }
  0xe0   :  { %v279_v39 = vpop.f32.mrf.mxu0 }
  0xe1   :  { %v1505_v40 = vadd.f32 %v1483_v27, %v279_v39  ;;  %1226 = vmatmul.mubr.msk.f32.vlgmr.msra.gmra.mxu1 %vm433_vm2, %v391_v37  ;;  %v396_v50 = vmul.f32 %v1514_v44, %v1514_v44 }
  0xe2   :  { %v1192_v41 = vpop.f32.mrf.mxu0  ;;  %1228 = vmatprep.mubr.msk.f32.mxu1 %vm433_vm2, %v392_v38 }
  0xe3   :  { %v394_v43 = vmul.f32 %v1505_v40, %v1505_v40  ;;  %v1522_v48 = vadd.f32 %v1192_v41, %v1483_v27 }
  0xe4   :  { %v282_v45 = vpop.f32.mrf.mxu0 }
  0xe5   :  { %v1517_v46 = vadd.f32 %v1483_v27, %v282_v45  ;;  %1229 = vmatmul.mubr.msk.f32.gmra.mxu1 %vm433_vm2, %v393_v42  ;;  %v397_v54 = vmul.f32 %v1522_v48, %v1522_v48 }
  0xe6   :  { %v1195_v47 = vpop.f32.mrf.mxu0  ;;  %1231 = vmatprep.mubr.msk.f32.mxu1 %vm433_vm2, %v394_v43 }
  0xe7   :  { %v395_v49 = vmul.f32 %v1517_v46, %v1517_v46  ;;  %v1538_v56 = vadd.f32 %v1195_v47, %v1483_v27 }
  0xe8   :  { %v295_v51 = vpop.f32.mrf.mxu0 }
  0xe9   :  { %v1529_v52 = vadd.f32 %v1483_v27, %v295_v51  ;;  %1232 = vmatmul.mubr.msk.f32.gmra.mxu1 %vm433_vm2, %v395_v49  ;;  %v400_v62 = vmul.f32 %v1538_v56, %v1538_v56 }
  0xea   :  { %v1196_v53 = vpop.f32.mrf.mxu0  ;;  %1234 = vmatprep.mubr.msk.f32.mxu1 %vm433_vm2, %v396_v50 }
  0xeb   :  { %v398_v55 = vmul.f32 %v1529_v52, %v1529_v52  ;;  %v1546_v60 = vadd.f32 %v1196_v53, %v1483_v27 }
  0xec   :  { %v298_v57 = vpop.f32.mrf.mxu0 }
  0xed   :  { %v1541_v58 = vadd.f32 %v1483_v27, %v298_v57  ;;  %1235 = vmatmul.mubr.msk.f32.gmra.mxu1 %vm433_vm2, %v397_v54  ;;  %v401_v2 = vmul.f32 %v1546_v60, %v1546_v60 }
  0xee   :  { %v1199_v59 = vpop.f32.mrf.mxu0  ;;  %1237 = vmatprep.mubr.msk.f32.mxu1 %vm433_vm2, %v398_v55 }
  0xef   :  { %v399_v61 = vmul.f32 %v1541_v58, %v1541_v58  ;;  %v1562_v4 = vadd.f32 %v1199_v59, %v1483_v27 }
  0xf0   :  { %v311_v63 = vpop.f32.mrf.mxu0 }
  0xf1   :  { %v1553_v0 = vadd.f32 %v1483_v27, %v311_v63  ;;  %1238 = vmatmul.mubr.msk.f32.gmra.mxu1 %vm433_vm2, %v399_v61  ;;  %v404_v10 = vmul.f32 %v1562_v4, %v1562_v4 }
  0xf2   :  { %v1200_v1 = vpop.f32.mrf.mxu0  ;;  %1240 = vmatprep.mubr.msk.f32.mxu1 %vm433_vm2, %v400_v62 }
  0xf3   :  { %v402_v3 = vmul.f32 %v1553_v0, %v1553_v0  ;;  %v1570_v8 = vadd.f32 %v1200_v1, %v1483_v27 }
  0xf4   :  { %v314_v5 = vpop.f32.mrf.mxu0 }
  0xf5   :  { %v1565_v6 = vadd.f32 %v1483_v27, %v314_v5  ;;  %1241 = vmatmul.mubr.msk.f32.gmra.mxu1 %vm433_vm2, %v401_v2  ;;  %v405_v14 = vmul.f32 %v1570_v8, %v1570_v8 }
  0xf6   :  { %v1203_v7 = vpop.f32.mrf.mxu0  ;;  %1243 = vmatprep.mubr.msk.f32.mxu1 %vm433_vm2, %v402_v3 }
  0xf7   :  { %v403_v9 = vmul.f32 %v1565_v6, %v1565_v6  ;;  %v1586_v16 = vadd.f32 %v1203_v7, %v1483_v27 }
  0xf8   :  { %v327_v11 = vpop.f32.mrf.mxu0 }
  0xf9   :  { %v1577_v12 = vadd.f32 %v1483_v27, %v327_v11  ;;  %1244 = vmatmul.mubr.msk.f32.gmra.mxu1 %vm433_vm2, %v403_v9  ;;  %v408_v22 = vmul.f32 %v1586_v16, %v1586_v16 }
  0xfa   :  { %v1204_v13 = vpop.f32.mrf.mxu0  ;;  %1246 = vmatprep.mubr.msk.f32.mxu1 %vm433_vm2, %v404_v10 }
  0xfb   :  { %v406_v15 = vmul.f32 %v1577_v12, %v1577_v12  ;;  %v1594_v20 = vadd.f32 %v1204_v13, %v1483_v27 }
  0xfc   :  { %v330_v17 = vpop.f32.mrf.mxu0 }
  0xfd   :  { %v1589_v18 = vadd.f32 %v1483_v27, %v330_v17  ;;  %1247 = vmatmul.mubr.msk.f32.gmra.mxu1 %vm433_vm2, %v405_v14  ;;  %v409_v26 = vmul.f32 %v1594_v20, %v1594_v20 }
  0xfe   :  { %v1207_v19 = vpop.f32.mrf.mxu0  ;;  %1249 = vmatprep.mubr.msk.f32.mxu1 %vm433_vm2, %v406_v15 }
  0xff   :  { %v407_v21 = vmul.f32 %v1589_v18, %v1589_v18  ;;  %v1610_v30 = vadd.f32 %v1207_v19, %v1483_v27 }
 0x100   :  { %v343_v23 = vpop.f32.mrf.mxu0 }
 0x101   :  { %v1601_v24 = vadd.f32 %v1483_v27, %v343_v23  ;;  %1250 = vmatmul.mubr.msk.f32.gmra.mxu1 %vm433_vm2, %v407_v21  ;;  %v412_v39 = vmul.f32 %v1610_v30, %v1610_v30 }
 0x102   :  { %v1208_v25 = vpop.f32.mrf.mxu0  ;;  %1252 = vmatprep.mubr.msk.f32.mxu1 %vm433_vm2, %v408_v22 }
 0x103   :  { %v410_v28 = vmul.f32 %v1601_v24, %v1601_v24  ;;  %v1618_v37 = vadd.f32 %v1208_v25, %v1483_v27 }
 0x104   :  { %v346_v31 = vpop.f32.mrf.mxu0 }
 0x105   :  { %v1613_v33 = vadd.f32 %v1483_v27, %v346_v31  ;;  %1253 = vmatmul.mubr.msk.f32.gmra.mxu1 %vm433_vm2, %v409_v26  ;;  %v413_v45 = vmul.f32 %v1618_v37, %v1618_v37 }
 0x106   :  { %v1211_v35 = vpop.f32.mrf.mxu0  ;;  %1255 = vmatprep.mubr.msk.f32.mxu1 %vm433_vm2, %v410_v28 }
 0x107   :  { %v411_v38 = vmul.f32 %v1613_v33, %v1613_v33  ;;  %v1634_v49 = vadd.f32 %v1211_v35, %v1483_v27 }
 0x108   :  { %v359_v41 = vpop.f32.mrf.mxu0 }
 0x109   :  { %v1625_v42 = vadd.f32 %v1483_v27, %v359_v41  ;;  %1256 = vmatmul.mubr.msk.f32.gmra.mxu1 %vm433_vm2, %v411_v38  ;;  %v416_v57 = vmul.f32 %v1634_v49, %v1634_v49 }
 0x10a   :  { %v1212_v43 = vpop.f32.mrf.mxu0  ;;  %1258 = vmatprep.mubr.msk.f32.mxu1 %vm433_vm2, %v412_v39 }
 0x10b   :  { %v414_v47 = vmul.f32 %v1625_v42, %v1625_v42  ;;  %v1642_v54 = vadd.f32 %v1212_v43, %v1483_v27 }
 0x10c   :  { %v362_v50 = vpop.f32.mrf.mxu0 }
 0x10d   :  { %v1637_v51 = vadd.f32 %v1483_v27, %v362_v50  ;;  %1259 = vmatmul.mubr.msk.f32.gmra.mxu1 %vm433_vm2, %v413_v45  ;;  %v417_v63 = vmul.f32 %v1642_v54, %v1642_v54 }
 0x10e   :  { %v1215_v53 = vpop.f32.mrf.mxu0  ;;  %1261 = vmatprep.mubr.msk.f32.mxu1 %vm433_vm2, %v414_v47 }
 0x10f   :  { %v415_v55 = vmul.f32 %v1637_v51, %v1637_v51  ;;  %v1658_v2 = vadd.f32 %v1215_v53, %v1483_v27 }
 0x110   :  { %v375_v59 = vpop.f32.mrf.mxu0 }
 0x111   :  { %v1649_v61 = vadd.f32 %v1483_v27, %v375_v59  ;;  %1262 = vmatmul.mubr.msk.f32.gmra.mxu1 %vm433_vm2, %v415_v55  ;;  %v420_v10 = vmul.f32 %v1658_v2, %v1658_v2 }
 0x112   :  { %v1216_v62 = vpop.f32.mrf.mxu0  ;;  %1264 = vmatprep.mubr.msk.f32.mxu1 %vm433_vm2, %v416_v57 }
 0x113   :  { %v418_v1 = vmul.f32 %v1649_v61, %v1649_v61  ;;  %v1666_v7 = vadd.f32 %v1216_v62, %v1483_v27 }
 0x114   :  { %v378_v3 = vpop.f32.mrf.mxu0 }
 0x115   :  { %v1661_v5 = vadd.f32 %v1483_v27, %v378_v3  ;;  %1265 = vmatmul.mubr.msk.f32.gmra.mxu1 %vm433_vm2, %v417_v63  ;;  %v421_v11 = vmul.f32 %v1666_v7, %v1666_v7  ;;  %v1680_v27 = vld [vmem:[%s2163_s4] ss:$0 sm:$0xff] }
 0x116   :  { %1267 = vmatprep.mubr.msk.f32.mxu1 %vm433_vm2, %v418_v1 }
 0x117   :  { %v419_v9 = vmul.f32 %v1661_v5, %v1661_v5 }
 0x119   :  { %1268 = vmatmul.mubr.msk.f32.gmra.mxu1 %vm433_vm2, %v419_v9 }
 0x11a   :  { %1270 = vmatprep.mubr.msk.f32.mxu1 %vm433_vm2, %v420_v10 }
 0x11d   :  { %1271 = vmatmul.mubr.msk.f32.gmra.mxu1 %vm433_vm2, %v421_v11 }
 0x1a1   :  { %v1227_v13 = vpop.f32.mrf.mxu1 }
 0x1a2   :  { %v602_v14 = vadd.f32 %v1227_v13, %v1680_v27 }
 0x1a3   :  { %v596_v15 = vpop.f32.mrf.mxu1 }
 0x1a4   :  { %1295 = vrsqrt.f32 %v602_v14  ;;  %v597_v17 = vadd.f32 %v1680_v27, %v596_v15  ;;  %vm764_vm3 = vcmp.eq.f32.partialorder %v602_v14, inf  ;;  %vm766_vm4 = vcmp.eq.f32.partialorder %v602_v14, 0.0 }
 0x1a5   :  { %v1230_v19 = vpop.f32.mrf.mxu1  ;;  %v767_v50 = vand.u32 2147483648, %v602_v14 }
 0x1a6   :  { %v612_v21 = vadd.f32 %v1230_v19, %v1680_v27  ;;  %1297 = vrsqrt.f32 %v597_v17  ;;  %vm757_vm5 = vcmp.eq.f32.partialorder %v597_v17, inf  ;;  %vm759_vm6 = vcmp.eq.f32.partialorder %v597_v17, 0.0 }
 0x1a7   :  { %v606_v22 = vpop.f32.mrf.mxu1  ;;  %v760_v55 = vand.u32 2147483648, %v597_v17 }
 0x1a8   :  { %1299 = vrsqrt.f32 %v612_v21  ;;  %v1686_v23 = vadd.f32 %v1680_v27, %v606_v22  ;;  %vm778_vm7 = vcmp.eq.f32.partialorder %v612_v21, inf  ;;  %vm780_vm8 = vcmp.eq.f32.partialorder %v612_v21, 0.0 }
 0x1a9   :  { %v1233_v25 = vpop.f32.mrf.mxu1  ;;  %v781_v63 = vand.u32 2147483648, %v612_v21 }
 0x1aa   :  { %v1689_v26 = vadd.f32 %v1233_v25, %v1680_v27  ;;  %1301 = vrsqrt.f32 %v1686_v23  ;;  %vm771_vm9 = vcmp.eq.f32.partialorder %v1686_v23, inf  ;;  %vm773_vm10 = vcmp.eq.f32.partialorder %v1686_v23, 0.0 }
 0x1ab   :  { %v616_v28 = vpop.f32.mrf.mxu1 }
 0x1ac   :  { %1303 = vrsqrt.f32 %v1689_v26  ;;  %v1694_v31 = vadd.f32 %v1680_v27, %v616_v28  ;;  %vm792_vm11 = vcmp.eq.f32.partialorder %v1689_v26, inf  ;;  %vm794_vm12 = vcmp.eq.f32.partialorder %v1689_v26, 0.0 }
 0x1ad   :  { %v1236_v35 = vpop.f32.mrf.mxu1 }
 0x1ae   :  { %v1697_v38 = vadd.f32 %v1236_v35, %v1680_v27  ;;  %1305 = vrsqrt.f32 %v1694_v31  ;;  %vm785_vm13 = vcmp.eq.f32.partialorder %v1694_v31, inf  ;;  %vm787_vm14 = vcmp.eq.f32.partialorder %v1694_v31, 0.0 }
 0x1af   :  { %v626_v39 = vpop.f32.mrf.mxu1 }
 0x1b0   :  { %1307 = vrsqrt.f32 %v1697_v38  ;;  %v1702_v43 = vadd.f32 %v1680_v27, %v626_v39  ;;  %vm806_vm15 = vcmp.eq.f32.partialorder %v1697_v38, inf  ;;  %vm808_vm0 = vcmp.eq.f32.partialorder %v1697_v38, 0.0 }
 0x1b1   :  { %v1296_v41 = vpop.eup %1295  ;;  %v1239_v45 = vpop.f32.mrf.mxu1 }
 0x1b2   :  { %v763_v47 = vmul.f32 %v1296_v41, %v602_v14  ;;  %v1705_v53 = vadd.f32 %v1239_v45, %v1680_v27  ;;  %1309 = vrsqrt.f32 %v1702_v43  ;;  %vm799_vm1 = vcmp.eq.f32.partialorder %v1702_v43, inf }
 0x1b3   :  { %v636_v57 = vpop.f32.mrf.mxu1  ;;  %v1298_v59 = vpop.eup %1297 }
 0x1b4   :  { %v765_v62 = vsel %vm764_vm3, %v602_v14, %v763_v47  ;;  %1311 = vrsqrt.f32 %v1705_v53  ;;  %v756_v9 = vmul.f32 %v1298_v59, %v597_v17  ;;  %v1712_v10 = vadd.f32 %v1680_v27, %v636_v57 }
 0x1b5   :  { %v1300_v1 = vpop.eup %1299  ;;  %v768_v3 = vsel %vm766_vm4, %v767_v50, %v765_v62  ;;  %v1242_v11 = vpop.f32.mrf.mxu1  ;;  %v774_v14 = vand.u32 2147483648, %v1686_v23  ;;  %v795_v50 = vand.u32 2147483648, %v1689_v26  ;;  %vm801_vm3 = vcmp.eq.f32.partialorder %v1702_v43, 0.0 }
 0x1b6   :  { %v980_v13 = vmul.f32 %v768_v3, %v1494_v34  ;;  %v777_v15 = vmul.f32 %v1300_v1, %v612_v21  ;;  %v1717_v19 = vadd.f32 %v1242_v11, %v1680_v27  ;;  %v758_v22 = vsel %vm757_vm5, %v597_v17, %v756_v9 }
 0x1b7   :  { %1313 = vrsqrt.f32 %v1712_v10  ;;  %v646_v25 = vpop.f32.mrf.mxu1  ;;  %v1302_v28 = vpop.eup %1301  ;;  %v761_v34 = vsel %vm759_vm6, %v760_v55, %v758_v22  ;;  %vm820_vm4 = vcmp.eq.f32.partialorder %v1705_v53, inf  ;;  %vm822_vm5 = vcmp.eq.f32.partialorder %v1705_v53, 0.0 }
 0x1b8   :  { %1012 = vst.msk [vmem:[%s2164_s5 + $0x8] sm:$0xff] %vm433_vm2, %v980_v13  ;;  %v779_v35 = vsel %vm778_vm7, %v612_v21, %v777_v15  ;;  %1315 = vrsqrt.f32 %v1717_v19  ;;  %v979_v41 = vmul.f32 %v761_v34, %v1486_v29  ;;  %v770_v47 = vmul.f32 %v1302_v28, %v1686_v23 }
 0x1b9   :  { %v1304_v39 = vpop.eup %1303  ;;  %v782_v45 = vsel %vm780_vm8, %v781_v63, %v779_v35  ;;  %v1245_v57 = vpop.f32.mrf.mxu1  ;;  %v788_v21 = vand.u32 2147483648, %v1694_v31  ;;  %v1748_v55 = vadd.f32 %v1680_v27, %v646_v25  ;;  %v809_v28 = vand.u32 2147483648, %v1697_v38 }
 0x1ba   :  { %v982_v59 = vmul.f32 %v782_v45, %v1498_v36  ;;  %v791_v17 = vmul.f32 %v1304_v39, %v1689_v26  ;;  %1011 = vst.msk [vmem:[%s2164_s5] sm:$0xff] %vm433_vm2, %v979_v41  ;;  %v772_v29 = vsel %vm771_vm9, %v1686_v23, %v770_v47  ;;  %v1751_v36 = vadd.f32 %v1245_v57, %v1680_v27 }
 0x1bb   :  { %v656_v62 = vpop.f32.mrf.mxu1  ;;  %v1306_v63 = vpop.eup %1305  ;;  %v775_v1 = vsel %vm773_vm10, %v774_v14, %v772_v29  ;;  %1317 = vrsqrt.f32 %v1748_v55  ;;  %v802_v39 = vand.u32 2147483648, %v1702_v43  ;;  %vm813_vm6 = vcmp.eq.f32.partialorder %v1712_v10, inf }
 0x1bc   :  { %1014 = vst.msk [vmem:[%s2164_s5 + $0x18] sm:$0xff] %vm433_vm2, %v982_v59  ;;  %v793_v3 = vsel %vm792_vm11, %v1689_v26, %v791_v17  ;;  %v1764_v9 = vadd.f32 %v1680_v27, %v656_v62  ;;  %v981_v13 = vmul.f32 %v775_v1, %v1491_v32  ;;  %v784_v22 = vmul.f32 %v1306_v63, %v1694_v31 }
 0x1bd   :  { %v1308_v11 = vpop.eup %1307  ;;  %v796_v15 = vsel %vm794_vm12, %v795_v50, %v793_v3  ;;  %v1248_v23 = vpop.f32.mrf.mxu1  ;;  %1319 = vrsqrt.f32 %v1751_v36  ;;  %v823_v17 = vand.u32 2147483648, %v1705_v53  ;;  %vm815_vm7 = vcmp.eq.f32.partialorder %v1712_v10, 0.0 }
 0x1be   :  { %v984_v14 = vmul.f32 %v796_v15, %v1517_v46  ;;  %v805_v25 = vmul.f32 %v1308_v11, %v1697_v38  ;;  %1013 = vst.msk [vmem:[%s2164_s5 + $0x10] sm:$0xff] %vm433_vm2, %v981_v13  ;;  %v786_v32 = vsel %vm785_vm13, %v1694_v31, %v784_v22  ;;  %1321 = vrsqrt.f32 %v1764_v9 }
 0x1bf   :  { %v666_v46 = vpop.f32.mrf.mxu1  ;;  %v1310_v26 = vpop.eup %1309  ;;  %v789_v34 = vsel %vm787_vm14, %v788_v21, %v786_v32  ;;  %vm834_vm8 = vcmp.eq.f32.partialorder %v1717_v19, inf  ;;  %vm836_vm9 = vcmp.eq.f32.partialorder %v1717_v19, 0.0  ;;  %vm827_vm10 = vcmp.eq.f32.partialorder %v1748_v55, inf }
 0x1c0   :  { %1016 = vst.msk [vmem:[%s2164_s5 + $0x28] sm:$0xff] %vm433_vm2, %v984_v14  ;;  %v807_v35 = vsel %vm806_vm15, %v1697_v38, %v805_v25  ;;  %v983_v45 = vmul.f32 %v789_v34, %v1505_v40  ;;  %v798_v50 = vmul.f32 %v1310_v26, %v1702_v43  ;;  %v1814_v38 = vadd.f32 %v1248_v23, %v1680_v27 }
 0x1c1   :  { %v1312_v41 = vpop.eup %1311  ;;  %v810_v47 = vsel %vm808_vm0, %v809_v28, %v807_v35  ;;  %v1251_v31 = vpop.f32.mrf.mxu1  ;;  %v816_v23 = vand.u32 2147483648, %v1712_v10  ;;  %vm829_vm11 = vcmp.eq.f32.partialorder %v1748_v55, 0.0  ;;  %vm848_vm12 = vcmp.eq.f32.partialorder %v1751_v36, inf }
 0x1c2   :  { %v986_v57 = vmul.f32 %v810_v47, %v1522_v48  ;;  %v819_v59 = vmul.f32 %v1312_v41, %v1705_v53  ;;  %1015 = vst.msk [vmem:[%s2164_s5 + $0x20] sm:$0xff] %vm433_vm2, %v983_v45  ;;  %v800_v40 = vsel %vm799_vm1, %v1702_v43, %v798_v50  ;;  %v1817_v48 = vadd.f32 %v1680_v27, %v666_v46 }
 0x1c3   :  { %v676_v29 = vpop.f32.mrf.mxu1  ;;  %v803_v62 = vsel %vm801_vm3, %v802_v39, %v800_v40  ;;  %v1830_v1 = vadd.f32 %v1251_v31, %v1680_v27  ;;  %1323 = vrsqrt.f32 %v1814_v38  ;;  %vm850_vm13 = vcmp.eq.f32.partialorder %v1751_v36, 0.0 }
 0x1c4   :  { %v1314_v21 = vpop.eup %1313  ;;  %1018 = vst.msk [vmem:[%s2164_s5 + $0x38] sm:$0xff] %vm433_vm2, %v986_v57  ;;  %v821_v63 = vsel %vm820_vm4, %v1705_v53, %v819_v59  ;;  %v985_v11 = vmul.f32 %v803_v62, %v1514_v44  ;;  %v1841_v25 = vadd.f32 %v1680_v27, %v676_v29  ;;  %1325 = vrsqrt.f32 %v1817_v48 }
 0x1c5   :  { %v1316_v3 = vpop.eup %1315  ;;  %v824_v13 = vsel %vm822_vm5, %v823_v17, %v821_v63  ;;  %v812_v15 = vmul.f32 %v1314_v21, %v1712_v10  ;;  %v1254_v43 = vpop.f32.mrf.mxu1  ;;  %1327 = vrsqrt.f32 %v1830_v1  ;;  %v851_v40 = vand.u32 2147483648, %v1751_v36 }
 0x1c6   :  { %v988_v22 = vmul.f32 %v824_v13, %v1541_v58  ;;  %v833_v14 = vmul.f32 %v1316_v3, %v1717_v19  ;;  %1017 = vst.msk [vmem:[%s2164_s5 + $0x30] sm:$0xff] %vm433_vm2, %v985_v11  ;;  %v837_v58 = vand.u32 2147483648, %v1717_v19  ;;  %1329 = vrsqrt.f32 %v1841_v25 }
 0x1c7   :  { %v814_v44 = vsel %vm813_vm6, %v1712_v10, %v812_v15  ;;  %v686_v53 = vpop.f32.mrf.mxu1  ;;  %v1878_v41 = vadd.f32 %v1254_v43, %v1680_v27  ;;  %vm841_vm14 = vcmp.eq.f32.partialorder %v1764_v9, inf  ;;  %v844_v11 = vand.u32 2147483648, %v1764_v9 }
 0x1c8   :  { %1020 = vst.msk [vmem:[%s2164_s5 + $0x48] sm:$0xff] %vm433_vm2, %v988_v22  ;;  %v817_v28 = vsel %vm815_vm7, %v816_v23, %v814_v44  ;;  %v835_v32 = vsel %vm834_vm8, %v1717_v19, %v833_v14  ;;  %v1318_v35 = vpop.eup %1317  ;;  %v1881_v45 = vadd.f32 %v1680_v27, %v686_v53  ;;  %vm843_vm15 = vcmp.eq.f32.partialorder %v1764_v9, 0.0 }
 0x1c9   :  { %v987_v46 = vmul.f32 %v817_v28, %v1529_v52  ;;  %v838_v26 = vsel %vm836_vm9, %v837_v58, %v835_v32  ;;  %v1257_v34 = vpop.f32.mrf.mxu1  ;;  %v826_v10 = vmul.f32 %v1318_v35, %v1748_v55  ;;  %1331 = vrsqrt.f32 %v1878_v41 }
 0x1ca   :  { %v990_v39 = vmul.f32 %v838_v26, %v1546_v60  ;;  %v1320_v52 = vpop.eup %1319  ;;  %v830_v60 = vand.u32 2147483648, %v1748_v55  ;;  %v1887_v31 = vadd.f32 %v1257_v34, %v1680_v27  ;;  %1333 = vrsqrt.f32 %v1881_v45 }
 0x1cb   :  { %1019 = vst.msk [vmem:[%s2164_s5 + $0x40] sm:$0xff] %vm433_vm2, %v987_v46  ;;  %v696_v19 = vpop.f32.mrf.mxu1  ;;  %v828_v47 = vsel %vm827_vm10, %v1748_v55, %v826_v10  ;;  %v847_v50 = vmul.f32 %v1320_v52, %v1751_v36  ;;  %v1322_v59 = vpop.eup %1321  ;;  %vm862_vm0 = vcmp.eq.f32.partialorder %v1814_v38, inf  ;;  %vm864_vm1 = vcmp.eq.f32.partialorder %v1814_v38, 0.0 }
 0x1cc   :  { %1022 = vst.msk [vmem:[%s2164_s5 + $0x58] sm:$0xff] %vm433_vm2, %v990_v39  ;;  %v831_v17 = vsel %vm829_vm11, %v830_v60, %v828_v47  ;;  %v840_v21 = vmul.f32 %v1322_v59, %v1764_v9  ;;  %v1896_v62 = vadd.f32 %v1680_v27, %v696_v19  ;;  %1335 = vrsqrt.f32 %v1887_v31 }
 0x1cd   :  { %v1260_v57 = vpop.f32.mrf.mxu1  ;;  %v989_v29 = vmul.f32 %v831_v17, %v1538_v56  ;;  %v849_v55 = vsel %vm848_vm12, %v1751_v36, %v847_v50  ;;  %v865_v22 = vand.u32 2147483648, %v1814_v38  ;;  %vm855_vm3 = vcmp.eq.f32.partialorder %v1817_v48, inf }
 0x1ce   :  { %v852_v3 = vsel %vm850_vm13, %v851_v40, %v849_v55  ;;  %v842_v36 = vsel %vm841_vm14, %v1764_v9, %v840_v21  ;;  %1337 = vrsqrt.f32 %v1896_v62  ;;  %vm857_vm4 = vcmp.eq.f32.partialorder %v1817_v48, 0.0 }
 0x1cf   :  { %v706_v63 = vpop.f32.mrf.mxu1  ;;  %1021 = vst.msk [vmem:[%s2164_s5 + $0x50] sm:$0xff] %vm433_vm2, %v989_v29  ;;  %v992_v56 = vmul.f32 %v852_v3, %v1565_v6  ;;  %v845_v43 = vsel %vm843_vm15, %v844_v11, %v842_v36  ;;  %v858_v44 = vand.u32 2147483648, %v1817_v48  ;;  %v1923_v58 = vadd.f32 %v1260_v57, %v1680_v27 }
 0x1d0   :  { %v1324_v15 = vpop.eup %1323  ;;  %v991_v6 = vmul.f32 %v845_v43, %v1553_v0  ;;  %v1926_v53 = vadd.f32 %v1680_v27, %v706_v63  ;;  %vm876_vm5 = vcmp.eq.f32.partialorder %v1830_v1, inf  ;;  %vm878_vm6 = vcmp.eq.f32.partialorder %v1830_v1, 0.0 }
 0x1d1   :  { %v1263_v13 = vpop.f32.mrf.mxu1  ;;  %1024 = vst.msk [vmem:[%s2164_s5 + $0x68] sm:$0xff] %vm433_vm2, %v992_v56  ;;  %v861_v9 = vmul.f32 %v1324_v15, %v1814_v38  ;;  %v1326_v14 = vpop.eup %1325  ;;  %v879_v34 = vand.u32 2147483648, %v1830_v1  ;;  %1339 = vrsqrt.f32 %v1923_v58  ;;  %vm869_vm7 = vcmp.eq.f32.partialorder %v1841_v25, inf }
 0x1d2   :  { %1023 = vst.msk [vmem:[%s2164_s5 + $0x60] sm:$0xff] %vm433_vm2, %v991_v6  ;;  %v854_v28 = vmul.f32 %v1326_v14, %v1817_v48  ;;  %v1328_v46 = vpop.eup %1327  ;;  %v1941_v35 = vadd.f32 %v1263_v13, %v1680_v27  ;;  %1341 = vrsqrt.f32 %v1926_v53  ;;  %vm871_vm8 = vcmp.eq.f32.partialorder %v1841_v25, 0.0 }
 0x1d3   :  { %v716_v23 = vpop.f32.mrf.mxu1  ;;  %v863_v0 = vsel %vm862_vm0, %v1814_v38, %v861_v9  ;;  %v1330_v39 = vpop.eup %1329  ;;  %v875_v52 = vmul.f32 %v1328_v46, %v1830_v1  ;;  %vm890_vm9 = vcmp.eq.f32.partialorder %v1878_v41, inf  ;;  %vm892_vm10 = vcmp.eq.f32.partialorder %v1878_v41, 0.0 }
 0x1d4   :  { %v866_v26 = vsel %vm864_vm1, %v865_v22, %v863_v0  ;;  %v856_v19 = vsel %vm855_vm3, %v1817_v48, %v854_v28  ;;  %v868_v47 = vmul.f32 %v1330_v39, %v1841_v25  ;;  %v1954_v50 = vadd.f32 %v1680_v27, %v716_v23 }
 0x1d5   :  { %v1266_v32 = vpop.f32.mrf.mxu1  ;;  %v994_v10 = vmul.f32 %v866_v26, %v1570_v8  ;;  %v859_v60 = vsel %vm857_vm4, %v858_v44, %v856_v19  ;;  %v877_v57 = vsel %vm876_vm5, %v1830_v1, %v875_v52  ;;  %v872_v48 = vand.u32 2147483648, %v1841_v25 }
 0x1d6   :  { %v993_v8 = vmul.f32 %v859_v60, %v1562_v4  ;;  %v880_v17 = vsel %vm878_vm6, %v879_v34, %v877_v57  ;;  %v870_v40 = vsel %vm869_vm7, %v1841_v25, %v868_v47  ;;  %1343 = vrsqrt.f32 %v1941_v35  ;;  %v1332_v29 = vpop.eup %1331 }
 0x1d7   :  { %v726_v38 = vpop.f32.mrf.mxu1  ;;  %1026 = vst.msk [vmem:[%s2164_s5 + $0x78] sm:$0xff] %vm433_vm2, %v994_v10  ;;  %v996_v4 = vmul.f32 %v880_v17, %v1589_v18  ;;  %v873_v55 = vsel %vm871_vm8, %v872_v48, %v870_v40  ;;  %v893_v1 = vand.u32 2147483648, %v1878_v41  ;;  %v889_v25 = vmul.f32 %v1332_v29, %v1878_v41  ;;  %v1334_v3 = vpop.eup %1333 }
 0x1d8   :  { %1025 = vst.msk [vmem:[%s2164_s5 + $0x70] sm:$0xff] %vm433_vm2, %v993_v8  ;;  %v995_v21 = vmul.f32 %v873_v55, %v1577_v12  ;;  %vm883_vm11 = vcmp.eq.f32.partialorder %v1881_v45, inf  ;;  %1345 = vrsqrt.f32 %v1954_v50  ;;  %vm885_vm12 = vcmp.eq.f32.partialorder %v1881_v45, 0.0 }
 0x1d9   :  { %v1269_v59 = vpop.f32.mrf.mxu1  ;;  %1028 = vst.msk [vmem:[%s2164_s5 + $0x88] sm:$0xff] %vm433_vm2, %v996_v4  ;;  %v886_v18 = vand.u32 2147483648, %v1881_v45  ;;  %v1989_v11 = vadd.f32 %v1266_v32, %v1680_v27  ;;  %v1992_v12 = vadd.f32 %v1680_v27, %v726_v38  ;;  %v1336_v56 = vpop.eup %1335  ;;  %v891_v36 = vsel %vm890_vm9, %v1878_v41, %v889_v25 }
 0x1da   :  { %1027 = vst.msk [vmem:[%s2164_s5 + $0x80] sm:$0xff] %vm433_vm2, %v995_v21  ;;  %v882_v13 = vmul.f32 %v1334_v3, %v1881_v45  ;;  %vm904_vm13 = vcmp.eq.f32.partialorder %v1887_v31, inf  ;;  %vm906_vm14 = vcmp.eq.f32.partialorder %v1887_v31, 0.0  ;;  %v894_v15 = vsel %vm892_vm10, %v893_v1, %v891_v36 }
 0x1db   :  { %v736_v63 = vpop.f32.mrf.mxu1  ;;  %v903_v43 = vmul.f32 %v1336_v56, %v1887_v31  ;;  %1347 = vrsqrt.f32 %v1989_v11  ;;  %v2009_v22 = vadd.f32 %v1269_v59, %v1680_v27  ;;  %v1338_v6 = vpop.eup %1337  ;;  %v998_v9 = vmul.f32 %v894_v15, %v1594_v20 }
 0x1dc   :  { %v884_v23 = vsel %vm883_vm11, %v1881_v45, %v882_v13  ;;  %v907_v14 = vand.u32 2147483648, %v1887_v31  ;;  %v2017_v44 = vadd.f32 %v1680_v27, %v736_v63  ;;  %v896_v32 = vmul.f32 %v1338_v6, %v1896_v62 }
 0x1dd   :  { %v1272_v41 = vpop.f32.mrf.mxu1  ;;  %v887_v0 = vsel %vm885_vm12, %v886_v18, %v884_v23  ;;  %v905_v28 = vsel %vm904_vm13, %v1887_v31, %v903_v43  ;;  %1349 = vrsqrt.f32 %v1992_v12  ;;  %1030 = vst.msk [vmem:[%s2164_s5 + $0x98] sm:$0xff] %vm433_vm2, %v998_v9  ;;  %vm897_vm15 = vcmp.eq.f32.partialorder %v1896_v62, inf }
 0x1de   :  { %v997_v20 = vmul.f32 %v887_v0, %v1586_v16  ;;  %v908_v46 = vsel %vm906_vm14, %v907_v14, %v905_v28  ;;  %v900_v45 = vand.u32 2147483648, %v1896_v62  ;;  %v1340_v26 = vpop.eup %1339  ;;  %v898_v39 = vsel %vm897_vm15, %v1896_v62, %v896_v32 }
 0x1df   :  { %v1000_v34 = vmul.f32 %v908_v46, %v1613_v33  ;;  %vm899_vm0 = vcmp.eq.f32.partialorder %v1896_v62, 0.0  ;;  %1351 = vrsqrt.f32 %v2009_v22  ;;  %v917_v31 = vmul.f32 %v1340_v26, %v1923_v58  ;;  %v746_v10 = vpop.f32.mrf.mxu1  ;;  %v1342_v19 = vpop.eup %1341 }
 0x1e0   :  { %1029 = vst.msk [vmem:[%s2164_s5 + $0x90] sm:$0xff] %vm433_vm2, %v997_v20  ;;  %v901_v16 = vsel %vm899_vm0, %v900_v45, %v898_v39  ;;  %vm918_vm1 = vcmp.eq.f32.partialorder %v1923_v58, inf  ;;  %v921_v62 = vand.u32 2147483648, %v1923_v58  ;;  %1353 = vrsqrt.f32 %v2017_v44 }
 0x1e1   :  { %1032 = vst.msk [vmem:[%s2164_s5 + $0xa8] sm:$0xff] %vm433_vm2, %v1000_v34  ;;  %v999_v33 = vmul.f32 %v901_v16, %v1601_v24  ;;  %v919_v52 = vsel %vm918_vm1, %v1923_v58, %v917_v31  ;;  %vm920_vm3 = vcmp.eq.f32.partialorder %v1923_v58, 0.0  ;;  %v910_v38 = vmul.f32 %v1342_v19, %v1926_v53 }
 0x1e2   :  { %vm911_vm4 = vcmp.eq.f32.partialorder %v1926_v53, inf  ;;  %v922_v24 = vsel %vm920_vm3, %v921_v62, %v919_v52  ;;  %v914_v47 = vand.u32 2147483648, %v1926_v53  ;;  %v2060_v8 = vadd.f32 %v1272_v41, %v1680_v27 }
 0x1e3   :  { %v1344_v60 = vpop.eup %1343  ;;  %1031 = vst.msk [vmem:[%s2164_s5 + $0xa0] sm:$0xff] %vm433_vm2, %v999_v33  ;;  %v2063_v57 = vadd.f32 %v1680_v27, %v746_v10  ;;  %v1002_v58 = vmul.f32 %v922_v24, %v1618_v37  ;;  %v912_v48 = vsel %vm911_vm4, %v1926_v53, %v910_v38  ;;  %vm913_vm5 = vcmp.eq.f32.partialorder %v1926_v53, 0.0 }
 0x1e4   :  { %v931_v59 = vmul.f32 %v1344_v60, %v1941_v35  ;;  %v915_v40 = vsel %vm913_vm5, %v914_v47, %v912_v48  ;;  %vm932_vm6 = vcmp.eq.f32.partialorder %v1941_v35, inf  ;;  %v935_v29 = vand.u32 2147483648, %v1941_v35 }
 0x1e5   :  { %v1346_v17 = vpop.eup %1345  ;;  %1355 = vrsqrt.f32 %v2060_v8  ;;  %1034 = vst.msk [vmem:[%s2164_s5 + $0xb8] sm:$0xff] %vm433_vm2, %v1002_v58  ;;  %v1001_v37 = vmul.f32 %v915_v40, %v1610_v30  ;;  %vm934_vm7 = vcmp.eq.f32.partialorder %v1941_v35, 0.0  ;;  %vm925_vm8 = vcmp.eq.f32.partialorder %v1954_v50, inf }
 0x1e6   :  { %v933_v27 = vsel %vm932_vm6, %v1941_v35, %v931_v59  ;;  %v924_v53 = vmul.f32 %v1346_v17, %v1954_v50  ;;  %v928_v55 = vand.u32 2147483648, %v1954_v50  ;;  %1357 = vrsqrt.f32 %v2063_v57 }
 0x1e7   :  { %v936_v4 = vsel %vm934_vm7, %v935_v29, %v933_v27  ;;  %1033 = vst.msk [vmem:[%s2164_s5 + $0xb0] sm:$0xff] %vm433_vm2, %v1001_v37  ;;  %vm927_vm9 = vcmp.eq.f32.partialorder %v1954_v50, 0.0  ;;  %vm946_vm10 = vcmp.eq.f32.partialorder %v1989_v11, inf  ;;  %v949_v18 = vand.u32 2147483648, %v1989_v11 }
 0x1e8   :  { %v1348_v1 = vpop.eup %1347  ;;  %v1004_v30 = vmul.f32 %v936_v4, %v1637_v51  ;;  %v926_v21 = vsel %vm925_vm8, %v1954_v50, %v924_v53  ;;  %vm948_vm11 = vcmp.eq.f32.partialorder %v1989_v11, 0.0  ;;  %vm939_vm12 = vcmp.eq.f32.partialorder %v1992_v12, inf }
 0x1e9   :  { %v929_v35 = vsel %vm927_vm9, %v928_v55, %v926_v21  ;;  %v945_v25 = vmul.f32 %v1348_v1, %v1989_v11  ;;  %vm941_vm13 = vcmp.eq.f32.partialorder %v1992_v12, 0.0  ;;  %vm960_vm14 = vcmp.eq.f32.partialorder %v2009_v22, inf }
 0x1ea   :  { %v1350_v63 = vpop.eup %1349  ;;  %1036 = vst.msk [vmem:[%s2164_s5 + $0xc8] sm:$0xff] %vm433_vm2, %v1004_v30  ;;  %v1003_v3 = vmul.f32 %v929_v35, %v1625_v42  ;;  %v942_v42 = vand.u32 2147483648, %v1992_v12  ;;  %v963_v9 = vand.u32 2147483648, %v2009_v22  ;;  %vm962_vm15 = vcmp.eq.f32.partialorder %v2009_v22, 0.0 }
 0x1eb   :  { %v947_v51 = vsel %vm946_vm10, %v1989_v11, %v945_v25  ;;  %v938_v50 = vmul.f32 %v1350_v63, %v1992_v12  ;;  %vm953_vm0 = vcmp.eq.f32.partialorder %v2017_v44, inf  ;;  %v956_v41 = vand.u32 2147483648, %v2017_v44 }
 0x1ec   :  { %v1352_v56 = vpop.eup %1351  ;;  %1035 = vst.msk [vmem:[%s2164_s5 + $0xc0] sm:$0xff] %vm433_vm2, %v1003_v3  ;;  %v950_v36 = vsel %vm948_vm11, %v949_v18, %v947_v51  ;;  %vm955_vm1 = vcmp.eq.f32.partialorder %v2017_v44, 0.0  ;;  %vm974_vm3 = vcmp.eq.f32.partialorder %v2060_v8, inf  ;;  %vm976_vm4 = vcmp.eq.f32.partialorder %v2060_v8, 0.0 }
 0x1ed   :  { %v1006_v13 = vmul.f32 %v950_v36, %v1642_v54  ;;  %v940_v15 = vsel %vm939_vm12, %v1992_v12, %v938_v50  ;;  %v959_v11 = vmul.f32 %v1352_v56, %v2009_v22  ;;  %v1354_v43 = vpop.eup %1353  ;;  %vm967_vm5 = vcmp.eq.f32.partialorder %v2063_v57, inf }
 0x1ee   :  { %v943_v6 = vsel %vm941_vm13, %v942_v42, %v940_v15  ;;  %v952_v12 = vmul.f32 %v1354_v43, %v2017_v44  ;;  %vm969_vm6 = vcmp.eq.f32.partialorder %v2063_v57, 0.0 }
 0x1ef   :  { %1038 = vst.msk [vmem:[%s2164_s5 + $0xd8] sm:$0xff] %vm433_vm2, %v1006_v13  ;;  %v1005_v23 = vmul.f32 %v943_v6, %v1634_v49  ;;  %v961_v54 = vsel %vm960_vm14, %v2009_v22, %v959_v11 }
 0x1f0   :  { %v964_v14 = vsel %vm962_vm15, %v963_v9, %v961_v54  ;;  %v954_v49 = vsel %vm953_vm0, %v2017_v44, %v952_v12 }
 0x1f1   :  { %1037 = vst.msk [vmem:[%s2164_s5 + $0xd0] sm:$0xff] %vm433_vm2, %v1005_v23  ;;  %v1008_v0 = vmul.f32 %v964_v14, %v1661_v5  ;;  %v957_v22 = vsel %vm955_vm1, %v956_v41, %v954_v49  ;;  %v977_v5 = vand.u32 2147483648, %v2060_v8 }
 0x1f2   :  { %v1356_v28 = vpop.eup %1355  ;;  %v1007_v32 = vmul.f32 %v957_v22, %v1649_v61  ;;  %v970_v61 = vand.u32 2147483648, %v2063_v57 }
 0x1f3   :  { %1040 = vst.msk [vmem:[%s2164_s5 + $0xe8] sm:$0xff] %vm433_vm2, %v1008_v0  ;;  %v973_v20 = vmul.f32 %v1356_v28, %v2060_v8  ;;  %v1358_v46 = vpop.eup %1357 }
 0x1f4   :  { %1039 = vst.msk [vmem:[%s2164_s5 + $0xe0] sm:$0xff] %vm433_vm2, %v1007_v32  ;;  %v966_v45 = vmul.f32 %v1358_v46, %v2063_v57 }
 0x1f5   :  { %v975_v44 = vsel %vm974_vm3, %v2060_v8, %v973_v20 }
 0x1f6   :  { %v978_v26 = vsel %vm976_vm4, %v977_v5, %v975_v44  ;;  %v968_v39 = vsel %vm967_vm5, %v2063_v57, %v966_v45 }
 0x1f7   :  { %v1010_v34 = vmul.f32 %v978_v26, %v1666_v7  ;;  %v971_v16 = vsel %vm969_vm6, %v970_v61, %v968_v39 }
 0x1f8   :  { %v1009_v31 = vmul.f32 %v971_v16, %v1658_v2 }
 0x1f9   :  { %1042 = vst.msk [vmem:[%s2164_s5 + $0xf8] sm:$0xff] %vm433_vm2, %v1010_v34 }
 0x1fa   :  { %1041 = vst.msk [vmem:[%s2164_s5 + $0xf0] sm:$0xff] %vm433_vm2, %v1009_v31 }

// kernel: scale_hyperprior_forward.31
= control target key start
LH: loop header
LB: loop body
LE: loop exit
PB: predicated region body
PF: predicated region fallthrough
CT: control target
= control target key end

     0   :  { %s814_s12 = smov 0   ;;  %s987_s0 = inlined_call_operand.vmem [shape: bf16[1024,72], index: 0, kind: input, shape index: {}]   ;;  %s988_s1 = inlined_call_operand.vmem [shape: bf16[72,12], index: 1, kind: input, shape index: {}]   ;;  %s989_s2 = inlined_call_operand.vmem [shape: f32[1,12], index: 2, kind: input, shape index: {}]   ;;  %s990_s3 = inlined_call_operand.vmem [shape: f32[1024,12], index: 3, kind: output, shape index: {}]  }
   0x1 LB: > { %s633_s13 = sadd.s32 4294967295, %s792_s12   ;;  %p637_p0 = scmp.ge.s32.totalorder %s792_s12, 1  ;;  %s792_s12 = sphi %s814_s12, %s13_s12  }
   0x2   : > { %p138_p1 = scmp.lt.s32.totalorder %s792_s12, 5 }
   0x4   : > { %p139_p2 = pnand %p637_p0, %p138_p1 }
   0x5   : > { %s638_s18 = sshll.u32 (!%p139_p2), %s633_s13, 5 }
   0x6   : > { %142 = sbr.rel (%p139_p2) target bundleno = 258 (0x102), region = 32  ;;  %p163_p3 = scmp.lt.s32.totalorder (!%p139_p2), %s638_s18, 127 }
   0xb   : > { %v765_v0 = vld [vmem:[%s988_s1 + $0x20] ss:$0 sps:$4 sm:$0xff]   ;;  %vm379_vm0 = vcmask 1043456   ;;  %v766_v1 = vld [vmem:[%s988_s1 + $0x18] sm:$0xff]   ;;  %v767_v3 = vld [vmem:[%s988_s1 + $0x10] sm:$0xff]   ;;  %s992_s18 = smov (!%p163_p3, %s638_s18), 127 }
   0xc   : > { %755 = vmatprep.subr.msk.bf16.mxu0 %vm379_vm0, %v765_v0  ;;  %756 = vmatprep.subr.msk.bf16.mxu1 %vm379_vm0, %v765_v0  ;;  %v381_v2 = vsel %vm379_vm0, %v765_v0, 0  ;;  %v768_v4 = vld [vmem:[%s988_s1 + $0x8] sm:$0xff]   ;;  %s639_s23 = sshll.u32 %s992_s18, 2  ;;  %vm330_vm1 = vcmask 588800   ;;  %v769_v7 = vld [vmem:[%s988_s1] sm:$0xff]   ;;  %s641_s29 = sshll.u32 %s992_s18, 3 }
   0xd   : > { %704 = vmatpush3.bf16.msra.mxu0 %v381_v2  ;;  %750 = vmatpush3.bf16.msra.mxu1 %v381_v2  ;;  %s840_s26 = scalar_lea.vmem %s987_s0, %s639_s23  ;;  %v881_v22 = vld [vmem:[%s989_s2] ss:$0 sm:$0xff]  ;;  %s886_s7 = scalar_lea.vmem %s990_s3, %s641_s29  ;;  %vm544_vm2 = vcmask 97280  }
   0xe   : > { %705 = vmatprep.subr.bf16.mxu0 %v766_v1  ;;  %746 = vmatprep.subr.bf16.mxu1 %v766_v1  ;;  %v770_v5 = vld [vmem:[%s840_s26] sm:$0xff]   ;;  %v772_v8 = vld [vmem:[%s840_s26 + $0x8] sm:$0xff]   ;;  %v774_v10 = vld [vmem:[%s840_s26 + $0x10] sm:$0xff]  }
   0xf   : > { %v771_v6 = vld [vmem:[%s840_s26 + $0x40] sm:$0xff]   ;;  %713 = vmatprep.mubr.msk.bf16.mxu0 %vm330_vm1, %v770_v5  ;;  %v773_v9 = vld [vmem:[%s840_s26 + $0x48] sm:$0xff]   ;;  %v775_v11 = vld [vmem:[%s840_s26 + $0x50] sm:$0xff]  }
  0x10   : > { %729 = vmatprep.mubr.msk.bf16.mxu1 %vm330_vm1, %v771_v6  ;;  %v776_v12 = vld [vmem:[%s840_s26 + $0x18] sm:$0xff]   ;;  %v778_v14 = vld [vmem:[%s840_s26 + $0x20] sm:$0xff]   ;;  %v780_v16 = vld [vmem:[%s840_s26 + $0x28] sm:$0xff]  }
  0x11   : > { %706 = vmatpush3.bf16.msra.mxu0 %v766_v1  ;;  %751 = vmatpush3.bf16.msra.mxu1 %v766_v1  ;;  %v777_v13 = vld [vmem:[%s840_s26 + $0x58] sm:$0xff]   ;;  %v779_v15 = vld [vmem:[%s840_s26 + $0x60] sm:$0xff]   ;;  %v781_v17 = vld [vmem:[%s840_s26 + $0x68] sm:$0xff]  }
  0x12   : > { %707 = vmatprep.subr.bf16.mxu0 %v767_v3  ;;  %747 = vmatprep.subr.bf16.mxu1 %v767_v3  ;;  %v782_v18 = vld [vmem:[%s840_s26 + $0x30] sm:$0xff]   ;;  %v784_v20 = vld [vmem:[%s840_s26 + $0x38] sm:$0xff]  }
  0x13   : > { %v783_v19 = vld [vmem:[%s840_s26 + $0x70] sm:$0xff]   ;;  %v785_v21 = vld [vmem:[%s840_s26 + $0x78] sm:$0xff]  }
  0x15   : > { %708 = vmatpush3.bf16.msra.mxu0 %v767_v3  ;;  %752 = vmatpush3.bf16.msra.mxu1 %v767_v3 }
  0x16   : > { %709 = vmatprep.subr.bf16.mxu0 %v768_v4  ;;  %748 = vmatprep.subr.bf16.mxu1 %v768_v4 }
  0x19   : > { %710 = vmatpush3.bf16.msra.mxu0 %v768_v4  ;;  %753 = vmatpush3.bf16.msra.mxu1 %v768_v4 }
  0x1a   : > { %711 = vmatprep.subr.bf16.mxu0 %v769_v7  ;;  %749 = vmatprep.subr.bf16.mxu1 %v769_v7 }
  0x1d   : > { %712 = vmatpush3.bf16.msra.mxu0 %v769_v7  ;;  %754 = vmatpush3.bf16.msra.mxu1 %v769_v7 }
  0x20   : > { %714 = vmatmul.mubr.msk.bf16.vlgmr.msra.gmra.mxu0 %vm330_vm1, %v772_v8  ;;  %730 = vmatmul.mubr.msk.bf16.vlgmr.msra.gmra.mxu1 %vm330_vm1, %v773_v9 }
  0x21   : > { %717 = vmatprep.mubr.msk.bf16.mxu0 %vm330_vm1, %v774_v10  ;;  %733 = vmatprep.mubr.msk.bf16.mxu1 %vm330_vm1, %v775_v11 }
  0x28   : > { %718 = vmatmul.mubr.msk.bf16.gmra.mxu0 %vm330_vm1, %v776_v12  ;;  %734 = vmatmul.mubr.msk.bf16.gmra.mxu1 %vm330_vm1, %v777_v13 }
  0x29   : > { %721 = vmatprep.mubr.msk.bf16.mxu0 %vm330_vm1, %v778_v14  ;;  %737 = vmatprep.mubr.msk.bf16.mxu1 %vm330_vm1, %v779_v15 }
  0x30   : > { %722 = vmatmul.mubr.msk.bf16.gmra.mxu0 %vm330_vm1, %v780_v16  ;;  %738 = vmatmul.mubr.msk.bf16.gmra.mxu1 %vm330_vm1, %v781_v17 }
  0x31   : > { %725 = vmatprep.mubr.msk.bf16.mxu0 %vm330_vm1, %v782_v18  ;;  %741 = vmatprep.mubr.msk.bf16.mxu1 %vm330_vm1, %v783_v19 }
  0x38   : > { %726 = vmatmul.mubr.msk.bf16.gmra.mxu0 %vm330_vm1, %v784_v20  ;;  %742 = vmatmul.mubr.msk.bf16.gmra.mxu1 %vm330_vm1, %v785_v21 }
  0xe0   : > { %v715_v23 = vpop.f32.mrf.mxu0  ;;  %v731_v24 = vpop.f32.mrf.mxu1 }
  0xe1   : > { %v426_v25 = vadd.f32 %v715_v23, %v881_v22  ;;  %v490_v26 = vadd.f32 %v731_v24, %v881_v22 }
  0xe2   : > { %v417_v27 = vpop.f32.mrf.mxu0  ;;  %v481_v28 = vpop.f32.mrf.mxu1 }
  0xe3   : > { %547 = vst.msk [vmem:[%s886_s7 + $0x10] sm:$0xff] %vm544_vm2, %v426_v25  ;;  %563 = vst.msk [vmem:[%s886_s7 + $0x90] sm:$0xff] %vm544_vm2, %v490_v26  ;;  %v418_v29 = vadd.f32 %v881_v22, %v417_v27  ;;  %v482_v30 = vadd.f32 %v881_v22, %v481_v28 }
  0xe4   : > { %v716_v31 = vpop.f32.mrf.mxu0  ;;  %v732_v32 = vpop.f32.mrf.mxu1 }
  0xe5   : > { %545 = vst.msk [vmem:[%s886_s7] sm:$0xff] %vm544_vm2, %v418_v29  ;;  %561 = vst.msk [vmem:[%s886_s7 + $0x80] sm:$0xff] %vm544_vm2, %v482_v30  ;;  %v429_v33 = vadd.f32 %v716_v31, %v881_v22  ;;  %v493_v34 = vadd.f32 %v732_v32, %v881_v22 }
  0xe6   : > { %v420_v35 = vpop.f32.mrf.mxu0  ;;  %v484_v36 = vpop.f32.mrf.mxu1 }
  0xe7   : > { %548 = vst.msk [vmem:[%s886_s7 + $0x18] sm:$0xff] %vm544_vm2, %v429_v33  ;;  %564 = vst.msk [vmem:[%s886_s7 + $0x98] sm:$0xff] %vm544_vm2, %v493_v34  ;;  %v421_v37 = vadd.f32 %v881_v22, %v420_v35  ;;  %v485_v38 = vadd.f32 %v881_v22, %v484_v36 }
  0xe8   : > { %v719_v39 = vpop.f32.mrf.mxu0  ;;  %v735_v40 = vpop.f32.mrf.mxu1 }
  0xe9   : > { %546 = vst.msk [vmem:[%s886_s7 + $0x8] sm:$0xff] %vm544_vm2, %v421_v37  ;;  %562 = vst.msk [vmem:[%s886_s7 + $0x88] sm:$0xff] %vm544_vm2, %v485_v38  ;;  %v442_v41 = vadd.f32 %v719_v39, %v881_v22  ;;  %v506_v42 = vadd.f32 %v735_v40, %v881_v22 }
  0xea   : > { %v433_v43 = vpop.f32.mrf.mxu0  ;;  %v497_v44 = vpop.f32.mrf.mxu1 }
  0xeb   : > { %551 = vst.msk [vmem:[%s886_s7 + $0x30] sm:$0xff] %vm544_vm2, %v442_v41  ;;  %567 = vst.msk [vmem:[%s886_s7 + $0xb0] sm:$0xff] %vm544_vm2, %v506_v42  ;;  %v434_v45 = vadd.f32 %v881_v22, %v433_v43  ;;  %v498_v46 = vadd.f32 %v881_v22, %v497_v44 }
  0xec   : > { %v720_v47 = vpop.f32.mrf.mxu0  ;;  %v736_v48 = vpop.f32.mrf.mxu1 }
  0xed   : > { %549 = vst.msk [vmem:[%s886_s7 + $0x20] sm:$0xff] %vm544_vm2, %v434_v45  ;;  %565 = vst.msk [vmem:[%s886_s7 + $0xa0] sm:$0xff] %vm544_vm2, %v498_v46  ;;  %v445_v49 = vadd.f32 %v720_v47, %v881_v22  ;;  %v509_v50 = vadd.f32 %v736_v48, %v881_v22 }
  0xee   : > { %v436_v51 = vpop.f32.mrf.mxu0  ;;  %v500_v52 = vpop.f32.mrf.mxu1 }
  0xef   : > { %552 = vst.msk [vmem:[%s886_s7 + $0x38] sm:$0xff] %vm544_vm2, %v445_v49  ;;  %568 = vst.msk [vmem:[%s886_s7 + $0xb8] sm:$0xff] %vm544_vm2, %v509_v50  ;;  %v437_v53 = vadd.f32 %v881_v22, %v436_v51  ;;  %v501_v54 = vadd.f32 %v881_v22, %v500_v52 }
  0xf0   : > { %v723_v55 = vpop.f32.mrf.mxu0  ;;  %v739_v56 = vpop.f32.mrf.mxu1 }
  0xf1   : > { %550 = vst.msk [vmem:[%s886_s7 + $0x28] sm:$0xff] %vm544_vm2, %v437_v53  ;;  %566 = vst.msk [vmem:[%s886_s7 + $0xa8] sm:$0xff] %vm544_vm2, %v501_v54  ;;  %v458_v57 = vadd.f32 %v723_v55, %v881_v22  ;;  %v522_v58 = vadd.f32 %v739_v56, %v881_v22 }
  0xf2   : > { %v449_v59 = vpop.f32.mrf.mxu0  ;;  %v513_v60 = vpop.f32.mrf.mxu1 }
  0xf3   : > { %555 = vst.msk [vmem:[%s886_s7 + $0x50] sm:$0xff] %vm544_vm2, %v458_v57  ;;  %571 = vst.msk [vmem:[%s886_s7 + $0xd0] sm:$0xff] %vm544_vm2, %v522_v58  ;;  %v450_v61 = vadd.f32 %v881_v22, %v449_v59  ;;  %v514_v62 = vadd.f32 %v881_v22, %v513_v60 }
  0xf4   : > { %v724_v63 = vpop.f32.mrf.mxu0  ;;  %v740_v0 = vpop.f32.mrf.mxu1 }
  0xf5   : > { %553 = vst.msk [vmem:[%s886_s7 + $0x40] sm:$0xff] %vm544_vm2, %v450_v61  ;;  %569 = vst.msk [vmem:[%s886_s7 + $0xc0] sm:$0xff] %vm544_vm2, %v514_v62  ;;  %v461_v1 = vadd.f32 %v724_v63, %v881_v22  ;;  %v525_v2 = vadd.f32 %v740_v0, %v881_v22 }
  0xf6   : > { %v452_v3 = vpop.f32.mrf.mxu0  ;;  %v516_v4 = vpop.f32.mrf.mxu1 }
  0xf7   : > { %556 = vst.msk [vmem:[%s886_s7 + $0x58] sm:$0xff] %vm544_vm2, %v461_v1  ;;  %572 = vst.msk [vmem:[%s886_s7 + $0xd8] sm:$0xff] %vm544_vm2, %v525_v2  ;;  %v453_v5 = vadd.f32 %v881_v22, %v452_v3  ;;  %v517_v6 = vadd.f32 %v881_v22, %v516_v4 }
  0xf8   : > { %v727_v7 = vpop.f32.mrf.mxu0  ;;  %v743_v8 = vpop.f32.mrf.mxu1 }
  0xf9   : > { %554 = vst.msk [vmem:[%s886_s7 + $0x48] sm:$0xff] %vm544_vm2, %v453_v5  ;;  %570 = vst.msk [vmem:[%s886_s7 + $0xc8] sm:$0xff] %vm544_vm2, %v517_v6  ;;  %v474_v9 = vadd.f32 %v727_v7, %v881_v22  ;;  %v538_v10 = vadd.f32 %v743_v8, %v881_v22 }
  0xfa   : > { %v465_v11 = vpop.f32.mrf.mxu0  ;;  %v529_v12 = vpop.f32.mrf.mxu1 }
  0xfb   : > { %559 = vst.msk [vmem:[%s886_s7 + $0x70] sm:$0xff] %vm544_vm2, %v474_v9  ;;  %575 = vst.msk [vmem:[%s886_s7 + $0xf0] sm:$0xff] %vm544_vm2, %v538_v10  ;;  %v466_v13 = vadd.f32 %v881_v22, %v465_v11  ;;  %v530_v14 = vadd.f32 %v881_v22, %v529_v12 }
  0xfc   : > { %v728_v15 = vpop.f32.mrf.mxu0  ;;  %v744_v16 = vpop.f32.mrf.mxu1 }
  0xfd   : > { %557 = vst.msk [vmem:[%s886_s7 + $0x60] sm:$0xff] %vm544_vm2, %v466_v13  ;;  %573 = vst.msk [vmem:[%s886_s7 + $0xe0] sm:$0xff] %vm544_vm2, %v530_v14  ;;  %v477_v17 = vadd.f32 %v728_v15, %v881_v22  ;;  %v541_v18 = vadd.f32 %v744_v16, %v881_v22 }
  0xfe   : > { %v468_v19 = vpop.f32.mrf.mxu0  ;;  %v532_v20 = vpop.f32.mrf.mxu1 }
  0xff   : > { %560 = vst.msk [vmem:[%s886_s7 + $0x78] sm:$0xff] %vm544_vm2, %v477_v17  ;;  %576 = vst.msk [vmem:[%s886_s7 + $0xf8] sm:$0xff] %vm544_vm2, %v541_v18  ;;  %v469_v21 = vadd.f32 %v881_v22, %v468_v19  ;;  %v533_v23 = vadd.f32 %v881_v22, %v532_v20 }
 0x101   : > { %558 = vst.msk [vmem:[%s886_s7 + $0x68] sm:$0xff] %vm544_vm2, %v469_v21  ;;  %574 = vst.msk [vmem:[%s886_s7 + $0xe8] sm:$0xff] %vm544_vm2, %v533_v23 }
 0x102 PF: > { %s13_s12 = sadd.s32 1, %s792_s12  }
 0x103   : > { %p10_p4 = scmp.ge.s32.totalorder %s13_s12, 6  }
 0x105   :  { %12 = sbr.rel (!%p10_p4) target bundleno = 1 (0x1), region = 62 }

</bundles_post_ra>
